<compile_context>
chip_gen: v6e
topology: v6e:2x2x1
jax: 0.10.0
libtpu: 0.0.40
codegen_flags: <defaults>
</compile_context>

<pallas_src>
import functools
import math

import jax
import jax.numpy as jnp
from jax.experimental import pallas as pl
from jax.experimental.pallas import tpu as pltpu


# ---------------------------------------------------------------------------
# in-kernel helpers
# ---------------------------------------------------------------------------
_ERF_P = 0.3275911
_ERF_A = (0.254829592, -0.284496736, 1.421413741, -1.453152027, 1.061405429)


def _erf(x):
    # Abramowitz & Stegun 7.1.26 rational approximation (float32-accurate erf).
    sgn = jnp.where(x >= 0.0, 1.0, -1.0)
    a = jnp.abs(x)
    t = 1.0 / (1.0 + _ERF_P * a)
    poly = t * (_ERF_A[0] + t * (_ERF_A[1] + t * (_ERF_A[2] + t * (_ERF_A[3] + t * _ERF_A[4]))))
    return sgn * (1.0 - poly * jnp.exp(-a * a))


def _gelu(x):
    # matches torch.nn.functional.gelu (exact / erf form)
    return 0.5 * x * (1.0 + _erf(x * (1.0 / math.sqrt(2.0))))


def _ln(x, g, b):
    mu = jnp.mean(x, axis=-1, keepdims=True)
    xc = x - mu
    var = jnp.mean(xc * xc, axis=-1, keepdims=True)
    return xc * jax.lax.rsqrt(var + 1e-5) * g + b


def _bf(x):
    return x.astype(jnp.bfloat16)


def _attn_sublayer(x, kv, wq_ref, bq_ref, wk_ref, bk_ref, wv_ref, bv_ref,
                   wo_ref, bo_ref, g_ref, be_ref, *, n_heads, causal, mix, ctxs_ref=None):
    """Attention sub-layer on values: QKV proj -> per-head softmax -> combine -> out-proj
    -> residual(x) -> LayerNorm.  kv=None means self-attention (reuse x).
    wq/wk/wv: [D, D] bf16 (wq pre-scaled by 1/sqrt(E)); wo: [H, E, D] bf16.
    mix=True uses a VMEM scratch (ctxs_ref, [H*Lq, E]) + stride-H loads to realize the
    torch transpose(2,1).view(B,L,-1) permutation without extra matmuls."""
    Lq, D = x.shape
    H = n_heads
    E = D // H
    xb = _bf(x)
    kvb = xb if kv is None else _bf(kv)
    S = Lq if kv is None else kv.shape[0]

    q = jnp.dot(xb, wq_ref[...], preferred_element_type=jnp.float32) + bq_ref[...]
    k = jnp.dot(kvb, wk_ref[...], preferred_element_type=jnp.float32) + bk_ref[...]
    v = jnp.dot(kvb, wv_ref[...], preferred_element_type=jnp.float32) + bv_ref[...]

    if causal:  # TriangularCausalMask (built once, hoisted out of the head loop)
        row = jax.lax.broadcasted_iota(jnp.int32, (Lq, S), 0)
        col = jax.lax.broadcasted_iota(jnp.int32, (Lq, S), 1)
        masked = col > row

    dn = (((1,), (1,)), ((), ()))          # contract last dim of q-slice with last of k-slice
    proj = jnp.zeros((Lq, D), jnp.float32)
    for h in range(H):
        sl = slice(h * E, (h + 1) * E)
        s = jax.lax.dot_general(q[:, sl], k[:, sl], dn, preferred_element_type=jnp.float32)
        if causal:
            s = jnp.where(masked, -1e30, s)
        m = jnp.max(s, axis=-1, keepdims=True)
        p = jnp.exp(s - m)
        p = p / jnp.sum(p, axis=-1, keepdims=True)          # exact softmax normalization
        ctx = jnp.dot(p, v[:, sl], preferred_element_type=jnp.float32)   # [Lq, E]
        if mix:
            ctxs_ref[h * Lq:(h + 1) * Lq, :] = ctx           # ctx_flat row n = h*Lq + l
        else:
            proj = proj + jnp.dot(_bf(ctx), wo_ref[h], preferred_element_type=jnp.float32)

    if mix:
        # mixed[l2, j*E+e] = ctx_flat[l2*H + j, e]  ->  stride-H sublane load per j.
        for j in range(H):
            mj = ctxs_ref[pl.ds(j, Lq, stride=H), :]
            proj = proj + jnp.dot(_bf(mj), wo_ref[j], preferred_element_type=jnp.float32)

    y = x + proj + bo_ref[...]
    return _ln(y, g_ref[...], be_ref[...])


def _ffn_sublayer(x, w1_ref, b1_ref, w2_ref, b2_ref, g_ref, be_ref):
    h = jnp.dot(_bf(x), w1_ref[...], preferred_element_type=jnp.float32) + b1_ref[...]
    h = _gelu(h)
    y = x + jnp.dot(_bf(h), w2_ref[...], preferred_element_type=jnp.float32) + b2_ref[...]
    return _ln(y, g_ref[...], be_ref[...])


# ---------------------------------------------------------------------------
# Pallas kernels
# ---------------------------------------------------------------------------
def _embed_kernel(x_ref, w_ref, b_ref, extra_ref, o_ref):
    # DataEmbedding: circular Conv1d(k=3,p=1) token embedding + (pos + temporal) add.
    # x: [L, Cin], w: [3*Cin, D], extra: [L, D]
    x = x_ref[...]
    L = x.shape[0]
    xm1 = pltpu.roll(x, 1, 0)        # x[(l-1) mod L]
    xp1 = pltpu.roll(x, L - 1, 0)    # x[(l+1) mod L]
    xcat = jnp.concatenate([xm1, x, xp1], axis=-1)            # [L, 3*Cin]
    y = jnp.dot(xcat, w_ref[...], preferred_element_type=jnp.float32)
    o_ref[...] = y + b_ref[...] + extra_ref[...]


def _encoder_layer_kernel(x_ref,
                          wq_ref, bq_ref, wk_ref, bk_ref, wv_ref, bv_ref, wo_ref, bo_ref,
                          g1_ref, be1_ref,
                          w1_ref, fb1_ref, w2_ref, fb2_ref,
                          g2_ref, be2_ref,
                          gf_ref, bf_ref,
                          o_ref, *, n_heads, final_ln):
    # Fused EncoderLayer: self-attn + LN1 + FFN + LN2 (+ optional encoder-final LN).
    x = x_ref[...]
    x1 = _attn_sublayer(x, None, wq_ref, bq_ref, wk_ref, bk_ref, wv_ref, bv_ref,
                        wo_ref, bo_ref, g1_ref, be1_ref,
                        n_heads=n_heads, causal=False, mix=False)
    y = _ffn_sublayer(x1, w1_ref, fb1_ref, w2_ref, fb2_ref, g2_ref, be2_ref)
    if final_ln:
        y = _ln(y, gf_ref[...], bf_ref[...])
    o_ref[...] = y


def _decoder_layer_kernel(x_ref, cross_ref,
                          swq_ref, sbq_ref, swk_ref, sbk_ref, swv_ref, sbv_ref, swo_ref, sbo_ref,
                          g1_ref, be1_ref,
                          cwq_ref, cbq_ref, cwk_ref, cbk_ref, cwv_ref, cbv_ref, cwo_ref, cbo_ref,
                          g2_ref, be2_ref,
                          w1_ref, fb1_ref, w2_ref, fb2_ref,
                          g3_ref, be3_ref,
                          o_ref, ctxs_ref, *, n_heads):
    # Fused DecoderLayer: causal self-attn (mix=True) + LN1 + cross-attn + LN2 + FFN + LN3.
    x = x_ref[...]
    cross = cross_ref[...]
    x1 = _attn_sublayer(x, None, swq_ref, sbq_ref, swk_ref, sbk_ref, swv_ref, sbv_ref,
                        swo_ref, sbo_ref, g1_ref, be1_ref,
                        n_heads=n_heads, causal=True, mix=True, ctxs_ref=ctxs_ref)
    x2 = _attn_sublayer(x1, cross, cwq_ref, cbq_ref, cwk_ref, cbk_ref, cwv_ref, cbv_ref,
                        cwo_ref, cbo_ref, g2_ref, be2_ref,
                        n_heads=n_heads, causal=False, mix=False)
    o_ref[...] = _ffn_sublayer(x2, w1_ref, fb1_ref, w2_ref, fb2_ref, g3_ref, be3_ref)


def _ln_proj_kernel(x_ref, g_ref, be_ref, w_ref, b_ref, o_ref):
    # decoder final LayerNorm + nn.Linear projection
    y = _ln(x_ref[...], g_ref[...], be_ref[...])
    o_ref[...] = jnp.dot(_bf(y), w_ref[...], preferred_element_type=jnp.float32) + b_ref[...]


def _distil_conv_kernel(x_ref, w_ref, cb_ref, y_ref, s1_ref, s2_ref):
    # ConvLayer pass 1: circular Conv1d(k=3,p=1) + per-sample BatchNorm partial sums.
    x = x_ref[...]
    L = x.shape[0]
    xm1 = pltpu.roll(x, 1, 0)
    xp1 = pltpu.roll(x, L - 1, 0)
    xcat = _bf(jnp.concatenate([xm1, x, xp1], axis=-1))        # [L, 3*D]
    y = jnp.dot(xcat, w_ref[...], preferred_element_type=jnp.float32) + cb_ref[...]
    y_ref[...] = y
    s1_ref[...] = jnp.sum(y, axis=0, keepdims=True)
    s2_ref[...] = jnp.sum(y * y, axis=0, keepdims=True)


def _distil_pool_kernel(y_ref, s1_ref, s2_ref, g_ref, be_ref, o_ref, buf_ref, *,
                        n_total, l_out):
    # ConvLayer pass 2: BatchNorm1d (batch statistics; training-state, matching a freshly
    # constructed torch module) -> ELU -> MaxPool1d(k=3, stride=2, padding=1).
    y = y_ref[...]
    L = y.shape[0]
    inv_n = 1.0 / n_total
    mean = jnp.sum(s1_ref[...], axis=0) * inv_n                # [1, D]
    var = jnp.sum(s2_ref[...], axis=0) * inv_n - mean * mean
    yb = (y - mean) * jax.lax.rsqrt(var + 1e-5) * g_ref[...] + be_ref[...]
    yb = jnp.where(yb > 0.0, yb, jnp.exp(jnp.minimum(yb, 0.0)) - 1.0)      # ELU(alpha=1)
    # sliding window max over {l-1, l, l+1}; window 0 fixed up separately (edge padding).
    a = jnp.maximum(jnp.maximum(pltpu.roll(yb, 1, 0), yb), pltpu.roll(yb, L - 1, 0))
    buf_ref[...] = a
    ev = buf_ref[pl.ds(0, l_out, stride=2), :]                 # rows 0, 2, ..., L-2
    row0 = jnp.max(yb[0:2, :], axis=0, keepdims=True)
    o_ref[...] = jnp.concatenate([row0, ev[1:, :]], axis=0)


# ---------------------------------------------------------------------------
# pallas_call wrappers
# ---------------------------------------------------------------------------
_PAR = pltpu.CompilerParams(dimension_semantics=("parallel",),
                            vmem_limit_bytes=48 * 1024 * 1024)


def _rep(a):
    nd = a.ndim
    return pl.BlockSpec(a.shape, lambda b, _nd=nd: (0,) * _nd)


def _per_batch(shape_tail):
    nt = len(shape_tail)
    return pl.BlockSpec((None,) + tuple(shape_tail), lambda b, _nt=nt: (b,) + (0,) * _nt)


def data_embedding(x, x_mark, conv_p, tables):
    B, L, Cin = x.shape
    D = conv_p["w"].shape[-1]
    idx = x_mark.astype(jnp.int32)
    extra = (tables["pos"][None, :L, :]                               # PositionalEmbedding
             + jnp.take(tables["month"], idx[..., 0], axis=0)         # fixed TemporalEmbedding
             + jnp.take(tables["day"], idx[..., 1], axis=0)
             + jnp.take(tables["weekday"], idx[..., 2], axis=0)
             + jnp.take(tables["hour"], idx[..., 3], axis=0))
    w = conv_p["w"].reshape(3 * Cin, D)
    b = conv_p["b"].reshape(1, D)
    return pl.pallas_call(
        _embed_kernel,
        grid=(B,),
        in_specs=[_per_batch((L, Cin)), _rep(w), _rep(b), _per_batch((L, D))],
        out_specs=_per_batch((L, D)),
        out_shape=jax.ShapeDtypeStruct((B, L, D), jnp.float32),
        compiler_params=_PAR,
    )(x, w, b, extra)


def _attn_ops(a, H, E, D):
    # Head-major out-proj weight; 1/sqrt(E) softmax scale folded into the Q projection.
    scale = 1.0 / math.sqrt(E)
    return [_bf(a["q"]["w"] * scale), (a["q"]["b"] * scale).reshape(1, D),
            _bf(a["k"]["w"]), a["k"]["b"].reshape(1, D),
            _bf(a["v"]["w"]), a["v"]["b"].reshape(1, D),
            _bf(a["o"]["w"].reshape(H, E, D)), a["o"]["b"].reshape(1, D)]


def encoder_layer(x, p, n_heads, final_norm=None):
    B, L, D = x.shape
    H = n_heads
    E = D // H
    Dff = p["ff1"]["w"].shape[1]
    g2 = p["norm2"]["g"].reshape(1, D)
    be2 = p["norm2"]["b"].reshape(1, D)
    if final_norm is None:
        gf, bfin = g2, be2            # placeholders (unused when final_ln=False)
    else:
        gf = final_norm["g"].reshape(1, D)
        bfin = final_norm["b"].reshape(1, D)
    ops = (_attn_ops(p["attn"], H, E, D)
           + [p["norm1"]["g"].reshape(1, D), p["norm1"]["b"].reshape(1, D)]
           + [_bf(p["ff1"]["w"]), p["ff1"]["b"].reshape(1, Dff),
              _bf(p["ff2"]["w"]), p["ff2"]["b"].reshape(1, D)]
           + [g2, be2, gf, bfin])
    kern = functools.partial(_encoder_layer_kernel, n_heads=H,
                             final_ln=final_norm is not None)
    return pl.pallas_call(
        kern,
        grid=(B,),
        in_specs=[_per_batch((L, D))] + [_rep(o) for o in ops],
        out_specs=_per_batch((L, D)),
        out_shape=jax.ShapeDtypeStruct((B, L, D), jnp.float32),
        compiler_params=_PAR,
    )(x, *ops)


def decoder_layer(x, cross, p, n_heads):
    B, Ld, D = x.shape
    S = cross.shape[1]
    H = n_heads
    E = D // H
    Dff = p["ff1"]["w"].shape[1]
    ops = (_attn_ops(p["self_attn"], H, E, D)
           + [p["norm1"]["g"].reshape(1, D), p["norm1"]["b"].reshape(1, D)]
           + _attn_ops(p["cross_attn"], H, E, D)
           + [p["norm2"]["g"].reshape(1, D), p["norm2"]["b"].reshape(1, D)]
           + [_bf(p["ff1"]["w"]), p["ff1"]["b"].reshape(1, Dff),
              _bf(p["ff2"]["w"]), p["ff2"]["b"].reshape(1, D)]
           + [p["norm3"]["g"].reshape(1, D), p["norm3"]["b"].reshape(1, D)])
    kern = functools.partial(_decoder_layer_kernel, n_heads=H)
    return pl.pallas_call(
        kern,
        grid=(B,),
        in_specs=[_per_batch((Ld, D)), _per_batch((S, D))] + [_rep(o) for o in ops],
        out_specs=_per_batch((Ld, D)),
        out_shape=jax.ShapeDtypeStruct((B, Ld, D), jnp.float32),
        scratch_shapes=[pltpu.VMEM((H * Ld, E), jnp.float32)],
        compiler_params=_PAR,
    )(x, cross, *ops)


def ln_project_tail(x, gamma, beta, w, b, pred_len):
    """Decoder norm + projection applied only to the last pred_len positions."""
    B, L, D = x.shape
    xt = x[:, L - pred_len:, :]
    Dout = w.shape[1]
    g = gamma.reshape(1, D)
    be = beta.reshape(1, D)
    wb = _bf(w)
    bb = b.reshape(1, Dout)
    return pl.pallas_call(
        _ln_proj_kernel,
        grid=(B,),
        in_specs=[_per_batch((pred_len, D)), _rep(g), _rep(be), _rep(wb), _rep(bb)],
        out_specs=_per_batch((pred_len, Dout)),
        out_shape=jax.ShapeDtypeStruct((B, pred_len, Dout), jnp.float32),
        compiler_params=_PAR,
    )(xt, g, be, wb, bb)


def distil_conv_layer(x, p):
    B, L, D = x.shape
    assert L % 2 == 0
    l_out = L // 2                      # MaxPool1d(kernel=3, stride=2, padding=1)
    w = _bf(p["conv"]["w"].reshape(3 * D, D))
    cb = p["conv"]["b"].reshape(1, D)
    g = p["bn"]["g"].reshape(1, D)
    be = p["bn"]["b"].reshape(1, D)

    y, s1, s2 = pl.pallas_call(
        _distil_conv_kernel,
        grid=(B,),
        in_specs=[_per_batch((L, D)), _rep(w), _rep(cb)],
        out_specs=[_per_batch((L, D)), _per_batch((1, D)), _per_batch((1, D))],
        out_shape=[jax.ShapeDtypeStruct((B, L, D), jnp.float32),
                   jax.ShapeDtypeStruct((B, 1, D), jnp.float32),
                   jax.ShapeDtypeStruct((B, 1, D), jnp.float32)],
        compiler_params=_PAR,
    )(x, w, cb)

    kern = functools.partial(_distil_pool_kernel, n_total=float(B * L), l_out=l_out)
    return pl.pallas_call(
        kern,
        grid=(B,),
        in_specs=[_per_batch((L, D)), _rep(s1), _rep(s2), _rep(g), _rep(be)],
        out_specs=_per_batch((l_out, D)),
        out_shape=jax.ShapeDtypeStruct((B, l_out, D), jnp.float32),
        scratch_shapes=[pltpu.VMEM((L, D), jnp.float32)],
        compiler_params=_PAR,
    )(y, s1, s2, g, be)


# ---------------------------------------------------------------------------
# model glue (layer composition, embedding tables, parameter init)
# ---------------------------------------------------------------------------
def _sinusoid_table(n, d_model):
    pos = jnp.arange(n, dtype=jnp.float32)[:, None]
    div = jnp.exp(jnp.arange(0, d_model, 2, dtype=jnp.float32) * (-math.log(10000.0) / d_model))
    ang = pos * div
    tab = jnp.zeros((n, d_model), jnp.float32)
    tab = tab.at[:, 0::2].set(jnp.sin(ang))
    tab = tab.at[:, 1::2].set(jnp.cos(ang))
    return tab


def make_fixed_tables(d_model, max_len=64):
    # PositionalEmbedding + fixed TemporalEmbedding (freq='h': month/day/weekday/hour)
    return {
        "pos": _sinusoid_table(max_len, d_model),
        "month": _sinusoid_table(13, d_model),
        "day": _sinusoid_table(32, d_model),
        "weekday": _sinusoid_table(7, d_model),
        "hour": _sinusoid_table(24, d_model),
    }


def informer_forward(params, cfg, x_enc, x_mark_enc, x_dec, x_mark_dec):
    tables = params["tables"]
    n_heads = cfg["n_heads"]
    # Encoder (distil=True: ConvLayer between attention layers); final LN folded into
    # the last encoder-layer kernel.
    enc = data_embedding(x_enc, x_mark_enc, params["enc_emb_conv"], tables)
    for l in range(cfg["e_layers"] - 1):
        enc = encoder_layer(enc, params["enc_layers"][l], n_heads)
        enc = distil_conv_layer(enc, params["enc_convs"][l])
    enc = encoder_layer(enc, params["enc_layers"][cfg["e_layers"] - 1], n_heads,
                        final_norm=params["enc_norm"])
    # Decoder
    dec = data_embedding(x_dec, x_mark_dec, params["dec_emb_conv"], tables)
    for l in range(cfg["d_layers"]):
        dec = decoder_layer(dec, enc, params["dec_layers"][l], n_heads)
    return ln_project_tail(dec, params["dec_norm"]["g"], params["dec_norm"]["b"],
                           params["projection"]["w"], params["projection"]["b"],
                           cfg["pred_len"])


# ------------------------- deterministic parameter init ---------------------
def _dense(key, din, dout, scale=0.05):
    kw, kb = jax.random.split(key)
    return {"w": scale * jax.random.normal(kw, (din, dout), jnp.float32),
            "b": scale * jax.random.normal(kb, (dout,), jnp.float32)}


def _conv3(key, cin, cout, scale=0.05):
    kw, kb = jax.random.split(key)
    return {"w": scale * jax.random.normal(kw, (3, cin, cout), jnp.float32),
            "b": scale * jax.random.normal(kb, (cout,), jnp.float32)}


def _norm_p(d):
    return {"g": jnp.ones((d,), jnp.float32), "b": jnp.zeros((d,), jnp.float32)}


def _attn_p(key, d_model):
    kq, kk, kv, ko = jax.random.split(key, 4)
    return {"q": _dense(kq, d_model, d_model), "k": _dense(kk, d_model, d_model),
            "v": _dense(kv, d_model, d_model), "o": _dense(ko, d_model, d_model)}


def _enc_layer_p(key, d_model, d_ff):
    ka, k1, k2 = jax.random.split(key, 3)
    return {"attn": _attn_p(ka, d_model), "ff1": _dense(k1, d_model, d_ff),
            "ff2": _dense(k2, d_ff, d_model), "norm1": _norm_p(d_model), "norm2": _norm_p(d_model)}


def _dec_layer_p(key, d_model, d_ff):
    ks, kc, k1, k2 = jax.random.split(key, 4)
    return {"self_attn": _attn_p(ks, d_model), "cross_attn": _attn_p(kc, d_model),
            "ff1": _dense(k1, d_model, d_ff), "ff2": _dense(k2, d_ff, d_model),
            "norm1": _norm_p(d_model), "norm2": _norm_p(d_model), "norm3": _norm_p(d_model)}


def init_informer_params(key, cfg):
    d_model, d_ff = cfg["d_model"], cfg["d_ff"]
    ke, kd, kel, kdl, kc, kp = jax.random.split(key, 6)
    p = {
        "tables": make_fixed_tables(d_model),
        "enc_emb_conv": _conv3(ke, cfg["enc_in"], d_model),
        "dec_emb_conv": _conv3(kd, cfg["dec_in"], d_model),
        "enc_layers": [_enc_layer_p(k, d_model, d_ff)
                       for k in jax.random.split(kel, cfg["e_layers"])],
        "dec_layers": [_dec_layer_p(k, d_model, d_ff)
                       for k in jax.random.split(kdl, cfg["d_layers"])],
        "enc_norm": _norm_p(d_model),
        "dec_norm": _norm_p(d_model),
        "projection": _dense(kp, d_model, cfg["c_out"]),
    }
    n_conv = max(cfg["e_layers"] - 1, 0)
    p["enc_convs"] = ([{"conv": _conv3(k, d_model, d_model), "bn": _norm_p(d_model)}
                       for k in jax.random.split(kc, n_conv)] if n_conv else [])
    return p


# ---------------------------------------------------------------------------
if __name__ == "__main__":
    cfg = dict(enc_in=4, dec_in=4, c_out=4, seq_len=16, label_len=8, pred_len=8,
               d_model=32, n_heads=4, e_layers=2, d_layers=1, d_ff=64)

    key = jax.random.PRNGKey(0)
    kparam, kxe, kxd, kme, kmd = jax.random.split(key, 5)
    params = init_informer_params(kparam, cfg)

    B = 2
    L_enc = cfg["seq_len"]
    L_dec = cfg["label_len"] + cfg["pred_len"]

    def make_mark(k, L):
        km, kd_, kw, kh = jax.random.split(k, 4)
        month = jax.random.randint(km, (B, L, 1), 0, 13)
        day = jax.random.randint(kd_, (B, L, 1), 0, 32)
        weekday = jax.random.randint(kw, (B, L, 1), 0, 7)
        hour = jax.random.randint(kh, (B, L, 1), 0, 24)
        return jnp.concatenate([month, day, weekday, hour], axis=-1).astype(jnp.float32)

    x_enc = jax.random.normal(kxe, (B, L_enc, cfg["enc_in"]), jnp.float32)
    x_dec = jax.random.normal(kxd, (B, L_dec, cfg["dec_in"]), jnp.float32)
    x_mark_enc = make_mark(kme, L_enc)
    x_mark_dec = make_mark(kmd, L_dec)

    fwd = jax.jit(lambda p, a, b, c, d: informer_forward(p, cfg, a, b, c, d))
    out = fwd(params, x_enc, x_mark_enc, x_dec, x_mark_dec)
    out = jax.block_until_ready(out)

    assert out.shape == (B, cfg["pred_len"], cfg["c_out"]), out.shape
    assert bool(jnp.all(jnp.isfinite(out)))
    print("KERNEL_OK")
</pallas_src>

<mosaic_0001>
module attributes {stable_mosaic.version = 11 : i64} {
  func.func @_embed_kernel(%arg0: i32, %arg1: memref<1x16x4xf32, #tpu.memory_space<vmem>>, %arg2: memref<12x32xf32, #tpu.memory_space<vmem>>, %arg3: memref<1x32xf32, #tpu.memory_space<vmem>>, %arg4: memref<1x16x32xf32, #tpu.memory_space<vmem>>, %arg5: memref<1x16x32xf32, #tpu.memory_space<vmem>>) attributes {dimension_semantics = [#tpu.dimension_semantics<parallel>], iteration_bounds = array<i64: 2>, scalar_prefetch = 0 : i64, scratch_operands = 0 : i64, tpu.core_type = #tpu.core_type<tc>, window_params = [{transform_indices = @transform_0, window_bounds = array<i64: 1, 16, 4>}, {pipeline_mode = #tpu.pipeline_mode<synchronous>, transform_indices = @transform_1, window_bounds = array<i64: 12, 32>}, {pipeline_mode = #tpu.pipeline_mode<synchronous>, transform_indices = @transform_2, window_bounds = array<i64: 1, 32>}, {transform_indices = @transform_3, window_bounds = array<i64: 1, 16, 32>}, {transform_indices = @transform_4, window_bounds = array<i64: 1, 16, 32>}]} {
    %c0 = arith.constant 0 : index
    %c0_0 = arith.constant 0 : index
    %c0_1 = arith.constant 0 : index
    %0 = vector.load %arg1[%c0, %c0_0, %c0_1] : memref<1x16x4xf32, #tpu.memory_space<vmem>>, vector<1x16x4xf32>
    %1 = vector.shape_cast %0 : vector<1x16x4xf32> to vector<16x4xf32>
    %c1_i32 = arith.constant 1 : i32
    %2 = tpu.dynamic_rotate %1 by %c1_i32 dim 0 : vector<16x4xf32>, i32 -> vector<16x4xf32>
    %c15_i32 = arith.constant 15 : i32
    %3 = tpu.dynamic_rotate %1 by %c15_i32 dim 0 : vector<16x4xf32>, i32 -> vector<16x4xf32>
    %4 = tpu.concatenate %2, %1, %3 in 1 : vector<16x4xf32>, vector<16x4xf32>, vector<16x4xf32> -> vector<16x12xf32>
    %c0_2 = arith.constant 0 : index
    %c0_3 = arith.constant 0 : index
    %5 = vector.load %arg2[%c0_2, %c0_3] : memref<12x32xf32, #tpu.memory_space<vmem>>, vector<12x32xf32>
    %cst = arith.constant dense<0.000000e+00> : vector<16x32xf32>
    %6 = tpu.matmul %4, %5, %cst {dimension_numbers = #tpu.dot_dimension_numbers<[1], [0], [0], [1], [0, 0, 1, 1], [], []>} : vector<16x12xf32>, vector<12x32xf32>, vector<16x32xf32> -> vector<16x32xf32>
    %c0_4 = arith.constant 0 : index
    %c0_5 = arith.constant 0 : index
    %7 = vector.load %arg3[%c0_4, %c0_5] : memref<1x32xf32, #tpu.memory_space<vmem>>, vector<1x32xf32>
    %8 = vector.broadcast %7 : vector<1x32xf32> to vector<16x32xf32>
    %9 = arith.addf %6, %8 : vector<16x32xf32>
    %c0_6 = arith.constant 0 : index
    %c0_7 = arith.constant 0 : index
    %c0_8 = arith.constant 0 : index
    %10 = vector.load %arg4[%c0_6, %c0_7, %c0_8] : memref<1x16x32xf32, #tpu.memory_space<vmem>>, vector<1x16x32xf32>
    %11 = vector.shape_cast %10 : vector<1x16x32xf32> to vector<16x32xf32>
    %12 = arith.addf %9, %11 : vector<16x32xf32>
    %c0_9 = arith.constant 0 : index
    %c0_10 = arith.constant 0 : index
    %c0_11 = arith.constant 0 : index
    %13 = vector.load %arg5[%c0_9, %c0_10, %c0_11] : memref<1x16x32xf32, #tpu.memory_space<vmem>>, vector<1x16x32xf32>
    %14 = vector.shape_cast %13 : vector<1x16x32xf32> to vector<16x32xf32>
    %15 = vector.shape_cast %12 : vector<16x32xf32> to vector<1x16x32xf32>
    tpu.vector_store %arg5[%c0_9, %c0_10, %c0_11], %15 {strides = array<i32>} : memref<1x16x32xf32, #tpu.memory_space<vmem>>, vector<1x16x32xf32>,
    return
  }
  func.func @transform_0(%arg0: i32) -> (i32, i32, i32) {
    %c0_i32 = arith.constant 0 : i32
    %c0_i32_0 = arith.constant 0 : i32
    %c0_i32_1 = arith.constant 0 : i32
    return %arg0, %c0_i32, %c0_i32_0 : i32, i32, i32
  }
  func.func @transform_1(%arg0: i32) -> (i32, i32) {
    %c0_i32 = arith.constant 0 : i32
    %c0_i32_0 = arith.constant 0 : i32
    %c0_i32_1 = arith.constant 0 : i32
    return %c0_i32, %c0_i32_0 : i32, i32
  }
  func.func @transform_2(%arg0: i32) -> (i32, i32) {
    %c0_i32 = arith.constant 0 : i32
    %c0_i32_0 = arith.constant 0 : i32
    %c0_i32_1 = arith.constant 0 : i32
    return %c0_i32, %c0_i32_0 : i32, i32
  }
  func.func @transform_3(%arg0: i32) -> (i32, i32, i32) {
    %c0_i32 = arith.constant 0 : i32
    %c0_i32_0 = arith.constant 0 : i32
    %c0_i32_1 = arith.constant 0 : i32
    return %arg0, %c0_i32, %c0_i32_0 : i32, i32, i32
  }
  func.func @transform_4(%arg0: i32) -> (i32, i32, i32) {
    %c0_i32 = arith.constant 0 : i32
    %c0_i32_0 = arith.constant 0 : i32
    %c0_i32_1 = arith.constant 0 : i32
    return %arg0, %c0_i32, %c0_i32_0 : i32, i32, i32
  }
}

module attributes {stable_mosaic.version = 11 : i64} {
  func.func @_distil_conv_kernel(%arg0: i32, %arg1: memref<1x16x32xf32, #tpu.memory_space<vmem>>, %arg2: memref<96x32xbf16, #tpu.memory_space<vmem>>, %arg3: memref<1x32xf32, #tpu.memory_space<vmem>>, %arg4: memref<1x16x32xf32, #tpu.memory_space<vmem>>, %arg5: memref<1x1x32xf32, #tpu.memory_space<vmem>>, %arg6: memref<1x1x32xf32, #tpu.memory_space<vmem>>) attributes {dimension_semantics = [#tpu.dimension_semantics<parallel>], iteration_bounds = array<i64: 2>, scalar_prefetch = 0 : i64, scratch_operands = 0 : i64, tpu.core_type = #tpu.core_type<tc>, window_params = [{transform_indices = @transform_0, window_bounds = array<i64: 1, 16, 32>}, {pipeline_mode = #tpu.pipeline_mode<synchronous>, transform_indices = @transform_1, window_bounds = array<i64: 96, 32>}, {pipeline_mode = #tpu.pipeline_mode<synchronous>, transform_indices = @transform_2, window_bounds = array<i64: 1, 32>}, {transform_indices = @transform_3, window_bounds = array<i64: 1, 16, 32>}, {transform_indices = @transform_4, window_bounds = array<i64: 1, 1, 32>}, {transform_indices = @transform_5, window_bounds = array<i64: 1, 1, 32>}]} {
    %c0 = arith.constant 0 : index
    %c0_0 = arith.constant 0 : index
    %c0_1 = arith.constant 0 : index
    %0 = vector.load %arg1[%c0, %c0_0, %c0_1] : memref<1x16x32xf32, #tpu.memory_space<vmem>>, vector<1x16x32xf32>
    %1 = vector.shape_cast %0 : vector<1x16x32xf32> to vector<16x32xf32>
    %c1_i32 = arith.constant 1 : i32
    %2 = tpu.dynamic_rotate %1 by %c1_i32 dim 0 : vector<16x32xf32>, i32 -> vector<16x32xf32>
    %c15_i32 = arith.constant 15 : i32
    %3 = tpu.dynamic_rotate %1 by %c15_i32 dim 0 : vector<16x32xf32>, i32 -> vector<16x32xf32>
    %4 = tpu.concatenate %2, %1, %3 in 1 : vector<16x32xf32>, vector<16x32xf32>, vector<16x32xf32> -> vector<16x96xf32>
    %5 = arith.truncf %4 : vector<16x96xf32> to vector<16x96xbf16>
    %c0_2 = arith.constant 0 : index
    %c0_3 = arith.constant 0 : index
    %6 = vector.load %arg2[%c0_2, %c0_3] : memref<96x32xbf16, #tpu.memory_space<vmem>>, vector<96x32xbf16>
    %cst = arith.constant dense<0.000000e+00> : vector<16x32xf32>
    %7 = tpu.matmul %5, %6, %cst {dimension_numbers = #tpu.dot_dimension_numbers<[1], [0], [0], [1], [0, 0, 1, 1], [], []>} : vector<16x96xbf16>, vector<96x32xbf16>, vector<16x32xf32> -> vector<16x32xf32>
    %c0_4 = arith.constant 0 : index
    %c0_5 = arith.constant 0 : index
    %8 = vector.load %arg3[%c0_4, %c0_5] : memref<1x32xf32, #tpu.memory_space<vmem>>, vector<1x32xf32>
    %9 = vector.broadcast %8 : vector<1x32xf32> to vector<16x32xf32>
    %10 = arith.addf %7, %9 : vector<16x32xf32>
    %c0_6 = arith.constant 0 : index
    %c0_7 = arith.constant 0 : index
    %c0_8 = arith.constant 0 : index
    %11 = vector.load %arg4[%c0_6, %c0_7, %c0_8] : memref<1x16x32xf32, #tpu.memory_space<vmem>>, vector<1x16x32xf32>
    %12 = vector.shape_cast %11 : vector<1x16x32xf32> to vector<16x32xf32>
    %13 = vector.shape_cast %10 : vector<16x32xf32> to vector<1x16x32xf32>
    tpu.vector_store %arg4[%c0_6, %c0_7, %c0_8], %13 {strides = array<i32>} : memref<1x16x32xf32, #tpu.memory_space<vmem>>, vector<1x16x32xf32>,
    %cst_9 = arith.constant dense<0.000000e+00> : vector<32xf32>
    %14 = vector.multi_reduction <add>, %10, %cst_9 [0] : vector<16x32xf32> to vector<32xf32>
    %15 = vector.shape_cast %14 : vector<32xf32> to vector<1x32xf32>
    %c0_10 = arith.constant 0 : index
    %c0_11 = arith.constant 0 : index
    %c0_12 = arith.constant 0 : index
    %16 = vector.load %arg5[%c0_10, %c0_11, %c0_12] : memref<1x1x32xf32, #tpu.memory_space<vmem>>, vector<1x1x32xf32>
    %17 = vector.shape_cast %16 : vector<1x1x32xf32> to vector<1x32xf32>
    %18 = vector.shape_cast %15 : vector<1x32xf32> to vector<1x1x32xf32>
    tpu.vector_store %arg5[%c0_10, %c0_11, %c0_12], %18 {strides = array<i32>} : memref<1x1x32xf32, #tpu.memory_space<vmem>>, vector<1x1x32xf32>,
    %19 = arith.mulf %10, %10 : vector<16x32xf32>
    %cst_13 = arith.constant dense<0.000000e+00> : vector<32xf32>
    %20 = vector.multi_reduction <add>, %19, %cst_13 [0] : vector<16x32xf32> to vector<32xf32>
    %21 = vector.shape_cast %20 : vector<32xf32> to vector<1x32xf32>
    %c0_14 = arith.constant 0 : index
    %c0_15 = arith.constant 0 : index
    %c0_16 = arith.constant 0 : index
    %22 = vector.load %arg6[%c0_14, %c0_15, %c0_16] : memref<1x1x32xf32, #tpu.memory_space<vmem>>, vector<1x1x32xf32>
    %23 = vector.shape_cast %22 : vector<1x1x32xf32> to vector<1x32xf32>
    %24 = vector.shape_cast %21 : vector<1x32xf32> to vector<1x1x32xf32>
    tpu.vector_store %arg6[%c0_14, %c0_15, %c0_16], %24 {strides = array<i32>} : memref<1x1x32xf32, #tpu.memory_space<vmem>>, vector<1x1x32xf32>,
    return
  }
  func.func @transform_0(%arg0: i32) -> (i32, i32, i32) {
    %c0_i32 = arith.constant 0 : i32
    %c0_i32_0 = arith.constant 0 : i32
    %c0_i32_1 = arith.constant 0 : i32
    return %arg0, %c0_i32, %c0_i32_0 : i32, i32, i32
  }
  func.func @transform_1(%arg0: i32) -> (i32, i32) {
    %c0_i32 = arith.constant 0 : i32
    %c0_i32_0 = arith.constant 0 : i32
    %c0_i32_1 = arith.constant 0 : i32
    return %c0_i32, %c0_i32_0 : i32, i32
  }
  func.func @transform_2(%arg0: i32) -> (i32, i32) {
    %c0_i32 = arith.constant 0 : i32
    %c0_i32_0 = arith.constant 0 : i32
    %c0_i32_1 = arith.constant 0 : i32
    return %c0_i32, %c0_i32_0 : i32, i32
  }
  func.func @transform_3(%arg0: i32) -> (i32, i32, i32) {
    %c0_i32 = arith.constant 0 : i32
    %c0_i32_0 = arith.constant 0 : i32
    %c0_i32_1 = arith.constant 0 : i32
    return %arg0, %c0_i32, %c0_i32_0 : i32, i32, i32
  }
  func.func @transform_4(%arg0: i32) -> (i32, i32, i32) {
    %c0_i32 = arith.constant 0 : i32
    %c0_i32_0 = arith.constant 0 : i32
    %c0_i32_1 = arith.constant 0 : i32
    return %arg0, %c0_i32, %c0_i32_0 : i32, i32, i32
  }
  func.func @transform_5(%arg0: i32) -> (i32, i32, i32) {
    %c0_i32 = arith.constant 0 : i32
    %c0_i32_0 = arith.constant 0 : i32
    %c0_i32_1 = arith.constant 0 : i32
    return %arg0, %c0_i32, %c0_i32_0 : i32, i32, i32
  }
}

module attributes {stable_mosaic.version = 11 : i64} {
  func.func @_distil_pool_kernel(%arg0: i32, %arg1: memref<1x16x32xf32, #tpu.memory_space<vmem>>, %arg2: memref<2x1x32xf32, #tpu.memory_space<vmem>>, %arg3: memref<2x1x32xf32, #tpu.memory_space<vmem>>, %arg4: memref<1x32xf32, #tpu.memory_space<vmem>>, %arg5: memref<1x32xf32, #tpu.memory_space<vmem>>, %arg6: memref<1x8x32xf32, #tpu.memory_space<vmem>>, %arg7: memref<16x32xf32, #tpu.memory_space<vmem>>) attributes {dimension_semantics = [#tpu.dimension_semantics<parallel>], iteration_bounds = array<i64: 2>, scalar_prefetch = 0 : i64, scratch_operands = 1 : i64, tpu.core_type = #tpu.core_type<tc>, window_params = [{transform_indices = @transform_0, window_bounds = array<i64: 1, 16, 32>}, {pipeline_mode = #tpu.pipeline_mode<synchronous>, transform_indices = @transform_1, window_bounds = array<i64: 2, 1, 32>}, {pipeline_mode = #tpu.pipeline_mode<synchronous>, transform_indices = @transform_2, window_bounds = array<i64: 2, 1, 32>}, {pipeline_mode = #tpu.pipeline_mode<synchronous>, transform_indices = @transform_3, window_bounds = array<i64: 1, 32>}, {pipeline_mode = #tpu.pipeline_mode<synchronous>, transform_indices = @transform_4, window_bounds = array<i64: 1, 32>}, {transform_indices = @transform_5, window_bounds = array<i64: 1, 8, 32>}]} {
    %c0 = arith.constant 0 : index
    %c0_0 = arith.constant 0 : index
    %c0_1 = arith.constant 0 : index
    %0 = vector.load %arg1[%c0, %c0_0, %c0_1] : memref<1x16x32xf32, #tpu.memory_space<vmem>>, vector<1x16x32xf32>
    %1 = vector.shape_cast %0 : vector<1x16x32xf32> to vector<16x32xf32>
    %c0_2 = arith.constant 0 : index
    %c0_3 = arith.constant 0 : index
    %c0_4 = arith.constant 0 : index
    %2 = vector.load %arg2[%c0_2, %c0_3, %c0_4] : memref<2x1x32xf32, #tpu.memory_space<vmem>>, vector<2x1x32xf32>
    %cst = arith.constant dense<0.000000e+00> : vector<1x32xf32>
    %3 = vector.multi_reduction <add>, %2, %cst [0] : vector<2x1x32xf32> to vector<1x32xf32>
    %cst_5 = arith.constant 3.125000e-02 : f32
    %4 = vector.broadcast %cst_5 : f32 to vector<1x32xf32>
    %5 = arith.mulf %3, %4 : vector<1x32xf32>
    %c0_6 = arith.constant 0 : index
    %c0_7 = arith.constant 0 : index
    %c0_8 = arith.constant 0 : index
    %6 = vector.load %arg3[%c0_6, %c0_7, %c0_8] : memref<2x1x32xf32, #tpu.memory_space<vmem>>, vector<2x1x32xf32>
    %cst_9 = arith.constant dense<0.000000e+00> : vector<1x32xf32>
    %7 = vector.multi_reduction <add>, %6, %cst_9 [0] : vector<2x1x32xf32> to vector<1x32xf32>
    %cst_10 = arith.constant 3.125000e-02 : f32
    %8 = vector.broadcast %cst_10 : f32 to vector<1x32xf32>
    %9 = arith.mulf %7, %8 : vector<1x32xf32>
    %10 = arith.mulf %5, %5 : vector<1x32xf32>
    %11 = arith.subf %9, %10 : vector<1x32xf32>
    %12 = vector.broadcast %5 : vector<1x32xf32> to vector<16x32xf32>
    %13 = arith.subf %1, %12 : vector<16x32xf32>
    %cst_11 = arith.constant 9.99999974E-6 : f32
    %14 = vector.broadcast %cst_11 : f32 to vector<1x32xf32>
    %15 = arith.addf %11, %14 : vector<1x32xf32>
    %16 = math.rsqrt %15 : vector<1x32xf32>
    %17 = vector.broadcast %16 : vector<1x32xf32> to vector<16x32xf32>
    %18 = arith.mulf %13, %17 : vector<16x32xf32>
    %c0_12 = arith.constant 0 : index
    %c0_13 = arith.constant 0 : index
    %19 = vector.load %arg4[%c0_12, %c0_13] : memref<1x32xf32, #tpu.memory_space<vmem>>, vector<1x32xf32>
    %20 = vector.broadcast %19 : vector<1x32xf32> to vector<16x32xf32>
    %21 = arith.mulf %18, %20 : vector<16x32xf32>
    %c0_14 = arith.constant 0 : index
    %c0_15 = arith.constant 0 : index
    %22 = vector.load %arg5[%c0_14, %c0_15] : memref<1x32xf32, #tpu.memory_space<vmem>>, vector<1x32xf32>
    %23 = vector.broadcast %22 : vector<1x32xf32> to vector<16x32xf32>
    %24 = arith.addf %21, %23 : vector<16x32xf32>
    %cst_16 = arith.constant 0.000000e+00 : f32
    %25 = vector.broadcast %cst_16 : f32 to vector<16x32xf32>
    %26 = arith.cmpf ogt, %24, %25 : vector<16x32xf32>
    %cst_17 = arith.constant 0.000000e+00 : f32
    %27 = vector.broadcast %cst_17 : f32 to vector<16x32xf32>
    %28 = arith.minimumf %24, %27 : vector<16x32xf32>
    %29 = math.exp %28 : vector<16x32xf32>
    %cst_18 = arith.constant 1.000000e+00 : f32
    %30 = vector.broadcast %cst_18 : f32 to vector<16x32xf32>
    %31 = arith.subf %29, %30 : vector<16x32xf32>
    %32 = arith.select %26, %24, %31 : vector<16x32xi1>, vector<16x32xf32>
    %c1_i32 = arith.constant 1 : i32
    %33 = tpu.dynamic_rotate %32 by %c1_i32 dim 0 : vector<16x32xf32>, i32 -> vector<16x32xf32>
    %34 = arith.maximumf %33, %32 : vector<16x32xf32>
    %c15_i32 = arith.constant 15 : i32
    %35 = tpu.dynamic_rotate %32 by %c15_i32 dim 0 : vector<16x32xf32>, i32 -> vector<16x32xf32>
    %36 = arith.maximumf %34, %35 : vector<16x32xf32>
    %c0_19 = arith.constant 0 : index
    %c0_20 = arith.constant 0 : index
    %37 = vector.load %arg7[%c0_19, %c0_20] : memref<16x32xf32, #tpu.memory_space<vmem>>, vector<16x32xf32>
    tpu.vector_store %arg7[%c0_19, %c0_20], %36 {strides = array<i32>} : memref<16x32xf32, #tpu.memory_space<vmem>>, vector<16x32xf32>,
    %c0_21 = arith.constant 0 : index
    %c0_22 = arith.constant 0 : index
    %38 = tpu.strided_load %arg7[%c0_21, %c0_22] {strides = array<i32: 2, 1>} : memref<16x32xf32, #tpu.memory_space<vmem>>, vector<8x32xf32>
    %39 = vector.extract_strided_slice %32 {offsets = [0, 0], sizes = [2, 32], strides = [1, 1]} : vector<16x32xf32> to vector<2x32xf32>
    %cst_23 = arith.constant dense<0xFF800000> : vector<32xf32>
    %40 = vector.multi_reduction <maximumf>, %39, %cst_23 [0] : vector<2x32xf32> to vector<32xf32>
    %41 = vector.shape_cast %40 : vector<32xf32> to vector<1x32xf32>
    %42 = vector.extract_strided_slice %38 {offsets = [1, 0], sizes = [7, 32], strides = [1, 1]} : vector<8x32xf32> to vector<7x32xf32>
    %43 = tpu.concatenate %41, %42 in 0 : vector<1x32xf32>, vector<7x32xf32> -> vector<8x32xf32>
    %c0_24 = arith.constant 0 : index
    %c0_25 = arith.constant 0 : index
    %c0_26 = arith.constant 0 : index
    %44 = vector.load %arg6[%c0_24, %c0_25, %c0_26] : memref<1x8x32xf32, #tpu.memory_space<vmem>>, vector<1x8x32xf32>
    %45 = vector.shape_cast %44 : vector<1x8x32xf32> to vector<8x32xf32>
    %46 = vector.shape_cast %43 : vector<8x32xf32> to vector<1x8x32xf32>
    tpu.vector_store %arg6[%c0_24, %c0_25, %c0_26], %46 {strides = array<i32>} : memref<1x8x32xf32, #tpu.memory_space<vmem>>, vector<1x8x32xf32>,
    return
  }
  func.func @transform_0(%arg0: i32) -> (i32, i32, i32) {
    %c0_i32 = arith.constant 0 : i32
    %c0_i32_0 = arith.constant 0 : i32
    %c0_i32_1 = arith.constant 0 : i32
    return %arg0, %c0_i32, %c0_i32_0 : i32, i32, i32
  }
  func.func @transform_1(%arg0: i32) -> (i32, i32, i32) {
    %c0_i32 = arith.constant 0 : i32
    %c0_i32_0 = arith.constant 0 : i32
    %c0_i32_1 = arith.constant 0 : i32
    %c0_i32_2 = arith.constant 0 : i32
    return %c0_i32, %c0_i32_0, %c0_i32_1 : i32, i32, i32
  }
  func.func @transform_2(%arg0: i32) -> (i32, i32, i32) {
    %c0_i32 = arith.constant 0 : i32
    %c0_i32_0 = arith.constant 0 : i32
    %c0_i32_1 = arith.constant 0 : i32
    %c0_i32_2 = arith.constant 0 : i32
    return %c0_i32, %c0_i32_0, %c0_i32_1 : i32, i32, i32
  }
  func.func @transform_3(%arg0: i32) -> (i32, i32) {
    %c0_i32 = arith.constant 0 : i32
    %c0_i32_0 = arith.constant 0 : i32
    %c0_i32_1 = arith.constant 0 : i32
    return %c0_i32, %c0_i32_0 : i32, i32
  }
  func.func @transform_4(%arg0: i32) -> (i32, i32) {
    %c0_i32 = arith.constant 0 : i32
    %c0_i32_0 = arith.constant 0 : i32
    %c0_i32_1 = arith.constant 0 : i32
    return %c0_i32, %c0_i32_0 : i32, i32
  }
  func.func @transform_5(%arg0: i32) -> (i32, i32, i32) {
    %c0_i32 = arith.constant 0 : i32
    %c0_i32_0 = arith.constant 0 : i32
    %c0_i32_1 = arith.constant 0 : i32
    return %arg0, %c0_i32, %c0_i32_0 : i32, i32, i32
  }
}

module attributes {stable_mosaic.version = 11 : i64} {
  func.func @_encoder_layer_kernel(%arg0: i32, %arg1: memref<1x16x32xf32, #tpu.memory_space<vmem>>, %arg2: memref<32x32xbf16, #tpu.memory_space<vmem>>, %arg3: memref<1x32xf32, #tpu.memory_space<vmem>>, %arg4: memref<32x32xbf16, #tpu.memory_space<vmem>>, %arg5: memref<1x32xf32, #tpu.memory_space<vmem>>, %arg6: memref<32x32xbf16, #tpu.memory_space<vmem>>, %arg7: memref<1x32xf32, #tpu.memory_space<vmem>>, %arg8: memref<4x8x32xbf16, #tpu.memory_space<vmem>>, %arg9: memref<1x32xf32, #tpu.memory_space<vmem>>, %arg10: memref<1x32xf32, #tpu.memory_space<vmem>>, %arg11: memref<1x32xf32, #tpu.memory_space<vmem>>, %arg12: memref<32x64xbf16, #tpu.memory_space<vmem>>, %arg13: memref<1x64xf32, #tpu.memory_space<vmem>>, %arg14: memref<64x32xbf16, #tpu.memory_space<vmem>>, %arg15: memref<1x32xf32, #tpu.memory_space<vmem>>, %arg16: memref<1x32xf32, #tpu.memory_space<vmem>>, %arg17: memref<1x32xf32, #tpu.memory_space<vmem>>, %arg18: memref<1x32xf32, #tpu.memory_space<vmem>>, %arg19: memref<1x32xf32, #tpu.memory_space<vmem>>, %arg20: memref<1x16x32xf32, #tpu.memory_space<vmem>>) attributes {dimension_semantics = [#tpu.dimension_semantics<parallel>], iteration_bounds = array<i64: 2>, scalar_prefetch = 0 : i64, scratch_operands = 0 : i64, tpu.core_type = #tpu.core_type<tc>, window_params = [{transform_indices = @transform_0, window_bounds = array<i64: 1, 16, 32>}, {pipeline_mode = #tpu.pipeline_mode<synchronous>, transform_indices = @transform_1, window_bounds = array<i64: 32, 32>}, {pipeline_mode = #tpu.pipeline_mode<synchronous>, transform_indices = @transform_2, window_bounds = array<i64: 1, 32>}, {pipeline_mode = #tpu.pipeline_mode<synchronous>, transform_indices = @transform_3, window_bounds = array<i64: 32, 32>}, {pipeline_mode = #tpu.pipeline_mode<synchronous>, transform_indices = @transform_4, window_bounds = array<i64: 1, 32>}, {pipeline_mode = #tpu.pipeline_mode<synchronous>, transform_indices = @transform_5, window_bounds = array<i64: 32, 32>}, {pipeline_mode = #tpu.pipeline_mode<synchronous>, transform_indices = @transform_6, window_bounds = array<i64: 1, 32>}, {pipeline_mode = #tpu.pipeline_mode<synchronous>, transform_indices = @transform_7, window_bounds = array<i64: 4, 8, 32>}, {pipeline_mode = #tpu.pipeline_mode<synchronous>, transform_indices = @transform_8, window_bounds = array<i64: 1, 32>}, {pipeline_mode = #tpu.pipeline_mode<synchronous>, transform_indices = @transform_9, window_bounds = array<i64: 1, 32>}, {pipeline_mode = #tpu.pipeline_mode<synchronous>, transform_indices = @transform_10, window_bounds = array<i64: 1, 32>}, {pipeline_mode = #tpu.pipeline_mode<synchronous>, transform_indices = @transform_11, window_bounds = array<i64: 32, 64>}, {pipeline_mode = #tpu.pipeline_mode<synchronous>, transform_indices = @transform_12, window_bounds = array<i64: 1, 64>}, {pipeline_mode = #tpu.pipeline_mode<synchronous>, transform_indices = @transform_13, window_bounds = array<i64: 64, 32>}, {pipeline_mode = #tpu.pipeline_mode<synchronous>, transform_indices = @transform_14, window_bounds = array<i64: 1, 32>}, {pipeline_mode = #tpu.pipeline_mode<synchronous>, transform_indices = @transform_15, window_bounds = array<i64: 1, 32>}, {pipeline_mode = #tpu.pipeline_mode<synchronous>, transform_indices = @transform_16, window_bounds = array<i64: 1, 32>}, {pipeline_mode = #tpu.pipeline_mode<synchronous>, transform_indices = @transform_17, window_bounds = array<i64: 1, 32>}, {pipeline_mode = #tpu.pipeline_mode<synchronous>, transform_indices = @transform_18, window_bounds = array<i64: 1, 32>}, {transform_indices = @transform_19, window_bounds = array<i64: 1, 16, 32>}]} {
    %c0 = arith.constant 0 : index
    %c0_0 = arith.constant 0 : index
    %c0_1 = arith.constant 0 : index
    %0 = vector.load %arg1[%c0, %c0_0, %c0_1] : memref<1x16x32xf32, #tpu.memory_space<vmem>>, vector<1x16x32xf32>
    %1 = vector.shape_cast %0 : vector<1x16x32xf32> to vector<16x32xf32>
    %2 = arith.truncf %1 : vector<16x32xf32> to vector<16x32xbf16>
    %c0_2 = arith.constant 0 : index
    %c0_3 = arith.constant 0 : index
    %3 = vector.load %arg2[%c0_2, %c0_3] : memref<32x32xbf16, #tpu.memory_space<vmem>>, vector<32x32xbf16>
    %cst = arith.constant dense<0.000000e+00> : vector<16x32xf32>
    %4 = tpu.matmul %2, %3, %cst {dimension_numbers = #tpu.dot_dimension_numbers<[1], [0], [0], [1], [0, 0, 1, 1], [], []>} : vector<16x32xbf16>, vector<32x32xbf16>, vector<16x32xf32> -> vector<16x32xf32>
    %c0_4 = arith.constant 0 : index
    %c0_5 = arith.constant 0 : index
    %5 = vector.load %arg3[%c0_4, %c0_5] : memref<1x32xf32, #tpu.memory_space<vmem>>, vector<1x32xf32>
    %6 = vector.broadcast %5 : vector<1x32xf32> to vector<16x32xf32>
    %7 = arith.addf %4, %6 : vector<16x32xf32>
    %c0_6 = arith.constant 0 : index
    %c0_7 = arith.constant 0 : index
    %8 = vector.load %arg4[%c0_6, %c0_7] : memref<32x32xbf16, #tpu.memory_space<vmem>>, vector<32x32xbf16>
    %cst_8 = arith.constant dense<0.000000e+00> : vector<16x32xf32>
    %9 = tpu.matmul %2, %8, %cst_8 {dimension_numbers = #tpu.dot_dimension_numbers<[1], [0], [0], [1], [0, 0, 1, 1], [], []>} : vector<16x32xbf16>, vector<32x32xbf16>, vector<16x32xf32> -> vector<16x32xf32>
    %c0_9 = arith.constant 0 : index
    %c0_10 = arith.constant 0 : index
    %10 = vector.load %arg5[%c0_9, %c0_10] : memref<1x32xf32, #tpu.memory_space<vmem>>, vector<1x32xf32>
    %11 = vector.broadcast %10 : vector<1x32xf32> to vector<16x32xf32>
    %12 = arith.addf %9, %11 : vector<16x32xf32>
    %c0_11 = arith.constant 0 : index
    %c0_12 = arith.constant 0 : index
    %13 = vector.load %arg6[%c0_11, %c0_12] : memref<32x32xbf16, #tpu.memory_space<vmem>>, vector<32x32xbf16>
    %cst_13 = arith.constant dense<0.000000e+00> : vector<16x32xf32>
    %14 = tpu.matmul %2, %13, %cst_13 {dimension_numbers = #tpu.dot_dimension_numbers<[1], [0], [0], [1], [0, 0, 1, 1], [], []>} : vector<16x32xbf16>, vector<32x32xbf16>, vector<16x32xf32> -> vector<16x32xf32>
    %c0_14 = arith.constant 0 : index
    %c0_15 = arith.constant 0 : index
    %15 = vector.load %arg7[%c0_14, %c0_15] : memref<1x32xf32, #tpu.memory_space<vmem>>, vector<1x32xf32>
    %16 = vector.broadcast %15 : vector<1x32xf32> to vector<16x32xf32>
    %17 = arith.addf %14, %16 : vector<16x32xf32>
    %cst_16 = arith.constant 0.000000e+00 : f32
    %18 = vector.broadcast %cst_16 : f32 to vector<16x32xf32>
    %19 = vector.extract_strided_slice %7 {offsets = [0, 0], sizes = [16, 8], strides = [1, 1]} : vector<16x32xf32> to vector<16x8xf32>
    %20 = vector.extract_strided_slice %12 {offsets = [0, 0], sizes = [16, 8], strides = [1, 1]} : vector<16x32xf32> to vector<16x8xf32>
    %cst_17 = arith.constant dense<0.000000e+00> : vector<16x16xf32>
    %21 = tpu.matmul %19, %20, %cst_17 {dimension_numbers = #tpu.dot_dimension_numbers<[1], [1], [0], [0], [0, 0, 1, 0], [], []>} : vector<16x8xf32>, vector<16x8xf32>, vector<16x16xf32> -> vector<16x16xf32>
    %cst_18 = arith.constant dense<0xFF800000> : vector<16xf32>
    %22 = vector.multi_reduction <maximumf>, %21, %cst_18 [1] : vector<16x16xf32> to vector<16xf32>
    %23 = vector.shape_cast %22 : vector<16xf32> to vector<16x1xf32>
    %24 = vector.broadcast %23 : vector<16x1xf32> to vector<16x16xf32>
    %25 = arith.subf %21, %24 : vector<16x16xf32>
    %26 = math.exp %25 : vector<16x16xf32>
    %cst_19 = arith.constant dense<0.000000e+00> : vector<16xf32>
    %27 = vector.multi_reduction <add>, %26, %cst_19 [1] : vector<16x16xf32> to vector<16xf32>
    %28 = vector.shape_cast %27 : vector<16xf32> to vector<16x1xf32>
    %29 = vector.broadcast %28 : vector<16x1xf32> to vector<16x16xf32>
    %30 = arith.divf %26, %29 : vector<16x16xf32>
    %31 = vector.extract_strided_slice %17 {offsets = [0, 0], sizes = [16, 8], strides = [1, 1]} : vector<16x32xf32> to vector<16x8xf32>
    %cst_20 = arith.constant dense<0.000000e+00> : vector<16x8xf32>
    %32 = tpu.matmul %30, %31, %cst_20 {dimension_numbers = #tpu.dot_dimension_numbers<[1], [0], [0], [1], [0, 0, 1, 1], [], []>} : vector<16x16xf32>, vector<16x8xf32>, vector<16x8xf32> -> vector<16x8xf32>
    %33 = arith.truncf %32 : vector<16x8xf32> to vector<16x8xbf16>
    %c0_21 = arith.constant 0 : index
    %c0_22 = arith.constant 0 : index
    %c0_23 = arith.constant 0 : index
    %34 = vector.load %arg8[%c0_21, %c0_22, %c0_23] : memref<4x8x32xbf16, #tpu.memory_space<vmem>>, vector<1x8x32xbf16>
    %35 = vector.shape_cast %34 : vector<1x8x32xbf16> to vector<8x32xbf16>
    %cst_24 = arith.constant dense<0.000000e+00> : vector<16x32xf32>
    %36 = tpu.matmul %33, %35, %cst_24 {dimension_numbers = #tpu.dot_dimension_numbers<[1], [0], [0], [1], [0, 0, 1, 1], [], []>} : vector<16x8xbf16>, vector<8x32xbf16>, vector<16x32xf32> -> vector<16x32xf32>
    %37 = arith.addf %18, %36 : vector<16x32xf32>
    %38 = vector.extract_strided_slice %7 {offsets = [0, 8], sizes = [16, 8], strides = [1, 1]} : vector<16x32xf32> to vector<16x8xf32>
    %39 = vector.extract_strided_slice %12 {offsets = [0, 8], sizes = [16, 8], strides = [1, 1]} : vector<16x32xf32> to vector<16x8xf32>
    %cst_25 = arith.constant dense<0.000000e+00> : vector<16x16xf32>
    %40 = tpu.matmul %38, %39, %cst_25 {dimension_numbers = #tpu.dot_dimension_numbers<[1], [1], [0], [0], [0, 0, 1, 0], [], []>} : vector<16x8xf32>, vector<16x8xf32>, vector<16x16xf32> -> vector<16x16xf32>
    %cst_26 = arith.constant dense<0xFF800000> : vector<16xf32>
    %41 = vector.multi_reduction <maximumf>, %40, %cst_26 [1] : vector<16x16xf32> to vector<16xf32>
    %42 = vector.shape_cast %41 : vector<16xf32> to vector<16x1xf32>
    %43 = vector.broadcast %42 : vector<16x1xf32> to vector<16x16xf32>
    %44 = arith.subf %40, %43 : vector<16x16xf32>
    %45 = math.exp %44 : vector<16x16xf32>
    %cst_27 = arith.constant dense<0.000000e+00> : vector<16xf32>
    %46 = vector.multi_reduction <add>, %45, %cst_27 [1] : vector<16x16xf32> to vector<16xf32>
    %47 = vector.shape_cast %46 : vector<16xf32> to vector<16x1xf32>
    %48 = vector.broadcast %47 : vector<16x1xf32> to vector<16x16xf32>
    %49 = arith.divf %45, %48 : vector<16x16xf32>
    %50 = vector.extract_strided_slice %17 {offsets = [0, 8], sizes = [16, 8], strides = [1, 1]} : vector<16x32xf32> to vector<16x8xf32>
    %cst_28 = arith.constant dense<0.000000e+00> : vector<16x8xf32>
    %51 = tpu.matmul %49, %50, %cst_28 {dimension_numbers = #tpu.dot_dimension_numbers<[1], [0], [0], [1], [0, 0, 1, 1], [], []>} : vector<16x16xf32>, vector<16x8xf32>, vector<16x8xf32> -> vector<16x8xf32>
    %52 = arith.truncf %51 : vector<16x8xf32> to vector<16x8xbf16>
    %c1 = arith.constant 1 : index
    %c0_29 = arith.constant 0 : index
    %c0_30 = arith.constant 0 : index
    %53 = vector.load %arg8[%c1, %c0_29, %c0_30] : memref<4x8x32xbf16, #tpu.memory_space<vmem>>, vector<1x8x32xbf16>
    %54 = vector.shape_cast %53 : vector<1x8x32xbf16> to vector<8x32xbf16>
    %cst_31 = arith.constant dense<0.000000e+00> : vector<16x32xf32>
    %55 = tpu.matmul %52, %54, %cst_31 {dimension_numbers = #tpu.dot_dimension_numbers<[1], [0], [0], [1], [0, 0, 1, 1], [], []>} : vector<16x8xbf16>, vector<8x32xbf16>, vector<16x32xf32> -> vector<16x32xf32>
    %56 = arith.addf %37, %55 : vector<16x32xf32>
    %57 = vector.extract_strided_slice %7 {offsets = [0, 16], sizes = [16, 8], strides = [1, 1]} : vector<16x32xf32> to vector<16x8xf32>
    %58 = vector.extract_strided_slice %12 {offsets = [0, 16], sizes = [16, 8], strides = [1, 1]} : vector<16x32xf32> to vector<16x8xf32>
    %cst_32 = arith.constant dense<0.000000e+00> : vector<16x16xf32>
    %59 = tpu.matmul %57, %58, %cst_32 {dimension_numbers = #tpu.dot_dimension_numbers<[1], [1], [0], [0], [0, 0, 1, 0], [], []>} : vector<16x8xf32>, vector<16x8xf32>, vector<16x16xf32> -> vector<16x16xf32>
    %cst_33 = arith.constant dense<0xFF800000> : vector<16xf32>
    %60 = vector.multi_reduction <maximumf>, %59, %cst_33 [1] : vector<16x16xf32> to vector<16xf32>
    %61 = vector.shape_cast %60 : vector<16xf32> to vector<16x1xf32>
    %62 = vector.broadcast %61 : vector<16x1xf32> to vector<16x16xf32>
    %63 = arith.subf %59, %62 : vector<16x16xf32>
    %64 = math.exp %63 : vector<16x16xf32>
    %cst_34 = arith.constant dense<0.000000e+00> : vector<16xf32>
    %65 = vector.multi_reduction <add>, %64, %cst_34 [1] : vector<16x16xf32> to vector<16xf32>
    %66 = vector.shape_cast %65 : vector<16xf32> to vector<16x1xf32>
    %67 = vector.broadcast %66 : vector<16x1xf32> to vector<16x16xf32>
    %68 = arith.divf %64, %67 : vector<16x16xf32>
    %69 = vector.extract_strided_slice %17 {offsets = [0, 16], sizes = [16, 8], strides = [1, 1]} : vector<16x32xf32> to vector<16x8xf32>
    %cst_35 = arith.constant dense<0.000000e+00> : vector<16x8xf32>
    %70 = tpu.matmul %68, %69, %cst_35 {dimension_numbers = #tpu.dot_dimension_numbers<[1], [0], [0], [1], [0, 0, 1, 1], [], []>} : vector<16x16xf32>, vector<16x8xf32>, vector<16x8xf32> -> vector<16x8xf32>
    %71 = arith.truncf %70 : vector<16x8xf32> to vector<16x8xbf16>
    %c2 = arith.constant 2 : index
    %c0_36 = arith.constant 0 : index
    %c0_37 = arith.constant 0 : index
    %72 = vector.load %arg8[%c2, %c0_36, %c0_37] : memref<4x8x32xbf16, #tpu.memory_space<vmem>>, vector<1x8x32xbf16>
    %73 = vector.shape_cast %72 : vector<1x8x32xbf16> to vector<8x32xbf16>
    %cst_38 = arith.constant dense<0.000000e+00> : vector<16x32xf32>
    %74 = tpu.matmul %71, %73, %cst_38 {dimension_numbers = #tpu.dot_dimension_numbers<[1], [0], [0], [1], [0, 0, 1, 1], [], []>} : vector<16x8xbf16>, vector<8x32xbf16>, vector<16x32xf32> -> vector<16x32xf32>
    %75 = arith.addf %56, %74 : vector<16x32xf32>
    %76 = vector.extract_strided_slice %7 {offsets = [0, 24], sizes = [16, 8], strides = [1, 1]} : vector<16x32xf32> to vector<16x8xf32>
    %77 = vector.extract_strided_slice %12 {offsets = [0, 24], sizes = [16, 8], strides = [1, 1]} : vector<16x32xf32> to vector<16x8xf32>
    %cst_39 = arith.constant dense<0.000000e+00> : vector<16x16xf32>
    %78 = tpu.matmul %76, %77, %cst_39 {dimension_numbers = #tpu.dot_dimension_numbers<[1], [1], [0], [0], [0, 0, 1, 0], [], []>} : vector<16x8xf32>, vector<16x8xf32>, vector<16x16xf32> -> vector<16x16xf32>
    %cst_40 = arith.constant dense<0xFF800000> : vector<16xf32>
    %79 = vector.multi_reduction <maximumf>, %78, %cst_40 [1] : vector<16x16xf32> to vector<16xf32>
    %80 = vector.shape_cast %79 : vector<16xf32> to vector<16x1xf32>
    %81 = vector.broadcast %80 : vector<16x1xf32> to vector<16x16xf32>
    %82 = arith.subf %78, %81 : vector<16x16xf32>
    %83 = math.exp %82 : vector<16x16xf32>
    %cst_41 = arith.constant dense<0.000000e+00> : vector<16xf32>
    %84 = vector.multi_reduction <add>, %83, %cst_41 [1] : vector<16x16xf32> to vector<16xf32>
    %85 = vector.shape_cast %84 : vector<16xf32> to vector<16x1xf32>
    %86 = vector.broadcast %85 : vector<16x1xf32> to vector<16x16xf32>
    %87 = arith.divf %83, %86 : vector<16x16xf32>
    %88 = vector.extract_strided_slice %17 {offsets = [0, 24], sizes = [16, 8], strides = [1, 1]} : vector<16x32xf32> to vector<16x8xf32>
    %cst_42 = arith.constant dense<0.000000e+00> : vector<16x8xf32>
    %89 = tpu.matmul %87, %88, %cst_42 {dimension_numbers = #tpu.dot_dimension_numbers<[1], [0], [0], [1], [0, 0, 1, 1], [], []>} : vector<16x16xf32>, vector<16x8xf32>, vector<16x8xf32> -> vector<16x8xf32>
    %90 = arith.truncf %89 : vector<16x8xf32> to vector<16x8xbf16>
    %c3 = arith.constant 3 : index
    %c0_43 = arith.constant 0 : index
    %c0_44 = arith.constant 0 : index
    %91 = vector.load %arg8[%c3, %c0_43, %c0_44] : memref<4x8x32xbf16, #tpu.memory_space<vmem>>, vector<1x8x32xbf16>
    %92 = vector.shape_cast %91 : vector<1x8x32xbf16> to vector<8x32xbf16>
    %cst_45 = arith.constant dense<0.000000e+00> : vector<16x32xf32>
    %93 = tpu.matmul %90, %92, %cst_45 {dimension_numbers = #tpu.dot_dimension_numbers<[1], [0], [0], [1], [0, 0, 1, 1], [], []>} : vector<16x8xbf16>, vector<8x32xbf16>, vector<16x32xf32> -> vector<16x32xf32>
    %94 = arith.addf %75, %93 : vector<16x32xf32>
    %95 = arith.addf %1, %94 : vector<16x32xf32>
    %c0_46 = arith.constant 0 : index
    %c0_47 = arith.constant 0 : index
    %96 = vector.load %arg9[%c0_46, %c0_47] : memref<1x32xf32, #tpu.memory_space<vmem>>, vector<1x32xf32>
    %97 = vector.broadcast %96 : vector<1x32xf32> to vector<16x32xf32>
    %98 = arith.addf %95, %97 : vector<16x32xf32>
    %c0_48 = arith.constant 0 : index
    %c0_49 = arith.constant 0 : index
    %99 = vector.load %arg10[%c0_48, %c0_49] : memref<1x32xf32, #tpu.memory_space<vmem>>, vector<1x32xf32>
    %c0_50 = arith.constant 0 : index
    %c0_51 = arith.constant 0 : index
    %100 = vector.load %arg11[%c0_50, %c0_51] : memref<1x32xf32, #tpu.memory_space<vmem>>, vector<1x32xf32>
    %cst_52 = arith.constant dense<0.000000e+00> : vector<16xf32>
    %101 = vector.multi_reduction <add>, %98, %cst_52 [1] : vector<16x32xf32> to vector<16xf32>
    %102 = vector.shape_cast %101 : vector<16xf32> to vector<16x1xf32>
    %cst_53 = arith.constant 3.200000e+01 : f32
    %103 = vector.broadcast %cst_53 : f32 to vector<16x1xf32>
    %104 = arith.divf %102, %103 : vector<16x1xf32>
    %105 = vector.broadcast %104 : vector<16x1xf32> to vector<16x32xf32>
    %106 = arith.subf %98, %105 : vector<16x32xf32>
    %107 = arith.mulf %106, %106 : vector<16x32xf32>
    %cst_54 = arith.constant dense<0.000000e+00> : vector<16xf32>
    %108 = vector.multi_reduction <add>, %107, %cst_54 [1] : vector<16x32xf32> to vector<16xf32>
    %109 = vector.shape_cast %108 : vector<16xf32> to vector<16x1xf32>
    %cst_55 = arith.constant 3.200000e+01 : f32
    %110 = vector.broadcast %cst_55 : f32 to vector<16x1xf32>
    %111 = arith.divf %109, %110 : vector<16x1xf32>
    %cst_56 = arith.constant 9.99999974E-6 : f32
    %112 = vector.broadcast %cst_56 : f32 to vector<16x1xf32>
    %113 = arith.addf %111, %112 : vector<16x1xf32>
    %114 = math.rsqrt %113 : vector<16x1xf32>
    %115 = vector.broadcast %114 : vector<16x1xf32> to vector<16x32xf32>
    %116 = arith.mulf %106, %115 : vector<16x32xf32>
    %117 = vector.broadcast %99 : vector<1x32xf32> to vector<16x32xf32>
    %118 = arith.mulf %116, %117 : vector<16x32xf32>
    %119 = vector.broadcast %100 : vector<1x32xf32> to vector<16x32xf32>
    %120 = arith.addf %118, %119 : vector<16x32xf32>
    %121 = arith.truncf %120 : vector<16x32xf32> to vector<16x32xbf16>
    %c0_57 = arith.constant 0 : index
    %c0_58 = arith.constant 0 : index
    %122 = vector.load %arg12[%c0_57, %c0_58] : memref<32x64xbf16, #tpu.memory_space<vmem>>, vector<32x64xbf16>
    %cst_59 = arith.constant dense<0.000000e+00> : vector<16x64xf32>
    %123 = tpu.matmul %121, %122, %cst_59 {dimension_numbers = #tpu.dot_dimension_numbers<[1], [0], [0], [1], [0, 0, 1, 1], [], []>} : vector<16x32xbf16>, vector<32x64xbf16>, vector<16x64xf32> -> vector<16x64xf32>
    %c0_60 = arith.constant 0 : index
    %c0_61 = arith.constant 0 : index
    %124 = vector.load %arg13[%c0_60, %c0_61] : memref<1x64xf32, #tpu.memory_space<vmem>>, vector<1x64xf32>
    %125 = vector.broadcast %124 : vector<1x64xf32> to vector<16x64xf32>
    %126 = arith.addf %123, %125 : vector<16x64xf32>
    %cst_62 = arith.constant 5.000000e-01 : f32
    %127 = vector.broadcast %cst_62 : f32 to vector<16x64xf32>
    %128 = arith.mulf %127, %126 : vector<16x64xf32>
    %cst_63 = arith.constant 0.707106769 : f32
    %129 = vector.broadcast %cst_63 : f32 to vector<16x64xf32>
    %130 = arith.mulf %126, %129 : vector<16x64xf32>
    %cst_64 = arith.constant 0.000000e+00 : f32
    %131 = vector.broadcast %cst_64 : f32 to vector<16x64xf32>
    %132 = arith.cmpf oge, %130, %131 : vector<16x64xf32>
    %cst_65 = arith.constant 1.000000e+00 : f32
    %cst_66 = arith.constant -1.000000e+00 : f32
    %133 = vector.broadcast %cst_65 : f32 to vector<16x64xf32>
    %134 = vector.broadcast %cst_66 : f32 to vector<16x64xf32>
    %135 = arith.select %132, %133, %134 : vector<16x64xi1>, vector<16x64xf32>
    %136 = math.absf %130 : vector<16x64xf32>
    %cst_67 = arith.constant 0.327591091 : f32
    %137 = vector.broadcast %cst_67 : f32 to vector<16x64xf32>
    %138 = arith.mulf %137, %136 : vector<16x64xf32>
    %cst_68 = arith.constant 1.000000e+00 : f32
    %139 = vector.broadcast %cst_68 : f32 to vector<16x64xf32>
    %140 = arith.addf %139, %138 : vector<16x64xf32>
    %cst_69 = arith.constant 1.000000e+00 : f32
    %141 = vector.broadcast %cst_69 : f32 to vector<16x64xf32>
    %142 = arith.divf %141, %140 : vector<16x64xf32>
    %cst_70 = arith.constant 1.06140542 : f32
    %143 = vector.broadcast %cst_70 : f32 to vector<16x64xf32>
    %144 = arith.mulf %142, %143 : vector<16x64xf32>
    %cst_71 = arith.constant -1.45315206 : f32
    %145 = vector.broadcast %cst_71 : f32 to vector<16x64xf32>
    %146 = arith.addf %145, %144 : vector<16x64xf32>
    %147 = arith.mulf %142, %146 : vector<16x64xf32>
    %cst_72 = arith.constant 1.42141378 : f32
    %148 = vector.broadcast %cst_72 : f32 to vector<16x64xf32>
    %149 = arith.addf %148, %147 : vector<16x64xf32>
    %150 = arith.mulf %142, %149 : vector<16x64xf32>
    %cst_73 = arith.constant -0.284496725 : f32
    %151 = vector.broadcast %cst_73 : f32 to vector<16x64xf32>
    %152 = arith.addf %151, %150 : vector<16x64xf32>
    %153 = arith.mulf %142, %152 : vector<16x64xf32>
    %cst_74 = arith.constant 0.254829586 : f32
    %154 = vector.broadcast %cst_74 : f32 to vector<16x64xf32>
    %155 = arith.addf %154, %153 : vector<16x64xf32>
    %156 = arith.mulf %142, %155 : vector<16x64xf32>
    %cst_75 = arith.constant 0.000000e+00 : f32
    %157 = vector.broadcast %cst_75 : f32 to vector<16x64xf32>
    %158 = arith.subf %157, %136 : vector<16x64xf32>
    %159 = arith.mulf %158, %136 : vector<16x64xf32>
    %160 = math.exp %159 : vector<16x64xf32>
    %161 = arith.mulf %156, %160 : vector<16x64xf32>
    %cst_76 = arith.constant 1.000000e+00 : f32
    %162 = vector.broadcast %cst_76 : f32 to vector<16x64xf32>
    %163 = arith.subf %162, %161 : vector<16x64xf32>
    %164 = arith.mulf %135, %163 : vector<16x64xf32>
    %cst_77 = arith.constant 1.000000e+00 : f32
    %165 = vector.broadcast %cst_77 : f32 to vector<16x64xf32>
    %166 = arith.addf %165, %164 : vector<16x64xf32>
    %167 = arith.mulf %128, %166 : vector<16x64xf32>
    %168 = arith.truncf %167 : vector<16x64xf32> to vector<16x64xbf16>
    %c0_78 = arith.constant 0 : index
    %c0_79 = arith.constant 0 : index
    %169 = vector.load %arg14[%c0_78, %c0_79] : memref<64x32xbf16, #tpu.memory_space<vmem>>, vector<64x32xbf16>
    %cst_80 = arith.constant dense<0.000000e+00> : vector<16x32xf32>
    %170 = tpu.matmul %168, %169, %cst_80 {dimension_numbers = #tpu.dot_dimension_numbers<[1], [0], [0], [1], [0, 0, 1, 1], [], []>} : vector<16x64xbf16>, vector<64x32xbf16>, vector<16x32xf32> -> vector<16x32xf32>
    %171 = arith.addf %120, %170 : vector<16x32xf32>
    %c0_81 = arith.constant 0 : index
    %c0_82 = arith.constant 0 : index
    %172 = vector.load %arg15[%c0_81, %c0_82] : memref<1x32xf32, #tpu.memory_space<vmem>>, vector<1x32xf32>
    %173 = vector.broadcast %172 : vector<1x32xf32> to vector<16x32xf32>
    %174 = arith.addf %171, %173 : vector<16x32xf32>
    %c0_83 = arith.constant 0 : index
    %c0_84 = arith.constant 0 : index
    %175 = vector.load %arg16[%c0_83, %c0_84] : memref<1x32xf32, #tpu.memory_space<vmem>>, vector<1x32xf32>
    %c0_85 = arith.constant 0 : index
    %c0_86 = arith.constant 0 : index
    %176 = vector.load %arg17[%c0_85, %c0_86] : memref<1x32xf32, #tpu.memory_space<vmem>>, vector<1x32xf32>
    %cst_87 = arith.constant dense<0.000000e+00> : vector<16xf32>
    %177 = vector.multi_reduction <add>, %174, %cst_87 [1] : vector<16x32xf32> to vector<16xf32>
    %178 = vector.shape_cast %177 : vector<16xf32> to vector<16x1xf32>
    %cst_88 = arith.constant 3.200000e+01 : f32
    %179 = vector.broadcast %cst_88 : f32 to vector<16x1xf32>
    %180 = arith.divf %178, %179 : vector<16x1xf32>
    %181 = vector.broadcast %180 : vector<16x1xf32> to vector<16x32xf32>
    %182 = arith.subf %174, %181 : vector<16x32xf32>
    %183 = arith.mulf %182, %182 : vector<16x32xf32>
    %cst_89 = arith.constant dense<0.000000e+00> : vector<16xf32>
    %184 = vector.multi_reduction <add>, %183, %cst_89 [1] : vector<16x32xf32> to vector<16xf32>
    %185 = vector.shape_cast %184 : vector<16xf32> to vector<16x1xf32>
    %cst_90 = arith.constant 3.200000e+01 : f32
    %186 = vector.broadcast %cst_90 : f32 to vector<16x1xf32>
    %187 = arith.divf %185, %186 : vector<16x1xf32>
    %cst_91 = arith.constant 9.99999974E-6 : f32
    %188 = vector.broadcast %cst_91 : f32 to vector<16x1xf32>
    %189 = arith.addf %187, %188 : vector<16x1xf32>
    %190 = math.rsqrt %189 : vector<16x1xf32>
    %191 = vector.broadcast %190 : vector<16x1xf32> to vector<16x32xf32>
    %192 = arith.mulf %182, %191 : vector<16x32xf32>
    %193 = vector.broadcast %175 : vector<1x32xf32> to vector<16x32xf32>
    %194 = arith.mulf %192, %193 : vector<16x32xf32>
    %195 = vector.broadcast %176 : vector<1x32xf32> to vector<16x32xf32>
    %196 = arith.addf %194, %195 : vector<16x32xf32>
    %c0_92 = arith.constant 0 : index
    %c0_93 = arith.constant 0 : index
    %c0_94 = arith.constant 0 : index
    %197 = vector.load %arg20[%c0_92, %c0_93, %c0_94] : memref<1x16x32xf32, #tpu.memory_space<vmem>>, vector<1x16x32xf32>
    %198 = vector.shape_cast %197 : vector<1x16x32xf32> to vector<16x32xf32>
    %199 = vector.shape_cast %196 : vector<16x32xf32> to vector<1x16x32xf32>
    tpu.vector_store %arg20[%c0_92, %c0_93, %c0_94], %199 {strides = array<i32>} : memref<1x16x32xf32, #tpu.memory_space<vmem>>, vector<1x16x32xf32>,
    return
  }
  func.func @transform_0(%arg0: i32) -> (i32, i32, i32) {
    %c0_i32 = arith.constant 0 : i32
    %c0_i32_0 = arith.constant 0 : i32
    %c0_i32_1 = arith.constant 0 : i32
    return %arg0, %c0_i32, %c0_i32_0 : i32, i32, i32
  }
  func.func @transform_1(%arg0: i32) -> (i32, i32) {
    %c0_i32 = arith.constant 0 : i32
    %c0_i32_0 = arith.constant 0 : i32
    %c0_i32_1 = arith.constant 0 : i32
    return %c0_i32, %c0_i32_0 : i32, i32
  }
  func.func @transform_2(%arg0: i32) -> (i32, i32) {
    %c0_i32 = arith.constant 0 : i32
    %c0_i32_0 = arith.constant 0 : i32
    %c0_i32_1 = arith.constant 0 : i32
    return %c0_i32, %c0_i32_0 : i32, i32
  }
  func.func @transform_3(%arg0: i32) -> (i32, i32) {
    %c0_i32 = arith.constant 0 : i32
    %c0_i32_0 = arith.constant 0 : i32
    %c0_i32_1 = arith.constant 0 : i32
    return %c0_i32, %c0_i32_0 : i32, i32
  }
  func.func @transform_4(%arg0: i32) -> (i32, i32) {
    %c0_i32 = arith.constant 0 : i32
    %c0_i32_0 = arith.constant 0 : i32
    %c0_i32_1 = arith.constant 0 : i32
    return %c0_i32, %c0_i32_0 : i32, i32
  }
  func.func @transform_5(%arg0: i32) -> (i32, i32) {
    %c0_i32 = arith.constant 0 : i32
    %c0_i32_0 = arith.constant 0 : i32
    %c0_i32_1 = arith.constant 0 : i32
    return %c0_i32, %c0_i32_0 : i32, i32
  }
  func.func @transform_6(%arg0: i32) -> (i32, i32) {
    %c0_i32 = arith.constant 0 : i32
    %c0_i32_0 = arith.constant 0 : i32
    %c0_i32_1 = arith.constant 0 : i32
    return %c0_i32, %c0_i32_0 : i32, i32
  }
  func.func @transform_7(%arg0: i32) -> (i32, i32, i32) {
    %c0_i32 = arith.constant 0 : i32
    %c0_i32_0 = arith.constant 0 : i32
    %c0_i32_1 = arith.constant 0 : i32
    %c0_i32_2 = arith.constant 0 : i32
    return %c0_i32, %c0_i32_0, %c0_i32_1 : i32, i32, i32
  }
  func.func @transform_8(%arg0: i32) -> (i32, i32) {
    %c0_i32 = arith.constant 0 : i32
    %c0_i32_0 = arith.constant 0 : i32
    %c0_i32_1 = arith.constant 0 : i32
    return %c0_i32, %c0_i32_0 : i32, i32
  }
  func.func @transform_9(%arg0: i32) -> (i32, i32) {
    %c0_i32 = arith.constant 0 : i32
    %c0_i32_0 = arith.constant 0 : i32
    %c0_i32_1 = arith.constant 0 : i32
    return %c0_i32, %c0_i32_0 : i32, i32
  }
  func.func @transform_10(%arg0: i32) -> (i32, i32) {
    %c0_i32 = arith.constant 0 : i32
    %c0_i32_0 = arith.constant 0 : i32
    %c0_i32_1 = arith.constant 0 : i32
    return %c0_i32, %c0_i32_0 : i32, i32
  }
  func.func @transform_11(%arg0: i32) -> (i32, i32) {
    %c0_i32 = arith.constant 0 : i32
    %c0_i32_0 = arith.constant 0 : i32
    %c0_i32_1 = arith.constant 0 : i32
    return %c0_i32, %c0_i32_0 : i32, i32
  }
  func.func @transform_12(%arg0: i32) -> (i32, i32) {
    %c0_i32 = arith.constant 0 : i32
    %c0_i32_0 = arith.constant 0 : i32
    %c0_i32_1 = arith.constant 0 : i32
    return %c0_i32, %c0_i32_0 : i32, i32
  }
  func.func @transform_13(%arg0: i32) -> (i32, i32) {
    %c0_i32 = arith.constant 0 : i32
    %c0_i32_0 = arith.constant 0 : i32
    %c0_i32_1 = arith.constant 0 : i32
    return %c0_i32, %c0_i32_0 : i32, i32
  }
  func.func @transform_14(%arg0: i32) -> (i32, i32) {
    %c0_i32 = arith.constant 0 : i32
    %c0_i32_0 = arith.constant 0 : i32
    %c0_i32_1 = arith.constant 0 : i32
    return %c0_i32, %c0_i32_0 : i32, i32
  }
  func.func @transform_15(%arg0: i32) -> (i32, i32) {
    %c0_i32 = arith.constant 0 : i32
    %c0_i32_0 = arith.constant 0 : i32
    %c0_i32_1 = arith.constant 0 : i32
    return %c0_i32, %c0_i32_0 : i32, i32
  }
  func.func @transform_16(%arg0: i32) -> (i32, i32) {
    %c0_i32 = arith.constant 0 : i32
    %c0_i32_0 = arith.constant 0 : i32
    %c0_i32_1 = arith.constant 0 : i32
    return %c0_i32, %c0_i32_0 : i32, i32
  }
  func.func @transform_17(%arg0: i32) -> (i32, i32) {
    %c0_i32 = arith.constant 0 : i32
    %c0_i32_0 = arith.constant 0 : i32
    %c0_i32_1 = arith.constant 0 : i32
    return %c0_i32, %c0_i32_0 : i32, i32
  }
  func.func @transform_18(%arg0: i32) -> (i32, i32) {
    %c0_i32 = arith.constant 0 : i32
    %c0_i32_0 = arith.constant 0 : i32
    %c0_i32_1 = arith.constant 0 : i32
    return %c0_i32, %c0_i32_0 : i32, i32
  }
  func.func @transform_19(%arg0: i32) -> (i32, i32, i32) {
    %c0_i32 = arith.constant 0 : i32
    %c0_i32_0 = arith.constant 0 : i32
    %c0_i32_1 = arith.constant 0 : i32
    return %arg0, %c0_i32, %c0_i32_0 : i32, i32, i32
  }
}

module attributes {stable_mosaic.version = 11 : i64} {
  func.func @_encoder_layer_kernel(%arg0: i32, %arg1: memref<1x8x32xf32, #tpu.memory_space<vmem>>, %arg2: memref<32x32xbf16, #tpu.memory_space<vmem>>, %arg3: memref<1x32xf32, #tpu.memory_space<vmem>>, %arg4: memref<32x32xbf16, #tpu.memory_space<vmem>>, %arg5: memref<1x32xf32, #tpu.memory_space<vmem>>, %arg6: memref<32x32xbf16, #tpu.memory_space<vmem>>, %arg7: memref<1x32xf32, #tpu.memory_space<vmem>>, %arg8: memref<4x8x32xbf16, #tpu.memory_space<vmem>>, %arg9: memref<1x32xf32, #tpu.memory_space<vmem>>, %arg10: memref<1x32xf32, #tpu.memory_space<vmem>>, %arg11: memref<1x32xf32, #tpu.memory_space<vmem>>, %arg12: memref<32x64xbf16, #tpu.memory_space<vmem>>, %arg13: memref<1x64xf32, #tpu.memory_space<vmem>>, %arg14: memref<64x32xbf16, #tpu.memory_space<vmem>>, %arg15: memref<1x32xf32, #tpu.memory_space<vmem>>, %arg16: memref<1x32xf32, #tpu.memory_space<vmem>>, %arg17: memref<1x32xf32, #tpu.memory_space<vmem>>, %arg18: memref<1x32xf32, #tpu.memory_space<vmem>>, %arg19: memref<1x32xf32, #tpu.memory_space<vmem>>, %arg20: memref<1x8x32xf32, #tpu.memory_space<vmem>>) attributes {dimension_semantics = [#tpu.dimension_semantics<parallel>], iteration_bounds = array<i64: 2>, scalar_prefetch = 0 : i64, scratch_operands = 0 : i64, tpu.core_type = #tpu.core_type<tc>, window_params = [{transform_indices = @transform_0, window_bounds = array<i64: 1, 8, 32>}, {pipeline_mode = #tpu.pipeline_mode<synchronous>, transform_indices = @transform_1, window_bounds = array<i64: 32, 32>}, {pipeline_mode = #tpu.pipeline_mode<synchronous>, transform_indices = @transform_2, window_bounds = array<i64: 1, 32>}, {pipeline_mode = #tpu.pipeline_mode<synchronous>, transform_indices = @transform_3, window_bounds = array<i64: 32, 32>}, {pipeline_mode = #tpu.pipeline_mode<synchronous>, transform_indices = @transform_4, window_bounds = array<i64: 1, 32>}, {pipeline_mode = #tpu.pipeline_mode<synchronous>, transform_indices = @transform_5, window_bounds = array<i64: 32, 32>}, {pipeline_mode = #tpu.pipeline_mode<synchronous>, transform_indices = @transform_6, window_bounds = array<i64: 1, 32>}, {pipeline_mode = #tpu.pipeline_mode<synchronous>, transform_indices = @transform_7, window_bounds = array<i64: 4, 8, 32>}, {pipeline_mode = #tpu.pipeline_mode<synchronous>, transform_indices = @transform_8, window_bounds = array<i64: 1, 32>}, {pipeline_mode = #tpu.pipeline_mode<synchronous>, transform_indices = @transform_9, window_bounds = array<i64: 1, 32>}, {pipeline_mode = #tpu.pipeline_mode<synchronous>, transform_indices = @transform_10, window_bounds = array<i64: 1, 32>}, {pipeline_mode = #tpu.pipeline_mode<synchronous>, transform_indices = @transform_11, window_bounds = array<i64: 32, 64>}, {pipeline_mode = #tpu.pipeline_mode<synchronous>, transform_indices = @transform_12, window_bounds = array<i64: 1, 64>}, {pipeline_mode = #tpu.pipeline_mode<synchronous>, transform_indices = @transform_13, window_bounds = array<i64: 64, 32>}, {pipeline_mode = #tpu.pipeline_mode<synchronous>, transform_indices = @transform_14, window_bounds = array<i64: 1, 32>}, {pipeline_mode = #tpu.pipeline_mode<synchronous>, transform_indices = @transform_15, window_bounds = array<i64: 1, 32>}, {pipeline_mode = #tpu.pipeline_mode<synchronous>, transform_indices = @transform_16, window_bounds = array<i64: 1, 32>}, {pipeline_mode = #tpu.pipeline_mode<synchronous>, transform_indices = @transform_17, window_bounds = array<i64: 1, 32>}, {pipeline_mode = #tpu.pipeline_mode<synchronous>, transform_indices = @transform_18, window_bounds = array<i64: 1, 32>}, {transform_indices = @transform_19, window_bounds = array<i64: 1, 8, 32>}]} {
    %c0 = arith.constant 0 : index
    %c0_0 = arith.constant 0 : index
    %c0_1 = arith.constant 0 : index
    %0 = vector.load %arg1[%c0, %c0_0, %c0_1] : memref<1x8x32xf32, #tpu.memory_space<vmem>>, vector<1x8x32xf32>
    %1 = vector.shape_cast %0 : vector<1x8x32xf32> to vector<8x32xf32>
    %2 = arith.truncf %1 : vector<8x32xf32> to vector<8x32xbf16>
    %c0_2 = arith.constant 0 : index
    %c0_3 = arith.constant 0 : index
    %3 = vector.load %arg2[%c0_2, %c0_3] : memref<32x32xbf16, #tpu.memory_space<vmem>>, vector<32x32xbf16>
    %cst = arith.constant dense<0.000000e+00> : vector<8x32xf32>
    %4 = tpu.matmul %2, %3, %cst {dimension_numbers = #tpu.dot_dimension_numbers<[1], [0], [0], [1], [0, 0, 1, 1], [], []>} : vector<8x32xbf16>, vector<32x32xbf16>, vector<8x32xf32> -> vector<8x32xf32>
    %c0_4 = arith.constant 0 : index
    %c0_5 = arith.constant 0 : index
    %5 = vector.load %arg3[%c0_4, %c0_5] : memref<1x32xf32, #tpu.memory_space<vmem>>, vector<1x32xf32>
    %6 = vector.broadcast %5 : vector<1x32xf32> to vector<8x32xf32>
    %7 = arith.addf %4, %6 : vector<8x32xf32>
    %c0_6 = arith.constant 0 : index
    %c0_7 = arith.constant 0 : index
    %8 = vector.load %arg4[%c0_6, %c0_7] : memref<32x32xbf16, #tpu.memory_space<vmem>>, vector<32x32xbf16>
    %cst_8 = arith.constant dense<0.000000e+00> : vector<8x32xf32>
    %9 = tpu.matmul %2, %8, %cst_8 {dimension_numbers = #tpu.dot_dimension_numbers<[1], [0], [0], [1], [0, 0, 1, 1], [], []>} : vector<8x32xbf16>, vector<32x32xbf16>, vector<8x32xf32> -> vector<8x32xf32>
    %c0_9 = arith.constant 0 : index
    %c0_10 = arith.constant 0 : index
    %10 = vector.load %arg5[%c0_9, %c0_10] : memref<1x32xf32, #tpu.memory_space<vmem>>, vector<1x32xf32>
    %11 = vector.broadcast %10 : vector<1x32xf32> to vector<8x32xf32>
    %12 = arith.addf %9, %11 : vector<8x32xf32>
    %c0_11 = arith.constant 0 : index
    %c0_12 = arith.constant 0 : index
    %13 = vector.load %arg6[%c0_11, %c0_12] : memref<32x32xbf16, #tpu.memory_space<vmem>>, vector<32x32xbf16>
    %cst_13 = arith.constant dense<0.000000e+00> : vector<8x32xf32>
    %14 = tpu.matmul %2, %13, %cst_13 {dimension_numbers = #tpu.dot_dimension_numbers<[1], [0], [0], [1], [0, 0, 1, 1], [], []>} : vector<8x32xbf16>, vector<32x32xbf16>, vector<8x32xf32> -> vector<8x32xf32>
    %c0_14 = arith.constant 0 : index
    %c0_15 = arith.constant 0 : index
    %15 = vector.load %arg7[%c0_14, %c0_15] : memref<1x32xf32, #tpu.memory_space<vmem>>, vector<1x32xf32>
    %16 = vector.broadcast %15 : vector<1x32xf32> to vector<8x32xf32>
    %17 = arith.addf %14, %16 : vector<8x32xf32>
    %cst_16 = arith.constant 0.000000e+00 : f32
    %18 = vector.broadcast %cst_16 : f32 to vector<8x32xf32>
    %19 = vector.extract_strided_slice %7 {offsets = [0, 0], sizes = [8, 8], strides = [1, 1]} : vector<8x32xf32> to vector<8x8xf32>
    %20 = vector.extract_strided_slice %12 {offsets = [0, 0], sizes = [8, 8], strides = [1, 1]} : vector<8x32xf32> to vector<8x8xf32>
    %cst_17 = arith.constant dense<0.000000e+00> : vector<8x8xf32>
    %21 = tpu.matmul %19, %20, %cst_17 {dimension_numbers = #tpu.dot_dimension_numbers<[1], [1], [0], [0], [0, 0, 1, 0], [], []>} : vector<8x8xf32>, vector<8x8xf32>, vector<8x8xf32> -> vector<8x8xf32>
    %cst_18 = arith.constant dense<0xFF800000> : vector<8xf32>
    %22 = vector.multi_reduction <maximumf>, %21, %cst_18 [1] : vector<8x8xf32> to vector<8xf32>
    %23 = vector.shape_cast %22 : vector<8xf32> to vector<8x1xf32>
    %24 = vector.broadcast %23 : vector<8x1xf32> to vector<8x8xf32>
    %25 = arith.subf %21, %24 : vector<8x8xf32>
    %26 = math.exp %25 : vector<8x8xf32>
    %cst_19 = arith.constant dense<0.000000e+00> : vector<8xf32>
    %27 = vector.multi_reduction <add>, %26, %cst_19 [1] : vector<8x8xf32> to vector<8xf32>
    %28 = vector.shape_cast %27 : vector<8xf32> to vector<8x1xf32>
    %29 = vector.broadcast %28 : vector<8x1xf32> to vector<8x8xf32>
    %30 = arith.divf %26, %29 : vector<8x8xf32>
    %31 = vector.extract_strided_slice %17 {offsets = [0, 0], sizes = [8, 8], strides = [1, 1]} : vector<8x32xf32> to vector<8x8xf32>
    %cst_20 = arith.constant dense<0.000000e+00> : vector<8x8xf32>
    %32 = tpu.matmul %30, %31, %cst_20 {dimension_numbers = #tpu.dot_dimension_numbers<[1], [0], [0], [1], [0, 0, 1, 1], [], []>} : vector<8x8xf32>, vector<8x8xf32>, vector<8x8xf32> -> vector<8x8xf32>
    %33 = arith.truncf %32 : vector<8x8xf32> to vector<8x8xbf16>
    %c0_21 = arith.constant 0 : index
    %c0_22 = arith.constant 0 : index
    %c0_23 = arith.constant 0 : index
    %34 = vector.load %arg8[%c0_21, %c0_22, %c0_23] : memref<4x8x32xbf16, #tpu.memory_space<vmem>>, vector<1x8x32xbf16>
    %35 = vector.shape_cast %34 : vector<1x8x32xbf16> to vector<8x32xbf16>
    %cst_24 = arith.constant dense<0.000000e+00> : vector<8x32xf32>
    %36 = tpu.matmul %33, %35, %cst_24 {dimension_numbers = #tpu.dot_dimension_numbers<[1], [0], [0], [1], [0, 0, 1, 1], [], []>} : vector<8x8xbf16>, vector<8x32xbf16>, vector<8x32xf32> -> vector<8x32xf32>
    %37 = arith.addf %18, %36 : vector<8x32xf32>
    %38 = vector.extract_strided_slice %7 {offsets = [0, 8], sizes = [8, 8], strides = [1, 1]} : vector<8x32xf32> to vector<8x8xf32>
    %39 = vector.extract_strided_slice %12 {offsets = [0, 8], sizes = [8, 8], strides = [1, 1]} : vector<8x32xf32> to vector<8x8xf32>
    %cst_25 = arith.constant dense<0.000000e+00> : vector<8x8xf32>
    %40 = tpu.matmul %38, %39, %cst_25 {dimension_numbers = #tpu.dot_dimension_numbers<[1], [1], [0], [0], [0, 0, 1, 0], [], []>} : vector<8x8xf32>, vector<8x8xf32>, vector<8x8xf32> -> vector<8x8xf32>
    %cst_26 = arith.constant dense<0xFF800000> : vector<8xf32>
    %41 = vector.multi_reduction <maximumf>, %40, %cst_26 [1] : vector<8x8xf32> to vector<8xf32>
    %42 = vector.shape_cast %41 : vector<8xf32> to vector<8x1xf32>
    %43 = vector.broadcast %42 : vector<8x1xf32> to vector<8x8xf32>
    %44 = arith.subf %40, %43 : vector<8x8xf32>
    %45 = math.exp %44 : vector<8x8xf32>
    %cst_27 = arith.constant dense<0.000000e+00> : vector<8xf32>
    %46 = vector.multi_reduction <add>, %45, %cst_27 [1] : vector<8x8xf32> to vector<8xf32>
    %47 = vector.shape_cast %46 : vector<8xf32> to vector<8x1xf32>
    %48 = vector.broadcast %47 : vector<8x1xf32> to vector<8x8xf32>
    %49 = arith.divf %45, %48 : vector<8x8xf32>
    %50 = vector.extract_strided_slice %17 {offsets = [0, 8], sizes = [8, 8], strides = [1, 1]} : vector<8x32xf32> to vector<8x8xf32>
    %cst_28 = arith.constant dense<0.000000e+00> : vector<8x8xf32>
    %51 = tpu.matmul %49, %50, %cst_28 {dimension_numbers = #tpu.dot_dimension_numbers<[1], [0], [0], [1], [0, 0, 1, 1], [], []>} : vector<8x8xf32>, vector<8x8xf32>, vector<8x8xf32> -> vector<8x8xf32>
    %52 = arith.truncf %51 : vector<8x8xf32> to vector<8x8xbf16>
    %c1 = arith.constant 1 : index
    %c0_29 = arith.constant 0 : index
    %c0_30 = arith.constant 0 : index
    %53 = vector.load %arg8[%c1, %c0_29, %c0_30] : memref<4x8x32xbf16, #tpu.memory_space<vmem>>, vector<1x8x32xbf16>
    %54 = vector.shape_cast %53 : vector<1x8x32xbf16> to vector<8x32xbf16>
    %cst_31 = arith.constant dense<0.000000e+00> : vector<8x32xf32>
    %55 = tpu.matmul %52, %54, %cst_31 {dimension_numbers = #tpu.dot_dimension_numbers<[1], [0], [0], [1], [0, 0, 1, 1], [], []>} : vector<8x8xbf16>, vector<8x32xbf16>, vector<8x32xf32> -> vector<8x32xf32>
    %56 = arith.addf %37, %55 : vector<8x32xf32>
    %57 = vector.extract_strided_slice %7 {offsets = [0, 16], sizes = [8, 8], strides = [1, 1]} : vector<8x32xf32> to vector<8x8xf32>
    %58 = vector.extract_strided_slice %12 {offsets = [0, 16], sizes = [8, 8], strides = [1, 1]} : vector<8x32xf32> to vector<8x8xf32>
    %cst_32 = arith.constant dense<0.000000e+00> : vector<8x8xf32>
    %59 = tpu.matmul %57, %58, %cst_32 {dimension_numbers = #tpu.dot_dimension_numbers<[1], [1], [0], [0], [0, 0, 1, 0], [], []>} : vector<8x8xf32>, vector<8x8xf32>, vector<8x8xf32> -> vector<8x8xf32>
    %cst_33 = arith.constant dense<0xFF800000> : vector<8xf32>
    %60 = vector.multi_reduction <maximumf>, %59, %cst_33 [1] : vector<8x8xf32> to vector<8xf32>
    %61 = vector.shape_cast %60 : vector<8xf32> to vector<8x1xf32>
    %62 = vector.broadcast %61 : vector<8x1xf32> to vector<8x8xf32>
    %63 = arith.subf %59, %62 : vector<8x8xf32>
    %64 = math.exp %63 : vector<8x8xf32>
    %cst_34 = arith.constant dense<0.000000e+00> : vector<8xf32>
    %65 = vector.multi_reduction <add>, %64, %cst_34 [1] : vector<8x8xf32> to vector<8xf32>
    %66 = vector.shape_cast %65 : vector<8xf32> to vector<8x1xf32>
    %67 = vector.broadcast %66 : vector<8x1xf32> to vector<8x8xf32>
    %68 = arith.divf %64, %67 : vector<8x8xf32>
    %69 = vector.extract_strided_slice %17 {offsets = [0, 16], sizes = [8, 8], strides = [1, 1]} : vector<8x32xf32> to vector<8x8xf32>
    %cst_35 = arith.constant dense<0.000000e+00> : vector<8x8xf32>
    %70 = tpu.matmul %68, %69, %cst_35 {dimension_numbers = #tpu.dot_dimension_numbers<[1], [0], [0], [1], [0, 0, 1, 1], [], []>} : vector<8x8xf32>, vector<8x8xf32>, vector<8x8xf32> -> vector<8x8xf32>
    %71 = arith.truncf %70 : vector<8x8xf32> to vector<8x8xbf16>
    %c2 = arith.constant 2 : index
    %c0_36 = arith.constant 0 : index
    %c0_37 = arith.constant 0 : index
    %72 = vector.load %arg8[%c2, %c0_36, %c0_37] : memref<4x8x32xbf16, #tpu.memory_space<vmem>>, vector<1x8x32xbf16>
    %73 = vector.shape_cast %72 : vector<1x8x32xbf16> to vector<8x32xbf16>
    %cst_38 = arith.constant dense<0.000000e+00> : vector<8x32xf32>
    %74 = tpu.matmul %71, %73, %cst_38 {dimension_numbers = #tpu.dot_dimension_numbers<[1], [0], [0], [1], [0, 0, 1, 1], [], []>} : vector<8x8xbf16>, vector<8x32xbf16>, vector<8x32xf32> -> vector<8x32xf32>
    %75 = arith.addf %56, %74 : vector<8x32xf32>
    %76 = vector.extract_strided_slice %7 {offsets = [0, 24], sizes = [8, 8], strides = [1, 1]} : vector<8x32xf32> to vector<8x8xf32>
    %77 = vector.extract_strided_slice %12 {offsets = [0, 24], sizes = [8, 8], strides = [1, 1]} : vector<8x32xf32> to vector<8x8xf32>
    %cst_39 = arith.constant dense<0.000000e+00> : vector<8x8xf32>
    %78 = tpu.matmul %76, %77, %cst_39 {dimension_numbers = #tpu.dot_dimension_numbers<[1], [1], [0], [0], [0, 0, 1, 0], [], []>} : vector<8x8xf32>, vector<8x8xf32>, vector<8x8xf32> -> vector<8x8xf32>
    %cst_40 = arith.constant dense<0xFF800000> : vector<8xf32>
    %79 = vector.multi_reduction <maximumf>, %78, %cst_40 [1] : vector<8x8xf32> to vector<8xf32>
    %80 = vector.shape_cast %79 : vector<8xf32> to vector<8x1xf32>
    %81 = vector.broadcast %80 : vector<8x1xf32> to vector<8x8xf32>
    %82 = arith.subf %78, %81 : vector<8x8xf32>
    %83 = math.exp %82 : vector<8x8xf32>
    %cst_41 = arith.constant dense<0.000000e+00> : vector<8xf32>
    %84 = vector.multi_reduction <add>, %83, %cst_41 [1] : vector<8x8xf32> to vector<8xf32>
    %85 = vector.shape_cast %84 : vector<8xf32> to vector<8x1xf32>
    %86 = vector.broadcast %85 : vector<8x1xf32> to vector<8x8xf32>
    %87 = arith.divf %83, %86 : vector<8x8xf32>
    %88 = vector.extract_strided_slice %17 {offsets = [0, 24], sizes = [8, 8], strides = [1, 1]} : vector<8x32xf32> to vector<8x8xf32>
    %cst_42 = arith.constant dense<0.000000e+00> : vector<8x8xf32>
    %89 = tpu.matmul %87, %88, %cst_42 {dimension_numbers = #tpu.dot_dimension_numbers<[1], [0], [0], [1], [0, 0, 1, 1], [], []>} : vector<8x8xf32>, vector<8x8xf32>, vector<8x8xf32> -> vector<8x8xf32>
    %90 = arith.truncf %89 : vector<8x8xf32> to vector<8x8xbf16>
    %c3 = arith.constant 3 : index
    %c0_43 = arith.constant 0 : index
    %c0_44 = arith.constant 0 : index
    %91 = vector.load %arg8[%c3, %c0_43, %c0_44] : memref<4x8x32xbf16, #tpu.memory_space<vmem>>, vector<1x8x32xbf16>
    %92 = vector.shape_cast %91 : vector<1x8x32xbf16> to vector<8x32xbf16>
    %cst_45 = arith.constant dense<0.000000e+00> : vector<8x32xf32>
    %93 = tpu.matmul %90, %92, %cst_45 {dimension_numbers = #tpu.dot_dimension_numbers<[1], [0], [0], [1], [0, 0, 1, 1], [], []>} : vector<8x8xbf16>, vector<8x32xbf16>, vector<8x32xf32> -> vector<8x32xf32>
    %94 = arith.addf %75, %93 : vector<8x32xf32>
    %95 = arith.addf %1, %94 : vector<8x32xf32>
    %c0_46 = arith.constant 0 : index
    %c0_47 = arith.constant 0 : index
    %96 = vector.load %arg9[%c0_46, %c0_47] : memref<1x32xf32, #tpu.memory_space<vmem>>, vector<1x32xf32>
    %97 = vector.broadcast %96 : vector<1x32xf32> to vector<8x32xf32>
    %98 = arith.addf %95, %97 : vector<8x32xf32>
    %c0_48 = arith.constant 0 : index
    %c0_49 = arith.constant 0 : index
    %99 = vector.load %arg10[%c0_48, %c0_49] : memref<1x32xf32, #tpu.memory_space<vmem>>, vector<1x32xf32>
    %c0_50 = arith.constant 0 : index
    %c0_51 = arith.constant 0 : index
    %100 = vector.load %arg11[%c0_50, %c0_51] : memref<1x32xf32, #tpu.memory_space<vmem>>, vector<1x32xf32>
    %cst_52 = arith.constant dense<0.000000e+00> : vector<8xf32>
    %101 = vector.multi_reduction <add>, %98, %cst_52 [1] : vector<8x32xf32> to vector<8xf32>
    %102 = vector.shape_cast %101 : vector<8xf32> to vector<8x1xf32>
    %cst_53 = arith.constant 3.200000e+01 : f32
    %103 = vector.broadcast %cst_53 : f32 to vector<8x1xf32>
    %104 = arith.divf %102, %103 : vector<8x1xf32>
    %105 = vector.broadcast %104 : vector<8x1xf32> to vector<8x32xf32>
    %106 = arith.subf %98, %105 : vector<8x32xf32>
    %107 = arith.mulf %106, %106 : vector<8x32xf32>
    %cst_54 = arith.constant dense<0.000000e+00> : vector<8xf32>
    %108 = vector.multi_reduction <add>, %107, %cst_54 [1] : vector<8x32xf32> to vector<8xf32>
    %109 = vector.shape_cast %108 : vector<8xf32> to vector<8x1xf32>
    %cst_55 = arith.constant 3.200000e+01 : f32
    %110 = vector.broadcast %cst_55 : f32 to vector<8x1xf32>
    %111 = arith.divf %109, %110 : vector<8x1xf32>
    %cst_56 = arith.constant 9.99999974E-6 : f32
    %112 = vector.broadcast %cst_56 : f32 to vector<8x1xf32>
    %113 = arith.addf %111, %112 : vector<8x1xf32>
    %114 = math.rsqrt %113 : vector<8x1xf32>
    %115 = vector.broadcast %114 : vector<8x1xf32> to vector<8x32xf32>
    %116 = arith.mulf %106, %115 : vector<8x32xf32>
    %117 = vector.broadcast %99 : vector<1x32xf32> to vector<8x32xf32>
    %118 = arith.mulf %116, %117 : vector<8x32xf32>
    %119 = vector.broadcast %100 : vector<1x32xf32> to vector<8x32xf32>
    %120 = arith.addf %118, %119 : vector<8x32xf32>
    %121 = arith.truncf %120 : vector<8x32xf32> to vector<8x32xbf16>
    %c0_57 = arith.constant 0 : index
    %c0_58 = arith.constant 0 : index
    %122 = vector.load %arg12[%c0_57, %c0_58] : memref<32x64xbf16, #tpu.memory_space<vmem>>, vector<32x64xbf16>
    %cst_59 = arith.constant dense<0.000000e+00> : vector<8x64xf32>
    %123 = tpu.matmul %121, %122, %cst_59 {dimension_numbers = #tpu.dot_dimension_numbers<[1], [0], [0], [1], [0, 0, 1, 1], [], []>} : vector<8x32xbf16>, vector<32x64xbf16>, vector<8x64xf32> -> vector<8x64xf32>
    %c0_60 = arith.constant 0 : index
    %c0_61 = arith.constant 0 : index
    %124 = vector.load %arg13[%c0_60, %c0_61] : memref<1x64xf32, #tpu.memory_space<vmem>>, vector<1x64xf32>
    %125 = vector.broadcast %124 : vector<1x64xf32> to vector<8x64xf32>
    %126 = arith.addf %123, %125 : vector<8x64xf32>
    %cst_62 = arith.constant 5.000000e-01 : f32
    %127 = vector.broadcast %cst_62 : f32 to vector<8x64xf32>
    %128 = arith.mulf %127, %126 : vector<8x64xf32>
    %cst_63 = arith.constant 0.707106769 : f32
    %129 = vector.broadcast %cst_63 : f32 to vector<8x64xf32>
    %130 = arith.mulf %126, %129 : vector<8x64xf32>
    %cst_64 = arith.constant 0.000000e+00 : f32
    %131 = vector.broadcast %cst_64 : f32 to vector<8x64xf32>
    %132 = arith.cmpf oge, %130, %131 : vector<8x64xf32>
    %cst_65 = arith.constant 1.000000e+00 : f32
    %cst_66 = arith.constant -1.000000e+00 : f32
    %133 = vector.broadcast %cst_65 : f32 to vector<8x64xf32>
    %134 = vector.broadcast %cst_66 : f32 to vector<8x64xf32>
    %135 = arith.select %132, %133, %134 : vector<8x64xi1>, vector<8x64xf32>
    %136 = math.absf %130 : vector<8x64xf32>
    %cst_67 = arith.constant 0.327591091 : f32
    %137 = vector.broadcast %cst_67 : f32 to vector<8x64xf32>
    %138 = arith.mulf %137, %136 : vector<8x64xf32>
    %cst_68 = arith.constant 1.000000e+00 : f32
    %139 = vector.broadcast %cst_68 : f32 to vector<8x64xf32>
    %140 = arith.addf %139, %138 : vector<8x64xf32>
    %cst_69 = arith.constant 1.000000e+00 : f32
    %141 = vector.broadcast %cst_69 : f32 to vector<8x64xf32>
    %142 = arith.divf %141, %140 : vector<8x64xf32>
    %cst_70 = arith.constant 1.06140542 : f32
    %143 = vector.broadcast %cst_70 : f32 to vector<8x64xf32>
    %144 = arith.mulf %142, %143 : vector<8x64xf32>
    %cst_71 = arith.constant -1.45315206 : f32
    %145 = vector.broadcast %cst_71 : f32 to vector<8x64xf32>
    %146 = arith.addf %145, %144 : vector<8x64xf32>
    %147 = arith.mulf %142, %146 : vector<8x64xf32>
    %cst_72 = arith.constant 1.42141378 : f32
    %148 = vector.broadcast %cst_72 : f32 to vector<8x64xf32>
    %149 = arith.addf %148, %147 : vector<8x64xf32>
    %150 = arith.mulf %142, %149 : vector<8x64xf32>
    %cst_73 = arith.constant -0.284496725 : f32
    %151 = vector.broadcast %cst_73 : f32 to vector<8x64xf32>
    %152 = arith.addf %151, %150 : vector<8x64xf32>
    %153 = arith.mulf %142, %152 : vector<8x64xf32>
    %cst_74 = arith.constant 0.254829586 : f32
    %154 = vector.broadcast %cst_74 : f32 to vector<8x64xf32>
    %155 = arith.addf %154, %153 : vector<8x64xf32>
    %156 = arith.mulf %142, %155 : vector<8x64xf32>
    %cst_75 = arith.constant 0.000000e+00 : f32
    %157 = vector.broadcast %cst_75 : f32 to vector<8x64xf32>
    %158 = arith.subf %157, %136 : vector<8x64xf32>
    %159 = arith.mulf %158, %136 : vector<8x64xf32>
    %160 = math.exp %159 : vector<8x64xf32>
    %161 = arith.mulf %156, %160 : vector<8x64xf32>
    %cst_76 = arith.constant 1.000000e+00 : f32
    %162 = vector.broadcast %cst_76 : f32 to vector<8x64xf32>
    %163 = arith.subf %162, %161 : vector<8x64xf32>
    %164 = arith.mulf %135, %163 : vector<8x64xf32>
    %cst_77 = arith.constant 1.000000e+00 : f32
    %165 = vector.broadcast %cst_77 : f32 to vector<8x64xf32>
    %166 = arith.addf %165, %164 : vector<8x64xf32>
    %167 = arith.mulf %128, %166 : vector<8x64xf32>
    %168 = arith.truncf %167 : vector<8x64xf32> to vector<8x64xbf16>
    %c0_78 = arith.constant 0 : index
    %c0_79 = arith.constant 0 : index
    %169 = vector.load %arg14[%c0_78, %c0_79] : memref<64x32xbf16, #tpu.memory_space<vmem>>, vector<64x32xbf16>
    %cst_80 = arith.constant dense<0.000000e+00> : vector<8x32xf32>
    %170 = tpu.matmul %168, %169, %cst_80 {dimension_numbers = #tpu.dot_dimension_numbers<[1], [0], [0], [1], [0, 0, 1, 1], [], []>} : vector<8x64xbf16>, vector<64x32xbf16>, vector<8x32xf32> -> vector<8x32xf32>
    %171 = arith.addf %120, %170 : vector<8x32xf32>
    %c0_81 = arith.constant 0 : index
    %c0_82 = arith.constant 0 : index
    %172 = vector.load %arg15[%c0_81, %c0_82] : memref<1x32xf32, #tpu.memory_space<vmem>>, vector<1x32xf32>
    %173 = vector.broadcast %172 : vector<1x32xf32> to vector<8x32xf32>
    %174 = arith.addf %171, %173 : vector<8x32xf32>
    %c0_83 = arith.constant 0 : index
    %c0_84 = arith.constant 0 : index
    %175 = vector.load %arg16[%c0_83, %c0_84] : memref<1x32xf32, #tpu.memory_space<vmem>>, vector<1x32xf32>
    %c0_85 = arith.constant 0 : index
    %c0_86 = arith.constant 0 : index
    %176 = vector.load %arg17[%c0_85, %c0_86] : memref<1x32xf32, #tpu.memory_space<vmem>>, vector<1x32xf32>
    %cst_87 = arith.constant dense<0.000000e+00> : vector<8xf32>
    %177 = vector.multi_reduction <add>, %174, %cst_87 [1] : vector<8x32xf32> to vector<8xf32>
    %178 = vector.shape_cast %177 : vector<8xf32> to vector<8x1xf32>
    %cst_88 = arith.constant 3.200000e+01 : f32
    %179 = vector.broadcast %cst_88 : f32 to vector<8x1xf32>
    %180 = arith.divf %178, %179 : vector<8x1xf32>
    %181 = vector.broadcast %180 : vector<8x1xf32> to vector<8x32xf32>
    %182 = arith.subf %174, %181 : vector<8x32xf32>
    %183 = arith.mulf %182, %182 : vector<8x32xf32>
    %cst_89 = arith.constant dense<0.000000e+00> : vector<8xf32>
    %184 = vector.multi_reduction <add>, %183, %cst_89 [1] : vector<8x32xf32> to vector<8xf32>
    %185 = vector.shape_cast %184 : vector<8xf32> to vector<8x1xf32>
    %cst_90 = arith.constant 3.200000e+01 : f32
    %186 = vector.broadcast %cst_90 : f32 to vector<8x1xf32>
    %187 = arith.divf %185, %186 : vector<8x1xf32>
    %cst_91 = arith.constant 9.99999974E-6 : f32
    %188 = vector.broadcast %cst_91 : f32 to vector<8x1xf32>
    %189 = arith.addf %187, %188 : vector<8x1xf32>
    %190 = math.rsqrt %189 : vector<8x1xf32>
    %191 = vector.broadcast %190 : vector<8x1xf32> to vector<8x32xf32>
    %192 = arith.mulf %182, %191 : vector<8x32xf32>
    %193 = vector.broadcast %175 : vector<1x32xf32> to vector<8x32xf32>
    %194 = arith.mulf %192, %193 : vector<8x32xf32>
    %195 = vector.broadcast %176 : vector<1x32xf32> to vector<8x32xf32>
    %196 = arith.addf %194, %195 : vector<8x32xf32>
    %c0_92 = arith.constant 0 : index
    %c0_93 = arith.constant 0 : index
    %197 = vector.load %arg18[%c0_92, %c0_93] : memref<1x32xf32, #tpu.memory_space<vmem>>, vector<1x32xf32>
    %c0_94 = arith.constant 0 : index
    %c0_95 = arith.constant 0 : index
    %198 = vector.load %arg19[%c0_94, %c0_95] : memref<1x32xf32, #tpu.memory_space<vmem>>, vector<1x32xf32>
    %cst_96 = arith.constant dense<0.000000e+00> : vector<8xf32>
    %199 = vector.multi_reduction <add>, %196, %cst_96 [1] : vector<8x32xf32> to vector<8xf32>
    %200 = vector.shape_cast %199 : vector<8xf32> to vector<8x1xf32>
    %cst_97 = arith.constant 3.200000e+01 : f32
    %201 = vector.broadcast %cst_97 : f32 to vector<8x1xf32>
    %202 = arith.divf %200, %201 : vector<8x1xf32>
    %203 = vector.broadcast %202 : vector<8x1xf32> to vector<8x32xf32>
    %204 = arith.subf %196, %203 : vector<8x32xf32>
    %205 = arith.mulf %204, %204 : vector<8x32xf32>
    %cst_98 = arith.constant dense<0.000000e+00> : vector<8xf32>
    %206 = vector.multi_reduction <add>, %205, %cst_98 [1] : vector<8x32xf32> to vector<8xf32>
    %207 = vector.shape_cast %206 : vector<8xf32> to vector<8x1xf32>
    %cst_99 = arith.constant 3.200000e+01 : f32
    %208 = vector.broadcast %cst_99 : f32 to vector<8x1xf32>
    %209 = arith.divf %207, %208 : vector<8x1xf32>
    %cst_100 = arith.constant 9.99999974E-6 : f32
    %210 = vector.broadcast %cst_100 : f32 to vector<8x1xf32>
    %211 = arith.addf %209, %210 : vector<8x1xf32>
    %212 = math.rsqrt %211 : vector<8x1xf32>
    %213 = vector.broadcast %212 : vector<8x1xf32> to vector<8x32xf32>
    %214 = arith.mulf %204, %213 : vector<8x32xf32>
    %215 = vector.broadcast %197 : vector<1x32xf32> to vector<8x32xf32>
    %216 = arith.mulf %214, %215 : vector<8x32xf32>
    %217 = vector.broadcast %198 : vector<1x32xf32> to vector<8x32xf32>
    %218 = arith.addf %216, %217 : vector<8x32xf32>
    %c0_101 = arith.constant 0 : index
    %c0_102 = arith.constant 0 : index
    %c0_103 = arith.constant 0 : index
    %219 = vector.load %arg20[%c0_101, %c0_102, %c0_103] : memref<1x8x32xf32, #tpu.memory_space<vmem>>, vector<1x8x32xf32>
    %220 = vector.shape_cast %219 : vector<1x8x32xf32> to vector<8x32xf32>
    %221 = vector.shape_cast %218 : vector<8x32xf32> to vector<1x8x32xf32>
    tpu.vector_store %arg20[%c0_101, %c0_102, %c0_103], %221 {strides = array<i32>} : memref<1x8x32xf32, #tpu.memory_space<vmem>>, vector<1x8x32xf32>,
    return
  }
  func.func @transform_0(%arg0: i32) -> (i32, i32, i32) {
    %c0_i32 = arith.constant 0 : i32
    %c0_i32_0 = arith.constant 0 : i32
    %c0_i32_1 = arith.constant 0 : i32
    return %arg0, %c0_i32, %c0_i32_0 : i32, i32, i32
  }
  func.func @transform_1(%arg0: i32) -> (i32, i32) {
    %c0_i32 = arith.constant 0 : i32
    %c0_i32_0 = arith.constant 0 : i32
    %c0_i32_1 = arith.constant 0 : i32
    return %c0_i32, %c0_i32_0 : i32, i32
  }
  func.func @transform_2(%arg0: i32) -> (i32, i32) {
    %c0_i32 = arith.constant 0 : i32
    %c0_i32_0 = arith.constant 0 : i32
    %c0_i32_1 = arith.constant 0 : i32
    return %c0_i32, %c0_i32_0 : i32, i32
  }
  func.func @transform_3(%arg0: i32) -> (i32, i32) {
    %c0_i32 = arith.constant 0 : i32
    %c0_i32_0 = arith.constant 0 : i32
    %c0_i32_1 = arith.constant 0 : i32
    return %c0_i32, %c0_i32_0 : i32, i32
  }
  func.func @transform_4(%arg0: i32) -> (i32, i32) {
    %c0_i32 = arith.constant 0 : i32
    %c0_i32_0 = arith.constant 0 : i32
    %c0_i32_1 = arith.constant 0 : i32
    return %c0_i32, %c0_i32_0 : i32, i32
  }
  func.func @transform_5(%arg0: i32) -> (i32, i32) {
    %c0_i32 = arith.constant 0 : i32
    %c0_i32_0 = arith.constant 0 : i32
    %c0_i32_1 = arith.constant 0 : i32
    return %c0_i32, %c0_i32_0 : i32, i32
  }
  func.func @transform_6(%arg0: i32) -> (i32, i32) {
    %c0_i32 = arith.constant 0 : i32
    %c0_i32_0 = arith.constant 0 : i32
    %c0_i32_1 = arith.constant 0 : i32
    return %c0_i32, %c0_i32_0 : i32, i32
  }
  func.func @transform_7(%arg0: i32) -> (i32, i32, i32) {
    %c0_i32 = arith.constant 0 : i32
    %c0_i32_0 = arith.constant 0 : i32
    %c0_i32_1 = arith.constant 0 : i32
    %c0_i32_2 = arith.constant 0 : i32
    return %c0_i32, %c0_i32_0, %c0_i32_1 : i32, i32, i32
  }
  func.func @transform_8(%arg0: i32) -> (i32, i32) {
    %c0_i32 = arith.constant 0 : i32
    %c0_i32_0 = arith.constant 0 : i32
    %c0_i32_1 = arith.constant 0 : i32
    return %c0_i32, %c0_i32_0 : i32, i32
  }
  func.func @transform_9(%arg0: i32) -> (i32, i32) {
    %c0_i32 = arith.constant 0 : i32
    %c0_i32_0 = arith.constant 0 : i32
    %c0_i32_1 = arith.constant 0 : i32
    return %c0_i32, %c0_i32_0 : i32, i32
  }
  func.func @transform_10(%arg0: i32) -> (i32, i32) {
    %c0_i32 = arith.constant 0 : i32
    %c0_i32_0 = arith.constant 0 : i32
    %c0_i32_1 = arith.constant 0 : i32
    return %c0_i32, %c0_i32_0 : i32, i32
  }
  func.func @transform_11(%arg0: i32) -> (i32, i32) {
    %c0_i32 = arith.constant 0 : i32
    %c0_i32_0 = arith.constant 0 : i32
    %c0_i32_1 = arith.constant 0 : i32
    return %c0_i32, %c0_i32_0 : i32, i32
  }
  func.func @transform_12(%arg0: i32) -> (i32, i32) {
    %c0_i32 = arith.constant 0 : i32
    %c0_i32_0 = arith.constant 0 : i32
    %c0_i32_1 = arith.constant 0 : i32
    return %c0_i32, %c0_i32_0 : i32, i32
  }
  func.func @transform_13(%arg0: i32) -> (i32, i32) {
    %c0_i32 = arith.constant 0 : i32
    %c0_i32_0 = arith.constant 0 : i32
    %c0_i32_1 = arith.constant 0 : i32
    return %c0_i32, %c0_i32_0 : i32, i32
  }
  func.func @transform_14(%arg0: i32) -> (i32, i32) {
    %c0_i32 = arith.constant 0 : i32
    %c0_i32_0 = arith.constant 0 : i32
    %c0_i32_1 = arith.constant 0 : i32
    return %c0_i32, %c0_i32_0 : i32, i32
  }
  func.func @transform_15(%arg0: i32) -> (i32, i32) {
    %c0_i32 = arith.constant 0 : i32
    %c0_i32_0 = arith.constant 0 : i32
    %c0_i32_1 = arith.constant 0 : i32
    return %c0_i32, %c0_i32_0 : i32, i32
  }
  func.func @transform_16(%arg0: i32) -> (i32, i32) {
    %c0_i32 = arith.constant 0 : i32
    %c0_i32_0 = arith.constant 0 : i32
    %c0_i32_1 = arith.constant 0 : i32
    return %c0_i32, %c0_i32_0 : i32, i32
  }
  func.func @transform_17(%arg0: i32) -> (i32, i32) {
    %c0_i32 = arith.constant 0 : i32
    %c0_i32_0 = arith.constant 0 : i32
    %c0_i32_1 = arith.constant 0 : i32
    return %c0_i32, %c0_i32_0 : i32, i32
  }
  func.func @transform_18(%arg0: i32) -> (i32, i32) {
    %c0_i32 = arith.constant 0 : i32
    %c0_i32_0 = arith.constant 0 : i32
    %c0_i32_1 = arith.constant 0 : i32
    return %c0_i32, %c0_i32_0 : i32, i32
  }
  func.func @transform_19(%arg0: i32) -> (i32, i32, i32) {
    %c0_i32 = arith.constant 0 : i32
    %c0_i32_0 = arith.constant 0 : i32
    %c0_i32_1 = arith.constant 0 : i32
    return %arg0, %c0_i32, %c0_i32_0 : i32, i32, i32
  }
}

module attributes {stable_mosaic.version = 11 : i64} {
  func.func @_decoder_layer_kernel(%arg0: i32, %arg1: memref<1x16x32xf32, #tpu.memory_space<vmem>>, %arg2: memref<1x8x32xf32, #tpu.memory_space<vmem>>, %arg3: memref<32x32xbf16, #tpu.memory_space<vmem>>, %arg4: memref<1x32xf32, #tpu.memory_space<vmem>>, %arg5: memref<32x32xbf16, #tpu.memory_space<vmem>>, %arg6: memref<1x32xf32, #tpu.memory_space<vmem>>, %arg7: memref<32x32xbf16, #tpu.memory_space<vmem>>, %arg8: memref<1x32xf32, #tpu.memory_space<vmem>>, %arg9: memref<4x8x32xbf16, #tpu.memory_space<vmem>>, %arg10: memref<1x32xf32, #tpu.memory_space<vmem>>, %arg11: memref<1x32xf32, #tpu.memory_space<vmem>>, %arg12: memref<1x32xf32, #tpu.memory_space<vmem>>, %arg13: memref<32x32xbf16, #tpu.memory_space<vmem>>, %arg14: memref<1x32xf32, #tpu.memory_space<vmem>>, %arg15: memref<32x32xbf16, #tpu.memory_space<vmem>>, %arg16: memref<1x32xf32, #tpu.memory_space<vmem>>, %arg17: memref<32x32xbf16, #tpu.memory_space<vmem>>, %arg18: memref<1x32xf32, #tpu.memory_space<vmem>>, %arg19: memref<4x8x32xbf16, #tpu.memory_space<vmem>>, %arg20: memref<1x32xf32, #tpu.memory_space<vmem>>, %arg21: memref<1x32xf32, #tpu.memory_space<vmem>>, %arg22: memref<1x32xf32, #tpu.memory_space<vmem>>, %arg23: memref<32x64xbf16, #tpu.memory_space<vmem>>, %arg24: memref<1x64xf32, #tpu.memory_space<vmem>>, %arg25: memref<64x32xbf16, #tpu.memory_space<vmem>>, %arg26: memref<1x32xf32, #tpu.memory_space<vmem>>, %arg27: memref<1x32xf32, #tpu.memory_space<vmem>>, %arg28: memref<1x32xf32, #tpu.memory_space<vmem>>, %arg29: memref<1x16x32xf32, #tpu.memory_space<vmem>>, %arg30: memref<64x8xf32, #tpu.memory_space<vmem>>) attributes {dimension_semantics = [#tpu.dimension_semantics<parallel>], iteration_bounds = array<i64: 2>, scalar_prefetch = 0 : i64, scratch_operands = 1 : i64, tpu.core_type = #tpu.core_type<tc>, window_params = [{transform_indices = @transform_0, window_bounds = array<i64: 1, 16, 32>}, {transform_indices = @transform_1, window_bounds = array<i64: 1, 8, 32>}, {pipeline_mode = #tpu.pipeline_mode<synchronous>, transform_indices = @transform_2, window_bounds = array<i64: 32, 32>}, {pipeline_mode = #tpu.pipeline_mode<synchronous>, transform_indices = @transform_3, window_bounds = array<i64: 1, 32>}, {pipeline_mode = #tpu.pipeline_mode<synchronous>, transform_indices = @transform_4, window_bounds = array<i64: 32, 32>}, {pipeline_mode = #tpu.pipeline_mode<synchronous>, transform_indices = @transform_5, window_bounds = array<i64: 1, 32>}, {pipeline_mode = #tpu.pipeline_mode<synchronous>, transform_indices = @transform_6, window_bounds = array<i64: 32, 32>}, {pipeline_mode = #tpu.pipeline_mode<synchronous>, transform_indices = @transform_7, window_bounds = array<i64: 1, 32>}, {pipeline_mode = #tpu.pipeline_mode<synchronous>, transform_indices = @transform_8, window_bounds = array<i64: 4, 8, 32>}, {pipeline_mode = #tpu.pipeline_mode<synchronous>, transform_indices = @transform_9, window_bounds = array<i64: 1, 32>}, {pipeline_mode = #tpu.pipeline_mode<synchronous>, transform_indices = @transform_10, window_bounds = array<i64: 1, 32>}, {pipeline_mode = #tpu.pipeline_mode<synchronous>, transform_indices = @transform_11, window_bounds = array<i64: 1, 32>}, {pipeline_mode = #tpu.pipeline_mode<synchronous>, transform_indices = @transform_12, window_bounds = array<i64: 32, 32>}, {pipeline_mode = #tpu.pipeline_mode<synchronous>, transform_indices = @transform_13, window_bounds = array<i64: 1, 32>}, {pipeline_mode = #tpu.pipeline_mode<synchronous>, transform_indices = @transform_14, window_bounds = array<i64: 32, 32>}, {pipeline_mode = #tpu.pipeline_mode<synchronous>, transform_indices = @transform_15, window_bounds = array<i64: 1, 32>}, {pipeline_mode = #tpu.pipeline_mode<synchronous>, transform_indices = @transform_16, window_bounds = array<i64: 32, 32>}, {pipeline_mode = #tpu.pipeline_mode<synchronous>, transform_indices = @transform_17, window_bounds = array<i64: 1, 32>}, {pipeline_mode = #tpu.pipeline_mode<synchronous>, transform_indices = @transform_18, window_bounds = array<i64: 4, 8, 32>}, {pipeline_mode = #tpu.pipeline_mode<synchronous>, transform_indices = @transform_19, window_bounds = array<i64: 1, 32>}, {pipeline_mode = #tpu.pipeline_mode<synchronous>, transform_indices = @transform_20, window_bounds = array<i64: 1, 32>}, {pipeline_mode = #tpu.pipeline_mode<synchronous>, transform_indices = @transform_21, window_bounds = array<i64: 1, 32>}, {pipeline_mode = #tpu.pipeline_mode<synchronous>, transform_indices = @transform_22, window_bounds = array<i64: 32, 64>}, {pipeline_mode = #tpu.pipeline_mode<synchronous>, transform_indices = @transform_23, window_bounds = array<i64: 1, 64>}, {pipeline_mode = #tpu.pipeline_mode<synchronous>, transform_indices = @transform_24, window_bounds = array<i64: 64, 32>}, {pipeline_mode = #tpu.pipeline_mode<synchronous>, transform_indices = @transform_25, window_bounds = array<i64: 1, 32>}, {pipeline_mode = #tpu.pipeline_mode<synchronous>, transform_indices = @transform_26, window_bounds = array<i64: 1, 32>}, {pipeline_mode = #tpu.pipeline_mode<synchronous>, transform_indices = @transform_27, window_bounds = array<i64: 1, 32>}, {transform_indices = @transform_28, window_bounds = array<i64: 1, 16, 32>}]} {
    %c0 = arith.constant 0 : index
    %c0_0 = arith.constant 0 : index
    %c0_1 = arith.constant 0 : index
    %0 = vector.load %arg1[%c0, %c0_0, %c0_1] : memref<1x16x32xf32, #tpu.memory_space<vmem>>, vector<1x16x32xf32>
    %1 = vector.shape_cast %0 : vector<1x16x32xf32> to vector<16x32xf32>
    %c0_2 = arith.constant 0 : index
    %c0_3 = arith.constant 0 : index
    %c0_4 = arith.constant 0 : index
    %2 = vector.load %arg2[%c0_2, %c0_3, %c0_4] : memref<1x8x32xf32, #tpu.memory_space<vmem>>, vector<1x8x32xf32>
    %3 = vector.shape_cast %2 : vector<1x8x32xf32> to vector<8x32xf32>
    %4 = arith.truncf %1 : vector<16x32xf32> to vector<16x32xbf16>
    %c0_5 = arith.constant 0 : index
    %c0_6 = arith.constant 0 : index
    %5 = vector.load %arg3[%c0_5, %c0_6] : memref<32x32xbf16, #tpu.memory_space<vmem>>, vector<32x32xbf16>
    %cst = arith.constant dense<0.000000e+00> : vector<16x32xf32>
    %6 = tpu.matmul %4, %5, %cst {dimension_numbers = #tpu.dot_dimension_numbers<[1], [0], [0], [1], [0, 0, 1, 1], [], []>} : vector<16x32xbf16>, vector<32x32xbf16>, vector<16x32xf32> -> vector<16x32xf32>
    %c0_7 = arith.constant 0 : index
    %c0_8 = arith.constant 0 : index
    %7 = vector.load %arg4[%c0_7, %c0_8] : memref<1x32xf32, #tpu.memory_space<vmem>>, vector<1x32xf32>
    %8 = vector.broadcast %7 : vector<1x32xf32> to vector<16x32xf32>
    %9 = arith.addf %6, %8 : vector<16x32xf32>
    %c0_9 = arith.constant 0 : index
    %c0_10 = arith.constant 0 : index
    %10 = vector.load %arg5[%c0_9, %c0_10] : memref<32x32xbf16, #tpu.memory_space<vmem>>, vector<32x32xbf16>
    %cst_11 = arith.constant dense<0.000000e+00> : vector<16x32xf32>
    %11 = tpu.matmul %4, %10, %cst_11 {dimension_numbers = #tpu.dot_dimension_numbers<[1], [0], [0], [1], [0, 0, 1, 1], [], []>} : vector<16x32xbf16>, vector<32x32xbf16>, vector<16x32xf32> -> vector<16x32xf32>
    %c0_12 = arith.constant 0 : index
    %c0_13 = arith.constant 0 : index
    %12 = vector.load %arg6[%c0_12, %c0_13] : memref<1x32xf32, #tpu.memory_space<vmem>>, vector<1x32xf32>
    %13 = vector.broadcast %12 : vector<1x32xf32> to vector<16x32xf32>
    %14 = arith.addf %11, %13 : vector<16x32xf32>
    %c0_14 = arith.constant 0 : index
    %c0_15 = arith.constant 0 : index
    %15 = vector.load %arg7[%c0_14, %c0_15] : memref<32x32xbf16, #tpu.memory_space<vmem>>, vector<32x32xbf16>
    %cst_16 = arith.constant dense<0.000000e+00> : vector<16x32xf32>
    %16 = tpu.matmul %4, %15, %cst_16 {dimension_numbers = #tpu.dot_dimension_numbers<[1], [0], [0], [1], [0, 0, 1, 1], [], []>} : vector<16x32xbf16>, vector<32x32xbf16>, vector<16x32xf32> -> vector<16x32xf32>
    %c0_17 = arith.constant 0 : index
    %c0_18 = arith.constant 0 : index
    %17 = vector.load %arg8[%c0_17, %c0_18] : memref<1x32xf32, #tpu.memory_space<vmem>>, vector<1x32xf32>
    %18 = vector.broadcast %17 : vector<1x32xf32> to vector<16x32xf32>
    %19 = arith.addf %16, %18 : vector<16x32xf32>
    %20 = tpu.iota {dimensions = array<i32: 0>} : vector<16x16xi32>
    %21 = tpu.iota {dimensions = array<i32: 1>} : vector<16x16xi32>
    %22 = arith.cmpi sgt, %21, %20 : vector<16x16xi32>
    %cst_19 = arith.constant 0.000000e+00 : f32
    %23 = vector.broadcast %cst_19 : f32 to vector<16x32xf32>
    %24 = vector.extract_strided_slice %9 {offsets = [0, 0], sizes = [16, 8], strides = [1, 1]} : vector<16x32xf32> to vector<16x8xf32>
    %25 = vector.extract_strided_slice %14 {offsets = [0, 0], sizes = [16, 8], strides = [1, 1]} : vector<16x32xf32> to vector<16x8xf32>
    %cst_20 = arith.constant dense<0.000000e+00> : vector<16x16xf32>
    %26 = tpu.matmul %24, %25, %cst_20 {dimension_numbers = #tpu.dot_dimension_numbers<[1], [1], [0], [0], [0, 0, 1, 0], [], []>} : vector<16x8xf32>, vector<16x8xf32>, vector<16x16xf32> -> vector<16x16xf32>
    %cst_21 = arith.constant -1.000000e+30 : f32
    %27 = vector.broadcast %cst_21 : f32 to vector<16x16xf32>
    %28 = arith.select %22, %27, %26 : vector<16x16xi1>, vector<16x16xf32>
    %cst_22 = arith.constant dense<0xFF800000> : vector<16xf32>
    %29 = vector.multi_reduction <maximumf>, %28, %cst_22 [1] : vector<16x16xf32> to vector<16xf32>
    %30 = vector.shape_cast %29 : vector<16xf32> to vector<16x1xf32>
    %31 = vector.broadcast %30 : vector<16x1xf32> to vector<16x16xf32>
    %32 = arith.subf %28, %31 : vector<16x16xf32>
    %33 = math.exp %32 : vector<16x16xf32>
    %cst_23 = arith.constant dense<0.000000e+00> : vector<16xf32>
    %34 = vector.multi_reduction <add>, %33, %cst_23 [1] : vector<16x16xf32> to vector<16xf32>
    %35 = vector.shape_cast %34 : vector<16xf32> to vector<16x1xf32>
    %36 = vector.broadcast %35 : vector<16x1xf32> to vector<16x16xf32>
    %37 = arith.divf %33, %36 : vector<16x16xf32>
    %38 = vector.extract_strided_slice %19 {offsets = [0, 0], sizes = [16, 8], strides = [1, 1]} : vector<16x32xf32> to vector<16x8xf32>
    %cst_24 = arith.constant dense<0.000000e+00> : vector<16x8xf32>
    %39 = tpu.matmul %37, %38, %cst_24 {dimension_numbers = #tpu.dot_dimension_numbers<[1], [0], [0], [1], [0, 0, 1, 1], [], []>} : vector<16x16xf32>, vector<16x8xf32>, vector<16x8xf32> -> vector<16x8xf32>
    %c0_25 = arith.constant 0 : index
    %c0_26 = arith.constant 0 : index
    %40 = vector.load %arg30[%c0_25, %c0_26] : memref<64x8xf32, #tpu.memory_space<vmem>>, vector<16x8xf32>
    tpu.vector_store %arg30[%c0_25, %c0_26], %39 {strides = array<i32>} : memref<64x8xf32, #tpu.memory_space<vmem>>, vector<16x8xf32>,
    %41 = vector.extract_strided_slice %9 {offsets = [0, 8], sizes = [16, 8], strides = [1, 1]} : vector<16x32xf32> to vector<16x8xf32>
    %42 = vector.extract_strided_slice %14 {offsets = [0, 8], sizes = [16, 8], strides = [1, 1]} : vector<16x32xf32> to vector<16x8xf32>
    %cst_27 = arith.constant dense<0.000000e+00> : vector<16x16xf32>
    %43 = tpu.matmul %41, %42, %cst_27 {dimension_numbers = #tpu.dot_dimension_numbers<[1], [1], [0], [0], [0, 0, 1, 0], [], []>} : vector<16x8xf32>, vector<16x8xf32>, vector<16x16xf32> -> vector<16x16xf32>
    %cst_28 = arith.constant -1.000000e+30 : f32
    %44 = vector.broadcast %cst_28 : f32 to vector<16x16xf32>
    %45 = arith.select %22, %44, %43 : vector<16x16xi1>, vector<16x16xf32>
    %cst_29 = arith.constant dense<0xFF800000> : vector<16xf32>
    %46 = vector.multi_reduction <maximumf>, %45, %cst_29 [1] : vector<16x16xf32> to vector<16xf32>
    %47 = vector.shape_cast %46 : vector<16xf32> to vector<16x1xf32>
    %48 = vector.broadcast %47 : vector<16x1xf32> to vector<16x16xf32>
    %49 = arith.subf %45, %48 : vector<16x16xf32>
    %50 = math.exp %49 : vector<16x16xf32>
    %cst_30 = arith.constant dense<0.000000e+00> : vector<16xf32>
    %51 = vector.multi_reduction <add>, %50, %cst_30 [1] : vector<16x16xf32> to vector<16xf32>
    %52 = vector.shape_cast %51 : vector<16xf32> to vector<16x1xf32>
    %53 = vector.broadcast %52 : vector<16x1xf32> to vector<16x16xf32>
    %54 = arith.divf %50, %53 : vector<16x16xf32>
    %55 = vector.extract_strided_slice %19 {offsets = [0, 8], sizes = [16, 8], strides = [1, 1]} : vector<16x32xf32> to vector<16x8xf32>
    %cst_31 = arith.constant dense<0.000000e+00> : vector<16x8xf32>
    %56 = tpu.matmul %54, %55, %cst_31 {dimension_numbers = #tpu.dot_dimension_numbers<[1], [0], [0], [1], [0, 0, 1, 1], [], []>} : vector<16x16xf32>, vector<16x8xf32>, vector<16x8xf32> -> vector<16x8xf32>
    %c16 = arith.constant 16 : index
    %c0_32 = arith.constant 0 : index
    %57 = vector.load %arg30[%c16, %c0_32] : memref<64x8xf32, #tpu.memory_space<vmem>>, vector<16x8xf32>
    tpu.vector_store %arg30[%c16, %c0_32], %56 {strides = array<i32>} : memref<64x8xf32, #tpu.memory_space<vmem>>, vector<16x8xf32>,
    %58 = vector.extract_strided_slice %9 {offsets = [0, 16], sizes = [16, 8], strides = [1, 1]} : vector<16x32xf32> to vector<16x8xf32>
    %59 = vector.extract_strided_slice %14 {offsets = [0, 16], sizes = [16, 8], strides = [1, 1]} : vector<16x32xf32> to vector<16x8xf32>
    %cst_33 = arith.constant dense<0.000000e+00> : vector<16x16xf32>
    %60 = tpu.matmul %58, %59, %cst_33 {dimension_numbers = #tpu.dot_dimension_numbers<[1], [1], [0], [0], [0, 0, 1, 0], [], []>} : vector<16x8xf32>, vector<16x8xf32>, vector<16x16xf32> -> vector<16x16xf32>
    %cst_34 = arith.constant -1.000000e+30 : f32
    %61 = vector.broadcast %cst_34 : f32 to vector<16x16xf32>
    %62 = arith.select %22, %61, %60 : vector<16x16xi1>, vector<16x16xf32>
    %cst_35 = arith.constant dense<0xFF800000> : vector<16xf32>
    %63 = vector.multi_reduction <maximumf>, %62, %cst_35 [1] : vector<16x16xf32> to vector<16xf32>
    %64 = vector.shape_cast %63 : vector<16xf32> to vector<16x1xf32>
    %65 = vector.broadcast %64 : vector<16x1xf32> to vector<16x16xf32>
    %66 = arith.subf %62, %65 : vector<16x16xf32>
    %67 = math.exp %66 : vector<16x16xf32>
    %cst_36 = arith.constant dense<0.000000e+00> : vector<16xf32>
    %68 = vector.multi_reduction <add>, %67, %cst_36 [1] : vector<16x16xf32> to vector<16xf32>
    %69 = vector.shape_cast %68 : vector<16xf32> to vector<16x1xf32>
    %70 = vector.broadcast %69 : vector<16x1xf32> to vector<16x16xf32>
    %71 = arith.divf %67, %70 : vector<16x16xf32>
    %72 = vector.extract_strided_slice %19 {offsets = [0, 16], sizes = [16, 8], strides = [1, 1]} : vector<16x32xf32> to vector<16x8xf32>
    %cst_37 = arith.constant dense<0.000000e+00> : vector<16x8xf32>
    %73 = tpu.matmul %71, %72, %cst_37 {dimension_numbers = #tpu.dot_dimension_numbers<[1], [0], [0], [1], [0, 0, 1, 1], [], []>} : vector<16x16xf32>, vector<16x8xf32>, vector<16x8xf32> -> vector<16x8xf32>
    %c32 = arith.constant 32 : index
    %c0_38 = arith.constant 0 : index
    %74 = vector.load %arg30[%c32, %c0_38] : memref<64x8xf32, #tpu.memory_space<vmem>>, vector<16x8xf32>
    tpu.vector_store %arg30[%c32, %c0_38], %73 {strides = array<i32>} : memref<64x8xf32, #tpu.memory_space<vmem>>, vector<16x8xf32>,
    %75 = vector.extract_strided_slice %9 {offsets = [0, 24], sizes = [16, 8], strides = [1, 1]} : vector<16x32xf32> to vector<16x8xf32>
    %76 = vector.extract_strided_slice %14 {offsets = [0, 24], sizes = [16, 8], strides = [1, 1]} : vector<16x32xf32> to vector<16x8xf32>
    %cst_39 = arith.constant dense<0.000000e+00> : vector<16x16xf32>
    %77 = tpu.matmul %75, %76, %cst_39 {dimension_numbers = #tpu.dot_dimension_numbers<[1], [1], [0], [0], [0, 0, 1, 0], [], []>} : vector<16x8xf32>, vector<16x8xf32>, vector<16x16xf32> -> vector<16x16xf32>
    %cst_40 = arith.constant -1.000000e+30 : f32
    %78 = vector.broadcast %cst_40 : f32 to vector<16x16xf32>
    %79 = arith.select %22, %78, %77 : vector<16x16xi1>, vector<16x16xf32>
    %cst_41 = arith.constant dense<0xFF800000> : vector<16xf32>
    %80 = vector.multi_reduction <maximumf>, %79, %cst_41 [1] : vector<16x16xf32> to vector<16xf32>
    %81 = vector.shape_cast %80 : vector<16xf32> to vector<16x1xf32>
    %82 = vector.broadcast %81 : vector<16x1xf32> to vector<16x16xf32>
    %83 = arith.subf %79, %82 : vector<16x16xf32>
    %84 = math.exp %83 : vector<16x16xf32>
    %cst_42 = arith.constant dense<0.000000e+00> : vector<16xf32>
    %85 = vector.multi_reduction <add>, %84, %cst_42 [1] : vector<16x16xf32> to vector<16xf32>
    %86 = vector.shape_cast %85 : vector<16xf32> to vector<16x1xf32>
    %87 = vector.broadcast %86 : vector<16x1xf32> to vector<16x16xf32>
    %88 = arith.divf %84, %87 : vector<16x16xf32>
    %89 = vector.extract_strided_slice %19 {offsets = [0, 24], sizes = [16, 8], strides = [1, 1]} : vector<16x32xf32> to vector<16x8xf32>
    %cst_43 = arith.constant dense<0.000000e+00> : vector<16x8xf32>
    %90 = tpu.matmul %88, %89, %cst_43 {dimension_numbers = #tpu.dot_dimension_numbers<[1], [0], [0], [1], [0, 0, 1, 1], [], []>} : vector<16x16xf32>, vector<16x8xf32>, vector<16x8xf32> -> vector<16x8xf32>
    %c48 = arith.constant 48 : index
    %c0_44 = arith.constant 0 : index
    %91 = vector.load %arg30[%c48, %c0_44] : memref<64x8xf32, #tpu.memory_space<vmem>>, vector<16x8xf32>
    tpu.vector_store %arg30[%c48, %c0_44], %90 {strides = array<i32>} : memref<64x8xf32, #tpu.memory_space<vmem>>, vector<16x8xf32>,
    %c0_45 = arith.constant 0 : index
    %c0_46 = arith.constant 0 : index
    %92 = tpu.strided_load %arg30[%c0_45, %c0_46] {strides = array<i32: 4, 1>} : memref<64x8xf32, #tpu.memory_space<vmem>>, vector<16x8xf32>
    %93 = arith.truncf %92 : vector<16x8xf32> to vector<16x8xbf16>
    %c0_47 = arith.constant 0 : index
    %c0_48 = arith.constant 0 : index
    %c0_49 = arith.constant 0 : index
    %94 = vector.load %arg9[%c0_47, %c0_48, %c0_49] : memref<4x8x32xbf16, #tpu.memory_space<vmem>>, vector<1x8x32xbf16>
    %95 = vector.shape_cast %94 : vector<1x8x32xbf16> to vector<8x32xbf16>
    %cst_50 = arith.constant dense<0.000000e+00> : vector<16x32xf32>
    %96 = tpu.matmul %93, %95, %cst_50 {dimension_numbers = #tpu.dot_dimension_numbers<[1], [0], [0], [1], [0, 0, 1, 1], [], []>} : vector<16x8xbf16>, vector<8x32xbf16>, vector<16x32xf32> -> vector<16x32xf32>
    %97 = arith.addf %23, %96 : vector<16x32xf32>
    %c1 = arith.constant 1 : index
    %c0_51 = arith.constant 0 : index
    %98 = tpu.strided_load %arg30[%c1, %c0_51] {strides = array<i32: 4, 1>} : memref<64x8xf32, #tpu.memory_space<vmem>>, vector<16x8xf32>
    %99 = arith.truncf %98 : vector<16x8xf32> to vector<16x8xbf16>
    %c1_52 = arith.constant 1 : index
    %c0_53 = arith.constant 0 : index
    %c0_54 = arith.constant 0 : index
    %100 = vector.load %arg9[%c1_52, %c0_53, %c0_54] : memref<4x8x32xbf16, #tpu.memory_space<vmem>>, vector<1x8x32xbf16>
    %101 = vector.shape_cast %100 : vector<1x8x32xbf16> to vector<8x32xbf16>
    %cst_55 = arith.constant dense<0.000000e+00> : vector<16x32xf32>
    %102 = tpu.matmul %99, %101, %cst_55 {dimension_numbers = #tpu.dot_dimension_numbers<[1], [0], [0], [1], [0, 0, 1, 1], [], []>} : vector<16x8xbf16>, vector<8x32xbf16>, vector<16x32xf32> -> vector<16x32xf32>
    %103 = arith.addf %97, %102 : vector<16x32xf32>
    %c2 = arith.constant 2 : index
    %c0_56 = arith.constant 0 : index
    %104 = tpu.strided_load %arg30[%c2, %c0_56] {strides = array<i32: 4, 1>} : memref<64x8xf32, #tpu.memory_space<vmem>>, vector<16x8xf32>
    %105 = arith.truncf %104 : vector<16x8xf32> to vector<16x8xbf16>
    %c2_57 = arith.constant 2 : index
    %c0_58 = arith.constant 0 : index
    %c0_59 = arith.constant 0 : index
    %106 = vector.load %arg9[%c2_57, %c0_58, %c0_59] : memref<4x8x32xbf16, #tpu.memory_space<vmem>>, vector<1x8x32xbf16>
    %107 = vector.shape_cast %106 : vector<1x8x32xbf16> to vector<8x32xbf16>
    %cst_60 = arith.constant dense<0.000000e+00> : vector<16x32xf32>
    %108 = tpu.matmul %105, %107, %cst_60 {dimension_numbers = #tpu.dot_dimension_numbers<[1], [0], [0], [1], [0, 0, 1, 1], [], []>} : vector<16x8xbf16>, vector<8x32xbf16>, vector<16x32xf32> -> vector<16x32xf32>
    %109 = arith.addf %103, %108 : vector<16x32xf32>
    %c3 = arith.constant 3 : index
    %c0_61 = arith.constant 0 : index
    %110 = tpu.strided_load %arg30[%c3, %c0_61] {strides = array<i32: 4, 1>} : memref<64x8xf32, #tpu.memory_space<vmem>>, vector<16x8xf32>
    %111 = arith.truncf %110 : vector<16x8xf32> to vector<16x8xbf16>
    %c3_62 = arith.constant 3 : index
    %c0_63 = arith.constant 0 : index
    %c0_64 = arith.constant 0 : index
    %112 = vector.load %arg9[%c3_62, %c0_63, %c0_64] : memref<4x8x32xbf16, #tpu.memory_space<vmem>>, vector<1x8x32xbf16>
    %113 = vector.shape_cast %112 : vector<1x8x32xbf16> to vector<8x32xbf16>
    %cst_65 = arith.constant dense<0.000000e+00> : vector<16x32xf32>
    %114 = tpu.matmul %111, %113, %cst_65 {dimension_numbers = #tpu.dot_dimension_numbers<[1], [0], [0], [1], [0, 0, 1, 1], [], []>} : vector<16x8xbf16>, vector<8x32xbf16>, vector<16x32xf32> -> vector<16x32xf32>
    %115 = arith.addf %109, %114 : vector<16x32xf32>
    %116 = arith.addf %1, %115 : vector<16x32xf32>
    %c0_66 = arith.constant 0 : index
    %c0_67 = arith.constant 0 : index
    %117 = vector.load %arg10[%c0_66, %c0_67] : memref<1x32xf32, #tpu.memory_space<vmem>>, vector<1x32xf32>
    %118 = vector.broadcast %117 : vector<1x32xf32> to vector<16x32xf32>
    %119 = arith.addf %116, %118 : vector<16x32xf32>
    %c0_68 = arith.constant 0 : index
    %c0_69 = arith.constant 0 : index
    %120 = vector.load %arg11[%c0_68, %c0_69] : memref<1x32xf32, #tpu.memory_space<vmem>>, vector<1x32xf32>
    %c0_70 = arith.constant 0 : index
    %c0_71 = arith.constant 0 : index
    %121 = vector.load %arg12[%c0_70, %c0_71] : memref<1x32xf32, #tpu.memory_space<vmem>>, vector<1x32xf32>
    %cst_72 = arith.constant dense<0.000000e+00> : vector<16xf32>
    %122 = vector.multi_reduction <add>, %119, %cst_72 [1] : vector<16x32xf32> to vector<16xf32>
    %123 = vector.shape_cast %122 : vector<16xf32> to vector<16x1xf32>
    %cst_73 = arith.constant 3.200000e+01 : f32
    %124 = vector.broadcast %cst_73 : f32 to vector<16x1xf32>
    %125 = arith.divf %123, %124 : vector<16x1xf32>
    %126 = vector.broadcast %125 : vector<16x1xf32> to vector<16x32xf32>
    %127 = arith.subf %119, %126 : vector<16x32xf32>
    %128 = arith.mulf %127, %127 : vector<16x32xf32>
    %cst_74 = arith.constant dense<0.000000e+00> : vector<16xf32>
    %129 = vector.multi_reduction <add>, %128, %cst_74 [1] : vector<16x32xf32> to vector<16xf32>
    %130 = vector.shape_cast %129 : vector<16xf32> to vector<16x1xf32>
    %cst_75 = arith.constant 3.200000e+01 : f32
    %131 = vector.broadcast %cst_75 : f32 to vector<16x1xf32>
    %132 = arith.divf %130, %131 : vector<16x1xf32>
    %cst_76 = arith.constant 9.99999974E-6 : f32
    %133 = vector.broadcast %cst_76 : f32 to vector<16x1xf32>
    %134 = arith.addf %132, %133 : vector<16x1xf32>
    %135 = math.rsqrt %134 : vector<16x1xf32>
    %136 = vector.broadcast %135 : vector<16x1xf32> to vector<16x32xf32>
    %137 = arith.mulf %127, %136 : vector<16x32xf32>
    %138 = vector.broadcast %120 : vector<1x32xf32> to vector<16x32xf32>
    %139 = arith.mulf %137, %138 : vector<16x32xf32>
    %140 = vector.broadcast %121 : vector<1x32xf32> to vector<16x32xf32>
    %141 = arith.addf %139, %140 : vector<16x32xf32>
    %142 = arith.truncf %141 : vector<16x32xf32> to vector<16x32xbf16>
    %143 = arith.truncf %3 : vector<8x32xf32> to vector<8x32xbf16>
    %c0_77 = arith.constant 0 : index
    %c0_78 = arith.constant 0 : index
    %144 = vector.load %arg13[%c0_77, %c0_78] : memref<32x32xbf16, #tpu.memory_space<vmem>>, vector<32x32xbf16>
    %cst_79 = arith.constant dense<0.000000e+00> : vector<16x32xf32>
    %145 = tpu.matmul %142, %144, %cst_79 {dimension_numbers = #tpu.dot_dimension_numbers<[1], [0], [0], [1], [0, 0, 1, 1], [], []>} : vector<16x32xbf16>, vector<32x32xbf16>, vector<16x32xf32> -> vector<16x32xf32>
    %c0_80 = arith.constant 0 : index
    %c0_81 = arith.constant 0 : index
    %146 = vector.load %arg14[%c0_80, %c0_81] : memref<1x32xf32, #tpu.memory_space<vmem>>, vector<1x32xf32>
    %147 = vector.broadcast %146 : vector<1x32xf32> to vector<16x32xf32>
    %148 = arith.addf %145, %147 : vector<16x32xf32>
    %c0_82 = arith.constant 0 : index
    %c0_83 = arith.constant 0 : index
    %149 = vector.load %arg15[%c0_82, %c0_83] : memref<32x32xbf16, #tpu.memory_space<vmem>>, vector<32x32xbf16>
    %cst_84 = arith.constant dense<0.000000e+00> : vector<8x32xf32>
    %150 = tpu.matmul %143, %149, %cst_84 {dimension_numbers = #tpu.dot_dimension_numbers<[1], [0], [0], [1], [0, 0, 1, 1], [], []>} : vector<8x32xbf16>, vector<32x32xbf16>, vector<8x32xf32> -> vector<8x32xf32>
    %c0_85 = arith.constant 0 : index
    %c0_86 = arith.constant 0 : index
    %151 = vector.load %arg16[%c0_85, %c0_86] : memref<1x32xf32, #tpu.memory_space<vmem>>, vector<1x32xf32>
    %152 = vector.broadcast %151 : vector<1x32xf32> to vector<8x32xf32>
    %153 = arith.addf %150, %152 : vector<8x32xf32>
    %c0_87 = arith.constant 0 : index
    %c0_88 = arith.constant 0 : index
    %154 = vector.load %arg17[%c0_87, %c0_88] : memref<32x32xbf16, #tpu.memory_space<vmem>>, vector<32x32xbf16>
    %cst_89 = arith.constant dense<0.000000e+00> : vector<8x32xf32>
    %155 = tpu.matmul %143, %154, %cst_89 {dimension_numbers = #tpu.dot_dimension_numbers<[1], [0], [0], [1], [0, 0, 1, 1], [], []>} : vector<8x32xbf16>, vector<32x32xbf16>, vector<8x32xf32> -> vector<8x32xf32>
    %c0_90 = arith.constant 0 : index
    %c0_91 = arith.constant 0 : index
    %156 = vector.load %arg18[%c0_90, %c0_91] : memref<1x32xf32, #tpu.memory_space<vmem>>, vector<1x32xf32>
    %157 = vector.broadcast %156 : vector<1x32xf32> to vector<8x32xf32>
    %158 = arith.addf %155, %157 : vector<8x32xf32>
    %cst_92 = arith.constant 0.000000e+00 : f32
    %159 = vector.broadcast %cst_92 : f32 to vector<16x32xf32>
    %160 = vector.extract_strided_slice %148 {offsets = [0, 0], sizes = [16, 8], strides = [1, 1]} : vector<16x32xf32> to vector<16x8xf32>
    %161 = vector.extract_strided_slice %153 {offsets = [0, 0], sizes = [8, 8], strides = [1, 1]} : vector<8x32xf32> to vector<8x8xf32>
    %cst_93 = arith.constant dense<0.000000e+00> : vector<16x8xf32>
    %162 = tpu.matmul %160, %161, %cst_93 {dimension_numbers = #tpu.dot_dimension_numbers<[1], [1], [0], [0], [0, 0, 1, 0], [], []>} : vector<16x8xf32>, vector<8x8xf32>, vector<16x8xf32> -> vector<16x8xf32>
    %cst_94 = arith.constant dense<0xFF800000> : vector<16xf32>
    %163 = vector.multi_reduction <maximumf>, %162, %cst_94 [1] : vector<16x8xf32> to vector<16xf32>
    %164 = vector.shape_cast %163 : vector<16xf32> to vector<16x1xf32>
    %165 = vector.broadcast %164 : vector<16x1xf32> to vector<16x8xf32>
    %166 = arith.subf %162, %165 : vector<16x8xf32>
    %167 = math.exp %166 : vector<16x8xf32>
    %cst_95 = arith.constant dense<0.000000e+00> : vector<16xf32>
    %168 = vector.multi_reduction <add>, %167, %cst_95 [1] : vector<16x8xf32> to vector<16xf32>
    %169 = vector.shape_cast %168 : vector<16xf32> to vector<16x1xf32>
    %170 = vector.broadcast %169 : vector<16x1xf32> to vector<16x8xf32>
    %171 = arith.divf %167, %170 : vector<16x8xf32>
    %172 = vector.extract_strided_slice %158 {offsets = [0, 0], sizes = [8, 8], strides = [1, 1]} : vector<8x32xf32> to vector<8x8xf32>
    %cst_96 = arith.constant dense<0.000000e+00> : vector<16x8xf32>
    %173 = tpu.matmul %171, %172, %cst_96 {dimension_numbers = #tpu.dot_dimension_numbers<[1], [0], [0], [1], [0, 0, 1, 1], [], []>} : vector<16x8xf32>, vector<8x8xf32>, vector<16x8xf32> -> vector<16x8xf32>
    %174 = arith.truncf %173 : vector<16x8xf32> to vector<16x8xbf16>
    %c0_97 = arith.constant 0 : index
    %c0_98 = arith.constant 0 : index
    %c0_99 = arith.constant 0 : index
    %175 = vector.load %arg19[%c0_97, %c0_98, %c0_99] : memref<4x8x32xbf16, #tpu.memory_space<vmem>>, vector<1x8x32xbf16>
    %176 = vector.shape_cast %175 : vector<1x8x32xbf16> to vector<8x32xbf16>
    %cst_100 = arith.constant dense<0.000000e+00> : vector<16x32xf32>
    %177 = tpu.matmul %174, %176, %cst_100 {dimension_numbers = #tpu.dot_dimension_numbers<[1], [0], [0], [1], [0, 0, 1, 1], [], []>} : vector<16x8xbf16>, vector<8x32xbf16>, vector<16x32xf32> -> vector<16x32xf32>
    %178 = arith.addf %159, %177 : vector<16x32xf32>
    %179 = vector.extract_strided_slice %148 {offsets = [0, 8], sizes = [16, 8], strides = [1, 1]} : vector<16x32xf32> to vector<16x8xf32>
    %180 = vector.extract_strided_slice %153 {offsets = [0, 8], sizes = [8, 8], strides = [1, 1]} : vector<8x32xf32> to vector<8x8xf32>
    %cst_101 = arith.constant dense<0.000000e+00> : vector<16x8xf32>
    %181 = tpu.matmul %179, %180, %cst_101 {dimension_numbers = #tpu.dot_dimension_numbers<[1], [1], [0], [0], [0, 0, 1, 0], [], []>} : vector<16x8xf32>, vector<8x8xf32>, vector<16x8xf32> -> vector<16x8xf32>
    %cst_102 = arith.constant dense<0xFF800000> : vector<16xf32>
    %182 = vector.multi_reduction <maximumf>, %181, %cst_102 [1] : vector<16x8xf32> to vector<16xf32>
    %183 = vector.shape_cast %182 : vector<16xf32> to vector<16x1xf32>
    %184 = vector.broadcast %183 : vector<16x1xf32> to vector<16x8xf32>
    %185 = arith.subf %181, %184 : vector<16x8xf32>
    %186 = math.exp %185 : vector<16x8xf32>
    %cst_103 = arith.constant dense<0.000000e+00> : vector<16xf32>
    %187 = vector.multi_reduction <add>, %186, %cst_103 [1] : vector<16x8xf32> to vector<16xf32>
    %188 = vector.shape_cast %187 : vector<16xf32> to vector<16x1xf32>
    %189 = vector.broadcast %188 : vector<16x1xf32> to vector<16x8xf32>
    %190 = arith.divf %186, %189 : vector<16x8xf32>
    %191 = vector.extract_strided_slice %158 {offsets = [0, 8], sizes = [8, 8], strides = [1, 1]} : vector<8x32xf32> to vector<8x8xf32>
    %cst_104 = arith.constant dense<0.000000e+00> : vector<16x8xf32>
    %192 = tpu.matmul %190, %191, %cst_104 {dimension_numbers = #tpu.dot_dimension_numbers<[1], [0], [0], [1], [0, 0, 1, 1], [], []>} : vector<16x8xf32>, vector<8x8xf32>, vector<16x8xf32> -> vector<16x8xf32>
    %193 = arith.truncf %192 : vector<16x8xf32> to vector<16x8xbf16>
    %c1_105 = arith.constant 1 : index
    %c0_106 = arith.constant 0 : index
    %c0_107 = arith.constant 0 : index
    %194 = vector.load %arg19[%c1_105, %c0_106, %c0_107] : memref<4x8x32xbf16, #tpu.memory_space<vmem>>, vector<1x8x32xbf16>
    %195 = vector.shape_cast %194 : vector<1x8x32xbf16> to vector<8x32xbf16>
    %cst_108 = arith.constant dense<0.000000e+00> : vector<16x32xf32>
    %196 = tpu.matmul %193, %195, %cst_108 {dimension_numbers = #tpu.dot_dimension_numbers<[1], [0], [0], [1], [0, 0, 1, 1], [], []>} : vector<16x8xbf16>, vector<8x32xbf16>, vector<16x32xf32> -> vector<16x32xf32>
    %197 = arith.addf %178, %196 : vector<16x32xf32>
    %198 = vector.extract_strided_slice %148 {offsets = [0, 16], sizes = [16, 8], strides = [1, 1]} : vector<16x32xf32> to vector<16x8xf32>
    %199 = vector.extract_strided_slice %153 {offsets = [0, 16], sizes = [8, 8], strides = [1, 1]} : vector<8x32xf32> to vector<8x8xf32>
    %cst_109 = arith.constant dense<0.000000e+00> : vector<16x8xf32>
    %200 = tpu.matmul %198, %199, %cst_109 {dimension_numbers = #tpu.dot_dimension_numbers<[1], [1], [0], [0], [0, 0, 1, 0], [], []>} : vector<16x8xf32>, vector<8x8xf32>, vector<16x8xf32> -> vector<16x8xf32>
    %cst_110 = arith.constant dense<0xFF800000> : vector<16xf32>
    %201 = vector.multi_reduction <maximumf>, %200, %cst_110 [1] : vector<16x8xf32> to vector<16xf32>
    %202 = vector.shape_cast %201 : vector<16xf32> to vector<16x1xf32>
    %203 = vector.broadcast %202 : vector<16x1xf32> to vector<16x8xf32>
    %204 = arith.subf %200, %203 : vector<16x8xf32>
    %205 = math.exp %204 : vector<16x8xf32>
    %cst_111 = arith.constant dense<0.000000e+00> : vector<16xf32>
    %206 = vector.multi_reduction <add>, %205, %cst_111 [1] : vector<16x8xf32> to vector<16xf32>
    %207 = vector.shape_cast %206 : vector<16xf32> to vector<16x1xf32>
    %208 = vector.broadcast %207 : vector<16x1xf32> to vector<16x8xf32>
    %209 = arith.divf %205, %208 : vector<16x8xf32>
    %210 = vector.extract_strided_slice %158 {offsets = [0, 16], sizes = [8, 8], strides = [1, 1]} : vector<8x32xf32> to vector<8x8xf32>
    %cst_112 = arith.constant dense<0.000000e+00> : vector<16x8xf32>
    %211 = tpu.matmul %209, %210, %cst_112 {dimension_numbers = #tpu.dot_dimension_numbers<[1], [0], [0], [1], [0, 0, 1, 1], [], []>} : vector<16x8xf32>, vector<8x8xf32>, vector<16x8xf32> -> vector<16x8xf32>
    %212 = arith.truncf %211 : vector<16x8xf32> to vector<16x8xbf16>
    %c2_113 = arith.constant 2 : index
    %c0_114 = arith.constant 0 : index
    %c0_115 = arith.constant 0 : index
    %213 = vector.load %arg19[%c2_113, %c0_114, %c0_115] : memref<4x8x32xbf16, #tpu.memory_space<vmem>>, vector<1x8x32xbf16>
    %214 = vector.shape_cast %213 : vector<1x8x32xbf16> to vector<8x32xbf16>
    %cst_116 = arith.constant dense<0.000000e+00> : vector<16x32xf32>
    %215 = tpu.matmul %212, %214, %cst_116 {dimension_numbers = #tpu.dot_dimension_numbers<[1], [0], [0], [1], [0, 0, 1, 1], [], []>} : vector<16x8xbf16>, vector<8x32xbf16>, vector<16x32xf32> -> vector<16x32xf32>
    %216 = arith.addf %197, %215 : vector<16x32xf32>
    %217 = vector.extract_strided_slice %148 {offsets = [0, 24], sizes = [16, 8], strides = [1, 1]} : vector<16x32xf32> to vector<16x8xf32>
    %218 = vector.extract_strided_slice %153 {offsets = [0, 24], sizes = [8, 8], strides = [1, 1]} : vector<8x32xf32> to vector<8x8xf32>
    %cst_117 = arith.constant dense<0.000000e+00> : vector<16x8xf32>
    %219 = tpu.matmul %217, %218, %cst_117 {dimension_numbers = #tpu.dot_dimension_numbers<[1], [1], [0], [0], [0, 0, 1, 0], [], []>} : vector<16x8xf32>, vector<8x8xf32>, vector<16x8xf32> -> vector<16x8xf32>
    %cst_118 = arith.constant dense<0xFF800000> : vector<16xf32>
    %220 = vector.multi_reduction <maximumf>, %219, %cst_118 [1] : vector<16x8xf32> to vector<16xf32>
    %221 = vector.shape_cast %220 : vector<16xf32> to vector<16x1xf32>
    %222 = vector.broadcast %221 : vector<16x1xf32> to vector<16x8xf32>
    %223 = arith.subf %219, %222 : vector<16x8xf32>
    %224 = math.exp %223 : vector<16x8xf32>
    %cst_119 = arith.constant dense<0.000000e+00> : vector<16xf32>
    %225 = vector.multi_reduction <add>, %224, %cst_119 [1] : vector<16x8xf32> to vector<16xf32>
    %226 = vector.shape_cast %225 : vector<16xf32> to vector<16x1xf32>
    %227 = vector.broadcast %226 : vector<16x1xf32> to vector<16x8xf32>
    %228 = arith.divf %224, %227 : vector<16x8xf32>
    %229 = vector.extract_strided_slice %158 {offsets = [0, 24], sizes = [8, 8], strides = [1, 1]} : vector<8x32xf32> to vector<8x8xf32>
    %cst_120 = arith.constant dense<0.000000e+00> : vector<16x8xf32>
    %230 = tpu.matmul %228, %229, %cst_120 {dimension_numbers = #tpu.dot_dimension_numbers<[1], [0], [0], [1], [0, 0, 1, 1], [], []>} : vector<16x8xf32>, vector<8x8xf32>, vector<16x8xf32> -> vector<16x8xf32>
    %231 = arith.truncf %230 : vector<16x8xf32> to vector<16x8xbf16>
    %c3_121 = arith.constant 3 : index
    %c0_122 = arith.constant 0 : index
    %c0_123 = arith.constant 0 : index
    %232 = vector.load %arg19[%c3_121, %c0_122, %c0_123] : memref<4x8x32xbf16, #tpu.memory_space<vmem>>, vector<1x8x32xbf16>
    %233 = vector.shape_cast %232 : vector<1x8x32xbf16> to vector<8x32xbf16>
    %cst_124 = arith.constant dense<0.000000e+00> : vector<16x32xf32>
    %234 = tpu.matmul %231, %233, %cst_124 {dimension_numbers = #tpu.dot_dimension_numbers<[1], [0], [0], [1], [0, 0, 1, 1], [], []>} : vector<16x8xbf16>, vector<8x32xbf16>, vector<16x32xf32> -> vector<16x32xf32>
    %235 = arith.addf %216, %234 : vector<16x32xf32>
    %236 = arith.addf %141, %235 : vector<16x32xf32>
    %c0_125 = arith.constant 0 : index
    %c0_126 = arith.constant 0 : index
    %237 = vector.load %arg20[%c0_125, %c0_126] : memref<1x32xf32, #tpu.memory_space<vmem>>, vector<1x32xf32>
    %238 = vector.broadcast %237 : vector<1x32xf32> to vector<16x32xf32>
    %239 = arith.addf %236, %238 : vector<16x32xf32>
    %c0_127 = arith.constant 0 : index
    %c0_128 = arith.constant 0 : index
    %240 = vector.load %arg21[%c0_127, %c0_128] : memref<1x32xf32, #tpu.memory_space<vmem>>, vector<1x32xf32>
    %c0_129 = arith.constant 0 : index
    %c0_130 = arith.constant 0 : index
    %241 = vector.load %arg22[%c0_129, %c0_130] : memref<1x32xf32, #tpu.memory_space<vmem>>, vector<1x32xf32>
    %cst_131 = arith.constant dense<0.000000e+00> : vector<16xf32>
    %242 = vector.multi_reduction <add>, %239, %cst_131 [1] : vector<16x32xf32> to vector<16xf32>
    %243 = vector.shape_cast %242 : vector<16xf32> to vector<16x1xf32>
    %cst_132 = arith.constant 3.200000e+01 : f32
    %244 = vector.broadcast %cst_132 : f32 to vector<16x1xf32>
    %245 = arith.divf %243, %244 : vector<16x1xf32>
    %246 = vector.broadcast %245 : vector<16x1xf32> to vector<16x32xf32>
    %247 = arith.subf %239, %246 : vector<16x32xf32>
    %248 = arith.mulf %247, %247 : vector<16x32xf32>
    %cst_133 = arith.constant dense<0.000000e+00> : vector<16xf32>
    %249 = vector.multi_reduction <add>, %248, %cst_133 [1] : vector<16x32xf32> to vector<16xf32>
    %250 = vector.shape_cast %249 : vector<16xf32> to vector<16x1xf32>
    %cst_134 = arith.constant 3.200000e+01 : f32
    %251 = vector.broadcast %cst_134 : f32 to vector<16x1xf32>
    %252 = arith.divf %250, %251 : vector<16x1xf32>
    %cst_135 = arith.constant 9.99999974E-6 : f32
    %253 = vector.broadcast %cst_135 : f32 to vector<16x1xf32>
    %254 = arith.addf %252, %253 : vector<16x1xf32>
    %255 = math.rsqrt %254 : vector<16x1xf32>
    %256 = vector.broadcast %255 : vector<16x1xf32> to vector<16x32xf32>
    %257 = arith.mulf %247, %256 : vector<16x32xf32>
    %258 = vector.broadcast %240 : vector<1x32xf32> to vector<16x32xf32>
    %259 = arith.mulf %257, %258 : vector<16x32xf32>
    %260 = vector.broadcast %241 : vector<1x32xf32> to vector<16x32xf32>
    %261 = arith.addf %259, %260 : vector<16x32xf32>
    %262 = arith.truncf %261 : vector<16x32xf32> to vector<16x32xbf16>
    %c0_136 = arith.constant 0 : index
    %c0_137 = arith.constant 0 : index
    %263 = vector.load %arg23[%c0_136, %c0_137] : memref<32x64xbf16, #tpu.memory_space<vmem>>, vector<32x64xbf16>
    %cst_138 = arith.constant dense<0.000000e+00> : vector<16x64xf32>
    %264 = tpu.matmul %262, %263, %cst_138 {dimension_numbers = #tpu.dot_dimension_numbers<[1], [0], [0], [1], [0, 0, 1, 1], [], []>} : vector<16x32xbf16>, vector<32x64xbf16>, vector<16x64xf32> -> vector<16x64xf32>
    %c0_139 = arith.constant 0 : index
    %c0_140 = arith.constant 0 : index
    %265 = vector.load %arg24[%c0_139, %c0_140] : memref<1x64xf32, #tpu.memory_space<vmem>>, vector<1x64xf32>
    %266 = vector.broadcast %265 : vector<1x64xf32> to vector<16x64xf32>
    %267 = arith.addf %264, %266 : vector<16x64xf32>
    %cst_141 = arith.constant 5.000000e-01 : f32
    %268 = vector.broadcast %cst_141 : f32 to vector<16x64xf32>
    %269 = arith.mulf %268, %267 : vector<16x64xf32>
    %cst_142 = arith.constant 0.707106769 : f32
    %270 = vector.broadcast %cst_142 : f32 to vector<16x64xf32>
    %271 = arith.mulf %267, %270 : vector<16x64xf32>
    %cst_143 = arith.constant 0.000000e+00 : f32
    %272 = vector.broadcast %cst_143 : f32 to vector<16x64xf32>
    %273 = arith.cmpf oge, %271, %272 : vector<16x64xf32>
    %cst_144 = arith.constant 1.000000e+00 : f32
    %cst_145 = arith.constant -1.000000e+00 : f32
    %274 = vector.broadcast %cst_144 : f32 to vector<16x64xf32>
    %275 = vector.broadcast %cst_145 : f32 to vector<16x64xf32>
    %276 = arith.select %273, %274, %275 : vector<16x64xi1>, vector<16x64xf32>
    %277 = math.absf %271 : vector<16x64xf32>
    %cst_146 = arith.constant 0.327591091 : f32
    %278 = vector.broadcast %cst_146 : f32 to vector<16x64xf32>
    %279 = arith.mulf %278, %277 : vector<16x64xf32>
    %cst_147 = arith.constant 1.000000e+00 : f32
    %280 = vector.broadcast %cst_147 : f32 to vector<16x64xf32>
    %281 = arith.addf %280, %279 : vector<16x64xf32>
    %cst_148 = arith.constant 1.000000e+00 : f32
    %282 = vector.broadcast %cst_148 : f32 to vector<16x64xf32>
    %283 = arith.divf %282, %281 : vector<16x64xf32>
    %cst_149 = arith.constant 1.06140542 : f32
    %284 = vector.broadcast %cst_149 : f32 to vector<16x64xf32>
    %285 = arith.mulf %283, %284 : vector<16x64xf32>
    %cst_150 = arith.constant -1.45315206 : f32
    %286 = vector.broadcast %cst_150 : f32 to vector<16x64xf32>
    %287 = arith.addf %286, %285 : vector<16x64xf32>
    %288 = arith.mulf %283, %287 : vector<16x64xf32>
    %cst_151 = arith.constant 1.42141378 : f32
    %289 = vector.broadcast %cst_151 : f32 to vector<16x64xf32>
    %290 = arith.addf %289, %288 : vector<16x64xf32>
    %291 = arith.mulf %283, %290 : vector<16x64xf32>
    %cst_152 = arith.constant -0.284496725 : f32
    %292 = vector.broadcast %cst_152 : f32 to vector<16x64xf32>
    %293 = arith.addf %292, %291 : vector<16x64xf32>
    %294 = arith.mulf %283, %293 : vector<16x64xf32>
    %cst_153 = arith.constant 0.254829586 : f32
    %295 = vector.broadcast %cst_153 : f32 to vector<16x64xf32>
    %296 = arith.addf %295, %294 : vector<16x64xf32>
    %297 = arith.mulf %283, %296 : vector<16x64xf32>
    %cst_154 = arith.constant 0.000000e+00 : f32
    %298 = vector.broadcast %cst_154 : f32 to vector<16x64xf32>
    %299 = arith.subf %298, %277 : vector<16x64xf32>
    %300 = arith.mulf %299, %277 : vector<16x64xf32>
    %301 = math.exp %300 : vector<16x64xf32>
    %302 = arith.mulf %297, %301 : vector<16x64xf32>
    %cst_155 = arith.constant 1.000000e+00 : f32
    %303 = vector.broadcast %cst_155 : f32 to vector<16x64xf32>
    %304 = arith.subf %303, %302 : vector<16x64xf32>
    %305 = arith.mulf %276, %304 : vector<16x64xf32>
    %cst_156 = arith.constant 1.000000e+00 : f32
    %306 = vector.broadcast %cst_156 : f32 to vector<16x64xf32>
    %307 = arith.addf %306, %305 : vector<16x64xf32>
    %308 = arith.mulf %269, %307 : vector<16x64xf32>
    %309 = arith.truncf %308 : vector<16x64xf32> to vector<16x64xbf16>
    %c0_157 = arith.constant 0 : index
    %c0_158 = arith.constant 0 : index
    %310 = vector.load %arg25[%c0_157, %c0_158] : memref<64x32xbf16, #tpu.memory_space<vmem>>, vector<64x32xbf16>
    %cst_159 = arith.constant dense<0.000000e+00> : vector<16x32xf32>
    %311 = tpu.matmul %309, %310, %cst_159 {dimension_numbers = #tpu.dot_dimension_numbers<[1], [0], [0], [1], [0, 0, 1, 1], [], []>} : vector<16x64xbf16>, vector<64x32xbf16>, vector<16x32xf32> -> vector<16x32xf32>
    %312 = arith.addf %261, %311 : vector<16x32xf32>
    %c0_160 = arith.constant 0 : index
    %c0_161 = arith.constant 0 : index
    %313 = vector.load %arg26[%c0_160, %c0_161] : memref<1x32xf32, #tpu.memory_space<vmem>>, vector<1x32xf32>
    %314 = vector.broadcast %313 : vector<1x32xf32> to vector<16x32xf32>
    %315 = arith.addf %312, %314 : vector<16x32xf32>
    %c0_162 = arith.constant 0 : index
    %c0_163 = arith.constant 0 : index
    %316 = vector.load %arg27[%c0_162, %c0_163] : memref<1x32xf32, #tpu.memory_space<vmem>>, vector<1x32xf32>
    %c0_164 = arith.constant 0 : index
    %c0_165 = arith.constant 0 : index
    %317 = vector.load %arg28[%c0_164, %c0_165] : memref<1x32xf32, #tpu.memory_space<vmem>>, vector<1x32xf32>
    %cst_166 = arith.constant dense<0.000000e+00> : vector<16xf32>
    %318 = vector.multi_reduction <add>, %315, %cst_166 [1] : vector<16x32xf32> to vector<16xf32>
    %319 = vector.shape_cast %318 : vector<16xf32> to vector<16x1xf32>
    %cst_167 = arith.constant 3.200000e+01 : f32
    %320 = vector.broadcast %cst_167 : f32 to vector<16x1xf32>
    %321 = arith.divf %319, %320 : vector<16x1xf32>
    %322 = vector.broadcast %321 : vector<16x1xf32> to vector<16x32xf32>
    %323 = arith.subf %315, %322 : vector<16x32xf32>
    %324 = arith.mulf %323, %323 : vector<16x32xf32>
    %cst_168 = arith.constant dense<0.000000e+00> : vector<16xf32>
    %325 = vector.multi_reduction <add>, %324, %cst_168 [1] : vector<16x32xf32> to vector<16xf32>
    %326 = vector.shape_cast %325 : vector<16xf32> to vector<16x1xf32>
    %cst_169 = arith.constant 3.200000e+01 : f32
    %327 = vector.broadcast %cst_169 : f32 to vector<16x1xf32>
    %328 = arith.divf %326, %327 : vector<16x1xf32>
    %cst_170 = arith.constant 9.99999974E-6 : f32
    %329 = vector.broadcast %cst_170 : f32 to vector<16x1xf32>
    %330 = arith.addf %328, %329 : vector<16x1xf32>
    %331 = math.rsqrt %330 : vector<16x1xf32>
    %332 = vector.broadcast %331 : vector<16x1xf32> to vector<16x32xf32>
    %333 = arith.mulf %323, %332 : vector<16x32xf32>
    %334 = vector.broadcast %316 : vector<1x32xf32> to vector<16x32xf32>
    %335 = arith.mulf %333, %334 : vector<16x32xf32>
    %336 = vector.broadcast %317 : vector<1x32xf32> to vector<16x32xf32>
    %337 = arith.addf %335, %336 : vector<16x32xf32>
    %c0_171 = arith.constant 0 : index
    %c0_172 = arith.constant 0 : index
    %c0_173 = arith.constant 0 : index
    %338 = vector.load %arg29[%c0_171, %c0_172, %c0_173] : memref<1x16x32xf32, #tpu.memory_space<vmem>>, vector<1x16x32xf32>
    %339 = vector.shape_cast %338 : vector<1x16x32xf32> to vector<16x32xf32>
    %340 = vector.shape_cast %337 : vector<16x32xf32> to vector<1x16x32xf32>
    tpu.vector_store %arg29[%c0_171, %c0_172, %c0_173], %340 {strides = array<i32>} : memref<1x16x32xf32, #tpu.memory_space<vmem>>, vector<1x16x32xf32>,
    return
  }
  func.func @transform_0(%arg0: i32) -> (i32, i32, i32) {
    %c0_i32 = arith.constant 0 : i32
    %c0_i32_0 = arith.constant 0 : i32
    %c0_i32_1 = arith.constant 0 : i32
    return %arg0, %c0_i32, %c0_i32_0 : i32, i32, i32
  }
  func.func @transform_1(%arg0: i32) -> (i32, i32, i32) {
    %c0_i32 = arith.constant 0 : i32
    %c0_i32_0 = arith.constant 0 : i32
    %c0_i32_1 = arith.constant 0 : i32
    return %arg0, %c0_i32, %c0_i32_0 : i32, i32, i32
  }
  func.func @transform_2(%arg0: i32) -> (i32, i32) {
    %c0_i32 = arith.constant 0 : i32
    %c0_i32_0 = arith.constant 0 : i32
    %c0_i32_1 = arith.constant 0 : i32
    return %c0_i32, %c0_i32_0 : i32, i32
  }
  func.func @transform_3(%arg0: i32) -> (i32, i32) {
    %c0_i32 = arith.constant 0 : i32
    %c0_i32_0 = arith.constant 0 : i32
    %c0_i32_1 = arith.constant 0 : i32
    return %c0_i32, %c0_i32_0 : i32, i32
  }
  func.func @transform_4(%arg0: i32) -> (i32, i32) {
    %c0_i32 = arith.constant 0 : i32
    %c0_i32_0 = arith.constant 0 : i32
    %c0_i32_1 = arith.constant 0 : i32
    return %c0_i32, %c0_i32_0 : i32, i32
  }
  func.func @transform_5(%arg0: i32) -> (i32, i32) {
    %c0_i32 = arith.constant 0 : i32
    %c0_i32_0 = arith.constant 0 : i32
    %c0_i32_1 = arith.constant 0 : i32
    return %c0_i32, %c0_i32_0 : i32, i32
  }
  func.func @transform_6(%arg0: i32) -> (i32, i32) {
    %c0_i32 = arith.constant 0 : i32
    %c0_i32_0 = arith.constant 0 : i32
    %c0_i32_1 = arith.constant 0 : i32
    return %c0_i32, %c0_i32_0 : i32, i32
  }
  func.func @transform_7(%arg0: i32) -> (i32, i32) {
    %c0_i32 = arith.constant 0 : i32
    %c0_i32_0 = arith.constant 0 : i32
    %c0_i32_1 = arith.constant 0 : i32
    return %c0_i32, %c0_i32_0 : i32, i32
  }
  func.func @transform_8(%arg0: i32) -> (i32, i32, i32) {
    %c0_i32 = arith.constant 0 : i32
    %c0_i32_0 = arith.constant 0 : i32
    %c0_i32_1 = arith.constant 0 : i32
    %c0_i32_2 = arith.constant 0 : i32
    return %c0_i32, %c0_i32_0, %c0_i32_1 : i32, i32, i32
  }
  func.func @transform_9(%arg0: i32) -> (i32, i32) {
    %c0_i32 = arith.constant 0 : i32
    %c0_i32_0 = arith.constant 0 : i32
    %c0_i32_1 = arith.constant 0 : i32
    return %c0_i32, %c0_i32_0 : i32, i32
  }
  func.func @transform_10(%arg0: i32) -> (i32, i32) {
    %c0_i32 = arith.constant 0 : i32
    %c0_i32_0 = arith.constant 0 : i32
    %c0_i32_1 = arith.constant 0 : i32
    return %c0_i32, %c0_i32_0 : i32, i32
  }
  func.func @transform_11(%arg0: i32) -> (i32, i32) {
    %c0_i32 = arith.constant 0 : i32
    %c0_i32_0 = arith.constant 0 : i32
    %c0_i32_1 = arith.constant 0 : i32
    return %c0_i32, %c0_i32_0 : i32, i32
  }
  func.func @transform_12(%arg0: i32) -> (i32, i32) {
    %c0_i32 = arith.constant 0 : i32
    %c0_i32_0 = arith.constant 0 : i32
    %c0_i32_1 = arith.constant 0 : i32
    return %c0_i32, %c0_i32_0 : i32, i32
  }
  func.func @transform_13(%arg0: i32) -> (i32, i32) {
    %c0_i32 = arith.constant 0 : i32
    %c0_i32_0 = arith.constant 0 : i32
    %c0_i32_1 = arith.constant 0 : i32
    return %c0_i32, %c0_i32_0 : i32, i32
  }
  func.func @transform_14(%arg0: i32) -> (i32, i32) {
    %c0_i32 = arith.constant 0 : i32
    %c0_i32_0 = arith.constant 0 : i32
    %c0_i32_1 = arith.constant 0 : i32
    return %c0_i32, %c0_i32_0 : i32, i32
  }
  func.func @transform_15(%arg0: i32) -> (i32, i32) {
    %c0_i32 = arith.constant 0 : i32
    %c0_i32_0 = arith.constant 0 : i32
    %c0_i32_1 = arith.constant 0 : i32
    return %c0_i32, %c0_i32_0 : i32, i32
  }
  func.func @transform_16(%arg0: i32) -> (i32, i32) {
    %c0_i32 = arith.constant 0 : i32
    %c0_i32_0 = arith.constant 0 : i32
    %c0_i32_1 = arith.constant 0 : i32
    return %c0_i32, %c0_i32_0 : i32, i32
  }
  func.func @transform_17(%arg0: i32) -> (i32, i32) {
    %c0_i32 = arith.constant 0 : i32
    %c0_i32_0 = arith.constant 0 : i32
    %c0_i32_1 = arith.constant 0 : i32
    return %c0_i32, %c0_i32_0 : i32, i32
  }
  func.func @transform_18(%arg0: i32) -> (i32, i32, i32) {
    %c0_i32 = arith.constant 0 : i32
    %c0_i32_0 = arith.constant 0 : i32
    %c0_i32_1 = arith.constant 0 : i32
    %c0_i32_2 = arith.constant 0 : i32
    return %c0_i32, %c0_i32_0, %c0_i32_1 : i32, i32, i32
  }
  func.func @transform_19(%arg0: i32) -> (i32, i32) {
    %c0_i32 = arith.constant 0 : i32
    %c0_i32_0 = arith.constant 0 : i32
    %c0_i32_1 = arith.constant 0 : i32
    return %c0_i32, %c0_i32_0 : i32, i32
  }
  func.func @transform_20(%arg0: i32) -> (i32, i32) {
    %c0_i32 = arith.constant 0 : i32
    %c0_i32_0 = arith.constant 0 : i32
    %c0_i32_1 = arith.constant 0 : i32
    return %c0_i32, %c0_i32_0 : i32, i32
  }
  func.func @transform_21(%arg0: i32) -> (i32, i32) {
    %c0_i32 = arith.constant 0 : i32
    %c0_i32_0 = arith.constant 0 : i32
    %c0_i32_1 = arith.constant 0 : i32
    return %c0_i32, %c0_i32_0 : i32, i32
  }
  func.func @transform_22(%arg0: i32) -> (i32, i32) {
    %c0_i32 = arith.constant 0 : i32
    %c0_i32_0 = arith.constant 0 : i32
    %c0_i32_1 = arith.constant 0 : i32
    return %c0_i32, %c0_i32_0 : i32, i32
  }
  func.func @transform_23(%arg0: i32) -> (i32, i32) {
    %c0_i32 = arith.constant 0 : i32
    %c0_i32_0 = arith.constant 0 : i32
    %c0_i32_1 = arith.constant 0 : i32
    return %c0_i32, %c0_i32_0 : i32, i32
  }
  func.func @transform_24(%arg0: i32) -> (i32, i32) {
    %c0_i32 = arith.constant 0 : i32
    %c0_i32_0 = arith.constant 0 : i32
    %c0_i32_1 = arith.constant 0 : i32
    return %c0_i32, %c0_i32_0 : i32, i32
  }
  func.func @transform_25(%arg0: i32) -> (i32, i32) {
    %c0_i32 = arith.constant 0 : i32
    %c0_i32_0 = arith.constant 0 : i32
    %c0_i32_1 = arith.constant 0 : i32
    return %c0_i32, %c0_i32_0 : i32, i32
  }
  func.func @transform_26(%arg0: i32) -> (i32, i32) {
    %c0_i32 = arith.constant 0 : i32
    %c0_i32_0 = arith.constant 0 : i32
    %c0_i32_1 = arith.constant 0 : i32
    return %c0_i32, %c0_i32_0 : i32, i32
  }
  func.func @transform_27(%arg0: i32) -> (i32, i32) {
    %c0_i32 = arith.constant 0 : i32
    %c0_i32_0 = arith.constant 0 : i32
    %c0_i32_1 = arith.constant 0 : i32
    return %c0_i32, %c0_i32_0 : i32, i32
  }
  func.func @transform_28(%arg0: i32) -> (i32, i32, i32) {
    %c0_i32 = arith.constant 0 : i32
    %c0_i32_0 = arith.constant 0 : i32
    %c0_i32_1 = arith.constant 0 : i32
    return %arg0, %c0_i32, %c0_i32_0 : i32, i32, i32
  }
}

module attributes {stable_mosaic.version = 11 : i64} {
  func.func @_ln_proj_kernel(%arg0: i32, %arg1: memref<1x8x32xf32, #tpu.memory_space<vmem>>, %arg2: memref<1x32xf32, #tpu.memory_space<vmem>>, %arg3: memref<1x32xf32, #tpu.memory_space<vmem>>, %arg4: memref<32x4xbf16, #tpu.memory_space<vmem>>, %arg5: memref<1x4xf32, #tpu.memory_space<vmem>>, %arg6: memref<1x8x4xf32, #tpu.memory_space<vmem>>) attributes {dimension_semantics = [#tpu.dimension_semantics<parallel>], iteration_bounds = array<i64: 2>, scalar_prefetch = 0 : i64, scratch_operands = 0 : i64, tpu.core_type = #tpu.core_type<tc>, window_params = [{transform_indices = @transform_0, window_bounds = array<i64: 1, 8, 32>}, {pipeline_mode = #tpu.pipeline_mode<synchronous>, transform_indices = @transform_1, window_bounds = array<i64: 1, 32>}, {pipeline_mode = #tpu.pipeline_mode<synchronous>, transform_indices = @transform_2, window_bounds = array<i64: 1, 32>}, {pipeline_mode = #tpu.pipeline_mode<synchronous>, transform_indices = @transform_3, window_bounds = array<i64: 32, 4>}, {pipeline_mode = #tpu.pipeline_mode<synchronous>, transform_indices = @transform_4, window_bounds = array<i64: 1, 4>}, {transform_indices = @transform_5, window_bounds = array<i64: 1, 8, 4>}]} {
    %c0 = arith.constant 0 : index
    %c0_0 = arith.constant 0 : index
    %c0_1 = arith.constant 0 : index
    %0 = vector.load %arg1[%c0, %c0_0, %c0_1] : memref<1x8x32xf32, #tpu.memory_space<vmem>>, vector<1x8x32xf32>
    %1 = vector.shape_cast %0 : vector<1x8x32xf32> to vector<8x32xf32>
    %c0_2 = arith.constant 0 : index
    %c0_3 = arith.constant 0 : index
    %2 = vector.load %arg2[%c0_2, %c0_3] : memref<1x32xf32, #tpu.memory_space<vmem>>, vector<1x32xf32>
    %c0_4 = arith.constant 0 : index
    %c0_5 = arith.constant 0 : index
    %3 = vector.load %arg3[%c0_4, %c0_5] : memref<1x32xf32, #tpu.memory_space<vmem>>, vector<1x32xf32>
    %cst = arith.constant dense<0.000000e+00> : vector<8xf32>
    %4 = vector.multi_reduction <add>, %1, %cst [1] : vector<8x32xf32> to vector<8xf32>
    %5 = vector.shape_cast %4 : vector<8xf32> to vector<8x1xf32>
    %cst_6 = arith.constant 3.200000e+01 : f32
    %6 = vector.broadcast %cst_6 : f32 to vector<8x1xf32>
    %7 = arith.divf %5, %6 : vector<8x1xf32>
    %8 = vector.broadcast %7 : vector<8x1xf32> to vector<8x32xf32>
    %9 = arith.subf %1, %8 : vector<8x32xf32>
    %10 = arith.mulf %9, %9 : vector<8x32xf32>
    %cst_7 = arith.constant dense<0.000000e+00> : vector<8xf32>
    %11 = vector.multi_reduction <add>, %10, %cst_7 [1] : vector<8x32xf32> to vector<8xf32>
    %12 = vector.shape_cast %11 : vector<8xf32> to vector<8x1xf32>
    %cst_8 = arith.constant 3.200000e+01 : f32
    %13 = vector.broadcast %cst_8 : f32 to vector<8x1xf32>
    %14 = arith.divf %12, %13 : vector<8x1xf32>
    %cst_9 = arith.constant 9.99999974E-6 : f32
    %15 = vector.broadcast %cst_9 : f32 to vector<8x1xf32>
    %16 = arith.addf %14, %15 : vector<8x1xf32>
    %17 = math.rsqrt %16 : vector<8x1xf32>
    %18 = vector.broadcast %17 : vector<8x1xf32> to vector<8x32xf32>
    %19 = arith.mulf %9, %18 : vector<8x32xf32>
    %20 = vector.broadcast %2 : vector<1x32xf32> to vector<8x32xf32>
    %21 = arith.mulf %19, %20 : vector<8x32xf32>
    %22 = vector.broadcast %3 : vector<1x32xf32> to vector<8x32xf32>
    %23 = arith.addf %21, %22 : vector<8x32xf32>
    %24 = arith.truncf %23 : vector<8x32xf32> to vector<8x32xbf16>
    %c0_10 = arith.constant 0 : index
    %c0_11 = arith.constant 0 : index
    %25 = vector.load %arg4[%c0_10, %c0_11] : memref<32x4xbf16, #tpu.memory_space<vmem>>, vector<32x4xbf16>
    %cst_12 = arith.constant dense<0.000000e+00> : vector<8x4xf32>
    %26 = tpu.matmul %24, %25, %cst_12 {dimension_numbers = #tpu.dot_dimension_numbers<[1], [0], [0], [1], [0, 0, 1, 1], [], []>} : vector<8x32xbf16>, vector<32x4xbf16>, vector<8x4xf32> -> vector<8x4xf32>
    %c0_13 = arith.constant 0 : index
    %c0_14 = arith.constant 0 : index
    %27 = vector.load %arg5[%c0_13, %c0_14] : memref<1x4xf32, #tpu.memory_space<vmem>>, vector<1x4xf32>
    %28 = vector.broadcast %27 : vector<1x4xf32> to vector<8x4xf32>
    %29 = arith.addf %26, %28 : vector<8x4xf32>
    %c0_15 = arith.constant 0 : index
    %c0_16 = arith.constant 0 : index
    %c0_17 = arith.constant 0 : index
    %30 = vector.load %arg6[%c0_15, %c0_16, %c0_17] : memref<1x8x4xf32, #tpu.memory_space<vmem>>, vector<1x8x4xf32>
    %31 = vector.shape_cast %30 : vector<1x8x4xf32> to vector<8x4xf32>
    %32 = vector.shape_cast %29 : vector<8x4xf32> to vector<1x8x4xf32>
    tpu.vector_store %arg6[%c0_15, %c0_16, %c0_17], %32 {strides = array<i32>} : memref<1x8x4xf32, #tpu.memory_space<vmem>>, vector<1x8x4xf32>,
    return
  }
  func.func @transform_0(%arg0: i32) -> (i32, i32, i32) {
    %c0_i32 = arith.constant 0 : i32
    %c0_i32_0 = arith.constant 0 : i32
    %c0_i32_1 = arith.constant 0 : i32
    return %arg0, %c0_i32, %c0_i32_0 : i32, i32, i32
  }
  func.func @transform_1(%arg0: i32) -> (i32, i32) {
    %c0_i32 = arith.constant 0 : i32
    %c0_i32_0 = arith.constant 0 : i32
    %c0_i32_1 = arith.constant 0 : i32
    return %c0_i32, %c0_i32_0 : i32, i32
  }
  func.func @transform_2(%arg0: i32) -> (i32, i32) {
    %c0_i32 = arith.constant 0 : i32
    %c0_i32_0 = arith.constant 0 : i32
    %c0_i32_1 = arith.constant 0 : i32
    return %c0_i32, %c0_i32_0 : i32, i32
  }
  func.func @transform_3(%arg0: i32) -> (i32, i32) {
    %c0_i32 = arith.constant 0 : i32
    %c0_i32_0 = arith.constant 0 : i32
    %c0_i32_1 = arith.constant 0 : i32
    return %c0_i32, %c0_i32_0 : i32, i32
  }
  func.func @transform_4(%arg0: i32) -> (i32, i32) {
    %c0_i32 = arith.constant 0 : i32
    %c0_i32_0 = arith.constant 0 : i32
    %c0_i32_1 = arith.constant 0 : i32
    return %c0_i32, %c0_i32_0 : i32, i32
  }
  func.func @transform_5(%arg0: i32) -> (i32, i32, i32) {
    %c0_i32 = arith.constant 0 : i32
    %c0_i32_0 = arith.constant 0 : i32
    %c0_i32_1 = arith.constant 0 : i32
    return %arg0, %c0_i32, %c0_i32_0 : i32, i32, i32
  }
}

</mosaic_0001>

<bundles_post_ra>
// kernel: _lambda_.8
= control target key start
LH: loop header
LB: loop body
LE: loop exit
PB: predicated region body
PF: predicated region fallthrough
CT: control target
= control target key end

     0   :  { %s499_s15 = smov 0   ;;  %s533_s0 = inlined_call_operand.vmem [shape: f32[2,16,4], index: 0, kind: input, shape index: {}]   ;;  %s534_s1 = inlined_call_operand.vmem [shape: f32[12,32], index: 1, kind: input, shape index: {}]   ;;  %s535_s2 = inlined_call_operand.vmem [shape: f32[1,32], index: 2, kind: input, shape index: {}]   ;;  %s536_s3 = inlined_call_operand.vmem [shape: f32[2,16,32], index: 3, kind: input, shape index: {}]   ;;  %s537_s4 = inlined_call_operand.vmem [shape: f32[2,16,32], index: 4, kind: output, shape index: {}]  }
   0x1 LB: > { %s423_s16 = sadd.s32 4294967295, %s470_s15   ;;  %p427_p0 = scmp.ge.s32.totalorder %s470_s15, 1  ;;  %s470_s15 = sphi %s499_s15, %s14_s15  }
   0x2   : > { %p172_p1 = scmp.lt.s32.totalorder %s470_s15, 3 }
   0x4   : > { %p173_p2 = pnand %p427_p0, %p172_p1 }
   0x5   : > { %p203_p3 = scmp.lt.s32.totalorder (!%p173_p2), %s423_s16, 1  ;;  %s472_s25 = smov (!%p173_p2), 4  }
   0x6   : > { %176 = sbr.rel (%p173_p2) target bundleno = 339 (0x153), region = 36  ;;  %s473_s26 = smov (!%p173_p2), 8  }
   0xb   : > { %v222_v0 = vlaneseq  ;;  %v255_v1 = vld [vmem:[%s534_s1 + $0x8] sm:$0xf]  ;;  %vm270_vm0 = vcmask 1043456   ;;  %v254_v2 = vld [vmem:[%s534_s1] sm:$0xff]  ;;  %s539_s16 = smov (!%p203_p3, %s423_s16), 1  ;;  %vm248_vm3 = vcmask 31744  }
   0xc   : > { %447 = vmatprep.subr.msk.mxu0 %vm270_vm0, %v255_v1  ;;  %s513_s21 = sshll.u32 %s539_s16, 4  ;;  %vm251_vm4 = vcmask 64512   ;;  %vm263_vm5 = vcmask 97280   ;;  %v434_v22 = vld [vmem:[%s535_s2] ss:$0 sm:$0xff]  ;;  %vm353_vm6 = vcmask 261120  }
   0xd   : > { %v223_v3 = vshrl.u32 %v222_v0, 7  ;;  %448 = vmatpush3.msk.msra.mxu0 %vm270_vm0, %v255_v1  ;;  %s207_s24 = scalar_lea.vmem %s533_s0, %s513_s21  ;;  %s212_s29 = scalar_lea.vmem %s536_s3, %s513_s21 }
   0xe   : > { %449 = vmatprep.subr.mxu0 %v254_v2  ;;  %v218_v4 = vld [vmem:[%s207_s24] sm:$0xff]  ;;  %v219_v5 = vld [vmem:[%s207_s24 + $0x8] sm:$0xff]  ;;  %s217_s8 = scalar_lea.vmem %s537_s4, %s513_s21 }
   0xf   : > { %450 = vmatpush3.msra.mxu0 %v254_v2  ;;  %vm229_vm1 = vcmp.lt.s32.totalorder %v223_v3, 7  ;;  %vm224_vm2 = vcmp.lt.s32.totalorder %v223_v3, 1  ;;  %v221_v6 = vrot.slane %v219_v5, 7  ;;  %234 = vrot.lane.b32.xlu0 %v218_v4, %s472_s25  ;;  %v220_v7 = vrot.slane %v218_v4, 7  ;;  %v350_v24 = vld [vmem:[%s212_s29 + $0x8] sm:$0xff]  ;;  %v349_v27 = vld [vmem:[%s212_s29] sm:$0xff] }
  0x10   : > { %v227_v8 = vrot.slane %v218_v4, 1  ;;  %v228_v9 = vrot.slane %v219_v5, 1 }
  0x11   : > { %v226_v11 = vsel %vm224_vm2, %v221_v6, %v220_v7  ;;  %v225_v12 = vsel %vm224_vm2, %v220_v7, %v221_v6 }
  0x12   : > { %v230_v10 = vsel %vm229_vm1, %v227_v8, %v228_v9  ;;  %v231_v13 = vsel %vm229_vm1, %v228_v9, %v227_v8 }
  0x13   : > { %242 = vrot.lane.b32.xlu1 %v230_v10, %s473_s26  ;;  %236 = vrot.lane.b32.xlu0 %v219_v5, %s472_s25 }
  0x17   : > { %244 = vrot.lane.b32.xlu1 %v231_v13, %s473_s26 }
  0x81   : > { %v235_v14 = vpop.permute.xlu0 %234 }
  0x82   : > { %v249_v15 = vsel %vm248_vm3, %v226_v11, %v235_v14 }
  0x85   : > { %v243_v16 = vpop.permute.xlu1 %242  ;;  %v237_v18 = vpop.permute.xlu0 %236 }
  0x86   : > { %v252_v17 = vsel %vm251_vm4, %v249_v15, %v243_v16  ;;  %v250_v19 = vsel %vm248_vm3, %v225_v12, %v237_v18 }
  0x87   : > { %451 = vmatprep.mubr.msk.f32.mxu0 %vm263_vm5, %v252_v17 }
  0x89   : > { %v245_v20 = vpop.permute.xlu1 %244 }
  0x8a   : > { %v253_v21 = vsel %vm251_vm4, %v250_v19, %v245_v20 }
  0x8b   : > { %452 = vmatmul.mubr.msk.f32.vlgmr.msra.gmra.mxu0 %vm263_vm5, %v253_v21 }
 0x14b   : > { %v453_v23 = vpop.f32.mrf.mxu0 }
 0x14c   : > { %v346_v25 = vadd.f32 %v453_v23, %v434_v22 }
 0x14d   : > { %v340_v26 = vpop.f32.mrf.mxu0 }
 0x14e   : > { %v352_v28 = vadd.f32 %v350_v24, %v346_v25  ;;  %v341_v29 = vadd.f32 %v434_v22, %v340_v26 }
 0x150   : > { %355 = vst.msk [vmem:[%s217_s8 + $0x8] sm:$0xff] %vm353_vm6, %v352_v28  ;;  %v351_v30 = vadd.f32 %v349_v27, %v341_v29 }
 0x152   : > { %354 = vst.msk [vmem:[%s217_s8] sm:$0xff] %vm353_vm6, %v351_v30 }
 0x153 PF: > { %s14_s15 = sadd.s32 1, %s470_s15  }
 0x154   : > { %p11_p4 = scmp.ge.s32.totalorder %s14_s15, 4  }
 0x156   :  { %13 = sbr.rel (!%p11_p4) target bundleno = 1 (0x1), region = 69 }

// kernel: _lambda_.11
= control target key start
LH: loop header
LB: loop body
LE: loop exit
PB: predicated region body
PF: predicated region fallthrough
CT: control target
= control target key end

     0   :  { %s435_s18 = smov 0   ;;  %s474_s0 = inlined_call_operand.vmem [shape: f32[2,16,32], index: 0, kind: input, shape index: {}]   ;;  %s475_s1 = inlined_call_operand.vmem [shape: f32[2,1,32], index: 1, kind: input, shape index: {}]   ;;  %s476_s2 = inlined_call_operand.vmem [shape: f32[2,1,32], index: 2, kind: input, shape index: {}]   ;;  %s477_s3 = inlined_call_operand.vmem [shape: f32[1,32], index: 3, kind: input, shape index: {}]   ;;  %s478_s4 = inlined_call_operand.vmem [shape: f32[1,32], index: 4, kind: input, shape index: {}]   ;;  %s479_s5 = inlined_call_operand.vmem [shape: f32[2,8,32], index: 5, kind: output, shape index: {}]  }
   0x1 LB: > { %s368_s19 = sadd.s32 4294967295, %s403_s18   ;;  %p372_p0 = scmp.ge.s32.totalorder %s403_s18, 1  ;;  %s403_s18 = sphi %s435_s18, %s15_s18  }
   0x2   : > { %p187_p1 = scmp.lt.s32.totalorder %s403_s18, 3 }
   0x4   : > { %p188_p2 = pnand %p372_p0, %p187_p1 }
   0x5   : > { %p214_p3 = scmp.lt.s32.totalorder (!%p188_p2), %s368_s19, 1 }
   0x6   : > { %191 = sbr.rel (%p188_p2) target bundleno = 84 (0x54), region = 40 }
   0xb   : > { %v225_v0 = vld [vmem:[%s475_s1] sm:$0x1]  ;;  %v226_v1 = vld [vmem:[%s475_s1 + $0x1] sm:$0x1]  ;;  %vm227_vm0 = vcmask 253952   ;;  %v240_v14 = vlaneseq  ;;  %s481_s19 = smov (!%p214_p3, %s368_s19), 1 }
   0xc   : > { %v228_v2 = vsel %vm227_vm0, %v225_v0, 0.0  ;;  %v229_v3 = vsel %vm227_vm0, %v226_v1, 0.0  ;;  %v232_v4 = vld [vmem:[%s476_s2] sm:$0x1]  ;;  %v233_v5 = vld [vmem:[%s476_s2 + $0x1] sm:$0x1] }
   0xd   : > { %v230_v6 = vadd.f32 %v229_v3, %v228_v2  ;;  %v234_v7 = vsel %vm227_vm0, %v232_v4, 0.0  ;;  %v235_v8 = vsel %vm227_vm0, %v233_v5, 0.0  ;;  %v241_v16 = vshrl.u32 %v240_v14, 7  ;;  %s382_s28 = sshll.u32 %s481_s19, 4  ;;  %v376_v25 = vld [vmem:[%s477_s3] ss:$0 sm:$0xff] }
   0xe   : > { %v236_v9 = vadd.f32 %v235_v8, %v234_v7  ;;  %s218_s6 = scalar_lea.vmem %s474_s0, %s382_s28  ;;  %v377_v28 = vld [vmem:[%s478_s4] ss:$0 sm:$0xff]  ;;  %vm304_vm3 = vcmask 254976   ;;  %vm300_vm6 = vcmask 261120   ;;  %s375_s11 = sshll.u32 %s481_s19, 3  ;;  %vm312_vm7 = vcmask 1040384  }
   0xf   : > { %v231_v10 = vmul.f32 0.03125, %v230_v6  ;;  %v242_v17 = vsub.s32 0, %v241_v16  ;;  %v223_v19 = vld [vmem:[%s218_s6] sm:$0xff]  ;;  %v224_v20 = vld [vmem:[%s218_s6 + $0x8] sm:$0xff]  ;;  %vm288_vm4 = vcmp.lt.s32.totalorder %v241_v16, 1  ;;  %vm295_vm5 = vcmp.lt.s32.totalorder %v241_v16, 7  ;;  %s222_s14 = scalar_lea.vmem %s479_s5, %s375_s11 }
  0x10   : > { %v237_v11 = vmul.f32 0.03125, %v236_v9 }
  0x11   : > { %v238_v12 = vmul.f32 %v231_v10, %v231_v10  ;;  %v243_v18 = vrot.slane %v231_v10, %v242_v17 }
  0x13   : > { %v239_v13 = vsub.f32 %v237_v11, %v238_v12  ;;  %v244_v21 = vsub.f32 %v223_v19, %v243_v18  ;;  %v245_v22 = vsub.f32 %v224_v20, %v243_v18 }
  0x15   : > { %v246_v15 = vadd.f32 1e-05, %v239_v13 }
  0x17   : > { %391 = vrsqrt.f32 %v246_v15 }
  0x24   : > { %v392_v23 = vpop.eup %391 }
  0x25   : > { %v251_v24 = vrot.slane %v392_v23, %v242_v17 }
  0x27   : > { %v252_v26 = vmul.f32 %v251_v24, %v244_v21  ;;  %v253_v27 = vmul.f32 %v251_v24, %v245_v22 }
  0x29   : > { %v261_v29 = vmul.f32 %v376_v25, %v252_v26  ;;  %v262_v30 = vmul.f32 %v376_v25, %v253_v27 }
  0x2b   : > { %v270_v31 = vadd.f32 %v377_v28, %v261_v29  ;;  %v271_v32 = vadd.f32 %v377_v28, %v262_v30 }
  0x2d   : > { %v274_v33 = vmin.f32 %v270_v31, 0.0  ;;  %v275_v34 = vmin.f32 %v271_v32, 0.0  ;;  %vm272_vm1 = vcmp.gt.f32.partialorder %v270_v31, 0.0  ;;  %vm273_vm2 = vcmp.gt.f32.partialorder %v271_v32, 0.0 }
  0x2f   : > { %v276_v35 = vmul.f32 1.442695, %v274_v33  ;;  %v278_v36 = vmul.f32 1.442695, %v275_v34 }
  0x31   : > { %393 = vpow2.f32 %v276_v35 }
  0x32   : > { %395 = vpow2.f32 %v278_v36 }
  0x3e   : > { %v394_v37 = vpop.eup %393 }
  0x3f   : > { %v396_v38 = vpop.eup %395  ;;  %v378_v39 = vadd.f32 -1.0, %v394_v37 }
  0x40   : > { %v379_v40 = vadd.f32 -1.0, %v396_v38 }
  0x41   : > { %v282_v41 = vsel %vm272_vm1, %v270_v31, %v378_v39 }
  0x42   : > { %v283_v42 = vsel %vm273_vm2, %v271_v32, %v379_v40  ;;  %v284_v43 = vrot.slane %v282_v41, 7  ;;  %v293_v44 = vrot.slane %v282_v41, 1  ;;  %v305_v45 = vsel %vm304_vm3, %v282_v41, -inf }
  0x43   : > { %v285_v46 = vrot.slane %v283_v42, 7  ;;  %v294_v47 = vrot.slane %v283_v42, 1  ;;  %v306_v48 = vrot.slane %v305_v45, 4 }
  0x45   : > { %v290_v49 = vsel %vm288_vm4, %v285_v46, %v284_v43  ;;  %v296_v50 = vsel %vm295_vm5, %v293_v44, %v294_v47  ;;  %v289_v51 = vsel %vm288_vm4, %v284_v43, %v285_v46  ;;  %v297_v52 = vsel %vm295_vm5, %v294_v47, %v293_v44 }
  0x46   : > { %v291_v53 = vmax.f32 %v290_v49, %v282_v41  ;;  %v292_v54 = vmax.f32 %v289_v51, %v283_v42  ;;  %v307_v55 = vmax.f32 %v305_v45, %v306_v48 }
  0x48   : > { %v298_v56 = vmax.f32 %v291_v53, %v296_v50  ;;  %v299_v57 = vmax.f32 %v292_v54, %v297_v52  ;;  %v308_v58 = vrot.slane %v307_v55, 2 }
  0x4a   : > { %301 = vst.msk [vmem:[#allocation2] sm:$0xff] %vm300_vm6, %v298_v56  ;;  %302 = vst.msk [vmem:[#allocation2 + $0x8] sm:$0xff] %vm300_vm6, %v299_v57  ;;  %v309_v59 = vmax.f32 %v307_v55, %v308_v58 }
  0x4c   : > { %v310_v60 = vrot.slane %v309_v59, 1 }
  0x4e   : > { %v311_v61 = vmax.f32 %v309_v59, %v310_v60 }
  0x51   : > { %v303_v62 = vld [vmem:[#allocation2] ss:$2 sm:$0xff] }
  0x52   : > { %v313_v63 = vsel %vm312_vm7, %v311_v61, %v303_v62 }
  0x53   : > { %314 = vst.msk [vmem:[%s222_s14] sm:$0xff] %vm300_vm6, %v313_v63 }
  0x54 PF: > { %s15_s18 = sadd.s32 1, %s403_s18  }
  0x55   : > { %p12_p4 = scmp.ge.s32.totalorder %s15_s18, 4  }
  0x57   :  { %14 = sbr.rel (!%p12_p4) target bundleno = 1 (0x1), region = 70 }

// kernel: _lambda_.10
= control target key start
LH: loop header
LB: loop body
LE: loop exit
PB: predicated region body
PF: predicated region fallthrough
CT: control target
= control target key end

     0   :  { %s624_s18 = smov 0   ;;  %s687_s0 = inlined_call_operand.vmem [shape: f32[2,16,32], index: 0, kind: input, shape index: {}]   ;;  %s688_s1 = inlined_call_operand.vmem [shape: bf16[96,32], index: 1, kind: input, shape index: {}]   ;;  %s689_s2 = inlined_call_operand.vmem [shape: f32[1,32], index: 2, kind: input, shape index: {}]   ;;  %s690_s3 = inlined_call_operand.vmem [shape: f32[2,16,32], index: 3, kind: output, shape index: {0}]   ;;  %s691_s4 = inlined_call_operand.vmem [shape: f32[2,1,32], index: 4, kind: output, shape index: {1}]   ;;  %s692_s5 = inlined_call_operand.vmem [shape: f32[2,1,32], index: 5, kind: output, shape index: {2}]  }
   0x1 LB: > { %s510_s19 = sadd.s32 4294967295, %s588_s18   ;;  %p514_p0 = scmp.ge.s32.totalorder %s588_s18, 1  ;;  %s588_s18 = sphi %s624_s18, %s16_s18  }
   0x2   : > { %p192_p1 = scmp.lt.s32.totalorder %s588_s18, 3 }
   0x4   : > { %p193_p2 = pnand %p514_p0, %p192_p1 }
   0x5   : > { %p226_p3 = scmp.lt.s32.totalorder (!%p193_p2), %s510_s19, 1  ;;  %s592_s30 = smov (!%p193_p2), 32  }
   0x6   : > { %196 = sbr.rel (%p193_p2) target bundleno = 359 (0x167), region = 32  ;;  %s593_s8 = smov (!%p193_p2), 64  }
   0xb   : > { %v247_v0 = vlaneseq  ;;  %v576_v1 = vld [vmem:[%s688_s1 + $0x28] sm:$0xff]   ;;  %v590_v2 = vmov 0.0   ;;  %v577_v3 = vld [vmem:[%s688_s1 + $0x20] sm:$0xff]   ;;  %s694_s19 = smov (!%p226_p3, %s510_s19), 1  ;;  %v578_v5 = vld [vmem:[%s688_s1 + $0x18] sm:$0xff]   ;;  %vm591_vm2 = vmmov 0  }
   0xc   : > { %538 = vmatprep.subr.bf16.mxu0 %v590_v2  ;;  %s529_s24 = sshll.u32 %s694_s19, 4  ;;  %550 = vmatprep.mubr.msk.bf16.mxu0 %vm591_vm2, %v590_v2  ;;  %v579_v17 = vld [vmem:[%s688_s1 + $0x10] sm:$0xff]   ;;  %v580_v19 = vld [vmem:[%s688_s1 + $0x8] sm:$0xff]   ;;  %v581_v20 = vld [vmem:[%s688_s1] sm:$0xff]   ;;  %vm273_vm3 = vcmask 261120   ;;  %vm276_vm4 = vcmask 523264   ;;  %s238_s22 = scalar_lea.vmem %s691_s4, %s694_s19 }
   0xd   : > { %v248_v4 = vshrl.u32 %v247_v0, 7  ;;  %539 = vmatpush3.bf16.msra.mxu0 %v576_v1  ;;  %s230_s27 = scalar_lea.vmem %s687_s0, %s529_s24  ;;  %vm335_vm5 = vcmask 785408   ;;  %v519_v32 = vld [vmem:[%s689_s2] ss:$0 sm:$0xff]  ;;  %s235_s17 = scalar_lea.vmem %s690_s3, %s529_s24  ;;  %vm391_vm6 = vcmask 253952  }
   0xe   : > { %540 = vmatprep.subr.bf16.mxu0 %v590_v2  ;;  %v243_v6 = vld [vmem:[%s230_s27] sm:$0xff]  ;;  %v244_v7 = vld [vmem:[%s230_s27 + $0x8] sm:$0xff]  ;;  %s241_s25 = scalar_lea.vmem %s692_s5, %s694_s19 }
   0xf   : > { %vm254_vm0 = vcmp.lt.s32.totalorder %v248_v4, 7  ;;  %vm249_vm1 = vcmp.lt.s32.totalorder %v248_v4, 1  ;;  %v246_v8 = vrot.slane %v244_v7, 7  ;;  %v253_v9 = vrot.slane %v244_v7, 1 }
  0x10   : > { %v566_v10 = vpack.i.bf16 %v244_v7, %v243_v6  ;;  %v245_v11 = vrot.slane %v243_v6, 7  ;;  %v252_v12 = vrot.slane %v243_v6, 1 }
  0x11   : > { %541 = vmatpush3.bf16.msra.mxu0 %v577_v3 }
  0x12   : > { %542 = vmatprep.subr.bf16.mxu0 %v590_v2  ;;  %567 = vrot.lane.b32.xlu0 %v566_v10, %s592_s30  ;;  %v250_v13 = vsel %vm249_vm1, %v245_v11, %v246_v8  ;;  %v251_v14 = vsel %vm249_vm1, %v246_v8, %v245_v11  ;;  %v255_v15 = vsel %vm254_vm0, %v252_v12, %v253_v9 }
  0x13   : > { %v256_v16 = vsel %vm254_vm0, %v253_v9, %v252_v12 }
  0x14   : > { %v571_v18 = vpack.i.bf16 %v256_v16, %v255_v15 }
  0x15   : > { %543 = vmatpush3.bf16.msra.mxu0 %v578_v5 }
  0x16   : > { %544 = vmatprep.subr.bf16.mxu0 %v590_v2  ;;  %572 = vrot.lane.b32.xlu0 %v571_v18, %s593_s8 }
  0x19   : > { %545 = vmatpush3.bf16.msra.mxu0 %v579_v17 }
  0x1a   : > { %546 = vmatprep.subr.bf16.mxu0 %v590_v2 }
  0x1d   : > { %547 = vmatpush3.bf16.msra.mxu0 %v580_v19 }
  0x1e   : > { %548 = vmatprep.subr.bf16.mxu0 %v590_v2 }
  0x21   : > { %549 = vmatpush3.bf16.msra.mxu0 %v581_v20 }
  0x84   : > { %v568_v21 = vpop.permute.xlu0 %567 }
  0x85   : > { %v570_v22 = vunpack.i.h.bf16 %v568_v21  ;;  %v569_v23 = vunpack.i.l.bf16 %v568_v21 }
  0x87   : > { %v274_v27 = vsel %vm273_vm3, %v251_v14, %v569_v23  ;;  %v275_v28 = vsel %vm273_vm3, %v250_v13, %v570_v22 }
  0x88   : > { %v573_v24 = vpop.permute.xlu0 %572 }
  0x89   : > { %v575_v25 = vunpack.i.h.bf16 %v573_v24  ;;  %v574_v26 = vunpack.i.l.bf16 %v573_v24 }
  0x8b   : > { %v277_v29 = vsel %vm276_vm4, %v274_v27, %v574_v26  ;;  %v278_v30 = vsel %vm276_vm4, %v275_v28, %v575_v25 }
  0x8c   : > { %v279_v31 = vpack.c.bf16 %v278_v30, %v277_v29 }
  0x8e   : > { %551 = vmatmul.mubr.msk.bf16.vlgmr.msra.gmra.mxu0 %vm335_vm5, %v279_v31 }
 0x14e   : > { %v373_v33 = vpop.f32.mrf.mxu0 }
 0x14f   : > { %v374_v34 = vadd.f32 %v519_v32, %v373_v33 }
 0x150   : > { %v552_v35 = vpop.f32.mrf.mxu0 }
 0x151   : > { %380 = vst.msk [vmem:[%s235_s17] sm:$0xff] %vm273_vm3, %v374_v34  ;;  %v393_v37 = vmul.f32 %v374_v34, %v374_v34  ;;  %v382_v40 = vsel %vm273_vm3, %v374_v34, 0.0 }
 0x152   : > { %v376_v36 = vpop.f32.mrf.mxu0 }
 0x153   : > { %v377_v38 = vadd.f32 %v519_v32, %v376_v36  ;;  %v395_v44 = vsel %vm273_vm3, %v393_v37, 0.0 }
 0x154   : > { %v553_v39 = vpop.f32.mrf.mxu0 }
 0x155   : > { %381 = vst.msk [vmem:[%s235_s17 + $0x8] sm:$0xff] %vm273_vm3, %v377_v38  ;;  %v383_v41 = vsel %vm273_vm3, %v377_v38, 0.0  ;;  %v394_v42 = vmul.f32 %v377_v38, %v377_v38 }
 0x156   : > { %v384_v43 = vadd.f32 %v383_v41, %v382_v40 }
 0x157   : > { %v396_v45 = vsel %vm273_vm3, %v394_v42, 0.0 }
 0x158   : > { %v385_v46 = vrot.slane %v384_v43, 4  ;;  %v397_v47 = vadd.f32 %v396_v45, %v395_v44 }
 0x15a   : > { %v386_v48 = vadd.f32 %v385_v46, %v384_v43  ;;  %v398_v49 = vrot.slane %v397_v47, 4 }
 0x15c   : > { %v387_v50 = vrot.slane %v386_v48, 2  ;;  %v399_v51 = vadd.f32 %v398_v49, %v397_v47 }
 0x15e   : > { %v388_v52 = vadd.f32 %v387_v50, %v386_v48  ;;  %v400_v53 = vrot.slane %v399_v51, 2 }
 0x160   : > { %v389_v54 = vrot.slane %v388_v52, 1  ;;  %v401_v55 = vadd.f32 %v400_v53, %v399_v51 }
 0x162   : > { %v390_v56 = vadd.f32 %v389_v54, %v388_v52  ;;  %v402_v57 = vrot.slane %v401_v55, 1 }
 0x164   : > { %392 = vst.msk [vmem:[%s238_s22] sm:$0x1] %vm391_vm6, %v390_v56  ;;  %v403_v58 = vadd.f32 %v402_v57, %v401_v55 }
 0x166   : > { %404 = vst.msk [vmem:[%s241_s25] sm:$0x1] %vm391_vm6, %v403_v58 }
 0x167 PF: > { %s16_s18 = sadd.s32 1, %s588_s18  }
 0x168   : > { %p13_p4 = scmp.ge.s32.totalorder %s16_s18, 4  }
 0x16a   :  { %15 = sbr.rel (!%p13_p4) target bundleno = 1 (0x1), region = 86 }

// kernel: _lambda_.9
= control target key start
LH: loop header
LB: loop body
LE: loop exit
PB: predicated region body
PF: predicated region fallthrough
CT: control target
= control target key end

     0   :  { %s2898_s0 = inlined_call_operand.vmem [shape: f32[2,16,32], index: 0, kind: input, shape index: {}]   ;;  %s2899_s1 = inlined_call_operand.vmem [shape: bf16[32,32], index: 1, kind: input, shape index: {}]   ;;  %s2900_s2 = inlined_call_operand.vmem [shape: f32[1,32], index: 2, kind: input, shape index: {}]   ;;  %s2901_s3 = inlined_call_operand.vmem [shape: bf16[32,32], index: 3, kind: input, shape index: {}]   ;;  %s2902_s4 = inlined_call_operand.vmem [shape: f32[1,32], index: 4, kind: input, shape index: {}]   ;;  %s2903_s5 = inlined_call_operand.vmem [shape: bf16[32,32], index: 5, kind: input, shape index: {}]   ;;  %s2904_s6 = inlined_call_operand.vmem [shape: f32[1,32], index: 6, kind: input, shape index: {}]   ;;  %s2905_s7 = inlined_call_operand.vmem [shape: bf16[4,8,32], index: 7, kind: input, shape index: {}]   ;;  %s2906_s8 = inlined_call_operand.vmem [shape: f32[1,32], index: 8, kind: input, shape index: {}]   ;;  %s2907_s9 = inlined_call_operand.vmem [shape: f32[1,32], index: 9, kind: input, shape index: {}]   ;;  %s2908_s10 = inlined_call_operand.vmem [shape: f32[1,32], index: 10, kind: input, shape index: {}]   ;;  %s2909_s11 = inlined_call_operand.vmem [shape: bf16[32,64], index: 11, kind: input, shape index: {}]   ;;  %s2910_s12 = inlined_call_operand.vmem [shape: f32[1,64], index: 12, kind: input, shape index: {}]   ;;  %s2911_s13 = inlined_call_operand.vmem [shape: bf16[64,32], index: 13, kind: input, shape index: {}]   ;;  %s2912_s14 = inlined_call_operand.vmem [shape: f32[1,32], index: 14, kind: input, shape index: {}]   ;;  %s2913_s15 = inlined_call_operand.vmem [shape: f32[1,32], index: 15, kind: input, shape index: {}, may-alias: {15,17}]   ;;  %s2914_s16 = inlined_call_operand.vmem [shape: f32[1,32], index: 16, kind: input, shape index: {}, may-alias: {16,18}]   ;;  %s2915_s17 = inlined_call_operand.vmem [shape: f32[1,32], index: 17, kind: input, shape index: {}, may-alias: {15,17}]   ;;  %s2916_s18 = inlined_call_operand.vmem [shape: f32[1,32], index: 18, kind: input, shape index: {}, may-alias: {16,18}]   ;;  %s2917_s19 = inlined_call_operand.vmem [shape: f32[2,16,32], index: 19, kind: output, shape index: {}]  }
   0x1   :  { %2920 = sst [smem:[#allocation2_spill]] %s2898_s0  ;;  %s2609_s0 = smov 0  }
   0x2   :  { %2921 = sst [smem:[#allocation3_spill]] %s2899_s1 }
   0x3   :  { %2922 = sst [smem:[#allocation4_spill]] %s2900_s2 }
   0x4   :  { %2923 = sst [smem:[#allocation5_spill]] %s2901_s3 }
   0x5 LB: > { %s2169_s30 = sadd.s32 4294967295, %s2501_s0   ;;  %p2173_p0 = scmp.ge.s32.totalorder %s2501_s0, 1  ;;  %s2501_s0 = sphi %s2609_s0, %s29_s0  }
   0x6   : > { %p537_p1 = scmp.lt.s32.totalorder %s2501_s0, 3 }
   0x8   : > { %p538_p2 = pnand %p2173_p0, %p537_p1 }
   0x9   : > { %s2924_s20 = sld [smem:[#allocation5_spill]] (!%p538_p2)  ;;  %p593_p3 = scmp.lt.s32.totalorder (!%p538_p2), %s2169_s30, 1 }
   0xa   : > { %541 = sbr.rel (%p538_p2) target bundleno = 3558 (0xde6), region = 96  ;;  %s2925_s22 = sld [smem:[#allocation3_spill]] (!%p538_p2) }
   0xb   : > { %s2926_s28 = sld [smem:[#allocation2_spill]] (!%p538_p2)  ;;  %s2505_s25 = smov (!%p538_p2), 120  }
   0xc   : > { %s2927_s24 = sld [smem:[#allocation4_spill]] (!%p538_p2)  ;;  %s2506_s17 = smov (!%p538_p2), 112  }
   0xd   : > { %s2507_s23 = smov (!%p538_p2), 104  }
   0xf   : > { %v2435_v0 = vld [vmem:[%s2924_s20 + $0x8] sm:$0xff]   ;;  %v2503_v1 = vmov 0.0   ;;  %v2437_v3 = vld [vmem:[%s2924_s20] sm:$0xff]   ;;  %vm2504_vm0 = vmmov 0   ;;  %s2929_s30 = smov (!%p593_p3, %s2169_s30), 1  ;;  %vm630_vm1 = vcmask 261120  }
  0x10   : > { %2305 = vmatprep.subr.bf16.mxu1 %v2503_v1  ;;  %2297 = vmatprep.subr.bf16.mxu0 %v2503_v1  ;;  %v2436_v2 = vld [vmem:[%s2925_s22 + $0x8] sm:$0xff]   ;;  %v2438_v4 = vld [vmem:[%s2925_s22] sm:$0xff]   ;;  %s2238_s3 = sshll.u32 %s2929_s30, 4  ;;  %vm803_vm2 = vcmask 64512   ;;  %vm891_vm3 = vcmask 130048   ;;  %vm1205_vm4 = vcmask 1043456  }
  0x11   : > { %2306 = vmatpush3.bf16.msra.mxu1 %v2435_v0  ;;  %2309 = vmatprep.mubr.msk.bf16.mxu1 %vm2504_vm0, %v2503_v1  ;;  %s597_s29 = scalar_lea.vmem %s2926_s28, %s2238_s3  ;;  %v2439_v8 = vld [vmem:[%s2903_s5 + $0x8] sm:$0xff]   ;;  %v2440_v9 = vld [vmem:[%s2903_s5] sm:$0xff]   ;;  %vm2012_vm7 = vcmask 523264   ;;  %s602_s21 = scalar_lea.vmem %s2917_s19, %s2238_s3 }
  0x12   : > { %2298 = vmatpush3.bf16.msra.mxu0 %v2436_v2  ;;  %2307 = vmatprep.subr.bf16.mxu1 %v2503_v1  ;;  %v2645_v5 = vld [vmem:[%s597_s29] sm:$0xff]  ;;  %v2647_v6 = vld [vmem:[%s597_s29 + $0x8] sm:$0xff] }
  0x13   : > { %2299 = vmatprep.subr.bf16.mxu0 %v2503_v1  ;;  %2301 = vmatprep.mubr.msk.bf16.mxu0 %vm2504_vm0, %v2503_v1  ;;  %v606_v7 = vpack.c.bf16 %v2647_v6, %v2645_v5  ;;  %v2178_v10 = vld [vmem:[%s2927_s24] ss:$0 sm:$0xff]  ;;  %v2202_v58 = vld [vmem:[%s2905_s7 + $0x4] sm:$0xf] }
  0x14   : > { %v2182_v16 = vld [vmem:[%s2902_s4] ss:$0 sm:$0xff]  ;;  %v1207_v62 = vsel %vm1205_vm4, %v2202_v58, 0 }
  0x15   : > { %2308 = vmatpush3.bf16.msra.mxu1 %v2437_v3  ;;  %v2186_v25 = vld [vmem:[%s2904_s6] ss:$0 sm:$0xff] }
  0x16   : > { %2300 = vmatpush3.bf16.msra.mxu0 %v2438_v4 }
  0x17   : > { %2313 = vmatprep.subr.bf16.mxu0 %v2503_v1 }
  0x18   : > { %2310 = vmatmul.mubr.msk.bf16.vlgmr.msra.gmra.mxu1 %vm630_vm1, %v606_v7 }
  0x19   : > { %2302 = vmatmul.mubr.msk.bf16.vlgmr.msra.gmra.mxu0 %vm630_vm1, %v606_v7 }
  0x1a   : > { %2317 = vmatprep.mubr.msk.bf16.mxu0 %vm2504_vm0, %v2503_v1  ;;  %2314 = vmatpush3.bf16.msra.mxu0 %v2439_v8 }
  0x1b   : > { %2315 = vmatprep.subr.bf16.mxu0 %v2503_v1 }
  0x1e   : > { %2316 = vmatpush3.bf16.msra.mxu0 %v2440_v9 }
  0x21   : > { %2318 = vmatmul.mubr.msk.bf16.vlgmr.msra.gmra.mxu0 %vm630_vm1, %v606_v7 }
  0xd8   : > { %v732_v11 = vpop.f32.mrf.mxu1 }
  0xd9   : > { %v668_v12 = vpop.f32.mrf.mxu0  ;;  %v2680_v23 = vadd.f32 %v2182_v16, %v732_v11 }
  0xda   : > { %v2667_v13 = vadd.f32 %v2178_v10, %v668_v12  ;;  %v2311_v14 = vpop.f32.mrf.mxu1 }
  0xdb   : > { %v2303_v15 = vpop.f32.mrf.mxu0 }
  0xdc   : > { %997 = vrot.lane.b32.xlu1 %v2667_v13, %s2505_s25  ;;  %2325 = vmatprep.mubr.msk.f32.mxu1 %vm803_vm2, %v2667_v13  ;;  %v735_v17 = vpop.f32.mrf.mxu1 }
  0xdd   : > { %v671_v18 = vpop.f32.mrf.mxu0  ;;  %v2676_v19 = vadd.f32 %v2182_v16, %v735_v17 }
  0xde   : > { %v2678_v20 = vadd.f32 %v2178_v10, %v671_v18  ;;  %v2312_v21 = vpop.f32.mrf.mxu1 }
  0xdf   : > { %v2304_v22 = vpop.f32.mrf.mxu0  ;;  %1003 = vrot.lane.b32.xlu0 %v2676_v19, %s2505_s25  ;;  %2321 = vmatprep.subr.msk.mxu1 %vm803_vm2, %v2676_v19 }
  0xe0   : > { %2322 = vmatpush3.xpose.msk.msra.mxu1 %vm803_vm2, %v2676_v19  ;;  %999 = vrot.lane.b32.xlu1 %v2678_v20, %s2505_s25 }
  0xe1   : > { %2323 = vmatprep.subr.msk.mxu1 %vm803_vm2, %v2680_v23  ;;  %v796_v24 = vpop.f32.mrf.mxu0 }
  0xe2   : > { %v2701_v28 = vadd.f32 %v2186_v25, %v796_v24 }
  0xe3   : > { %1001 = vrot.lane.b32.xlu0 %v2680_v23, %s2505_s25  ;;  %v2319_v26 = vpop.f32.mrf.mxu0 }
  0xe4   : > { %2324 = vmatpush3.xpose.msk.msra.mxu1 %vm803_vm2, %v2680_v23 }
  0xe5   : > { %v799_v27 = vpop.f32.mrf.mxu0 }
  0xe6   : > { %v2703_v29 = vadd.f32 %v2186_v25, %v799_v27 }
  0xe7   : > { %2326 = vmatmul.mubr.msk.f32.vlgmr.msra.gmra.mxu1 %vm803_vm2, %v2678_v20  ;;  %v2320_v30 = vpop.f32.mrf.mxu0 }
  0xe8   : > { %2328 = vmatprep.subr.mxu1 %v2703_v29 }
  0xe9   : > { %2329 = vmatpush3.msra.mxu1 %v2703_v29 }
  0xea   : > { %2330 = vmatprep.subr.mxu1 %v2701_v28 }
  0xeb   : > { %2331 = vmatpush3.msra.mxu1 %v2701_v28 }
  0xec   : > { %2355 = vmatprep.subr.bf16.mxu1 %v2503_v1 }
 0x14e   : > { %v998_v31 = vpop.permute.xlu1 %997 }
 0x14f   : > { %2339 = vmatprep.mubr.msk.f32.mxu0 %vm803_vm2, %v998_v31  ;;  %v996_v31 = vld [vmem:[%s2905_s7] sm:$0xf] }
 0x151   : > { %v1004_v32 = vpop.permute.xlu0 %1003 }
 0x152   : > { %2335 = vmatprep.subr.msk.mxu0 %vm803_vm2, %v1004_v32  ;;  %v1000_v34 = vpop.permute.xlu1 %999 }
 0x153   : > { %2336 = vmatpush3.xpose.msk.msra.mxu0 %vm803_vm2, %v1004_v32  ;;  %v1254_v32 = vsel %vm1205_vm4, %v996_v31, 0 }
 0x155   : > { %v1002_v33 = vpop.permute.xlu0 %1001 }
 0x156   : > { %2337 = vmatprep.subr.msk.mxu0 %vm803_vm2, %v1002_v33 }
 0x157   : > { %2338 = vmatpush3.xpose.msk.msra.mxu0 %vm803_vm2, %v1002_v33 }
 0x15a   : > { %2340 = vmatmul.mubr.msk.f32.vlgmr.msra.gmra.mxu0 %vm803_vm2, %v1000_v34 }
 0x1a7   : > { %v2327_v39 = vpop.f32.mrf.mxu1 }
 0x1a8   : > { %v895_v40 = vsel %vm891_vm3, %v2327_v39, -inf }
 0x1a9   : > { %v882_v52 = vpop.f32.mrf.mxu1 }
 0x1aa   : > { %v892_v53 = vsel %vm891_vm3, %v882_v52, -inf }
 0x21a   : > { %v2341_v35 = vpop.f32.mrf.mxu0 }
 0x21b   : > { %v1091_v36 = vsel %vm891_vm3, %v2341_v35, -inf }
 0x21c   : > { %1092 = vmax.xlane.f32.xlu1 %v1091_v36  ;;  %v1079_v37 = vpop.f32.mrf.mxu0 }
 0x21d   : > { %v1088_v38 = vsel %vm891_vm3, %v1079_v37, -inf }
 0x21e   : > { %1089 = vmax.xlane.f32.xlu0 %v1088_v38 }
 0x22d   : > { %1114 = vrot.lane.b32.xlu1 %v2703_v29, %s2505_s25 }
 0x231   : > { %1303 = vrot.lane.b32.xlu1 %v2676_v19, %s2506_s17 }
 0x235   : > { %1301 = vrot.lane.b32.xlu1 %v2680_v23, %s2506_s17 }
 0x239   : > { %1299 = vrot.lane.b32.xlu1 %v2678_v20, %s2506_s17 }
 0x25d   : > { %896 = vmax.xlane.f32.xlu1 %v895_v40 }
 0x2a5   : > { %v1093_v41 = vpop.xlane.xlu1 %1092 }
 0x2a6   : > { %v1095_v42 = vsub.f32 %v2341_v35, %v1093_v41 }
 0x2a7   : > { %v1090_v43 = vpop.xlane.xlu0 %1089 }
 0x2a8   : > { %v1098_v44 = vmul.f32 1.442695, %v1095_v42  ;;  %v1094_v45 = vsub.f32 %v1079_v37, %v1090_v43 }
 0x2a9   : > { %v1115_v46 = vpop.permute.xlu1 %1114 }
 0x2aa   : > { %2447 = vpow2.f32 %v1098_v44  ;;  %v1096_v47 = vmul.f32 1.442695, %v1094_v45  ;;  %2342 = vmatprep.subr.mxu0 %v1115_v46 }
 0x2ab   : > { %2343 = vmatpush3.msra.mxu0 %v1115_v46 }
 0x2ac   : > { %2449 = vpow2.f32 %v1096_v47 }
 0x2ad   : > { %v1304_v63 = vpop.permute.xlu1 %1303 }
 0x2b1   : > { %v1302_v0 = vpop.permute.xlu1 %1301 }
 0x2b5   : > { %v1300_v2 = vpop.permute.xlu1 %1299 }
 0x2b7   : > { %v2448_v48 = vpop.eup %2447 }
 0x2b8   : > { %v1103_v49 = vsel %vm891_vm3, %v2448_v48, 0.0 }
 0x2b9   : > { %v2450_v50 = vpop.eup %2449  ;;  %1104 = vadd.xlane.f32.xlu0 %v1103_v49 }
 0x2ba   : > { %v1100_v51 = vsel %vm891_vm3, %v2450_v50, 0.0 }
 0x2bd   : > { %1101 = vadd.xlane.f32.xlu0 %v1100_v51 }
 0x2d3   : > { %1112 = vrot.lane.b32.xlu0 %v2701_v28, %s2505_s25 }
 0x2d7   : > { %1297 = vrot.lane.b32.xlu0 %v2667_v13, %s2506_s17 }
 0x2e6   : > { %v897_v3 = vpop.xlane.xlu1 %896 }
 0x2e7   : > { %v899_v7 = vsub.f32 %v2327_v39, %v897_v3  ;;  %v2211_v3 = vld [vmem:[%s2905_s7 + $0x8] sm:$0xf] }
 0x2e9   : > { %v902_v10 = vmul.f32 1.442695, %v899_v7 }
 0x2f6   : > { %893 = vmax.xlane.f32.xlu0 %v892_v53 }
 0x342   : > { %v1105_v54 = vpop.xlane.xlu0 %1104 }
 0x343   : > { %2451 = vrcp.f32 %v1105_v54 }
 0x346   : > { %v1102_v55 = vpop.xlane.xlu0 %1101 }
 0x347   : > { %2453 = vrcp.f32 %v1102_v55 }
 0x34a   : > { %v1113_v56 = vpop.permute.xlu0 %1112 }
 0x34b   : > { %2344 = vmatprep.subr.mxu0 %v1113_v56 }
 0x34c   : > { %2345 = vmatpush3.msra.mxu0 %v1113_v56 }
 0x34d   : > { %2349 = vmatprep.subr.bf16.mxu0 %v2503_v1 }
 0x34e   : > { %v1298_v4 = vpop.permute.xlu0 %1297 }
 0x350   : > { %v2452_v57 = vpop.eup %2451 }
 0x351   : > { %v1109_v61 = vmul.f32 %v2452_v57, %v2448_v48 }
 0x354   : > { %v2454_v59 = vpop.eup %2453 }
 0x355   : > { %v1107_v60 = vmul.f32 %v2454_v59, %v2450_v50 }
 0x357   : > { %2346 = vmatprep.mubr.msk.f32.mxu0 %vm891_vm3, %v1107_v60 }
 0x358   : > { %2347 = vmatmul.mubr.msk.f32.vlgmr.msra.gmra.mxu0 %vm891_vm3, %v1109_v61 }
 0x359   : > { %2350 = vmatpush3.bf16.msra.mxu0 %v1207_v62  ;;  %2351 = vmatprep.mubr.msk.bf16.mxu0 %vm2504_vm0, %v2503_v1 }
 0x35a   : > { %2361 = vmatprep.subr.msk.mxu0 %vm803_vm2, %v1304_v63 }
 0x37f   : > { %v894_v8 = vpop.xlane.xlu0 %893 }
 0x380   : > { %v898_v9 = vsub.f32 %v882_v52, %v894_v8 }
 0x382   : > { %v900_v11 = vmul.f32 1.442695, %v898_v9 }
 0x384   : > { %2455 = vpow2.f32 %v900_v11 }
 0x385   : > { %2457 = vpow2.f32 %v902_v10 }
 0x391   : > { %v2456_v12 = vpop.eup %2455 }
 0x392   : > { %v904_v14 = vsel %vm891_vm3, %v2456_v12, 0.0  ;;  %v2458_v15 = vpop.eup %2457 }
 0x393   : > { %905 = vadd.xlane.f32.xlu0 %v904_v14  ;;  %v907_v16 = vsel %vm891_vm3, %v2458_v15, 0.0 }
 0x397   : > { %908 = vadd.xlane.f32.xlu0 %v907_v16 }
 0x418   : > { %v2348_v17 = vpop.f32.mrf.mxu0 }
 0x41a   : > { %v1190_v18 = vpop.f32.mrf.mxu0 }
 0x41b   : > { %v1199_v21 = vpack.c.bf16 %v2348_v17, %v1190_v18 }
 0x41c   : > { %v906_v22 = vpop.xlane.xlu0 %905 }
 0x41d   : > { %2459 = vrcp.f32 %v906_v22  ;;  %2352 = vmatmul.mubr.msk.bf16.vlgmr.msra.gmra.mxu0 %vm803_vm2, %v1199_v21 }
 0x41e   : > { %2362 = vmatpush3.xpose.msk.msra.mxu0 %vm803_vm2, %v1304_v63  ;;  %2365 = vmatprep.mubr.msk.f32.mxu0 %vm803_vm2, %v1298_v4  ;;  %v1504_v4 = vsel %vm1205_vm4, %v2211_v3, 0  ;;  %v2441_v3 = vld [vmem:[%s2909_s11 + $0x8] sm:$0xff]  }
 0x41f   : > { %2363 = vmatprep.subr.msk.mxu0 %vm803_vm2, %v1302_v0 }
 0x420   : > { %v909_v24 = vpop.xlane.xlu0 %908 }
 0x421   : > { %2461 = vrcp.f32 %v909_v24 }
 0x422   : > { %2364 = vmatpush3.xpose.msk.msra.mxu0 %vm803_vm2, %v1302_v0 }
 0x423   : > { %2375 = vmatprep.subr.bf16.mxu0 %v2503_v1 }
 0x425   : > { %2366 = vmatmul.mubr.msk.f32.vlgmr.msra.gmra.mxu0 %vm803_vm2, %v1300_v2 }
 0x426   : > { %2377 = vmatprep.mubr.msk.bf16.mxu0 %vm2504_vm0, %v2503_v1  ;;  %2376 = vmatpush3.bf16.msra.mxu0 %v1504_v4  ;;  %v2442_v4 = vld [vmem:[%s2909_s11] sm:$0xff]  }
 0x42a   : > { %v2460_v25 = vpop.eup %2459 }
 0x42b   : > { %v911_v26 = vmul.f32 %v2460_v25, %v2456_v12 }
 0x42d   : > { %2332 = vmatprep.mubr.msk.f32.mxu1 %vm891_vm3, %v911_v26 }
 0x42e   : > { %v2462_v27 = vpop.eup %2461 }
 0x42f   : > { %v913_v30 = vmul.f32 %v2462_v27, %v2458_v15 }
 0x431   : > { %2333 = vmatmul.mubr.msk.f32.vlgmr.msra.gmra.mxu1 %vm891_vm3, %v913_v30 }
 0x432   : > { %2357 = vmatprep.mubr.msk.bf16.mxu1 %vm2504_vm0, %v2503_v1  ;;  %2356 = vmatpush3.bf16.msra.mxu1 %v1254_v32 }
 0x4dd   : > { %v2763_v33 = vpop.f32.mrf.mxu0 }
 0x4df   : > { %v2353_v34 = vpop.f32.mrf.mxu0 }
 0x4e1   : > { %v2765_v35 = vpop.f32.mrf.mxu0 }
 0x4e3   : > { %v2354_v36 = vpop.f32.mrf.mxu0 }
 0x4e5   : > { %v2367_v37 = vpop.f32.mrf.mxu0 }
 0x4e6   : > { %v1391_v38 = vsel %vm891_vm3, %v2367_v37, -inf }
 0x4e7   : > { %v1379_v39 = vpop.f32.mrf.mxu0  ;;  %1392 = vmax.xlane.f32.xlu0 %v1391_v38 }
 0x4e8   : > { %v1388_v40 = vsel %vm891_vm3, %v1379_v39, -inf }
 0x4e9   : > { %1389 = vmax.xlane.f32.xlu1 %v1388_v40 }
 0x4f1   : > { %v2334_v41 = vpop.f32.mrf.mxu1 }
 0x4f3   : > { %v986_v42 = vpop.f32.mrf.mxu1 }
 0x4f4   : > { %v995_v43 = vpack.c.bf16 %v2334_v41, %v986_v42 }
 0x4f6   : > { %2358 = vmatmul.mubr.msk.bf16.vlgmr.msra.gmra.mxu1 %vm803_vm2, %v995_v43 }
 0x4fa   : > { %1412 = vrot.lane.b32.xlu1 %v2703_v29, %s2506_s17 }
 0x4fe   : > { %1555 = vrot.lane.b32.xlu1 %v2676_v19, %s2507_s23 }
 0x502   : > { %1553 = vrot.lane.b32.xlu1 %v2680_v23, %s2507_s23 }
 0x570   : > { %v1393_v44 = vpop.xlane.xlu0 %1392 }
 0x571   : > { %v1395_v45 = vsub.f32 %v2367_v37, %v1393_v44 }
 0x572   : > { %v1390_v46 = vpop.xlane.xlu1 %1389 }
 0x573   : > { %v1398_v47 = vmul.f32 1.442695, %v1395_v45  ;;  %v1394_v48 = vsub.f32 %v1379_v39, %v1390_v46 }
 0x575   : > { %2463 = vpow2.f32 %v1398_v47  ;;  %v1396_v49 = vmul.f32 1.442695, %v1394_v48 }
 0x576   : > { %v1413_v50 = vpop.permute.xlu1 %1412 }
 0x577   : > { %2465 = vpow2.f32 %v1396_v49  ;;  %2368 = vmatprep.subr.mxu1 %v1413_v50 }
 0x578   : > { %2369 = vmatpush3.msra.mxu1 %v1413_v50 }
 0x57a   : > { %v1556_v57 = vpop.permute.xlu1 %1555 }
 0x57e   : > { %v1554_v58 = vpop.permute.xlu1 %1553 }
 0x582   : > { %v2464_v51 = vpop.eup %2463 }
 0x583   : > { %v1403_v52 = vsel %vm891_vm3, %v2464_v51, 0.0 }
 0x584   : > { %v2466_v53 = vpop.eup %2465  ;;  %1404 = vadd.xlane.f32.xlu0 %v1403_v52  ;;  %v2221_v52 = vld [vmem:[%s2906_s8] ss:$0 sm:$0xff] }
 0x585   : > { %v1400_v19 = vsel %vm891_vm3, %v2466_v53, 0.0 }
 0x586   : > { %1401 = vadd.xlane.f32.xlu1 %v1400_v19 }
 0x597   : > { %1551 = vrot.lane.b32.xlu1 %v2678_v20, %s2507_s23 }
 0x59a   : > { %1410 = vrot.lane.b32.xlu0 %v2701_v28, %s2506_s17 }
 0x59e   : > { %1549 = vrot.lane.b32.xlu0 %v2667_v13, %s2507_s23 }
 0x5b6   : > { %v1290_v23 = vpop.f32.mrf.mxu1 }
 0x5b8   : > { %v2359_v54 = vpop.f32.mrf.mxu1 }
 0x5ba   : > { %v2784_v55 = vpop.f32.mrf.mxu1 }
 0x5bb   : > { %v1294_v36 = vadd.f32 %v2784_v55, %v2765_v35  ;;  %v2219_v35 = vld [vmem:[%s2905_s7 + $0xc] sm:$0xf] }
 0x5bc   : > { %v2360_v56 = vpop.f32.mrf.mxu1  ;;  %v1756_v45 = vsel %vm1205_vm4, %v2219_v35, 0 }
 0x60d   : > { %v1405_v59 = vpop.xlane.xlu0 %1404 }
 0x60e   : > { %2467 = vrcp.f32 %v1405_v59 }
 0x60f   : > { %v1402_v60 = vpop.xlane.xlu1 %1401 }
 0x610   : > { %2469 = vrcp.f32 %v1402_v60 }
 0x611   : > { %v1411_v61 = vpop.permute.xlu0 %1410 }
 0x612   : > { %2370 = vmatprep.subr.mxu1 %v1411_v61 }
 0x613   : > { %2371 = vmatpush3.msra.mxu1 %v1411_v61  ;;  %v1552_v2 = vpop.permute.xlu1 %1551 }
 0x614   : > { %2381 = vmatprep.subr.msk.mxu1 %vm803_vm2, %v1556_v57 }
 0x615   : > { %v1550_v0 = vpop.permute.xlu0 %1549 }
 0x61b   : > { %v2468_v20 = vpop.eup %2467 }
 0x61c   : > { %v1409_v13 = vmul.f32 %v2468_v20, %v2464_v51 }
 0x61d   : > { %v2470_v62 = vpop.eup %2469 }
 0x61e   : > { %v1407_v63 = vmul.f32 %v2470_v62, %v2466_v53 }
 0x620   : > { %2372 = vmatprep.mubr.msk.f32.mxu1 %vm891_vm3, %v1407_v63 }
 0x621   : > { %2373 = vmatmul.mubr.msk.f32.vlgmr.msra.gmra.mxu1 %vm891_vm3, %v1409_v13 }
 0x622   : > { %2382 = vmatpush3.xpose.msk.msra.mxu1 %vm803_vm2, %v1556_v57  ;;  %2385 = vmatprep.mubr.msk.f32.mxu1 %vm803_vm2, %v1550_v0 }
 0x623   : > { %2383 = vmatprep.subr.msk.mxu1 %vm803_vm2, %v1554_v58 }
 0x626   : > { %2384 = vmatpush3.xpose.msk.msra.mxu1 %vm803_vm2, %v1554_v58 }
 0x627   : > { %2395 = vmatprep.subr.bf16.mxu1 %v2503_v1 }
 0x629   : > { %2386 = vmatmul.mubr.msk.f32.vlgmr.msra.gmra.mxu1 %vm803_vm2, %v1552_v2 }
 0x62a   : > { %2397 = vmatprep.mubr.msk.bf16.mxu1 %vm2504_vm0, %v2503_v1  ;;  %2396 = vmatpush3.bf16.msra.mxu1 %v1756_v45 }
 0x62b   : > { %2409 = vmatprep.subr.bf16.mxu1 %v2503_v1 }
 0x6e1   : > { %v2374_v7 = vpop.f32.mrf.mxu1 }
 0x6e3   : > { %v1488_v8 = vpop.f32.mrf.mxu1 }
 0x6e4   : > { %v1497_v9 = vpack.c.bf16 %v2374_v7, %v1488_v8 }
 0x6e6   : > { %2378 = vmatmul.mubr.msk.bf16.vlgmr.msra.gmra.mxu0 %vm803_vm2, %v1497_v9 }
 0x6e9   : > { %v2387_v10 = vpop.f32.mrf.mxu1 }
 0x6ea   : > { %v1643_v11 = vsel %vm891_vm3, %v2387_v10, -inf }
 0x6eb   : > { %1644 = vmax.xlane.f32.xlu1 %v1643_v11  ;;  %v1631_v12 = vpop.f32.mrf.mxu1 }
 0x6ec   : > { %v1640_v14 = vsel %vm891_vm3, %v1631_v12, -inf }
 0x6ed   : > { %1641 = vmax.xlane.f32.xlu0 %v1640_v14 }
 0x6fc   : > { %1664 = vrot.lane.b32.xlu1 %v2703_v29, %s2507_s23  ;;  %v1291_v29 = vadd.f32 %v1290_v23, %v2763_v33 }
 0x774   : > { %v1645_v15 = vpop.xlane.xlu1 %1644 }
 0x775   : > { %v1647_v16 = vsub.f32 %v2387_v10, %v1645_v15 }
 0x776   : > { %v1642_v17 = vpop.xlane.xlu0 %1641 }
 0x777   : > { %v1650_v18 = vmul.f32 1.442695, %v1647_v16  ;;  %v1646_v21 = vsub.f32 %v1631_v12, %v1642_v17  ;;  %v2222_v16 = vld [vmem:[%s2907_s9] ss:$0 sm:$0xff] }
 0x778   : > { %v1665_v22 = vpop.permute.xlu1 %1664 }
 0x779   : > { %2471 = vpow2.f32 %v1650_v18  ;;  %v1648_v24 = vmul.f32 1.442695, %v1646_v21  ;;  %2388 = vmatprep.subr.mxu0 %v1665_v22 }
 0x77a   : > { %2389 = vmatpush3.msra.mxu0 %v1665_v22  ;;  %v2223_v22 = vld [vmem:[%s2908_s10] ss:$0 sm:$0xff] }
 0x77b   : > { %2473 = vpow2.f32 %v1648_v24 }
 0x786   : > { %v2472_v25 = vpop.eup %2471 }
 0x787   : > { %v1655_v26 = vsel %vm891_vm3, %v2472_v25, 0.0 }
 0x788   : > { %v2474_v27 = vpop.eup %2473  ;;  %1656 = vadd.xlane.f32.xlu0 %v1655_v26 }
 0x789   : > { %v1652_v30 = vsel %vm891_vm3, %v2474_v27, 0.0 }
 0x78c   : > { %1653 = vadd.xlane.f32.xlu0 %v1652_v30  ;;  %v2443_v30 = vld [vmem:[%s2911_s13 + $0x18] sm:$0xff]  }
 0x7a2   : > { %1662 = vrot.lane.b32.xlu0 %v2701_v28, %s2507_s23 }
 0x7a6   : > { %v1540_v31 = vpop.f32.mrf.mxu0 }
 0x7a7   : > { %v1547_v32 = vadd.f32 %v1540_v31, %v1291_v29  ;;  %v2444_v29 = vld [vmem:[%s2911_s13 + $0x10] sm:$0xff]   ;;  %v2445_v31 = vld [vmem:[%s2911_s13 + $0x8] sm:$0xff]  }
 0x7a8   : > { %v2379_v34 = vpop.f32.mrf.mxu0 }
 0x7a9   : > { %v2224_v34 = vld [vmem:[%s2910_s12] ss:$0 sm:$0xff] }
 0x7aa   : > { %v1543_v37 = vpop.f32.mrf.mxu0 }
 0x7ab   : > { %v1548_v38 = vadd.f32 %v1543_v37, %v1294_v36 }
 0x7ac   : > { %v2380_v39 = vpop.f32.mrf.mxu0 }
 0x811   : > { %v1657_v40 = vpop.xlane.xlu0 %1656 }
 0x812   : > { %2475 = vrcp.f32 %v1657_v40 }
 0x815   : > { %v1654_v41 = vpop.xlane.xlu0 %1653 }
 0x816   : > { %2477 = vrcp.f32 %v1654_v41 }
 0x819   : > { %v1663_v42 = vpop.permute.xlu0 %1662 }
 0x81a   : > { %2390 = vmatprep.subr.mxu0 %v1663_v42 }
 0x81b   : > { %2391 = vmatpush3.msra.mxu0 %v1663_v42 }
 0x81c   : > { %2401 = vmatprep.subr.bf16.mxu0 %v2503_v1 }
 0x81f   : > { %v2476_v28 = vpop.eup %2475 }
 0x820   : > { %v1661_v44 = vmul.f32 %v2476_v28, %v2472_v25 }
 0x823   : > { %v2478_v33 = vpop.eup %2477 }
 0x824   : > { %v1659_v43 = vmul.f32 %v2478_v33, %v2474_v27 }
 0x826   : > { %2392 = vmatprep.mubr.msk.f32.mxu0 %vm891_vm3, %v1659_v43 }
 0x827   : > { %2393 = vmatmul.mubr.msk.f32.vlgmr.msra.gmra.mxu0 %vm891_vm3, %v1661_v44 }
 0x828   : > { %2405 = vmatprep.mubr.msk.bf16.mxu0 %vm2504_vm0, %v2503_v1  ;;  %2402 = vmatpush3.bf16.msra.mxu0 %v2441_v3 }
 0x829   : > { %2403 = vmatprep.subr.bf16.mxu0 %v2503_v1 }
 0x82c   : > { %2404 = vmatpush3.bf16.msra.mxu0 %v2442_v4 }
 0x8e7   : > { %v2394_v46 = vpop.f32.mrf.mxu0 }
 0x8e9   : > { %v1740_v47 = vpop.f32.mrf.mxu0 }
 0x8ea   : > { %v1749_v48 = vpack.c.bf16 %v2394_v46, %v1740_v47 }
 0x8ec   : > { %2398 = vmatmul.mubr.msk.bf16.vlgmr.msra.gmra.mxu1 %vm803_vm2, %v1749_v48 }
 0x8ed   : > { %2417 = vmatprep.mubr.msk.bf16.mxu1 %vm2504_vm0, %v2503_v1  ;;  %2410 = vmatpush3.bf16.msra.mxu1 %v2443_v30 }
 0x8ee   : > { %2411 = vmatprep.subr.bf16.mxu1 %v2503_v1 }
 0x8f1   : > { %2412 = vmatpush3.bf16.msra.mxu1 %v2444_v29 }
 0x8f2   : > { %2413 = vmatprep.subr.bf16.mxu1 %v2503_v1 }
 0x8f5   : > { %2414 = vmatpush3.bf16.msra.mxu1 %v2445_v31  ;;  %v2233_v31 = vld [vmem:[%s2912_s14] ss:$0 sm:$0xff] }
 0x8f6   : > { %2415 = vmatprep.subr.bf16.mxu1 %v2503_v1 }
 0x9ac   : > { %v1792_v49 = vpop.f32.mrf.mxu1 }
 0x9ad   : > { %v1799_v50 = vadd.f32 %v1792_v49, %v1547_v32  ;;  %v2446_v32 = vld [vmem:[%s2911_s13] sm:$0xff]  }
 0x9ae   : > { %v2399_v51 = vpop.f32.mrf.mxu1  ;;  %2416 = vmatpush3.bf16.msra.mxu1 %v2446_v32 }
 0x9af   : > { %v1801_v53 = vadd.f32 %v1799_v50, %v2645_v5 }
 0x9b0   : > { %v1795_v19 = vpop.f32.mrf.mxu1 }
 0x9b1   : > { %v1800_v23 = vadd.f32 %v1795_v19, %v1548_v38  ;;  %v1810_v54 = vadd.f32 %v2221_v52, %v1801_v53 }
 0x9b2   : > { %v2400_v55 = vpop.f32.mrf.mxu1 }
 0x9b3   : > { %v1802_v56 = vadd.f32 %v1800_v23, %v2647_v6  ;;  %v1814_v57 = vsel %vm630_vm1, %v1810_v54, 0.0 }
 0x9b4   : > { %1815 = vadd.xlane.f32.xlu1 %v1814_v57 }
 0x9b5   : > { %v1811_v58 = vadd.f32 %v2221_v52, %v1802_v56 }
 0x9b7   : > { %v1817_v59 = vsel %vm630_vm1, %v1811_v58, 0.0 }
 0x9b8   : > { %1818 = vadd.xlane.f32.xlu0 %v1817_v59 }
 0xa3d   : > { %v1816_v60 = vpop.xlane.xlu1 %1815 }
 0xa3e   : > { %v1821_v61 = vmul.f32 0.03125, %v1816_v60 }
 0xa40   : > { %v1823_v20 = vsub.f32 %v1810_v54, %v1821_v61 }
 0xa41   : > { %v1819_v62 = vpop.xlane.xlu0 %1818 }
 0xa42   : > { %v1822_v63 = vmul.f32 0.03125, %v1819_v62  ;;  %v1825_v13 = vmul.f32 %v1823_v20, %v1823_v20 }
 0xa44   : > { %v1824_v5 = vsub.f32 %v1811_v58, %v1822_v63  ;;  %v1827_v0 = vsel %vm630_vm1, %v1825_v13, 0.0 }
 0xa45   : > { %1828 = vadd.xlane.f32.xlu1 %v1827_v0 }
 0xa46   : > { %v1826_v2 = vmul.f32 %v1824_v5, %v1824_v5 }
 0xa48   : > { %v1830_v6 = vsel %vm630_vm1, %v1826_v2, 0.0 }
 0xa49   : > { %1831 = vadd.xlane.f32.xlu0 %v1830_v6 }
 0xace   : > { %v1829_v7 = vpop.xlane.xlu1 %1828 }
 0xacf   : > { %v1833_v8 = vmul.f32 0.03125, %v1829_v7 }
 0xad1   : > { %v1835_v9 = vadd.f32 1e-05, %v1833_v8 }
 0xad2   : > { %v1832_v10 = vpop.xlane.xlu0 %1831 }
 0xad3   : > { %2479 = vrsqrt.f32 %v1835_v9  ;;  %v1834_v11 = vmul.f32 0.03125, %v1832_v10  ;;  %v2508_v9 = vmov -1.0  }
 0xad5   : > { %v1836_v12 = vadd.f32 1e-05, %v1834_v11 }
 0xad7   : > { %2481 = vrsqrt.f32 %v1836_v12 }
 0xae0   : > { %v2480_v14 = vpop.eup %2479 }
 0xae1   : > { %v1839_v15 = vmul.f32 %v2480_v14, %v1823_v20 }
 0xae3   : > { %v1847_v21 = vmul.f32 %v2222_v16, %v1839_v15 }
 0xae4   : > { %v2482_v17 = vpop.eup %2481 }
 0xae5   : > { %v1840_v18 = vmul.f32 %v2482_v17, %v1824_v5  ;;  %v2848_v25 = vadd.f32 %v2223_v22, %v1847_v21 }
 0xae7   : > { %v1848_v24 = vmul.f32 %v2222_v16, %v1840_v18 }
 0xae9   : > { %v2850_v26 = vadd.f32 %v2223_v22, %v1848_v24 }
 0xaeb   : > { %v1857_v27 = vpack.c.bf16 %v2850_v26, %v2848_v25 }
 0xaed   : > { %2406 = vmatmul.mubr.msk.bf16.vlgmr.msra.gmra.mxu0 %vm630_vm1, %v1857_v27 }
 0xbad   : > { %v1918_v36 = vpop.f32.mrf.mxu0 }
 0xbae   : > { %v1919_v37 = vadd.f32 %v2224_v34, %v1918_v36 }
 0xbaf   : > { %v2407_v38 = vpop.f32.mrf.mxu0 }
 0xbb0   : > { %v1927_v39 = vmul.f32 0.70710677, %v1919_v37  ;;  %v1925_v18 = vmul.f32 0.5, %v1919_v37 }
 0xbb1   : > { %v1921_v40 = vpop.f32.mrf.mxu0 }
 0xbb2   : > { %v1933_v41 = vand.u32 2147483647, %v1927_v39  ;;  %v1922_v42 = vadd.f32 %v2224_v34, %v1921_v40  ;;  %vm1929_vm5 = vcmp.ge.f32.partialorder %v1927_v39, 0.0 }
 0xbb3   : > { %v2408_v28 = vpop.f32.mrf.mxu0  ;;  %v1931_v10 = vsel %vm1929_vm5, 1.0, %v2508_v9 }
 0xbb4   : > { %v1935_v33 = vmul.f32 0.3275911, %v1933_v41  ;;  %v1928_v43 = vmul.f32 0.70710677, %v1922_v42  ;;  %v1961_v46 = vsub.f32 0.0, %v1933_v41  ;;  %v1926_v21 = vmul.f32 0.5, %v1922_v42 }
 0xbb6   : > { %v1937_v1 = vadd.f32 1.0, %v1935_v33  ;;  %v1934_v44 = vand.u32 2147483647, %v1928_v43  ;;  %v1963_v47 = vmul.f32 %v1961_v46, %v1933_v41  ;;  %vm1930_vm6 = vcmp.ge.f32.partialorder %v1928_v43, 0.0 }
 0xbb7   : > { %v1932_v15 = vsel %vm1930_vm6, 1.0, %v2508_v9 }
 0xbb8   : > { %2483 = vrcp.f32 %v1937_v1  ;;  %v1936_v35 = vmul.f32 0.3275911, %v1934_v44  ;;  %v1962_v48 = vsub.f32 0.0, %v1934_v44  ;;  %v1965_v51 = vmul.f32 1.442695, %v1963_v47 }
 0xbba   : > { %v1938_v45 = vadd.f32 1.0, %v1936_v35  ;;  %v1964_v52 = vmul.f32 %v1962_v48, %v1934_v44 }
 0xbbc   : > { %2485 = vrcp.f32 %v1938_v45  ;;  %v1967_v55 = vmul.f32 1.442695, %v1964_v52 }
 0xbbd   : > { %2487 = vpow2.f32 %v1965_v51 }
 0xbbe   : > { %2489 = vpow2.f32 %v1967_v55 }
 0xbc5   : > { %v2484_v49 = vpop.eup %2483 }
 0xbc6   : > { %v1943_v50 = vmul.f32 1.0614054, %v2484_v49 }
 0xbc8   : > { %v1945_v53 = vadd.f32 -1.4531521, %v1943_v50 }
 0xbc9   : > { %v2486_v19 = vpop.eup %2485 }
 0xbca   : > { %v1947_v23 = vmul.f32 %v2484_v49, %v1945_v53  ;;  %v1944_v54 = vmul.f32 1.0614054, %v2486_v19  ;;  %v2488_v2 = vpop.eup %2487 }
 0xbcb   : > { %v2490_v8 = vpop.eup %2489 }
 0xbcc   : > { %v1949_v56 = vadd.f32 1.4214138, %v1947_v23  ;;  %v1946_v57 = vadd.f32 -1.4531521, %v1944_v54  ;;  %v2235_v54 = vld [vmem:[%s2914_s16] ss:$0 sm:$0xff] }
 0xbce   : > { %v1951_v58 = vmul.f32 %v2484_v49, %v1949_v56  ;;  %v1948_v59 = vmul.f32 %v2486_v19, %v1946_v57 }
 0xbd0   : > { %v1953_v60 = vadd.f32 -0.28449672, %v1951_v58  ;;  %v1950_v61 = vadd.f32 1.4214138, %v1948_v59 }
 0xbd2   : > { %v1955_v20 = vmul.f32 %v2484_v49, %v1953_v60  ;;  %v1952_v62 = vmul.f32 %v2486_v19, %v1950_v61 }
 0xbd4   : > { %v1957_v63 = vadd.f32 0.2548296, %v1955_v20  ;;  %v1954_v13 = vadd.f32 -0.28449672, %v1952_v62 }
 0xbd6   : > { %v1959_v5 = vmul.f32 %v2484_v49, %v1957_v63  ;;  %v1956_v0 = vmul.f32 %v2486_v19, %v1954_v13 }
 0xbd8   : > { %v1969_v6 = vmul.f32 %v2488_v2, %v1959_v5  ;;  %v1958_v3 = vadd.f32 0.2548296, %v1956_v0 }
 0xbda   : > { %v1971_v4 = vsub.f32 1.0, %v1969_v6  ;;  %v1960_v7 = vmul.f32 %v2486_v19, %v1958_v3  ;;  %v2234_v19 = vld [vmem:[%s2913_s15] ss:$0 sm:$0xff] }
 0xbdc   : > { %v1973_v11 = vmul.f32 %v1971_v4, %v1931_v10  ;;  %v1970_v12 = vmul.f32 %v2490_v8, %v1960_v7 }
 0xbde   : > { %v1972_v14 = vsub.f32 1.0, %v1970_v12  ;;  %v1975_v16 = vadd.f32 1.0, %v1973_v11 }
 0xbe0   : > { %v1974_v17 = vmul.f32 %v1972_v14, %v1932_v15  ;;  %v1977_v24 = vmul.f32 %v1975_v16, %v1925_v18 }
 0xbe2   : > { %v1976_v22 = vadd.f32 1.0, %v1974_v17 }
 0xbe4   : > { %v1978_v27 = vmul.f32 %v1976_v22, %v1926_v21 }
 0xbe6   : > { %v1979_v30 = vpack.c.bf16 %v1978_v27, %v1977_v24 }
 0xbe8   : > { %2418 = vmatmul.mubr.msk.bf16.vlgmr.msra.gmra.mxu1 %vm2012_vm7, %v1979_v30 }
 0xca8   : > { %v2050_v29 = vpop.f32.mrf.mxu1 }
 0xca9   : > { %v2057_v32 = vadd.f32 %v2050_v29, %v2848_v25 }
 0xcaa   : > { %v2419_v34 = vpop.f32.mrf.mxu1 }
 0xcab   : > { %v2066_v36 = vadd.f32 %v2233_v31, %v2057_v32 }
 0xcac   : > { %v2053_v38 = vpop.f32.mrf.mxu1 }
 0xcad   : > { %v2058_v39 = vadd.f32 %v2053_v38, %v2850_v26  ;;  %v2070_v37 = vsel %vm630_vm1, %v2066_v36, 0.0 }
 0xcae   : > { %2071 = vadd.xlane.f32.xlu1 %v2070_v37  ;;  %v2420_v40 = vpop.f32.mrf.mxu1 }
 0xcaf   : > { %v2067_v41 = vadd.f32 %v2233_v31, %v2058_v39 }
 0xcb1   : > { %v2073_v42 = vsel %vm630_vm1, %v2067_v41, 0.0 }
 0xcb2   : > { %2074 = vadd.xlane.f32.xlu0 %v2073_v42 }
 0xd37   : > { %v2072_v28 = vpop.xlane.xlu1 %2071 }
 0xd38   : > { %v2076_v33 = vmul.f32 0.03125, %v2072_v28 }
 0xd3a   : > { %v2078_v43 = vsub.f32 %v2066_v36, %v2076_v33 }
 0xd3b   : > { %v2075_v1 = vpop.xlane.xlu0 %2074 }
 0xd3c   : > { %v2077_v44 = vmul.f32 0.03125, %v2075_v1  ;;  %v2080_v35 = vmul.f32 %v2078_v43, %v2078_v43 }
 0xd3e   : > { %v2079_v25 = vsub.f32 %v2067_v41, %v2077_v44  ;;  %v2082_v45 = vsel %vm630_vm1, %v2080_v35, 0.0 }
 0xd3f   : > { %2083 = vadd.xlane.f32.xlu1 %v2082_v45 }
 0xd40   : > { %v2081_v46 = vmul.f32 %v2079_v25, %v2079_v25 }
 0xd42   : > { %v2085_v26 = vsel %vm630_vm1, %v2081_v46, 0.0 }
 0xd43   : > { %2086 = vadd.xlane.f32.xlu0 %v2085_v26 }
 0xdc8   : > { %v2084_v47 = vpop.xlane.xlu1 %2083 }
 0xdc9   : > { %v2088_v48 = vmul.f32 0.03125, %v2084_v47 }
 0xdcb   : > { %v2090_v49 = vadd.f32 1e-05, %v2088_v48 }
 0xdcc   : > { %v2087_v50 = vpop.xlane.xlu0 %2086 }
 0xdcd   : > { %2491 = vrsqrt.f32 %v2090_v49  ;;  %v2089_v51 = vmul.f32 0.03125, %v2087_v50 }
 0xdcf   : > { %v2091_v52 = vadd.f32 1e-05, %v2089_v51 }
 0xdd1   : > { %2493 = vrsqrt.f32 %v2091_v52 }
 0xdda   : > { %v2492_v53 = vpop.eup %2491 }
 0xddb   : > { %v2094_v23 = vmul.f32 %v2492_v53, %v2078_v43 }
 0xddd   : > { %v2102_v55 = vmul.f32 %v2234_v19, %v2094_v23 }
 0xdde   : > { %v2494_v56 = vpop.eup %2493 }
 0xddf   : > { %v2110_v57 = vadd.f32 %v2235_v54, %v2102_v55  ;;  %v2095_v58 = vmul.f32 %v2494_v56, %v2079_v25 }
 0xde1   : > { %2112 = vst.msk [vmem:[%s602_s21] sm:$0xff] %vm630_vm1, %v2110_v57  ;;  %v2103_v59 = vmul.f32 %v2234_v19, %v2095_v58 }
 0xde3   : > { %v2111_v60 = vadd.f32 %v2235_v54, %v2103_v59 }
 0xde5   : > { %2113 = vst.msk [vmem:[%s602_s21 + $0x8] sm:$0xff] %vm630_vm1, %v2111_v60 }
 0xde6 PF: > { %s29_s0 = sadd.s32 1, %s2501_s0  }
 0xde7   : > { %p26_p4 = scmp.ge.s32.totalorder %s29_s0, 4  }
 0xde9   :  { %28 = sbr.rel (!%p26_p4) target bundleno = 5 (0x5), region = 129 }

// kernel: _lambda_.15
= control target key start
LH: loop header
LB: loop body
LE: loop exit
PB: predicated region body
PF: predicated region fallthrough
CT: control target
= control target key end

     0   :  { %s455_s18 = smov 0   ;;  %s497_s0 = inlined_call_operand.vmem [shape: f32[2,8,32], index: 0, kind: input, shape index: {}]   ;;  %s498_s1 = inlined_call_operand.vmem [shape: f32[1,32], index: 1, kind: input, shape index: {}]   ;;  %s499_s2 = inlined_call_operand.vmem [shape: f32[1,32], index: 2, kind: input, shape index: {}]   ;;  %s500_s3 = inlined_call_operand.vmem [shape: bf16[32,4], index: 3, kind: input, shape index: {}]   ;;  %s501_s4 = inlined_call_operand.vmem [shape: f32[1,4], index: 4, kind: input, shape index: {}]   ;;  %s502_s5 = inlined_call_operand.vmem [shape: f32[2,8,4], index: 5, kind: output, shape index: {}]  }
   0x1 LB: > { %s375_s19 = sadd.s32 4294967295, %s421_s18   ;;  %p379_p0 = scmp.ge.s32.totalorder %s421_s18, 1  ;;  %s421_s18 = sphi %s455_s18, %s15_s18  }
   0x2   : > { %p186_p1 = scmp.lt.s32.totalorder %s421_s18, 3 }
   0x4   : > { %p187_p2 = pnand %p379_p0, %p186_p1 }
   0x5   : > { %p212_p3 = scmp.lt.s32.totalorder (!%p187_p2), %s375_s19, 1 }
   0x6   : > { %190 = sbr.rel (%p187_p2) target bundleno = 524 (0x20c), region = 40 }
   0xb   : > { %s504_s19 = smov (!%p212_p3, %s375_s19), 1  ;;  %vm224_vm0 = vcmask 261120   ;;  %v411_v7 = vld [vmem:[%s500_s3 + $0x8] sm:$0xff]   ;;  %v423_v8 = vmov 0.0   ;;  %vm424_vm1 = vmmov 0   ;;  %v412_v9 = vld [vmem:[%s500_s3] sm:$0xff]  }
   0xc   : > { %s380_s20 = sshll.u32 %s504_s19, 3  ;;  %393 = vmatprep.subr.bf16.mxu0 %v423_v8  ;;  %397 = vmatprep.mubr.msk.bf16.mxu0 %vm424_vm1, %v423_v8  ;;  %v382_v14 = vld [vmem:[%s498_s1] ss:$0 sm:$0xff]  ;;  %vm320_vm2 = vcmask 31744  }
   0xd   : > { %s215_s23 = scalar_lea.vmem %s497_s0, %s380_s20  ;;  %394 = vmatpush3.bf16.msra.mxu0 %v411_v7  ;;  %v383_v16 = vld [vmem:[%s499_s2] ss:$0 sm:$0xff]  ;;  %s219_s11 = scalar_lea.vmem %s502_s5, %s380_s20 }
   0xe   : > { %v221_v0 = vld [vmem:[%s215_s23] sm:$0xff]  ;;  %395 = vmatprep.subr.bf16.mxu0 %v423_v8 }
   0xf   : > { %v225_v1 = vsel %vm224_vm0, %v221_v0, 0.0  ;;  %v384_v20 = vld [vmem:[%s501_s4] ss:$0 sm:$0xff] }
  0x10   : > { %226 = vadd.xlane.f32.xlu0 %v225_v1 }
  0x11   : > { %396 = vmatpush3.bf16.msra.mxu0 %v412_v9 }
  0x99   : > { %v227_v2 = vpop.xlane.xlu0 %226 }
  0x9a   : > { %v229_v3 = vmul.f32 0.03125, %v227_v2 }
  0x9c   : > { %v230_v4 = vsub.f32 %v221_v0, %v229_v3 }
  0x9e   : > { %v231_v5 = vmul.f32 %v230_v4, %v230_v4 }
  0xa0   : > { %v232_v6 = vsel %vm224_vm0, %v231_v5, 0.0 }
  0xa1   : > { %233 = vadd.xlane.f32.xlu0 %v232_v6 }
 0x12a   : > { %v234_v10 = vpop.xlane.xlu0 %233 }
 0x12b   : > { %v235_v11 = vmul.f32 0.03125, %v234_v10 }
 0x12d   : > { %v236_v12 = vadd.f32 1e-05, %v235_v11 }
 0x12f   : > { %413 = vrsqrt.f32 %v236_v12 }
 0x13c   : > { %v414_v13 = vpop.eup %413 }
 0x13d   : > { %v238_v15 = vmul.f32 %v414_v13, %v230_v4 }
 0x13f   : > { %v245_v17 = vmul.f32 %v382_v14, %v238_v15 }
 0x141   : > { %v252_v18 = vadd.f32 %v383_v16, %v245_v17 }
 0x143   : > { %v253_v19 = vpack.c.bf16 %v252_v18, %v252_v18 }
 0x145   : > { %398 = vmatmul.mubr.msk.bf16.vlgmr.msra.gmra.mxu0 %vm224_vm0, %v253_v19 }
 0x205   : > { %v314_v21 = vpop.f32.mrf.mxu0 }
 0x206   : > { %v315_v22 = vadd.f32 %v384_v20, %v314_v21 }
 0x207   : > { %v399_v23 = vpop.f32.mrf.mxu0 }
 0x208   : > { %321 = vst.msk [vmem:[%s219_s11] sm:$0xff] %vm320_vm2, %v315_v22 }
 0x209   : > { %v317_v24 = vpop.f32.mrf.mxu0 }
 0x20b   : > { %v400_v25 = vpop.f32.mrf.mxu0 }
 0x20c PF: > { %s15_s18 = sadd.s32 1, %s421_s18  }
 0x20d   : > { %p12_p4 = scmp.ge.s32.totalorder %s15_s18, 4  }
 0x20f   :  { %14 = sbr.rel (!%p12_p4) target bundleno = 1 (0x1), region = 70 }

// kernel: _lambda_.12
= control target key start
LH: loop header
LB: loop body
LE: loop exit
PB: predicated region body
PF: predicated region fallthrough
CT: control target
= control target key end

     0   :  { %s2586_s0 = inlined_call_operand.vmem [shape: f32[2,8,32], index: 0, kind: input, shape index: {}]   ;;  %s2587_s1 = inlined_call_operand.vmem [shape: bf16[32,32], index: 1, kind: input, shape index: {}]   ;;  %s2588_s2 = inlined_call_operand.vmem [shape: f32[1,32], index: 2, kind: input, shape index: {}]   ;;  %s2589_s3 = inlined_call_operand.vmem [shape: bf16[32,32], index: 3, kind: input, shape index: {}]   ;;  %s2590_s4 = inlined_call_operand.vmem [shape: f32[1,32], index: 4, kind: input, shape index: {}]   ;;  %s2591_s5 = inlined_call_operand.vmem [shape: bf16[32,32], index: 5, kind: input, shape index: {}]   ;;  %s2592_s6 = inlined_call_operand.vmem [shape: f32[1,32], index: 6, kind: input, shape index: {}]   ;;  %s2593_s7 = inlined_call_operand.vmem [shape: bf16[4,8,32], index: 7, kind: input, shape index: {}]   ;;  %s2594_s8 = inlined_call_operand.vmem [shape: f32[1,32], index: 8, kind: input, shape index: {}]   ;;  %s2595_s9 = inlined_call_operand.vmem [shape: f32[1,32], index: 9, kind: input, shape index: {}]   ;;  %s2596_s10 = inlined_call_operand.vmem [shape: f32[1,32], index: 10, kind: input, shape index: {}]   ;;  %s2597_s11 = inlined_call_operand.vmem [shape: bf16[32,64], index: 11, kind: input, shape index: {}]   ;;  %s2598_s12 = inlined_call_operand.vmem [shape: f32[1,64], index: 12, kind: input, shape index: {}]   ;;  %s2599_s13 = inlined_call_operand.vmem [shape: bf16[64,32], index: 13, kind: input, shape index: {}]   ;;  %s2600_s14 = inlined_call_operand.vmem [shape: f32[1,32], index: 14, kind: input, shape index: {}]   ;;  %s2601_s15 = inlined_call_operand.vmem [shape: f32[1,32], index: 15, kind: input, shape index: {}]   ;;  %s2602_s16 = inlined_call_operand.vmem [shape: f32[1,32], index: 16, kind: input, shape index: {}]   ;;  %s2603_s17 = inlined_call_operand.vmem [shape: f32[1,32], index: 17, kind: input, shape index: {}]   ;;  %s2604_s18 = inlined_call_operand.vmem [shape: f32[1,32], index: 18, kind: input, shape index: {}]   ;;  %s2605_s19 = inlined_call_operand.vmem [shape: f32[2,8,32], index: 19, kind: output, shape index: {}]  }
   0x1   :  { %2608 = sst [smem:[#allocation2_spill]] %s2586_s0  ;;  %s2352_s0 = smov 0  }
   0x2   :  { %2609 = sst [smem:[#allocation3_spill]] %s2587_s1 }
   0x3   :  { %2610 = sst [smem:[#allocation4_spill]] %s2588_s2 }
   0x4   :  { %2611 = sst [smem:[#allocation5_spill]] %s2589_s3 }
   0x5 LB: > { %s1980_s30 = sadd.s32 4294967295, %s2244_s0   ;;  %p1984_p0 = scmp.ge.s32.totalorder %s2244_s0, 1  ;;  %s2244_s0 = sphi %s2352_s0, %s29_s0  }
   0x6   : > { %p536_p1 = scmp.lt.s32.totalorder %s2244_s0, 3 }
   0x8   : > { %p537_p2 = pnand %p1984_p0, %p536_p1 }
   0x9   : > { %s2612_s1 = sld [smem:[#allocation5_spill]] (!%p537_p2)  ;;  %p590_p3 = scmp.lt.s32.totalorder (!%p537_p2), %s1980_s30, 1 }
   0xa   : > { %540 = sbr.rel (%p537_p2) target bundleno = 3825 (0xef1), region = 96  ;;  %s2613_s23 = sld [smem:[#allocation3_spill]] (!%p537_p2) }
   0xb   : > { %s2614_s20 = sld [smem:[#allocation2_spill]] (!%p537_p2)  ;;  %s2249_s24 = smov (!%p537_p2), 112  }
   0xc   : > { %s2250_s29 = smov (!%p537_p2), 104  }
   0xf   : > { %v2200_v0 = vld [vmem:[%s2612_s1 + $0x8] sm:$0xff]   ;;  %v2246_v1 = vmov 0.0   ;;  %v2202_v3 = vld [vmem:[%s2612_s1] sm:$0xff]   ;;  %vm2247_vm0 = vmmov 0   ;;  %s2617_s30 = smov (!%p590_p3, %s1980_s30), 1  ;;  %vm624_vm1 = vcmask 261120  }
  0x10   : > { %2086 = vmatprep.subr.bf16.mxu1 %v2246_v1  ;;  %2078 = vmatprep.subr.bf16.mxu0 %v2246_v1  ;;  %v2201_v2 = vld [vmem:[%s2613_s23 + $0x8] sm:$0xff]   ;;  %v2203_v4 = vld [vmem:[%s2613_s23] sm:$0xff]   ;;  %s1985_s27 = sshll.u32 %s2617_s30, 3  ;;  %vm794_vm2 = vcmask 64512   ;;  %vm1129_vm3 = vcmask 1043456   ;;  %vm1815_vm5 = vcmask 523264  }
  0x11   : > { %2087 = vmatpush3.bf16.msra.mxu1 %v2200_v0  ;;  %2090 = vmatprep.mubr.msk.bf16.mxu1 %vm2247_vm0, %v2246_v1  ;;  %s593_s21 = scalar_lea.vmem %s2614_s20, %s1985_s27  ;;  %v2204_v7 = vld [vmem:[%s2591_s5 + $0x8] sm:$0xff]   ;;  %v2205_v8 = vld [vmem:[%s2591_s5] sm:$0xff]   ;;  %s2615_s20 = sld [smem:[#allocation4_spill]] }
  0x12   : > { %2079 = vmatpush3.bf16.msra.mxu0 %v2201_v2  ;;  %2088 = vmatprep.subr.bf16.mxu1 %v2246_v1  ;;  %v2389_v5 = vld [vmem:[%s593_s21] sm:$0xff]  ;;  %s2248_s21 = smov 120   ;;  %s597_s3 = scalar_lea.vmem %s2605_s19, %s1985_s27 }
  0x13   : > { %2080 = vmatprep.subr.bf16.mxu0 %v2246_v1  ;;  %2082 = vmatprep.mubr.msk.bf16.mxu0 %vm2247_vm0, %v2246_v1  ;;  %v600_v6 = vpack.c.bf16 %v2389_v5, %v2389_v5  ;;  %v1991_v9 = vld [vmem:[%s2590_s4] ss:$0 sm:$0xff]  ;;  %v2005_v48 = vld [vmem:[%s2593_s7 + $0x4] sm:$0xf] }
  0x14   : > { %v1995_v21 = vld [vmem:[%s2592_s6] ss:$0 sm:$0xff]  ;;  %v1131_v49 = vsel %vm1129_vm3, %v2005_v48, 0 }
  0x15   : > { %2089 = vmatpush3.bf16.msra.mxu1 %v2202_v3  ;;  %v956_v52 = vld [vmem:[%s2593_s7] sm:$0xf] }
  0x16   : > { %2081 = vmatpush3.bf16.msra.mxu0 %v2203_v4  ;;  %2102 = vmatprep.subr.mxu1 %v2246_v1  ;;  %v1177_v55 = vsel %vm1129_vm3, %v956_v52, 0 }
  0x17   : > { %2094 = vmatprep.subr.bf16.mxu0 %v2246_v1  ;;  %v1987_v10 = vld [vmem:[%s2615_s20] ss:$0 sm:$0xff] }
  0x18   : > { %2091 = vmatmul.mubr.msk.bf16.vlgmr.msra.gmra.mxu1 %vm624_vm1, %v600_v6 }
  0x19   : > { %2083 = vmatmul.mubr.msk.bf16.vlgmr.msra.gmra.mxu0 %vm624_vm1, %v600_v6  ;;  %2104 = vmatprep.mubr.msk.f32.mxu1 %vm2247_vm0, %v2246_v1 }
  0x1a   : > { %2098 = vmatprep.mubr.msk.bf16.mxu0 %vm2247_vm0, %v2246_v1  ;;  %2095 = vmatpush3.bf16.msra.mxu0 %v2204_v7 }
  0x1b   : > { %2096 = vmatprep.subr.bf16.mxu0 %v2246_v1 }
  0x1e   : > { %2097 = vmatpush3.bf16.msra.mxu0 %v2205_v8 }
  0x1f   : > { %2112 = vmatprep.subr.mxu0 %v2246_v1 }
  0x21   : > { %2099 = vmatmul.mubr.msk.bf16.vlgmr.msra.gmra.mxu0 %vm624_vm1, %v600_v6 }
  0x22   : > { %2114 = vmatprep.mubr.msk.f32.mxu0 %vm2247_vm0, %v2246_v1 }
  0xd8   : > { %v725_v11 = vpop.f32.mrf.mxu1 }
  0xd9   : > { %v662_v12 = vpop.f32.mrf.mxu0  ;;  %v2417_v13 = vadd.f32 %v1991_v9, %v725_v11 }
  0xda   : > { %v2419_v14 = vadd.f32 %v1987_v10, %v662_v12  ;;  %v2092_v15 = vpop.f32.mrf.mxu1 }
  0xdb   : > { %v2084_v16 = vpop.f32.mrf.mxu0  ;;  %959 = vrot.lane.b32.xlu0 %v2417_v13, %s2248_s21  ;;  %2103 = vmatpush3.xpose.msk.msra.mxu1 %vm794_vm2, %v2417_v13 }
  0xdc   : > { %v728_v17 = vpop.f32.mrf.mxu1  ;;  %2107 = vmatprep.subr.mxu1 %v2246_v1 }
  0xdd   : > { %v665_v18 = vpop.f32.mrf.mxu0 }
  0xde   : > { %v2093_v19 = vpop.f32.mrf.mxu1  ;;  %2105 = vmatmul.mubr.msk.f32.vlgmr.msra.gmra.mxu1 %vm794_vm2, %v2419_v14 }
  0xdf   : > { %v2085_v20 = vpop.f32.mrf.mxu0  ;;  %957 = vrot.lane.b32.xlu0 %v2419_v14, %s2248_s21  ;;  %2109 = vmatprep.mubr.msk.f32.mxu1 %vm2247_vm0, %v2246_v1 }
  0xe1   : > { %v788_v22 = vpop.f32.mrf.mxu0 }
  0xe2   : > { %v2435_v23 = vadd.f32 %v1995_v21, %v788_v22 }
  0xe3   : > { %v2100_v24 = vpop.f32.mrf.mxu0 }
  0xe4   : > { %2108 = vmatpush3.msra.mxu1 %v2435_v23 }
  0xe5   : > { %v791_v25 = vpop.f32.mrf.mxu0  ;;  %2117 = vmatprep.subr.mxu1 %v2246_v1 }
  0xe7   : > { %v2101_v26 = vpop.f32.mrf.mxu0 }
 0x14d   : > { %v960_v27 = vpop.permute.xlu0 %959 }
 0x14e   : > { %2113 = vmatpush3.xpose.msk.msra.mxu0 %vm794_vm2, %v960_v27 }
 0x14f   : > { %2122 = vmatprep.subr.bf16.mxu0 %v2246_v1 }
 0x151   : > { %v958_v28 = vpop.permute.xlu0 %957 }
 0x152   : > { %2115 = vmatmul.mubr.msk.f32.vlgmr.msra.gmra.mxu0 %vm794_vm2, %v958_v28 }
 0x153   : > { %2124 = vmatprep.mubr.msk.bf16.mxu0 %vm2247_vm0, %v2246_v1  ;;  %2123 = vmatpush3.bf16.msra.mxu0 %v1131_v49 }
 0x154   : > { %2134 = vmatprep.subr.mxu0 %v2246_v1 }
 0x19e   : > { %v867_v29 = vpop.f32.mrf.mxu1 }
 0x19f   : > { %v871_v30 = vsel %vm794_vm2, %v867_v29, -inf }
 0x1a0   : > { %872 = vmax.xlane.f32.xlu1 %v871_v30  ;;  %v2106_v31 = vpop.f32.mrf.mxu1 }
 0x212   : > { %v1031_v32 = vpop.f32.mrf.mxu0 }
 0x213   : > { %v1035_v33 = vsel %vm794_vm2, %v1031_v32, -inf }
 0x214   : > { %1036 = vmax.xlane.f32.xlu1 %v1035_v33  ;;  %v2116_v34 = vpop.f32.mrf.mxu0 }
 0x229   : > { %v873_v35 = vpop.xlane.xlu1 %872 }
 0x22a   : > { %v874_v36 = vsub.f32 %v867_v29, %v873_v35 }
 0x22c   : > { %v875_v37 = vmul.f32 1.442695, %v874_v36 }
 0x22e   : > { %2212 = vpow2.f32 %v875_v37 }
 0x23b   : > { %v2213_v38 = vpop.eup %2212 }
 0x23c   : > { %v877_v39 = vsel %vm794_vm2, %v2213_v38, 0.0 }
 0x23d   : > { %878 = vadd.xlane.f32.xlu0 %v877_v39 }
 0x253   : > { %1308 = vrot.lane.b32.xlu0 %v2435_v23, %s2249_s24 }
 0x29d   : > { %v1037_v40 = vpop.xlane.xlu1 %1036 }
 0x29e   : > { %v1038_v41 = vsub.f32 %v1031_v32, %v1037_v40 }
 0x2a0   : > { %v1039_v42 = vmul.f32 1.442695, %v1038_v41 }
 0x2a2   : > { %2214 = vpow2.f32 %v1039_v42 }
 0x2af   : > { %v2215_v43 = vpop.eup %2214 }
 0x2b0   : > { %v1041_v44 = vsel %vm794_vm2, %v2215_v43, 0.0 }
 0x2b1   : > { %1042 = vadd.xlane.f32.xlu1 %v1041_v44 }
 0x2c2   : > { %1047 = vrot.lane.b32.xlu1 %v2435_v23, %s2248_s21 }
 0x2c6   : > { %v879_v45 = vpop.xlane.xlu0 %878  ;;  %1221 = vrot.lane.b32.xlu1 %v2417_v13, %s2249_s24 }
 0x2c7   : > { %2216 = vrcp.f32 %v879_v45 }
 0x2ca   : > { %1219 = vrot.lane.b32.xlu1 %v2419_v14, %s2249_s24  ;;  %v1309_v59 = vpop.permute.xlu0 %1308 }
 0x2d4   : > { %v2217_v46 = vpop.eup %2216 }
 0x2d5   : > { %v881_v47 = vmul.f32 %v2217_v46, %v2213_v38 }
 0x2d7   : > { %2110 = vmatmul.mubr.msk.f32.vlgmr.msra.gmra.mxu1 %vm794_vm2, %v881_v47 }
 0x2d8   : > { %2119 = vmatprep.mubr.msk.f32.mxu1 %vm2247_vm0, %v2246_v1 }
 0x33a   : > { %v1043_v50 = vpop.xlane.xlu1 %1042 }
 0x33b   : > { %2218 = vrcp.f32 %v1043_v50 }
 0x33e   : > { %v1048_v51 = vpop.permute.xlu1 %1047 }
 0x33f   : > { %2118 = vmatpush3.msra.mxu1 %v1048_v51 }
 0x340   : > { %2128 = vmatprep.subr.bf16.mxu1 %v2246_v1 }
 0x342   : > { %v1222_v63 = vpop.permute.xlu1 %1221 }
 0x346   : > { %v1220_v0 = vpop.permute.xlu1 %1219 }
 0x348   : > { %v2219_v53 = vpop.eup %2218 }
 0x349   : > { %v1045_v54 = vmul.f32 %v2219_v53, %v2215_v43 }
 0x34b   : > { %2120 = vmatmul.mubr.msk.f32.vlgmr.msra.gmra.mxu1 %vm794_vm2, %v1045_v54 }
 0x34c   : > { %2129 = vmatpush3.bf16.msra.mxu1 %v1177_v55  ;;  %2130 = vmatprep.mubr.msk.bf16.mxu1 %vm2247_vm0, %v2246_v1  ;;  %v2018_v55 = vld [vmem:[%s2594_s8] ss:$0 sm:$0xff] }
 0x34d   : > { %2139 = vmatprep.subr.mxu1 %v2246_v1 }
 0x397   : > { %v951_v56 = vpop.f32.mrf.mxu1 }
 0x398   : > { %v955_v57 = vpack.c.bf16 %v951_v56, %v951_v56 }
 0x399   : > { %v2111_v58 = vpop.f32.mrf.mxu1 }
 0x39a   : > { %2131 = vmatmul.mubr.msk.bf16.vlgmr.msra.gmra.mxu1 %vm794_vm2, %v955_v57 }
 0x39b   : > { %2140 = vmatpush3.msra.mxu1 %v1309_v59  ;;  %2141 = vmatprep.mubr.msk.f32.mxu1 %vm2247_vm0, %v2246_v1 }
 0x39c   : > { %2150 = vmatprep.subr.mxu1 %v2246_v1 }
 0x40b   : > { %v1119_v60 = vpop.f32.mrf.mxu1 }
 0x40c   : > { %v1123_v61 = vpack.c.bf16 %v1119_v60, %v1119_v60 }
 0x40d   : > { %v2121_v62 = vpop.f32.mrf.mxu1 }
 0x40e   : > { %2125 = vmatmul.mubr.msk.bf16.vlgmr.msra.gmra.mxu0 %vm794_vm2, %v1123_v61 }
 0x40f   : > { %2135 = vmatpush3.xpose.msk.msra.mxu0 %vm794_vm2, %v1222_v63  ;;  %2136 = vmatprep.mubr.msk.f32.mxu0 %vm2247_vm0, %v2246_v1 }
 0x410   : > { %2144 = vmatprep.subr.bf16.mxu0 %v2246_v1 }
 0x416   : > { %2137 = vmatmul.mubr.msk.f32.vlgmr.msra.gmra.mxu0 %vm794_vm2, %v1220_v0 }
 0x417   : > { %2146 = vmatprep.mubr.msk.bf16.mxu0 %vm2247_vm0, %v2246_v1 }
 0x45a   : > { %v1213_v2 = vpop.f32.mrf.mxu1 }
 0x45c   : > { %v2132_v3 = vpop.f32.mrf.mxu1 }
 0x45d   : > { %v2206_v3 = vld [vmem:[%s2597_s11 + $0x8] sm:$0xff]  }
 0x45e   : > { %v1216_v4 = vpop.f32.mrf.mxu1 }
 0x460   : > { %v2133_v6 = vpop.f32.mrf.mxu1 }
 0x4ce   : > { %v1167_v7 = vpop.f32.mrf.mxu0 }
 0x4cf   : > { %v1214_v38 = vadd.f32 %v1213_v2, %v1167_v7 }
 0x4d0   : > { %v2126_v8 = vpop.f32.mrf.mxu0 }
 0x4d2   : > { %v1170_v9 = vpop.f32.mrf.mxu0 }
 0x4d3   : > { %v2019_v9 = vld [vmem:[%s2595_s9] ss:$0 sm:$0xff] }
 0x4d4   : > { %v2127_v10 = vpop.f32.mrf.mxu0 }
 0x4d6   : > { %v1293_v11 = vpop.f32.mrf.mxu0 }
 0x4d7   : > { %v1297_v12 = vsel %vm794_vm2, %v1293_v11, -inf }
 0x4d8   : > { %1298 = vmax.xlane.f32.xlu1 %v1297_v12  ;;  %v2138_v15 = vpop.f32.mrf.mxu0 }
 0x561   : > { %v1299_v16 = vpop.xlane.xlu1 %1298 }
 0x562   : > { %v1300_v17 = vsub.f32 %v1293_v11, %v1299_v16  ;;  %v2020_v11 = vld [vmem:[%s2596_s10] ss:$0 sm:$0xff] }
 0x564   : > { %v1301_v18 = vmul.f32 1.442695, %v1300_v17  ;;  %v2208_v17 = vld [vmem:[%s2599_s13 + $0x18] sm:$0xff]  }
 0x566   : > { %2220 = vpow2.f32 %v1301_v18  ;;  %v2209_v18 = vld [vmem:[%s2599_s13 + $0x10] sm:$0xff]  }
 0x573   : > { %v2221_v19 = vpop.eup %2220 }
 0x574   : > { %v1303_v20 = vsel %vm794_vm2, %v2221_v19, 0.0 }
 0x575   : > { %1304 = vadd.xlane.f32.xlu0 %v1303_v20  ;;  %v2211_v20 = vld [vmem:[%s2599_s13] sm:$0xff]  }
 0x58b   : > { %1436 = vrot.lane.b32.xlu0 %v2417_v13, %s2250_s29  ;;  %v2011_v13 = vld [vmem:[%s2593_s7 + $0x8] sm:$0xf] }
 0x58f   : > { %1434 = vrot.lane.b32.xlu0 %v2419_v14, %s2250_s29  ;;  %v1391_v14 = vsel %vm1129_vm3, %v2011_v13, 0 }
 0x590   : > { %2145 = vmatpush3.bf16.msra.mxu0 %v1391_v14 }
 0x591   : > { %2174 = vmatprep.subr.bf16.mxu0 %v2246_v1 }
 0x5fe   : > { %v1305_v21 = vpop.xlane.xlu0 %1304 }
 0x5ff   : > { %2222 = vrcp.f32 %v1305_v21  ;;  %v2021_v21 = vld [vmem:[%s2598_s12] ss:$0 sm:$0xff] }
 0x602   : > { %v1437_v24 = vpop.permute.xlu0 %1436 }
 0x606   : > { %v1435_v26 = vpop.permute.xlu0 %1434 }
 0x60c   : > { %v2223_v22 = vpop.eup %2222 }
 0x60d   : > { %v1307_v25 = vmul.f32 %v2223_v22, %v2221_v19  ;;  %v2210_v19 = vld [vmem:[%s2599_s13 + $0x8] sm:$0xff]  }
 0x60f   : > { %2142 = vmatmul.mubr.msk.f32.vlgmr.msra.gmra.mxu1 %vm794_vm2, %v1307_v25 }
 0x610   : > { %2151 = vmatpush3.xpose.msk.msra.mxu1 %vm794_vm2, %v1437_v24  ;;  %2152 = vmatprep.mubr.msk.f32.mxu1 %vm2247_vm0, %v2246_v1 }
 0x611   : > { %2155 = vmatprep.subr.mxu1 %v2246_v1 }
 0x613   : > { %2153 = vmatmul.mubr.msk.f32.vlgmr.msra.gmra.mxu1 %vm794_vm2, %v1435_v26 }
 0x614   : > { %2157 = vmatprep.mubr.msk.f32.mxu1 %vm2247_vm0, %v2246_v1 }
 0x6cf   : > { %v1380_v27 = vpop.f32.mrf.mxu1 }
 0x6d0   : > { %v1384_v28 = vpack.c.bf16 %v1380_v27, %v1380_v27 }
 0x6d1   : > { %v2143_v29 = vpop.f32.mrf.mxu1 }
 0x6d2   : > { %2147 = vmatmul.mubr.msk.bf16.vlgmr.msra.gmra.mxu0 %vm794_vm2, %v1384_v28 }
 0x6d3   : > { %v1508_v30 = vpop.f32.mrf.mxu1  ;;  %2182 = vmatprep.mubr.msk.bf16.mxu0 %vm2247_vm0, %v2246_v1  ;;  %2175 = vmatpush3.bf16.msra.mxu0 %v2208_v17 }
 0x6d4   : > { %v1512_v31 = vsel %vm794_vm2, %v1508_v30, -inf  ;;  %2176 = vmatprep.subr.bf16.mxu0 %v2246_v1 }
 0x6d5   : > { %1513 = vmax.xlane.f32.xlu0 %v1512_v31  ;;  %v2154_v32 = vpop.f32.mrf.mxu1 }
 0x6d7   : > { %2177 = vmatpush3.bf16.msra.mxu0 %v2209_v18 }
 0x6d8   : > { %2178 = vmatprep.subr.bf16.mxu0 %v2246_v1 }
 0x6db   : > { %2179 = vmatpush3.bf16.msra.mxu0 %v2210_v19 }
 0x6dc   : > { %2180 = vmatprep.subr.bf16.mxu0 %v2246_v1 }
 0x6df   : > { %2181 = vmatpush3.bf16.msra.mxu0 %v2211_v20 }
 0x75e   : > { %v1514_v33 = vpop.xlane.xlu0 %1513 }
 0x75f   : > { %v1515_v34 = vsub.f32 %v1508_v30, %v1514_v33 }
 0x761   : > { %v1516_v35 = vmul.f32 1.442695, %v1515_v34 }
 0x763   : > { %2224 = vpow2.f32 %v1516_v35 }
 0x770   : > { %v2225_v36 = vpop.eup %2224 }
 0x771   : > { %v1518_v37 = vsel %vm794_vm2, %v2225_v36, 0.0 }
 0x772   : > { %1519 = vadd.xlane.f32.xlu1 %v1518_v37 }
 0x783   : > { %1523 = vrot.lane.b32.xlu1 %v2435_v23, %s2250_s29  ;;  %v2016_v23 = vld [vmem:[%s2593_s7 + $0xc] sm:$0xf] }
 0x784   : > { %v1606_v48 = vsel %vm1129_vm3, %v2016_v23, 0 }
 0x792   : > { %v1427_v39 = vpop.f32.mrf.mxu0 }
 0x793   : > { %v1433_v40 = vadd.f32 %v1427_v39, %v1214_v38 }
 0x794   : > { %v2148_v41 = vpop.f32.mrf.mxu0 }
 0x796   : > { %v1430_v42 = vpop.f32.mrf.mxu0 }
 0x798   : > { %v2149_v43 = vpop.f32.mrf.mxu0 }
 0x7fb   : > { %v1520_v44 = vpop.xlane.xlu1 %1519 }
 0x7fc   : > { %2226 = vrcp.f32 %v1520_v44 }
 0x7ff   : > { %v1524_v45 = vpop.permute.xlu1 %1523 }
 0x800   : > { %2156 = vmatpush3.msra.mxu1 %v1524_v45  ;;  %v2251_v45 = vmov -1.0  }
 0x801   : > { %2160 = vmatprep.subr.bf16.mxu1 %v2246_v1 }
 0x809   : > { %v2227_v46 = vpop.eup %2226 }
 0x80a   : > { %v1522_v47 = vmul.f32 %v2227_v46, %v2225_v36 }
 0x80c   : > { %2158 = vmatmul.mubr.msk.f32.vlgmr.msra.gmra.mxu1 %vm794_vm2, %v1522_v47 }
 0x80d   : > { %2162 = vmatprep.mubr.msk.bf16.mxu1 %vm2247_vm0, %v2246_v1  ;;  %2161 = vmatpush3.bf16.msra.mxu1 %v1606_v48 }
 0x80e   : > { %2166 = vmatprep.subr.bf16.mxu1 %v2246_v1 }
 0x8cc   : > { %v1595_v49 = vpop.f32.mrf.mxu1 }
 0x8cd   : > { %v1599_v50 = vpack.c.bf16 %v1595_v49, %v1595_v49 }
 0x8ce   : > { %v2159_v51 = vpop.f32.mrf.mxu1 }
 0x8cf   : > { %2163 = vmatmul.mubr.msk.bf16.vlgmr.msra.gmra.mxu1 %vm794_vm2, %v1599_v50 }
 0x8d0   : > { %2170 = vmatprep.mubr.msk.bf16.mxu1 %vm2247_vm0, %v2246_v1  ;;  %2167 = vmatpush3.bf16.msra.mxu1 %v2206_v3 }
 0x8d1   : > { %2168 = vmatprep.subr.bf16.mxu1 %v2246_v1 }
 0x98f   : > { %v1642_v52 = vpop.f32.mrf.mxu1 }
 0x990   : > { %v1648_v53 = vadd.f32 %v1642_v52, %v1433_v40  ;;  %v2030_v52 = vld [vmem:[%s2600_s14] ss:$0 sm:$0xff] }
 0x991   : > { %v2164_v54 = vpop.f32.mrf.mxu1 }
 0x992   : > { %v1649_v56 = vadd.f32 %v1648_v53, %v2389_v5  ;;  %v2207_v5 = vld [vmem:[%s2597_s11] sm:$0xff]  }
 0x993   : > { %v1645_v57 = vpop.f32.mrf.mxu1  ;;  %2169 = vmatpush3.bf16.msra.mxu1 %v2207_v5 }
 0x994   : > { %v1657_v58 = vadd.f32 %v2018_v55, %v1649_v56 }
 0x995   : > { %v2165_v59 = vpop.f32.mrf.mxu1 }
 0x996   : > { %v1660_v60 = vsel %vm624_vm1, %v1657_v58, 0.0 }
 0x997   : > { %1661 = vadd.xlane.f32.xlu1 %v1660_v60 }
 0xa20   : > { %v1662_v61 = vpop.xlane.xlu1 %1661 }
 0xa21   : > { %v1664_v62 = vmul.f32 0.03125, %v1662_v61 }
 0xa23   : > { %v1665_v63 = vsub.f32 %v1657_v58, %v1664_v62 }
 0xa25   : > { %v1666_v0 = vmul.f32 %v1665_v63, %v1665_v63 }
 0xa27   : > { %v1667_v2 = vsel %vm624_vm1, %v1666_v0, 0.0 }
 0xa28   : > { %1668 = vadd.xlane.f32.xlu0 %v1667_v2 }
 0xab1   : > { %v1669_v4 = vpop.xlane.xlu0 %1668 }
 0xab2   : > { %v1670_v6 = vmul.f32 0.03125, %v1669_v4  ;;  %v2031_v4 = vld [vmem:[%s2601_s15] ss:$0 sm:$0xff] }
 0xab4   : > { %v1671_v7 = vadd.f32 1e-05, %v1670_v6 }
 0xab6   : > { %2228 = vrsqrt.f32 %v1671_v7  ;;  %v2032_v7 = vld [vmem:[%s2602_s16] ss:$0 sm:$0xff] }
 0xac3   : > { %v2229_v8 = vpop.eup %2228 }
 0xac4   : > { %v1673_v10 = vmul.f32 %v2229_v8, %v1665_v63 }
 0xac6   : > { %v1680_v12 = vmul.f32 %v2019_v9, %v1673_v10 }
 0xac8   : > { %v1687_v15 = vadd.f32 %v2020_v11, %v1680_v12 }
 0xaca   : > { %v1688_v16 = vpack.c.bf16 %v1687_v15, %v1687_v15 }
 0xacc   : > { %2171 = vmatmul.mubr.msk.bf16.vlgmr.msra.gmra.mxu1 %vm624_vm1, %v1688_v16 }
 0xb8c   : > { %v1749_v22 = vpop.f32.mrf.mxu1 }
 0xb8d   : > { %v1750_v24 = vadd.f32 %v2021_v21, %v1749_v22  ;;  %v2033_v22 = vld [vmem:[%s2603_s17] ss:$0 sm:$0xff] }
 0xb8e   : > { %v2172_v25 = vpop.f32.mrf.mxu1 }
 0xb8f   : > { %v1756_v26 = vmul.f32 0.70710677, %v1750_v24  ;;  %v1755_v23 = vmul.f32 0.5, %v1750_v24  ;;  %v2034_v25 = vld [vmem:[%s2604_s18] ss:$0 sm:$0xff] }
 0xb90   : > { %v1752_v13 = vpop.f32.mrf.mxu1 }
 0xb91   : > { %v1759_v14 = vand.u32 2147483647, %v1756_v26  ;;  %vm1757_vm4 = vcmp.ge.f32.partialorder %v1756_v26, 0.0 }
 0xb92   : > { %v2173_v27 = vpop.f32.mrf.mxu1  ;;  %v1758_v46 = vsel %vm1757_vm4, 1.0, %v2251_v45 }
 0xb93   : > { %v1760_v28 = vmul.f32 0.3275911, %v1759_v14  ;;  %v1773_v1 = vsub.f32 0.0, %v1759_v14 }
 0xb95   : > { %v1761_v29 = vadd.f32 1.0, %v1760_v28  ;;  %v1774_v30 = vmul.f32 %v1773_v1, %v1759_v14 }
 0xb97   : > { %2230 = vrcp.f32 %v1761_v29  ;;  %v1775_v33 = vmul.f32 1.442695, %v1774_v30 }
 0xb99   : > { %2232 = vpow2.f32 %v1775_v33 }
 0xba4   : > { %v2231_v31 = vpop.eup %2230 }
 0xba5   : > { %v1764_v32 = vmul.f32 1.0614054, %v2231_v31 }
 0xba6   : > { %v2233_v42 = vpop.eup %2232 }
 0xba7   : > { %v1765_v34 = vadd.f32 -1.4531521, %v1764_v32 }
 0xba9   : > { %v1766_v35 = vmul.f32 %v2231_v31, %v1765_v34 }
 0xbab   : > { %v1767_v36 = vadd.f32 1.4214138, %v1766_v35 }
 0xbad   : > { %v1768_v37 = vmul.f32 %v2231_v31, %v1767_v36 }
 0xbaf   : > { %v1769_v38 = vadd.f32 -0.28449672, %v1768_v37 }
 0xbb1   : > { %v1770_v39 = vmul.f32 %v2231_v31, %v1769_v38 }
 0xbb3   : > { %v1771_v40 = vadd.f32 0.2548296, %v1770_v39 }
 0xbb5   : > { %v1772_v41 = vmul.f32 %v2231_v31, %v1771_v40 }
 0xbb7   : > { %v1777_v43 = vmul.f32 %v2233_v42, %v1772_v41 }
 0xbb9   : > { %v1778_v44 = vsub.f32 1.0, %v1777_v43 }
 0xbbb   : > { %v1779_v47 = vmul.f32 %v1778_v44, %v1758_v46 }
 0xbbd   : > { %v1780_v48 = vadd.f32 1.0, %v1779_v47 }
 0xbbf   : > { %v1781_v49 = vmul.f32 %v1780_v48, %v1755_v23 }
 0xbc1   : > { %v1782_v50 = vpack.c.bf16 %v1781_v49, %v1781_v49 }
 0xbc3   : > { %2183 = vmatmul.mubr.msk.bf16.vlgmr.msra.gmra.mxu0 %vm1815_vm5, %v1782_v50 }
 0xc83   : > { %v1853_v51 = vpop.f32.mrf.mxu0 }
 0xc84   : > { %v1859_v53 = vadd.f32 %v1853_v51, %v1687_v15 }
 0xc85   : > { %v2184_v54 = vpop.f32.mrf.mxu0 }
 0xc86   : > { %v1867_v55 = vadd.f32 %v2030_v52, %v1859_v53 }
 0xc87   : > { %v1856_v56 = vpop.f32.mrf.mxu0 }
 0xc88   : > { %v1870_v57 = vsel %vm624_vm1, %v1867_v55, 0.0 }
 0xc89   : > { %1871 = vadd.xlane.f32.xlu0 %v1870_v57  ;;  %v2185_v58 = vpop.f32.mrf.mxu0 }
 0xd12   : > { %v1872_v59 = vpop.xlane.xlu0 %1871 }
 0xd13   : > { %v1873_v60 = vmul.f32 0.03125, %v1872_v59 }
 0xd15   : > { %v1874_v61 = vsub.f32 %v1867_v55, %v1873_v60 }
 0xd17   : > { %v1875_v62 = vmul.f32 %v1874_v61, %v1874_v61 }
 0xd19   : > { %v1876_v63 = vsel %vm624_vm1, %v1875_v62, 0.0 }
 0xd1a   : > { %1877 = vadd.xlane.f32.xlu0 %v1876_v63 }
 0xda3   : > { %v1878_v0 = vpop.xlane.xlu0 %1877 }
 0xda4   : > { %v1879_v2 = vmul.f32 0.03125, %v1878_v0 }
 0xda6   : > { %v1880_v3 = vadd.f32 1e-05, %v1879_v2 }
 0xda8   : > { %2234 = vrsqrt.f32 %v1880_v3 }
 0xdb5   : > { %v2235_v5 = vpop.eup %2234 }
 0xdb6   : > { %v1882_v6 = vmul.f32 %v2235_v5, %v1874_v61 }
 0xdb8   : > { %v1889_v8 = vmul.f32 %v2031_v4, %v1882_v6 }
 0xdba   : > { %v1896_v9 = vadd.f32 %v2032_v7, %v1889_v8 }
 0xdbc   : > { %v1899_v10 = vsel %vm624_vm1, %v1896_v9, 0.0 }
 0xdbd   : > { %1900 = vadd.xlane.f32.xlu0 %v1899_v10 }
 0xe46   : > { %v1901_v11 = vpop.xlane.xlu0 %1900 }
 0xe47   : > { %v1902_v12 = vmul.f32 0.03125, %v1901_v11 }
 0xe49   : > { %v1903_v15 = vsub.f32 %v1896_v9, %v1902_v12 }
 0xe4b   : > { %v1904_v16 = vmul.f32 %v1903_v15, %v1903_v15 }
 0xe4d   : > { %v1905_v17 = vsel %vm624_vm1, %v1904_v16, 0.0 }
 0xe4e   : > { %1906 = vadd.xlane.f32.xlu0 %v1905_v17 }
 0xed7   : > { %v1907_v18 = vpop.xlane.xlu0 %1906 }
 0xed8   : > { %v1908_v19 = vmul.f32 0.03125, %v1907_v18 }
 0xeda   : > { %v1909_v20 = vadd.f32 1e-05, %v1908_v19 }
 0xedc   : > { %2236 = vrsqrt.f32 %v1909_v20 }
 0xee9   : > { %v2237_v21 = vpop.eup %2236 }
 0xeea   : > { %v1911_v24 = vmul.f32 %v2237_v21, %v1903_v15 }
 0xeec   : > { %v1918_v26 = vmul.f32 %v2033_v22, %v1911_v24 }
 0xeee   : > { %v1925_v13 = vadd.f32 %v2034_v25, %v1918_v26 }
 0xef0   : > { %1926 = vst.msk [vmem:[%s597_s3] sm:$0xff] %vm624_vm1, %v1925_v13 }
 0xef1 PF: > { %s29_s0 = sadd.s32 1, %s2244_s0  }
 0xef2   : > { %p26_p4 = scmp.ge.s32.totalorder %s29_s0, 4  }
 0xef4   :  { %28 = sbr.rel (!%p26_p4) target bundleno = 5 (0x5), region = 129 }

// kernel: _lambda_.14
= control target key start
LH: loop header
LB: loop body
LE: loop exit
PB: predicated region body
PF: predicated region fallthrough
CT: control target
= control target key end

     0   :  { %s4914_s0 = inlined_call_operand.vmem [shape: f32[2,16,32], index: 0, kind: input, shape index: {}]   ;;  %s4915_s1 = inlined_call_operand.vmem [shape: f32[2,8,32], index: 1, kind: input, shape index: {}]   ;;  %s4916_s2 = inlined_call_operand.vmem [shape: bf16[32,32], index: 2, kind: input, shape index: {}]   ;;  %s4917_s3 = inlined_call_operand.vmem [shape: f32[1,32], index: 3, kind: input, shape index: {}]   ;;  %s4918_s4 = inlined_call_operand.vmem [shape: bf16[32,32], index: 4, kind: input, shape index: {}]   ;;  %s4919_s5 = inlined_call_operand.vmem [shape: f32[1,32], index: 5, kind: input, shape index: {}]   ;;  %s4920_s6 = inlined_call_operand.vmem [shape: bf16[32,32], index: 6, kind: input, shape index: {}]   ;;  %s4921_s7 = inlined_call_operand.vmem [shape: f32[1,32], index: 7, kind: input, shape index: {}]   ;;  %s4922_s8 = inlined_call_operand.vmem [shape: bf16[4,8,32], index: 8, kind: input, shape index: {}]   ;;  %s4923_s9 = inlined_call_operand.vmem [shape: f32[1,32], index: 9, kind: input, shape index: {}]   ;;  %s4924_s10 = inlined_call_operand.vmem [shape: f32[1,32], index: 10, kind: input, shape index: {}]   ;;  %s4925_s11 = inlined_call_operand.vmem [shape: f32[1,32], index: 11, kind: input, shape index: {}]   ;;  %s4926_s12 = inlined_call_operand.vmem [shape: bf16[32,32], index: 12, kind: input, shape index: {}]   ;;  %s4927_s13 = inlined_call_operand.vmem [shape: f32[1,32], index: 13, kind: input, shape index: {}]   ;;  %s4928_s14 = inlined_call_operand.vmem [shape: bf16[32,32], index: 14, kind: input, shape index: {}]   ;;  %s4929_s15 = inlined_call_operand.vmem [shape: f32[1,32], index: 15, kind: input, shape index: {}]   ;;  %s4930_s16 = inlined_call_operand.vmem [shape: bf16[32,32], index: 16, kind: input, shape index: {}]   ;;  %s4931_s17 = inlined_call_operand.vmem [shape: f32[1,32], index: 17, kind: input, shape index: {}]   ;;  %s4932_s18 = inlined_call_operand.vmem [shape: bf16[4,8,32], index: 18, kind: input, shape index: {}]   ;;  %s4933_s19 = inlined_call_operand.vmem [shape: f32[1,32], index: 19, kind: input, shape index: {}]   ;;  %s4934_s20 = inlined_call_operand.vmem [shape: f32[1,32], index: 20, kind: input, shape index: {}]   ;;  %s4935_s21 = inlined_call_operand.vmem [shape: f32[1,32], index: 21, kind: input, shape index: {}]   ;;  %s4936_s22 = inlined_call_operand.vmem [shape: bf16[32,64], index: 22, kind: input, shape index: {}]   ;;  %s4937_s23 = inlined_call_operand.vmem [shape: f32[1,64], index: 23, kind: input, shape index: {}]   ;;  %s4938_s24 = inlined_call_operand.vmem [shape: bf16[64,32], index: 24, kind: input, shape index: {}]   ;;  %s4939_s25 = inlined_call_operand.vmem [shape: f32[1,32], index: 25, kind: input, shape index: {}]   ;;  %s4940_s26 = inlined_call_operand.vmem [shape: f32[1,32], index: 26, kind: input, shape index: {}]   ;;  %s4941_s27 = inlined_call_operand.vmem [shape: f32[1,32], index: 27, kind: input, shape index: {}]   ;;  %s4942_s28 = inlined_call_operand.vmem [shape: f32[2,16,32], index: 28, kind: output, shape index: {}]  }
   0x1   :  { %4958 = sst [smem:[#allocation3_spill]] %s4914_s0 }
   0x2   :  { %4959 = sst [smem:[#allocation4_spill]] %s4915_s1 }
   0x3   :  { %4960 = sst [smem:[#allocation5_spill]] %s4916_s2 }
   0x4   :  { %4961 = sst [smem:[#allocation6_spill]] %s4917_s3 }
   0x5   :  { %4962 = sst [smem:[#allocation7_spill]] %s4918_s4 }
   0x6   :  { %4963 = sst [smem:[#allocation8_spill]] %s4919_s5 }
   0x7   :  { %4964 = sst [smem:[#allocation9_spill]] %s4920_s6 }
   0x8   :  { %4965 = sst [smem:[#allocation10_spill]] %s4921_s7 }
   0x9   :  { %4966 = sst [smem:[#allocation11_spill]] %s4922_s8  ;;  %s4402_s8 = smov 0  }
   0xa   :  { %4967 = sst [smem:[#allocation12_spill]] %s4923_s9 }
   0xb   :  { %4968 = sst [smem:[#allocation13_spill]] %s4924_s10 }
   0xc   :  { %4969 = sst [smem:[#allocation14_spill]] %s4925_s11 }
   0xd   :  { %4970 = sst [smem:[#allocation15_spill]] %s4926_s12 }
   0xe LB: > { %s3703_s5 = sadd.s32 4294967295, %s4249_s8   ;;  %p3707_p0 = scmp.ge.s32.totalorder %s4249_s8, 1  ;;  %s4249_s8 = sphi %s4402_s8, %s38_s8  }
   0xf   : > { %p771_p1 = scmp.lt.s32.totalorder %s4249_s8, 3 }
  0x11   : > { %p772_p2 = pnand %p3707_p0, %p771_p1 }
  0x12   : > { %s4971_s3 = sld [smem:[#allocation5_spill]] (!%p772_p2)  ;;  %p849_p3 = scmp.lt.s32.totalorder (!%p772_p2), %s3703_s5, 1 }
  0x13   : > { %775 = sbr.rel (%p772_p2) target bundleno = 5683 (0x1633), region = 132  ;;  %s4972_s0 = sld [smem:[#allocation7_spill]] (!%p772_p2) }
  0x14   : > { %s4973_s9 = sld [smem:[#allocation3_spill]] (!%p772_p2)  ;;  %s4951_s29 = smov (!%p772_p2), 112  }
  0x15   : > { %s4974_s11 = sld [smem:[#allocation9_spill]] (!%p772_p2)  ;;  %s4985_s6 = smov (!%p772_p2), 112  }
  0x16   : > { %s4975_s4 = sld [smem:[#allocation6_spill]] (!%p772_p2) }
  0x17   : > { %s4976_s10 = sld [smem:[#allocation8_spill]] (!%p772_p2) }
  0x18   : > { %v4141_v0 = vld [vmem:[%s4971_s3 + $0x8] sm:$0xff]   ;;  %v4251_v1 = vmov 0.0   ;;  %v4143_v3 = vld [vmem:[%s4971_s3] sm:$0xff]   ;;  %vm4252_vm0 = vmmov 0   ;;  %s4989_s5 = smov (!%p849_p3, %s3703_s5), 1  ;;  %vm891_vm1 = vcmask 261120   ;;  %v1064_v39 = vlaneseq }
  0x19   : > { %3915 = vmatprep.subr.bf16.mxu0 %v4251_v1  ;;  %3923 = vmatprep.subr.bf16.mxu1 %v4251_v1  ;;  %v4142_v2 = vld [vmem:[%s4972_s0 + $0x8] sm:$0xff]   ;;  %v4144_v4 = vld [vmem:[%s4972_s0] sm:$0xff]   ;;  %s4948_s12 = sshll.u32 %s4989_s5, 4  ;;  %vm1071_vm2 = vcmask 64512   ;;  %s4977_s1 = sld [smem:[#allocation10_spill]]  ;;  %vm1161_vm4 = vcmask 130048  }
  0x1a   : > { %3916 = vmatpush3.bf16.msra.mxu0 %v4141_v0  ;;  %3919 = vmatprep.mubr.msk.bf16.mxu0 %vm4252_vm0, %v4251_v1  ;;  %s853_s30 = scalar_lea.vmem %s4973_s9, %s4948_s12  ;;  %s4953_s9 = smov 120   ;;  %v4522_v40 = vshrl.u32 %v1064_v39, 7  ;;  %v4527_v42 = vand.u32 127, %v1064_v39  ;;  %vm1896_vm6 = vcmask 1043456   ;;  %vm3534_vm9 = vcmask 523264  }
  0x1b   : > { %3924 = vmatpush3.bf16.msra.mxu1 %v4142_v2  ;;  %3917 = vmatprep.subr.bf16.mxu0 %v4251_v1  ;;  %v4439_v5 = vld [vmem:[%s853_s30] sm:$0xff]  ;;  %v4441_v6 = vld [vmem:[%s853_s30 + $0x8] sm:$0xff]  ;;  %s4979_s30 = sld [smem:[#allocation12_spill]]  ;;  %s4986_s3 = smov 104  }
  0x1c   : > { %3925 = vmatprep.subr.bf16.mxu1 %v4251_v1  ;;  %3927 = vmatprep.mubr.msk.bf16.mxu1 %vm4252_vm0, %v4251_v1  ;;  %v867_v7 = vpack.c.bf16 %v4441_v6, %v4439_v5  ;;  %v4145_v8 = vld [vmem:[%s4974_s11 + $0x8] sm:$0xff]   ;;  %v4146_v9 = vld [vmem:[%s4974_s11] sm:$0xff]   ;;  %v4525_v41 = vadd.s32 8, %v4522_v40  ;;  %vm1069_vm5 = vcmp.gt.s32.totalorder %v4527_v42, %v4522_v40  ;;  %s4982_s12 = sld [smem:[#allocation13_spill]] }
  0x1d   : > { %v3713_v10 = vld [vmem:[%s4975_s4] ss:$0 sm:$0xff]  ;;  %s4949_s4 = smov 104  }
  0x1e   : > { %3918 = vmatpush3.bf16.msra.mxu0 %v4143_v3  ;;  %v3717_v16 = vld [vmem:[%s4976_s10] ss:$0 sm:$0xff]  ;;  %vm1070_vm3 = vcmp.gt.s32.totalorder %v4527_v42, %v4525_v41  ;;  %s4978_s10 = sld [smem:[#allocation11_spill]] }
  0x1f   : > { %3926 = vmatpush3.bf16.msra.mxu1 %v4144_v4  ;;  %3931 = vmatprep.subr.bf16.mxu0 %v4251_v1  ;;  %v3721_v25 = vld [vmem:[%s4977_s1] ss:$0 sm:$0xff] }
  0x21   : > { %3920 = vmatmul.mubr.msk.bf16.vlgmr.msra.gmra.mxu0 %vm891_vm1, %v867_v7 }
  0x22   : > { %3928 = vmatmul.mubr.msk.bf16.vlgmr.msra.gmra.mxu1 %vm891_vm1, %v867_v7  ;;  %3935 = vmatprep.mubr.msk.bf16.mxu0 %vm4252_vm0, %v4251_v1 }
  0x23   : > { %3932 = vmatpush3.bf16.msra.mxu0 %v4145_v8 }
  0x24   : > { %3933 = vmatprep.subr.bf16.mxu0 %v4251_v1 }
  0x27   : > { %3934 = vmatpush3.bf16.msra.mxu0 %v4146_v9 }
  0x2a   : > { %3936 = vmatmul.mubr.msk.bf16.vlgmr.msra.gmra.mxu0 %vm891_vm1, %v867_v7 }
  0xe1   : > { %v929_v11 = vpop.f32.mrf.mxu0 }
  0xe2   : > { %v993_v12 = vpop.f32.mrf.mxu1  ;;  %v4460_v13 = vadd.f32 %v3713_v10, %v929_v11 }
  0xe3   : > { %v3921_v15 = vpop.f32.mrf.mxu0  ;;  %v4471_v22 = vadd.f32 %v3717_v16, %v993_v12 }
  0xe4   : > { %v3929_v14 = vpop.f32.mrf.mxu1  ;;  %1267 = vrot.lane.b32.xlu1 %v4460_v13, %s4953_s9  ;;  %3943 = vmatprep.mubr.msk.f32.mxu1 %vm1071_vm2, %v4460_v13 }
  0xe5   : > { %v932_v18 = vpop.f32.mrf.mxu0 }
  0xe6   : > { %v996_v17 = vpop.f32.mrf.mxu1  ;;  %v4489_v23 = vadd.f32 %v3713_v10, %v932_v18 }
  0xe7   : > { %v4469_v19 = vadd.f32 %v3717_v16, %v996_v17  ;;  %v3922_v21 = vpop.f32.mrf.mxu0 }
  0xe8   : > { %v3930_v20 = vpop.f32.mrf.mxu1 }
  0xe9   : > { %1273 = vrot.lane.b32.xlu0 %v4469_v19, %s4953_s9  ;;  %3939 = vmatprep.subr.msk.mxu1 %vm1071_vm2, %v4469_v19 }
  0xea   : > { %1479 = vrot.lane.b32.xlu1 %v4469_v19, %s4951_s29  ;;  %3940 = vmatpush3.xpose.msk.msra.mxu1 %vm1071_vm2, %v4469_v19  ;;  %v1057_v24 = vpop.f32.mrf.mxu0 }
  0xeb   : > { %3941 = vmatprep.subr.msk.mxu1 %vm1071_vm2, %v4471_v22  ;;  %v4502_v28 = vadd.f32 %v3721_v25, %v1057_v24 }
  0xec   : > { %v3937_v26 = vpop.f32.mrf.mxu0 }
  0xed   : > { %1271 = vrot.lane.b32.xlu0 %v4471_v22, %s4953_s9 }
  0xee   : > { %1477 = vrot.lane.b32.xlu1 %v4471_v22, %s4951_s29  ;;  %3942 = vmatpush3.xpose.msk.msra.mxu1 %vm1071_vm2, %v4471_v22  ;;  %v1060_v27 = vpop.f32.mrf.mxu0 }
  0xef   : > { %v4504_v29 = vadd.f32 %v3721_v25, %v1060_v27 }
  0xf0   : > { %v3938_v30 = vpop.f32.mrf.mxu0 }
  0xf1   : > { %1269 = vrot.lane.b32.xlu0 %v4489_v23, %s4953_s9  ;;  %3944 = vmatmul.mubr.msk.f32.vlgmr.msra.gmra.mxu1 %vm1071_vm2, %v4489_v23 }
  0xf2   : > { %1475 = vrot.lane.b32.xlu1 %v4489_v23, %s4951_s29  ;;  %3946 = vmatprep.subr.mxu1 %v4504_v29 }
  0xf3   : > { %3947 = vmatpush3.msra.mxu1 %v4504_v29 }
  0xf4   : > { %3948 = vmatprep.subr.mxu1 %v4502_v28 }
  0xf5   : > { %1473 = vrot.lane.b32.xlu0 %v4460_v13, %s4951_s29  ;;  %3949 = vmatpush3.msra.mxu1 %v4502_v28 }
 0x156   : > { %v1268_v31 = vpop.permute.xlu1 %1267 }
 0x157   : > { %3957 = vmatprep.mubr.msk.f32.mxu0 %vm1071_vm2, %v1268_v31 }
 0x15b   : > { %v1274_v32 = vpop.permute.xlu0 %1273 }
 0x15c   : > { %3953 = vmatprep.subr.msk.mxu0 %vm1071_vm2, %v1274_v32  ;;  %v1480_v33 = vpop.permute.xlu1 %1479 }
 0x15d   : > { %3954 = vmatpush3.xpose.msk.msra.mxu0 %vm1071_vm2, %v1274_v32 }
 0x15f   : > { %v1272_v34 = vpop.permute.xlu0 %1271 }
 0x160   : > { %3955 = vmatprep.subr.msk.mxu0 %vm1071_vm2, %v1272_v34  ;;  %v1478_v36 = vpop.permute.xlu1 %1477 }
 0x161   : > { %3956 = vmatpush3.xpose.msk.msra.mxu0 %vm1071_vm2, %v1272_v34 }
 0x162   : > { %3967 = vmatprep.subr.msk.mxu0 %vm1071_vm2, %v1480_v33 }
 0x163   : > { %v1270_v35 = vpop.permute.xlu0 %1269 }
 0x164   : > { %3958 = vmatmul.mubr.msk.f32.vlgmr.msra.gmra.mxu0 %vm1071_vm2, %v1270_v35  ;;  %v1476_v38 = vpop.permute.xlu1 %1475 }
 0x165   : > { %3968 = vmatpush3.xpose.msk.msra.mxu0 %vm1071_vm2, %v1480_v33 }
 0x166   : > { %3969 = vmatprep.subr.msk.mxu0 %vm1071_vm2, %v1478_v36 }
 0x167   : > { %v1474_v37 = vpop.permute.xlu0 %1473 }
 0x168   : > { %3971 = vmatprep.mubr.msk.f32.mxu0 %vm1071_vm2, %v1474_v37 }
 0x169   : > { %3970 = vmatpush3.xpose.msk.msra.mxu0 %vm1071_vm2, %v1478_v36 }
 0x16c   : > { %3972 = vmatmul.mubr.msk.f32.vlgmr.msra.gmra.mxu0 %vm1071_vm2, %v1476_v38 }
 0x1b1   : > { %v3945_v43 = vpop.f32.mrf.mxu1 }
 0x1b2   : > { %v1160_v44 = vsel %vm1070_vm3, -1e+30, %v3945_v43 }
 0x1b3   : > { %v1150_v45 = vpop.f32.mrf.mxu1  ;;  %v1165_v46 = vsel %vm1161_vm4, %v1160_v44, -inf }
 0x1b4   : > { %v1159_v47 = vsel %vm1069_vm5, -1e+30, %v1150_v45  ;;  %1166 = vmax.xlane.f32.xlu1 %v1165_v46 }
 0x1b5   : > { %v1162_v48 = vsel %vm1161_vm4, %v1159_v47, -inf }
 0x1b6   : > { %1163 = vmax.xlane.f32.xlu0 %v1162_v48 }
 0x1c5   : > { %1386 = vrot.lane.b32.xlu1 %v4504_v29, %s4953_s9 }
 0x1c9   : > { %1590 = vrot.lane.b32.xlu1 %v4504_v29, %s4951_s29 }
 0x224   : > { %v3959_v49 = vpop.f32.mrf.mxu0 }
 0x225   : > { %v1359_v53 = vsel %vm1070_vm3, -1e+30, %v3959_v49 }
 0x226   : > { %v1349_v50 = vpop.f32.mrf.mxu0  ;;  %v1363_v55 = vsel %vm1161_vm4, %v1359_v53, -inf }
 0x227   : > { %v1358_v51 = vsel %vm1069_vm5, -1e+30, %v1349_v50 }
 0x228   : > { %v1360_v52 = vsel %vm1161_vm4, %v1358_v51, -inf }
 0x229   : > { %1361 = vmax.xlane.f32.xlu0 %v1360_v52 }
 0x22c   : > { %v3973_v54 = vpop.f32.mrf.mxu0 }
 0x22d   : > { %v1565_v56 = vsel %vm1070_vm3, -1e+30, %v3973_v54  ;;  %1364 = vmax.xlane.f32.xlu0 %v1363_v55 }
 0x22e   : > { %v1555_v57 = vpop.f32.mrf.mxu0  ;;  %v1569_v60 = vsel %vm1161_vm4, %v1565_v56, -inf }
 0x22f   : > { %v1564_v58 = vsel %vm1069_vm5, -1e+30, %v1555_v57 }
 0x230   : > { %v1566_v59 = vsel %vm1161_vm4, %v1564_v58, -inf }
 0x231   : > { %1567 = vmax.xlane.f32.xlu1 %v1566_v59  ;;  %1570 = vmax.xlane.f32.xlu0 %v1569_v60 }
 0x23d   : > { %v1167_v61 = vpop.xlane.xlu1 %1166 }
 0x23e   : > { %v1169_v0 = vsub.f32 %v1160_v44, %v1167_v61 }
 0x23f   : > { %v1164_v63 = vpop.xlane.xlu0 %1163 }
 0x240   : > { %v1168_v2 = vsub.f32 %v1159_v47, %v1164_v63  ;;  %v1172_v3 = vmul.f32 1.442695, %v1169_v0 }
 0x241   : > { %v1387_v62 = vpop.permute.xlu1 %1386 }
 0x242   : > { %1588 = vrot.lane.b32.xlu1 %v4502_v28, %s4951_s29  ;;  %3960 = vmatprep.subr.mxu1 %v1387_v62  ;;  %v1170_v4 = vmul.f32 1.442695, %v1168_v2  ;;  %4159 = vpow2.f32 %v1172_v3  ;;  %s4980_s29 = sld [smem:[#allocation4_spill]] }
 0x244   : > { %4161 = vpow2.f32 %v1170_v4 }
 0x245   : > { %v1591_v32 = vpop.permute.xlu1 %1590 }
 0x247   : > { %1384 = vrot.lane.b32.xlu0 %v4502_v28, %s4953_s9 }
 0x24f   : > { %v4160_v7 = vpop.eup %4159 }
 0x250   : > { %v1177_v10 = vsel %vm1161_vm4, %v4160_v7, 0.0 }
 0x251   : > { %v4162_v8 = vpop.eup %4161 }
 0x252   : > { %v1174_v9 = vsel %vm1161_vm4, %v4162_v8, 0.0 }
 0x266   : > { %1175 = vadd.xlane.f32.xlu1 %v1174_v9  ;;  %1178 = vadd.xlane.f32.xlu0 %v1177_v10 }
 0x2b2   : > { %v1362_v11 = vpop.xlane.xlu0 %1361 }
 0x2b3   : > { %v1366_v12 = vsub.f32 %v1358_v51, %v1362_v11 }
 0x2b5   : > { %v1368_v14 = vmul.f32 1.442695, %v1366_v12 }
 0x2b6   : > { %v1365_v15 = vpop.xlane.xlu0 %1364 }
 0x2b7   : > { %4163 = vpow2.f32 %v1368_v14  ;;  %v1367_v16 = vsub.f32 %v1359_v53, %v1365_v15 }
 0x2b9   : > { %v1370_v17 = vmul.f32 1.442695, %v1367_v16 }
 0x2ba   : > { %v1571_v18 = vpop.xlane.xlu0 %1570  ;;  %v1568_v33 = vpop.xlane.xlu1 %1567 }
 0x2bb   : > { %4165 = vpow2.f32 %v1370_v17  ;;  %v1573_v20 = vsub.f32 %v1565_v56, %v1571_v18  ;;  %v1572_v34 = vsub.f32 %v1564_v58, %v1568_v33 }
 0x2bd   : > { %v1576_v21 = vmul.f32 1.442695, %v1573_v20  ;;  %v1574_v35 = vmul.f32 1.442695, %v1572_v34 }
 0x2be   : > { %v1589_v36 = vpop.permute.xlu1 %1588  ;;  %v1385_v37 = vpop.permute.xlu0 %1384 }
 0x2bf   : > { %4167 = vpow2.f32 %v1576_v21 }
 0x2c0   : > { %4169 = vpow2.f32 %v1574_v35 }
 0x2c4   : > { %v4164_v24 = vpop.eup %4163 }
 0x2c5   : > { %v1372_v25 = vsel %vm1161_vm4, %v4164_v24, 0.0 }
 0x2c6   : > { %1373 = vadd.xlane.f32.xlu1 %v1372_v25 }
 0x2c8   : > { %v4166_v26 = vpop.eup %4165 }
 0x2c9   : > { %v1375_v27 = vsel %vm1161_vm4, %v4166_v26, 0.0 }
 0x2ca   : > { %1376 = vadd.xlane.f32.xlu0 %v1375_v27 }
 0x2cc   : > { %v4168_v30 = vpop.eup %4167 }
 0x2cd   : > { %v1581_v31 = vsel %vm1161_vm4, %v4168_v30, 0.0  ;;  %v4170_v43 = vpop.eup %4169 }
 0x2ce   : > { %1582 = vadd.xlane.f32.xlu0 %v1581_v31 }
 0x2d7   : > { %1681 = vrot.lane.b32.xlu1 %v4471_v22, %s4949_s4  ;;  %v1578_v22 = vsel %vm1161_vm4, %v4170_v43, 0.0 }
 0x2e4   : > { %1683 = vrot.lane.b32.xlu0 %v4469_v19, %s4949_s4 }
 0x2e8   : > { %1677 = vrot.lane.b32.xlu0 %v4460_v13, %s4949_s4 }
 0x2ef   : > { %v1176_v38 = vpop.xlane.xlu1 %1175  ;;  %v1179_v39 = vpop.xlane.xlu0 %1178 }
 0x2f0   : > { %4171 = vrcp.f32 %v1176_v38  ;;  %v3754_v38 = vld [vmem:[%s4978_s10 + $0xc] sm:$0xf] }
 0x2f1   : > { %4173 = vrcp.f32 %v1179_v39 }
 0x2fb   : > { %1579 = vadd.xlane.f32.xlu1 %v1578_v22 }
 0x2fd   : > { %v4172_v44 = vpop.eup %4171 }
 0x2fe   : > { %v4174_v45 = vpop.eup %4173  ;;  %v1181_v46 = vmul.f32 %v4172_v44, %v4162_v8 }
 0x2ff   : > { %v1183_v47 = vmul.f32 %v4174_v45, %v4160_v7 }
 0x300   : > { %3950 = vmatprep.mubr.msk.f32.mxu1 %vm1161_vm4, %v1181_v46 }
 0x301   : > { %3951 = vmatmul.mubr.msk.f32.vlgmr.msra.gmra.mxu1 %vm1161_vm4, %v1183_v47 }
 0x302   : > { %3961 = vmatpush3.msra.mxu1 %v1387_v62 }
 0x303   : > { %3962 = vmatprep.subr.mxu1 %v1385_v37 }
 0x304   : > { %3963 = vmatpush3.msra.mxu1 %v1385_v37  ;;  %v3752_v37 = vld [vmem:[%s4978_s10 + $0x8] sm:$0xf] }
 0x305   : > { %3974 = vmatprep.subr.mxu1 %v1591_v32  ;;  %v1999_v47 = vsel %vm1896_vm6, %v3752_v37, 0 }
 0x30c   : > { %1679 = vrot.lane.b32.xlu1 %v4489_v23, %s4949_s4 }
 0x34f   : > { %v1374_v13 = vpop.xlane.xlu1 %1373 }
 0x350   : > { %4175 = vrcp.f32 %v1374_v13  ;;  %v2055_v13 = vsel %vm1896_vm6, %v3754_v38, 0 }
 0x353   : > { %v1377_v19 = vpop.xlane.xlu0 %1376  ;;  %v1682_v23 = vpop.permute.xlu1 %1681 }
 0x354   : > { %4177 = vrcp.f32 %v1377_v19 }
 0x357   : > { %v1583_v51 = vpop.xlane.xlu0 %1582 }
 0x358   : > { %4179 = vrcp.f32 %v1583_v51 }
 0x35b   : > { %v1684_v53 = vpop.permute.xlu0 %1683 }
 0x35d   : > { %v4176_v48 = vpop.eup %4175 }
 0x35e   : > { %v1379_v49 = vmul.f32 %v4176_v48, %v4164_v24 }
 0x35f   : > { %v1678_v59 = vpop.permute.xlu0 %1677 }
 0x360   : > { %3964 = vmatprep.mubr.msk.f32.mxu1 %vm1161_vm4, %v1379_v49 }
 0x361   : > { %v4178_v50 = vpop.eup %4177 }
 0x362   : > { %v1381_v52 = vmul.f32 %v4178_v50, %v4166_v26 }
 0x364   : > { %3965 = vmatmul.mubr.msk.f32.vlgmr.msra.gmra.mxu1 %vm1161_vm4, %v1381_v52 }
 0x365   : > { %3975 = vmatpush3.msra.mxu1 %v1591_v32  ;;  %v4180_v55 = vpop.eup %4179  ;;  %v1885_v32 = vld [vmem:[%s4978_s10] sm:$0xf] }
 0x366   : > { %3976 = vmatprep.subr.mxu1 %v1589_v36  ;;  %v1587_v58 = vmul.f32 %v4180_v55, %v4168_v30  ;;  %v1945_v34 = vsel %vm1896_vm6, %v1885_v32, 0 }
 0x367   : > { %3977 = vmatpush3.msra.mxu1 %v1589_v36 }
 0x368   : > { %3981 = vmatprep.subr.msk.mxu1 %vm1071_vm2, %v1684_v53 }
 0x384   : > { %v1580_v54 = vpop.xlane.xlu1 %1579 }
 0x385   : > { %4181 = vrcp.f32 %v1580_v54 }
 0x388   : > { %v1680_v60 = vpop.permute.xlu1 %1679 }
 0x392   : > { %v4182_v56 = vpop.eup %4181 }
 0x393   : > { %v1585_v57 = vmul.f32 %v4182_v56, %v4170_v43 }
 0x395   : > { %3978 = vmatprep.mubr.msk.f32.mxu1 %vm1161_vm4, %v1585_v57 }
 0x396   : > { %3979 = vmatmul.mubr.msk.f32.vlgmr.msra.gmra.mxu1 %vm1161_vm4, %v1587_v58 }
 0x397   : > { %3982 = vmatpush3.xpose.msk.msra.mxu1 %vm1071_vm2, %v1684_v53  ;;  %3985 = vmatprep.mubr.msk.f32.mxu1 %vm1071_vm2, %v1678_v59 }
 0x398   : > { %3983 = vmatprep.subr.msk.mxu1 %vm1071_vm2, %v1682_v23 }
 0x39b   : > { %3984 = vmatpush3.xpose.msk.msra.mxu1 %vm1071_vm2, %v1682_v23 }
 0x39c   : > { %4001 = vmatprep.subr.bf16.mxu1 %v4251_v1 }
 0x39e   : > { %3986 = vmatmul.mubr.msk.f32.vlgmr.msra.gmra.mxu1 %vm1071_vm2, %v1680_v60 }
 0x39f   : > { %4003 = vmatprep.mubr.msk.bf16.mxu1 %vm4252_vm0, %v4251_v1  ;;  %4002 = vmatpush3.bf16.msra.mxu1 %v1945_v34 }
 0x3a0   : > { %4013 = vmatprep.subr.bf16.mxu1 %v4251_v1 }
 0x3c1   : > { %v3952_v61 = vpop.f32.mrf.mxu1 }
 0x3c2   : > { %1266 = vst.msk [vmem:[#allocation2 + $0x8] sm:$0xff] %vm1071_vm2, %v3952_v61 }
 0x3c3   : > { %v1256_v62 = vpop.f32.mrf.mxu1 }
 0x3c4   : > { %1265 = vst.msk [vmem:[#allocation2] sm:$0xff] %vm1071_vm2, %v1256_v62 }
 0x424   : > { %v3966_v63 = vpop.f32.mrf.mxu1 }
 0x425   : > { %1472 = vst.msk [vmem:[#allocation2 + $0x18] sm:$0xff] %vm1071_vm2, %v3966_v63 }
 0x426   : > { %v1462_v0 = vpop.f32.mrf.mxu1 }
 0x427   : > { %1471 = vst.msk [vmem:[#allocation2 + $0x10] sm:$0xff] %vm1071_vm2, %v1462_v0 }
 0x42e   : > { %v1887_v39 = vld [vmem:[#allocation2 + $0x1] ss:$4 sm:$0xff]  ;;  %v1881_v22 = vld [vmem:[#allocation2] ss:$4 sm:$0xff]  ;;  %v1989_v49 = vld [vmem:[#allocation2 + $0x2] ss:$4 sm:$0xff] }
 0x42f   : > { %v2045_v50 = vld [vmem:[#allocation2 + $0x3] ss:$4 sm:$0xff] }
 0x456   : > { %v3980_v2 = vpop.f32.mrf.mxu1 }
 0x457   : > { %1676 = vst.msk [vmem:[#allocation2 + $0x28] sm:$0xff] %vm1071_vm2, %v3980_v2 }
 0x458   : > { %v1666_v3 = vpop.f32.mrf.mxu1 }
 0x459   : > { %1675 = vst.msk [vmem:[#allocation2 + $0x20] sm:$0xff] %vm1071_vm2, %v1666_v3 }
 0x45e   : > { %v3987_v4 = vpop.f32.mrf.mxu1 }
 0x45f   : > { %v1769_v7 = vsel %vm1070_vm3, -1e+30, %v3987_v4 }
 0x460   : > { %v1759_v8 = vpop.f32.mrf.mxu1  ;;  %v1773_v9 = vsel %vm1161_vm4, %v1769_v7, -inf }
 0x461   : > { %v1768_v10 = vsel %vm1069_vm5, -1e+30, %v1759_v8  ;;  %1774 = vmax.xlane.f32.xlu1 %v1773_v9  ;;  %v3756_v9 = vld [vmem:[%s4979_s30] ss:$0 sm:$0xff]  ;;  %s3710_s30 = sshll.u32 %s4989_s5, 3 }
 0x462   : > { %v1770_v11 = vsel %vm1161_vm4, %v1768_v10, -inf  ;;  %s857_s9 = scalar_lea.vmem %s4980_s29, %s3710_s30  ;;  %s4984_s30 = smov 120  }
 0x463   : > { %1771 = vmax.xlane.f32.xlu0 %v1770_v11 }
 0x472   : > { %1794 = vrot.lane.b32.xlu1 %v4504_v29, %s4949_s4 }
 0x4ea   : > { %v1775_v12 = vpop.xlane.xlu1 %1774 }
 0x4eb   : > { %v1777_v14 = vsub.f32 %v1769_v7, %v1775_v12 }
 0x4ec   : > { %v1772_v15 = vpop.xlane.xlu0 %1771 }
 0x4ed   : > { %v1780_v16 = vmul.f32 1.442695, %v1777_v14  ;;  %v1776_v41 = vsub.f32 %v1768_v10, %v1772_v15 }
 0x4ee   : > { %v1795_v17 = vpop.permute.xlu1 %1794 }
 0x4ef   : > { %4183 = vpow2.f32 %v1780_v16  ;;  %v1778_v18 = vmul.f32 1.442695, %v1776_v41  ;;  %3988 = vmatprep.subr.mxu0 %v1795_v17 }
 0x4f0   : > { %3989 = vmatpush3.msra.mxu0 %v1795_v17 }
 0x4f1   : > { %4185 = vpow2.f32 %v1778_v18 }
 0x4fc   : > { %v4184_v40 = vpop.eup %4183 }
 0x4fd   : > { %v1785_v42 = vsel %vm1161_vm4, %v4184_v40, 0.0 }
 0x4fe   : > { %v4186_v20 = vpop.eup %4185  ;;  %1786 = vadd.xlane.f32.xlu0 %v1785_v42 }
 0x4ff   : > { %v1782_v21 = vsel %vm1161_vm4, %v4186_v20, 0.0 }
 0x502   : > { %1783 = vadd.xlane.f32.xlu0 %v1782_v21 }
 0x518   : > { %1792 = vrot.lane.b32.xlu0 %v4502_v28, %s4949_s4  ;;  %v3749_v28 = vld [vmem:[%s4978_s10 + $0x4] sm:$0xf]  ;;  %s4981_s10 = sld [smem:[#allocation15_spill]] }
 0x519   : > { %v1898_v33 = vsel %vm1896_vm6, %v3749_v28, 0  ;;  %v866_v28 = vld [vmem:[%s857_s9] sm:$0xff]  ;;  %s4983_s4 = sld [smem:[#allocation14_spill]] }
 0x51e   : > { %v4149_v32 = vld [vmem:[%s4981_s10 + $0x8] sm:$0xff]   ;;  %v4150_v34 = vld [vmem:[%s4981_s10] sm:$0xff]  }
 0x587   : > { %v1787_v29 = vpop.xlane.xlu0 %1786 }
 0x588   : > { %4187 = vrcp.f32 %v1787_v29 }
 0x58b   : > { %v1784_v24 = vpop.xlane.xlu0 %1783 }
 0x58c   : > { %4189 = vrcp.f32 %v1784_v24 }
 0x58f   : > { %v1793_v25 = vpop.permute.xlu0 %1792 }
 0x590   : > { %3990 = vmatprep.subr.mxu0 %v1793_v25 }
 0x591   : > { %3991 = vmatpush3.msra.mxu0 %v1793_v25 }
 0x592   : > { %3995 = vmatprep.subr.bf16.mxu0 %v4251_v1 }
 0x595   : > { %v4188_v26 = vpop.eup %4187 }
 0x596   : > { %v1791_v31 = vmul.f32 %v4188_v26, %v4184_v40 }
 0x599   : > { %v4190_v27 = vpop.eup %4189 }
 0x59a   : > { %v1789_v30 = vmul.f32 %v4190_v27, %v4186_v20 }
 0x59c   : > { %3992 = vmatprep.mubr.msk.f32.mxu0 %vm1161_vm4, %v1789_v30  ;;  %v4147_v30 = vld [vmem:[%s4928_s14 + $0x8] sm:$0xff]  }
 0x59d   : > { %3993 = vmatmul.mubr.msk.f32.vlgmr.msra.gmra.mxu0 %vm1161_vm4, %v1791_v31  ;;  %v4148_v31 = vld [vmem:[%s4928_s14] sm:$0xff]  }
 0x59e   : > { %3997 = vmatprep.mubr.msk.bf16.mxu0 %vm4252_vm0, %v4251_v1  ;;  %3996 = vmatpush3.bf16.msra.mxu0 %v1898_v33  ;;  %v2157_v33 = vpack.c.bf16 %v866_v28, %v866_v28 }
 0x59f   : > { %4007 = vmatprep.subr.bf16.mxu0 %v4251_v1 }
 0x65d   : > { %v3994_v35 = vpop.f32.mrf.mxu0 }
 0x65e   : > { %1880 = vst.msk [vmem:[#allocation2 + $0x38] sm:$0xff] %vm1071_vm2, %v3994_v35 }
 0x65f   : > { %v1870_v36 = vpop.f32.mrf.mxu0 }
 0x660   : > { %1879 = vst.msk [vmem:[#allocation2 + $0x30] sm:$0xff] %vm1071_vm2, %v1870_v36 }
 0x667   : > { %v1889_v43 = vld [vmem:[#allocation2 + $0x21] ss:$4 sm:$0xff]  ;;  %v1883_v44 = vld [vmem:[#allocation2 + $0x20] ss:$4 sm:$0xff]  ;;  %v1991_v19 = vld [vmem:[#allocation2 + $0x22] ss:$4 sm:$0xff] }
 0x668   : > { %v1890_v45 = vpack.c.bf16 %v1889_v43, %v1887_v39  ;;  %v1884_v46 = vpack.c.bf16 %v1883_v44, %v1881_v22  ;;  %v2047_v48 = vld [vmem:[#allocation2 + $0x23] ss:$4 sm:$0xff]  ;;  %v1992_v51 = vpack.c.bf16 %v1991_v19, %v1989_v49  ;;  %v3758_v19 = vld [vmem:[%s4983_s4] ss:$0 sm:$0xff] }
 0x669   : > { %v2048_v52 = vpack.c.bf16 %v2047_v48, %v2045_v50 }
 0x66a   : > { %3998 = vmatmul.mubr.msk.bf16.vlgmr.msra.gmra.mxu0 %vm1071_vm2, %v1890_v45  ;;  %4004 = vmatmul.mubr.msk.bf16.vlgmr.msra.gmra.mxu1 %vm1071_vm2, %v1884_v46  ;;  %v3757_v45 = vld [vmem:[%s4982_s12] ss:$0 sm:$0xff] }
 0x66b   : > { %4008 = vmatpush3.bf16.msra.mxu0 %v1999_v47  ;;  %4014 = vmatpush3.bf16.msra.mxu1 %v2055_v13 }
 0x66c   : > { %4009 = vmatprep.mubr.msk.bf16.mxu0 %vm4252_vm0, %v4251_v1  ;;  %4015 = vmatprep.mubr.msk.bf16.mxu1 %vm4252_vm0, %v4251_v1 }
 0x66d   : > { %4027 = vmatprep.subr.bf16.mxu1 %v4251_v1  ;;  %4019 = vmatprep.subr.bf16.mxu0 %v4251_v1 }
 0x672   : > { %4010 = vmatmul.mubr.msk.bf16.vlgmr.msra.gmra.mxu0 %vm1071_vm2, %v1992_v51  ;;  %4016 = vmatmul.mubr.msk.bf16.vlgmr.msra.gmra.mxu1 %vm1071_vm2, %v2048_v52  ;;  %v3763_v52 = vld [vmem:[%s4929_s15] ss:$0 sm:$0xff] }
 0x673   : > { %4031 = vmatprep.mubr.msk.bf16.mxu1 %vm4252_vm0, %v4251_v1  ;;  %4023 = vmatprep.mubr.msk.bf16.mxu0 %vm4252_vm0, %v4251_v1 }
 0x674   : > { %4028 = vmatpush3.bf16.msra.mxu1 %v4147_v30  ;;  %4020 = vmatpush3.bf16.msra.mxu0 %v4149_v32 }
 0x675   : > { %4029 = vmatprep.subr.bf16.mxu1 %v4251_v1  ;;  %4021 = vmatprep.subr.bf16.mxu0 %v4251_v1 }
 0x678   : > { %4030 = vmatpush3.bf16.msra.mxu1 %v4148_v31  ;;  %4022 = vmatpush3.bf16.msra.mxu0 %v4150_v34 }
 0x679   : > { %4035 = vmatprep.subr.bf16.mxu0 %v4251_v1 }
 0x67b   : > { %4032 = vmatmul.mubr.msk.bf16.vlgmr.msra.gmra.mxu1 %vm891_vm1, %v2157_v33 }
 0x72a   : > { %v1934_v53 = vpop.f32.mrf.mxu0  ;;  %v1981_v23 = vpop.f32.mrf.mxu1 }
 0x72b   : > { %v1982_v60 = vadd.f32 %v1981_v23, %v1934_v53 }
 0x72c   : > { %v3999_v54 = vpop.f32.mrf.mxu0  ;;  %v4005_v55 = vpop.f32.mrf.mxu1 }
 0x72e   : > { %v1937_v56 = vpop.f32.mrf.mxu0  ;;  %v1984_v57 = vpop.f32.mrf.mxu1 }
 0x72f   : > { %v1985_v3 = vadd.f32 %v1984_v57, %v1937_v56  ;;  %v4151_v57 = vld [vmem:[%s4930_s16 + $0x8] sm:$0xff]  }
 0x730   : > { %v4000_v58 = vpop.f32.mrf.mxu0  ;;  %v4006_v59 = vpop.f32.mrf.mxu1 }
 0x731   : > { %v4152_v58 = vld [vmem:[%s4930_s16] sm:$0xff]  }
 0x732   : > { %v2035_v61 = vpop.f32.mrf.mxu0  ;;  %v2091_v62 = vpop.f32.mrf.mxu1 }
 0x733   : > { %v2042_v63 = vadd.f32 %v2035_v61, %v1982_v60  ;;  %v3759_v60 = vld [vmem:[%s4927_s13] ss:$0 sm:$0xff] }
 0x734   : > { %v4011_v0 = vpop.f32.mrf.mxu0  ;;  %v4017_v2 = vpop.f32.mrf.mxu1 }
 0x735   : > { %v2098_v4 = vadd.f32 %v2091_v62, %v2042_v63 }
 0x736   : > { %v2038_v7 = vpop.f32.mrf.mxu0  ;;  %v2094_v8 = vpop.f32.mrf.mxu1 }
 0x737   : > { %v2100_v10 = vadd.f32 %v2098_v4, %v4439_v5  ;;  %v2043_v11 = vadd.f32 %v2038_v7, %v1985_v3  ;;  %v3767_v4 = vld [vmem:[%s4931_s17] ss:$0 sm:$0xff] }
 0x738   : > { %v4012_v12 = vpop.f32.mrf.mxu0  ;;  %v4018_v14 = vpop.f32.mrf.mxu1 }
 0x739   : > { %v2099_v15 = vadd.f32 %v2094_v8, %v2043_v11  ;;  %v2109_v16 = vadd.f32 %v3756_v9, %v2100_v10 }
 0x73b   : > { %v2101_v41 = vadd.f32 %v2099_v15, %v4441_v6  ;;  %v2113_v17 = vsel %vm891_vm1, %v2109_v16, 0.0  ;;  %v2285_v53 = vpop.f32.mrf.mxu1 }
 0x73c   : > { %2114 = vadd.xlane.f32.xlu1 %v2113_v17  ;;  %v4700_v23 = vadd.f32 %v3763_v52, %v2285_v53 }
 0x73d   : > { %v2110_v18 = vadd.f32 %v3756_v9, %v2101_v41  ;;  %v4033_v54 = vpop.f32.mrf.mxu1 }
 0x73e   : > { %4043 = vmatprep.subr.msk.mxu1 %vm1071_vm2, %v4700_v23 }
 0x73f   : > { %v2116_v40 = vsel %vm891_vm1, %v2110_v18, 0.0  ;;  %v2288_v55 = vpop.f32.mrf.mxu1  ;;  %4044 = vmatpush3.xpose.msk.msra.mxu1 %vm1071_vm2, %v4700_v23 }
 0x740   : > { %2117 = vadd.xlane.f32.xlu0 %v2116_v40 }
 0x741   : > { %v4034_v56 = vpop.f32.mrf.mxu1 }
 0x742   : > { %v2542_v56 = vld [vmem:[%s4932_s18] sm:$0xf] }
 0x7c5   : > { %v2115_v42 = vpop.xlane.xlu1 %2114 }
 0x7c6   : > { %v2120_v20 = vmul.f32 0.03125, %v2115_v42 }
 0x7c8   : > { %v2122_v21 = vsub.f32 %v2109_v16, %v2120_v20 }
 0x7c9   : > { %v2118_v29 = vpop.xlane.xlu0 %2117 }
 0x7ca   : > { %v2121_v5 = vmul.f32 0.03125, %v2118_v29  ;;  %v2124_v24 = vmul.f32 %v2122_v21, %v2122_v21 }
 0x7cc   : > { %v2123_v25 = vsub.f32 %v2110_v18, %v2121_v5  ;;  %v2126_v26 = vsel %vm891_vm1, %v2124_v24, 0.0 }
 0x7cd   : > { %2127 = vadd.xlane.f32.xlu1 %v2126_v26 }
 0x7ce   : > { %v2125_v27 = vmul.f32 %v2123_v25, %v2123_v25 }
 0x7d0   : > { %v2129_v6 = vsel %vm891_vm1, %v2125_v27, 0.0 }
 0x7d1   : > { %2130 = vadd.xlane.f32.xlu0 %v2129_v6 }
 0x7de   : > { %2547 = vrot.lane.b32.xlu1 %v4700_v23, %s4984_s30 }
 0x856   : > { %v2128_v35 = vpop.xlane.xlu1 %2127 }
 0x857   : > { %v2132_v36 = vmul.f32 0.03125, %v2128_v35 }
 0x859   : > { %v2134_v37 = vadd.f32 1e-05, %v2132_v36 }
 0x85a   : > { %v2131_v38 = vpop.xlane.xlu0 %2130  ;;  %v2548_v59 = vpop.permute.xlu1 %2547 }
 0x85b   : > { %4191 = vrsqrt.f32 %v2134_v37  ;;  %v2133_v39 = vmul.f32 0.03125, %v2131_v38 }
 0x85d   : > { %v2135_v43 = vadd.f32 1e-05, %v2133_v39 }
 0x85f   : > { %4193 = vrsqrt.f32 %v2135_v43 }
 0x868   : > { %v4192_v22 = vpop.eup %4191 }
 0x869   : > { %v2138_v44 = vmul.f32 %v4192_v22, %v2122_v21  ;;  %v3781_v22 = vld [vmem:[%s4932_s18 + $0x4] sm:$0xf] }
 0x86b   : > { %v2146_v13 = vmul.f32 %v3757_v45, %v2138_v44  ;;  %v2744_v44 = vsel %vm1896_vm6, %v3781_v22, 0 }
 0x86c   : > { %v4194_v46 = vpop.eup %4193 }
 0x86d   : > { %v2139_v47 = vmul.f32 %v4194_v46, %v2123_v25  ;;  %v4688_v49 = vadd.f32 %v3758_v19, %v2146_v13 }
 0x86f   : > { %v2147_v48 = vmul.f32 %v3757_v45, %v2139_v47 }
 0x871   : > { %v4690_v50 = vadd.f32 %v3758_v19, %v2147_v48 }
 0x873   : > { %v2156_v51 = vpack.c.bf16 %v4690_v50, %v4688_v49 }
 0x875   : > { %4024 = vmatmul.mubr.msk.bf16.vlgmr.msra.gmra.mxu0 %vm891_vm1, %v2156_v51 }
 0x876   : > { %4039 = vmatprep.mubr.msk.bf16.mxu0 %vm4252_vm0, %v4251_v1  ;;  %4036 = vmatpush3.bf16.msra.mxu0 %v4151_v57 }
 0x877   : > { %4037 = vmatprep.subr.bf16.mxu0 %v4251_v1 }
 0x87a   : > { %4038 = vmatpush3.bf16.msra.mxu0 %v4152_v58 }
 0x87b   : > { %4053 = vmatprep.subr.msk.mxu0 %vm1071_vm2, %v2548_v59 }
 0x87d   : > { %4040 = vmatmul.mubr.msk.bf16.vlgmr.msra.gmra.mxu0 %vm891_vm1, %v2157_v33 }
 0x87e   : > { %4054 = vmatpush3.xpose.msk.msra.mxu0 %vm1071_vm2, %v2548_v59 }
 0x87f   : > { %4063 = vmatprep.subr.bf16.mxu0 %v4251_v1 }
 0x935   : > { %v2218_v61 = vpop.f32.mrf.mxu0 }
 0x936   : > { %v4722_v62 = vadd.f32 %v3759_v60, %v2218_v61 }
 0x937   : > { %v4025_v63 = vpop.f32.mrf.mxu0 }
 0x938   : > { %2543 = vrot.lane.b32.xlu0 %v4722_v62, %s4984_s30  ;;  %4045 = vmatprep.mubr.msk.f32.mxu1 %vm1071_vm2, %v4722_v62 }
 0x939   : > { %v2221_v0 = vpop.f32.mrf.mxu0 }
 0x93a   : > { %v4728_v2 = vadd.f32 %v3759_v60, %v2221_v0  ;;  %v2791_v60 = vsel %vm1896_vm6, %v2542_v56, 0 }
 0x93b   : > { %v4026_v3 = vpop.f32.mrf.mxu0 }
 0x93c   : > { %2545 = vrot.lane.b32.xlu1 %v4728_v2, %s4984_s30  ;;  %4046 = vmatmul.mubr.msk.f32.vlgmr.msra.gmra.mxu1 %vm1071_vm2, %v4728_v2 }
 0x93d   : > { %v2348_v7 = vpop.f32.mrf.mxu0 }
 0x93e   : > { %v4737_v8 = vadd.f32 %v3767_v4, %v2348_v7 }
 0x93f   : > { %v4041_v9 = vpop.f32.mrf.mxu0 }
 0x940   : > { %4048 = vmatprep.subr.mxu1 %v4737_v8 }
 0x941   : > { %v2351_v10 = vpop.f32.mrf.mxu0  ;;  %4049 = vmatpush3.msra.mxu1 %v4737_v8 }
 0x943   : > { %v4042_v11 = vpop.f32.mrf.mxu0 }
 0x9aa   : > { %v2544_v12 = vpop.permute.xlu0 %2543 }
 0x9ab   : > { %4055 = vmatprep.mubr.msk.f32.mxu0 %vm1071_vm2, %v2544_v12 }
 0x9ae   : > { %v2546_v14 = vpop.permute.xlu1 %2545 }
 0x9af   : > { %4056 = vmatmul.mubr.msk.f32.vlgmr.msra.gmra.mxu0 %vm1071_vm2, %v2546_v14 }
 0x9b0   : > { %4065 = vmatprep.mubr.msk.bf16.mxu0 %vm4252_vm0, %v4251_v1  ;;  %4064 = vmatpush3.bf16.msra.mxu0 %v2744_v44 }
 0x9fc   : > { %v4047_v15 = vpop.f32.mrf.mxu1 }
 0x9fd   : > { %v2441_v16 = vsel %vm1071_vm2, %v4047_v15, -inf }
 0x9fe   : > { %2442 = vmax.xlane.f32.xlu0 %v2441_v16  ;;  %v2429_v41 = vpop.f32.mrf.mxu1 }
 0x9ff   : > { %v2438_v17 = vsel %vm1071_vm2, %v2429_v41, -inf }
 0xa00   : > { %2439 = vmax.xlane.f32.xlu1 %v2438_v17 }
 0xa6f   : > { %v4057_v18 = vpop.f32.mrf.mxu0 }
 0xa70   : > { %v2633_v40 = vsel %vm1071_vm2, %v4057_v18, -inf }
 0xa71   : > { %v2621_v42 = vpop.f32.mrf.mxu0  ;;  %2634 = vmax.xlane.f32.xlu1 %v2633_v40 }
 0xa72   : > { %v2630_v20 = vsel %vm1071_vm2, %v2621_v42, -inf }
 0xa73   : > { %2631 = vmax.xlane.f32.xlu0 %v2630_v20 }
 0xa87   : > { %v2443_v21 = vpop.xlane.xlu0 %2442 }
 0xa88   : > { %v2445_v29 = vsub.f32 %v4047_v15, %v2443_v21 }
 0xa89   : > { %v2440_v5 = vpop.xlane.xlu1 %2439 }
 0xa8a   : > { %v2448_v24 = vmul.f32 1.442695, %v2445_v29  ;;  %v2444_v25 = vsub.f32 %v2429_v41, %v2440_v5 }
 0xa8c   : > { %4195 = vpow2.f32 %v2448_v24  ;;  %v2446_v26 = vmul.f32 1.442695, %v2444_v25 }
 0xa8e   : > { %4197 = vpow2.f32 %v2446_v26 }
 0xa99   : > { %v4196_v27 = vpop.eup %4195 }
 0xa9a   : > { %v2453_v6 = vsel %vm1071_vm2, %v4196_v27, 0.0 }
 0xa9b   : > { %v4198_v30 = vpop.eup %4197  ;;  %2454 = vadd.xlane.f32.xlu1 %v2453_v6 }
 0xa9c   : > { %v2450_v31 = vsel %vm1071_vm2, %v4198_v30, 0.0 }
 0xa9d   : > { %2451 = vadd.xlane.f32.xlu0 %v2450_v31 }
 0xafa   : > { %v2635_v28 = vpop.xlane.xlu1 %2634 }
 0xafb   : > { %v2637_v32 = vsub.f32 %v4057_v18, %v2635_v28 }
 0xafc   : > { %v2632_v33 = vpop.xlane.xlu0 %2631 }
 0xafd   : > { %v2640_v34 = vmul.f32 1.442695, %v2637_v32  ;;  %v2636_v35 = vsub.f32 %v2621_v42, %v2632_v33 }
 0xaff   : > { %4199 = vpow2.f32 %v2640_v34  ;;  %v2638_v36 = vmul.f32 1.442695, %v2636_v35 }
 0xb01   : > { %4201 = vpow2.f32 %v2638_v36 }
 0xb0c   : > { %v4200_v37 = vpop.eup %4199 }
 0xb0d   : > { %v2645_v38 = vsel %vm1071_vm2, %v4200_v37, 0.0 }
 0xb0e   : > { %v4202_v39 = vpop.eup %4201  ;;  %2646 = vadd.xlane.f32.xlu1 %v2645_v38 }
 0xb0f   : > { %v2642_v43 = vsel %vm1071_vm2, %v4202_v39, 0.0 }
 0xb10   : > { %2643 = vadd.xlane.f32.xlu0 %v2642_v43 }
 0xb1f   : > { %2838 = vrot.lane.b32.xlu1 %v4700_v23, %s4985_s6 }
 0xb23   : > { %2834 = vrot.lane.b32.xlu1 %v4722_v62, %s4985_s6 }
 0xb24   : > { %v2455_v45 = vpop.xlane.xlu1 %2454 }
 0xb25   : > { %4203 = vrcp.f32 %v2455_v45 }
 0xb26   : > { %2653 = vrot.lane.b32.xlu0 %v4737_v8, %s4984_s30  ;;  %v2452_v46 = vpop.xlane.xlu0 %2451  ;;  %s4987_s30 = sshll.u32 %s4989_s5, 4 }
 0xb27   : > { %4205 = vrcp.f32 %v2452_v46  ;;  %s862_s0 = scalar_lea.vmem %s4942_s28, %s4987_s30 }
 0xb2a   : > { %2836 = vrot.lane.b32.xlu0 %v4728_v2, %s4985_s6 }
 0xb32   : > { %v4204_v47 = vpop.eup %4203 }
 0xb33   : > { %v2459_v48 = vmul.f32 %v4204_v47, %v4196_v27 }
 0xb34   : > { %v4206_v13 = vpop.eup %4205 }
 0xb35   : > { %v2457_v19 = vmul.f32 %v4206_v13, %v4198_v30 }
 0xb37   : > { %4050 = vmatprep.mubr.msk.f32.mxu1 %vm1071_vm2, %v2457_v19 }
 0xb38   : > { %4051 = vmatmul.mubr.msk.f32.vlgmr.msra.gmra.mxu1 %vm1071_vm2, %v2459_v48 }
 0xb97   : > { %v2647_v51 = vpop.xlane.xlu1 %2646 }
 0xb98   : > { %4207 = vrcp.f32 %v2647_v51 }
 0xb99   : > { %v2644_v52 = vpop.xlane.xlu0 %2643 }
 0xb9a   : > { %4209 = vrcp.f32 %v2644_v52 }
 0xb9b   : > { %v2839_v53 = vpop.permute.xlu1 %2838 }
 0xb9c   : > { %4075 = vmatprep.subr.msk.mxu0 %vm1071_vm2, %v2839_v53 }
 0xb9d   : > { %v2654_v54 = vpop.permute.xlu0 %2653 }
 0xb9e   : > { %4058 = vmatprep.subr.mxu1 %v2654_v54 }
 0xb9f   : > { %4059 = vmatpush3.msra.mxu1 %v2654_v54  ;;  %v2835_v9 = vpop.permute.xlu1 %2834 }
 0xba0   : > { %4069 = vmatprep.subr.bf16.mxu1 %v4251_v1 }
 0xba1   : > { %v2837_v10 = vpop.permute.xlu0 %2836 }
 0xba5   : > { %v4208_v55 = vpop.eup %4207 }
 0xba6   : > { %v2651_v59 = vmul.f32 %v4208_v55, %v4200_v37 }
 0xba7   : > { %v4210_v57 = vpop.eup %4209 }
 0xba8   : > { %v2649_v58 = vmul.f32 %v4210_v57, %v4202_v39  ;;  %v3789_v39 = vld [vmem:[%s4932_s18 + $0x8] sm:$0xf] }
 0xba9   : > { %v3034_v43 = vsel %vm1896_vm6, %v3789_v39, 0  ;;  %v4154_v39 = vld [vmem:[%s4936_s22] sm:$0xff]  }
 0xbaa   : > { %4060 = vmatprep.mubr.msk.f32.mxu1 %vm1071_vm2, %v2649_v58 }
 0xbab   : > { %4061 = vmatmul.mubr.msk.f32.vlgmr.msra.gmra.mxu1 %vm1071_vm2, %v2651_v59 }
 0xbac   : > { %4070 = vmatpush3.bf16.msra.mxu1 %v2791_v60  ;;  %4071 = vmatprep.mubr.msk.bf16.mxu1 %vm4252_vm0, %v4251_v1 }
 0xbf8   : > { %v4052_v61 = vpop.f32.mrf.mxu1 }
 0xbfa   : > { %v2532_v63 = vpop.f32.mrf.mxu1 }
 0xbfb   : > { %v2541_v0 = vpack.c.bf16 %v4052_v61, %v2532_v63 }
 0xbfd   : > { %4072 = vmatmul.mubr.msk.bf16.vlgmr.msra.gmra.mxu1 %vm1071_vm2, %v2541_v0 }
 0xc6b   : > { %v4062_v3 = vpop.f32.mrf.mxu1 }
 0xc6d   : > { %v2728_v4 = vpop.f32.mrf.mxu1 }
 0xc6e   : > { %v2737_v7 = vpack.c.bf16 %v4062_v3, %v2728_v4 }
 0xc70   : > { %4066 = vmatmul.mubr.msk.bf16.vlgmr.msra.gmra.mxu0 %vm1071_vm2, %v2737_v7 }
 0xc71   : > { %4076 = vmatpush3.xpose.msk.msra.mxu0 %vm1071_vm2, %v2839_v53  ;;  %4077 = vmatprep.mubr.msk.f32.mxu0 %vm1071_vm2, %v2835_v9 }
 0xc72   : > { %4085 = vmatprep.subr.bf16.mxu0 %v4251_v1 }
 0xc78   : > { %4078 = vmatmul.mubr.msk.f32.vlgmr.msra.gmra.mxu0 %vm1071_vm2, %v2837_v10 }
 0xc79   : > { %4087 = vmatprep.mubr.msk.bf16.mxu0 %vm4252_vm0, %v4251_v1  ;;  %4086 = vmatpush3.bf16.msra.mxu0 %v3034_v43 }
 0xc7a   : > { %4115 = vmatprep.subr.bf16.mxu0 %v4251_v1 }
 0xcbd   : > { %v4785_v11 = vpop.f32.mrf.mxu1 }
 0xcbf   : > { %v4073_v12 = vpop.f32.mrf.mxu1 }
 0xcc1   : > { %v4787_v14 = vpop.f32.mrf.mxu1 }
 0xcc3   : > { %v4074_v15 = vpop.f32.mrf.mxu1 }
 0xd30   : > { %v4789_v16 = vpop.f32.mrf.mxu0 }
 0xd31   : > { %v2828_v60 = vadd.f32 %v4785_v11, %v4789_v16 }
 0xd32   : > { %v4067_v41 = vpop.f32.mrf.mxu0 }
 0xd34   : > { %v4791_v17 = vpop.f32.mrf.mxu0 }
 0xd35   : > { %v2831_v3 = vadd.f32 %v4787_v14, %v4791_v17  ;;  %v3796_v14 = vld [vmem:[%s4932_s18 + $0xc] sm:$0xf] }
 0xd36   : > { %v4068_v18 = vpop.f32.mrf.mxu0  ;;  %v3279_v17 = vsel %vm1896_vm6, %v3796_v14, 0 }
 0xd38   : > { %v4079_v40 = vpop.f32.mrf.mxu0 }
 0xd39   : > { %v2924_v42 = vsel %vm1071_vm2, %v4079_v40, -inf }
 0xd3a   : > { %2925 = vmax.xlane.f32.xlu0 %v2924_v42  ;;  %v2912_v20 = vpop.f32.mrf.mxu0 }
 0xd3b   : > { %v2921_v21 = vsel %vm1071_vm2, %v2912_v20, -inf }
 0xd3c   : > { %2922 = vmax.xlane.f32.xlu1 %v2921_v21 }
 0xdc3   : > { %v2926_v29 = vpop.xlane.xlu0 %2925 }
 0xdc4   : > { %v2928_v5 = vsub.f32 %v4079_v40, %v2926_v29 }
 0xdc5   : > { %v2923_v24 = vpop.xlane.xlu1 %2922 }
 0xdc6   : > { %v2931_v25 = vmul.f32 1.442695, %v2928_v5  ;;  %v2927_v26 = vsub.f32 %v2912_v20, %v2923_v24  ;;  %v3798_v5 = vld [vmem:[%s4933_s19] ss:$0 sm:$0xff] }
 0xdc8   : > { %4211 = vpow2.f32 %v2931_v25  ;;  %v2929_v27 = vmul.f32 1.442695, %v2927_v26 }
 0xdca   : > { %4213 = vpow2.f32 %v2929_v27 }
 0xdd5   : > { %v4212_v6 = vpop.eup %4211 }
 0xdd6   : > { %v2936_v30 = vsel %vm1071_vm2, %v4212_v6, 0.0 }
 0xdd7   : > { %v4214_v31 = vpop.eup %4213  ;;  %2937 = vadd.xlane.f32.xlu1 %v2936_v30 }
 0xdd8   : > { %v2933_v28 = vsel %vm1071_vm2, %v4214_v31, 0.0 }
 0xdd9   : > { %2934 = vadd.xlane.f32.xlu0 %v2933_v28 }
 0xde8   : > { %3083 = vrot.lane.b32.xlu1 %v4700_v23, %s4986_s3 }
 0xdec   : > { %3079 = vrot.lane.b32.xlu1 %v4722_v62, %s4986_s3 }
 0xdef   : > { %2943 = vrot.lane.b32.xlu0 %v4737_v8, %s4985_s6 }
 0xdf3   : > { %3081 = vrot.lane.b32.xlu0 %v4728_v2, %s4986_s3 }
 0xe60   : > { %v2938_v32 = vpop.xlane.xlu1 %2937 }
 0xe61   : > { %4215 = vrcp.f32 %v2938_v32 }
 0xe62   : > { %v2935_v33 = vpop.xlane.xlu0 %2934 }
 0xe63   : > { %4217 = vrcp.f32 %v2935_v33 }
 0xe64   : > { %v3084_v35 = vpop.permute.xlu1 %3083 }
 0xe66   : > { %v2944_v34 = vpop.permute.xlu0 %2943 }
 0xe67   : > { %4080 = vmatprep.subr.mxu1 %v2944_v34 }
 0xe68   : > { %4081 = vmatpush3.msra.mxu1 %v2944_v34  ;;  %v3080_v38 = vpop.permute.xlu1 %3079 }
 0xe69   : > { %4091 = vmatprep.subr.msk.mxu1 %vm1071_vm2, %v3084_v35 }
 0xe6a   : > { %v3082_v2 = vpop.permute.xlu0 %3081 }
 0xe6e   : > { %v4216_v23 = vpop.eup %4215 }
 0xe6f   : > { %v2942_v62 = vmul.f32 %v4216_v23, %v4212_v6 }
 0xe70   : > { %v4218_v36 = vpop.eup %4217 }
 0xe71   : > { %v2940_v37 = vmul.f32 %v4218_v36, %v4214_v31 }
 0xe73   : > { %4082 = vmatprep.mubr.msk.f32.mxu1 %vm1071_vm2, %v2940_v37 }
 0xe74   : > { %4083 = vmatmul.mubr.msk.f32.vlgmr.msra.gmra.mxu1 %vm1071_vm2, %v2942_v62 }
 0xe75   : > { %4092 = vmatpush3.xpose.msk.msra.mxu1 %vm1071_vm2, %v3084_v35  ;;  %4093 = vmatprep.mubr.msk.f32.mxu1 %vm1071_vm2, %v3080_v38 }
 0xe78   : > { %4094 = vmatmul.mubr.msk.f32.vlgmr.msra.gmra.mxu1 %vm1071_vm2, %v3082_v2  ;;  %v4153_v2 = vld [vmem:[%s4936_s22 + $0x8] sm:$0xff]  }
 0xf34   : > { %v4084_v22 = vpop.f32.mrf.mxu1 }
 0xf36   : > { %v3018_v44 = vpop.f32.mrf.mxu1 }
 0xf37   : > { %v3027_v45 = vpack.c.bf16 %v4084_v22, %v3018_v44 }
 0xf38   : > { %v4095_v46 = vpop.f32.mrf.mxu1 }
 0xf39   : > { %4088 = vmatmul.mubr.msk.bf16.vlgmr.msra.gmra.mxu0 %vm1071_vm2, %v3027_v45  ;;  %v3169_v47 = vsel %vm1071_vm2, %v4095_v46, -inf }
 0xf3a   : > { %3170 = vmax.xlane.f32.xlu0 %v3169_v47  ;;  %v3157_v13 = vpop.f32.mrf.mxu1  ;;  %4123 = vmatprep.mubr.msk.bf16.mxu0 %vm4252_vm0, %v4251_v1 }
 0xf3b   : > { %v3166_v19 = vsel %vm1071_vm2, %v3157_v13, -inf }
 0xf3c   : > { %3167 = vmax.xlane.f32.xlu1 %v3166_v19 }
 0xfc3   : > { %v3171_v48 = vpop.xlane.xlu0 %3170 }
 0xfc4   : > { %v3173_v51 = vsub.f32 %v4095_v46, %v3171_v48  ;;  %v3799_v48 = vld [vmem:[%s4934_s20] ss:$0 sm:$0xff] }
 0xfc5   : > { %v3168_v52 = vpop.xlane.xlu1 %3167 }
 0xfc6   : > { %v3176_v53 = vmul.f32 1.442695, %v3173_v51  ;;  %v3172_v54 = vsub.f32 %v3157_v13, %v3168_v52 }
 0xfc8   : > { %4219 = vpow2.f32 %v3176_v53  ;;  %v3174_v55 = vmul.f32 1.442695, %v3172_v54  ;;  %v3800_v54 = vld [vmem:[%s4935_s21] ss:$0 sm:$0xff] }
 0xfca   : > { %4221 = vpow2.f32 %v3174_v55 }
 0xfd5   : > { %v4220_v56 = vpop.eup %4219 }
 0xfd6   : > { %v3181_v57 = vsel %vm1071_vm2, %v4220_v56, 0.0 }
 0xfd7   : > { %v4222_v58 = vpop.eup %4221  ;;  %3182 = vadd.xlane.f32.xlu1 %v3181_v57 }
 0xfd8   : > { %v3178_v59 = vsel %vm1071_vm2, %v4222_v58, 0.0 }
 0xfd9   : > { %3179 = vadd.xlane.f32.xlu0 %v3178_v59  ;;  %v4155_v59 = vld [vmem:[%s4938_s24 + $0x18] sm:$0xff]  }
 0xfda   : > { %4116 = vmatpush3.bf16.msra.mxu0 %v4155_v59 }
 0xfdb   : > { %4117 = vmatprep.subr.bf16.mxu0 %v4251_v1 }
 0xfef   : > { %3188 = vrot.lane.b32.xlu0 %v4737_v8, %s4986_s3 }
 0xff9   : > { %v3070_v61 = vpop.f32.mrf.mxu0 }
 0xffa   : > { %v3077_v63 = vadd.f32 %v3070_v61, %v2828_v60  ;;  %v4156_v60 = vld [vmem:[%s4938_s24 + $0x10] sm:$0xff]   ;;  %v4157_v61 = vld [vmem:[%s4938_s24 + $0x8] sm:$0xff]  }
 0xffb   : > { %v4089_v0 = vpop.f32.mrf.mxu0  ;;  %4118 = vmatpush3.bf16.msra.mxu0 %v4156_v60 }
 0xffc   : > { %4119 = vmatprep.subr.bf16.mxu0 %v4251_v1  ;;  %v3801_v0 = vld [vmem:[%s4937_s23] ss:$0 sm:$0xff] }
 0xffd   : > { %v3073_v4 = vpop.f32.mrf.mxu0 }
 0xffe   : > { %v3078_v7 = vadd.f32 %v3073_v4, %v2831_v3 }
 0xfff   : > { %v4090_v9 = vpop.f32.mrf.mxu0  ;;  %4120 = vmatpush3.bf16.msra.mxu0 %v4157_v61  ;;  %v3810_v61 = vld [vmem:[%s4939_s25] ss:$0 sm:$0xff] }
0x1000   : > { %4121 = vmatprep.subr.bf16.mxu0 %v4251_v1 }
0x1060   : > { %v3183_v10 = vpop.xlane.xlu1 %3182 }
0x1061   : > { %4223 = vrcp.f32 %v3183_v10 }
0x1062   : > { %v3180_v12 = vpop.xlane.xlu0 %3179 }
0x1063   : > { %4225 = vrcp.f32 %v3180_v12 }
0x1066   : > { %v3189_v15 = vpop.permute.xlu0 %3188 }
0x1067   : > { %4096 = vmatprep.subr.mxu1 %v3189_v15 }
0x1068   : > { %4097 = vmatpush3.msra.mxu1 %v3189_v15 }
0x1069   : > { %4101 = vmatprep.subr.bf16.mxu1 %v4251_v1 }
0x106e   : > { %v4224_v8 = vpop.eup %4223 }
0x106f   : > { %v3187_v41 = vmul.f32 %v4224_v8, %v4220_v56 }
0x1070   : > { %v4226_v11 = vpop.eup %4225 }
0x1071   : > { %v3185_v16 = vmul.f32 %v4226_v11, %v4222_v58 }
0x1073   : > { %4098 = vmatprep.mubr.msk.f32.mxu1 %vm1071_vm2, %v3185_v16 }
0x1074   : > { %4099 = vmatmul.mubr.msk.f32.vlgmr.msra.gmra.mxu1 %vm1071_vm2, %v3187_v41 }
0x1075   : > { %4103 = vmatprep.mubr.msk.bf16.mxu1 %vm4252_vm0, %v4251_v1  ;;  %4102 = vmatpush3.bf16.msra.mxu1 %v3279_v17 }
0x1076   : > { %4107 = vmatprep.subr.bf16.mxu1 %v4251_v1 }
0x1134   : > { %v4100_v18 = vpop.f32.mrf.mxu1 }
0x1136   : > { %v3263_v40 = vpop.f32.mrf.mxu1 }
0x1137   : > { %v3272_v42 = vpack.c.bf16 %v4100_v18, %v3263_v40 }
0x1139   : > { %4104 = vmatmul.mubr.msk.bf16.vlgmr.msra.gmra.mxu1 %vm1071_vm2, %v3272_v42 }
0x113a   : > { %4111 = vmatprep.mubr.msk.bf16.mxu1 %vm4252_vm0, %v4251_v1  ;;  %4108 = vmatpush3.bf16.msra.mxu1 %v4153_v2 }
0x113b   : > { %4109 = vmatprep.subr.bf16.mxu1 %v4251_v1 }
0x113e   : > { %4110 = vmatpush3.bf16.msra.mxu1 %v4154_v39 }
0x11f9   : > { %v3315_v20 = vpop.f32.mrf.mxu1 }
0x11fa   : > { %v3322_v21 = vadd.f32 %v3315_v20, %v3077_v63  ;;  %v4158_v63 = vld [vmem:[%s4938_s24] sm:$0xff]  }
0x11fb   : > { %v4105_v29 = vpop.f32.mrf.mxu1  ;;  %4122 = vmatpush3.bf16.msra.mxu0 %v4158_v63 }
0x11fc   : > { %v3324_v24 = vadd.f32 %v3322_v21, %v4688_v49 }
0x11fd   : > { %v3318_v25 = vpop.f32.mrf.mxu1 }
0x11fe   : > { %v3323_v26 = vadd.f32 %v3318_v25, %v3078_v7  ;;  %v3333_v27 = vadd.f32 %v3798_v5, %v3324_v24 }
0x11ff   : > { %v4106_v6 = vpop.f32.mrf.mxu1 }
0x1200   : > { %v3325_v30 = vadd.f32 %v3323_v26, %v4690_v50  ;;  %v3337_v31 = vsel %vm891_vm1, %v3333_v27, 0.0 }
0x1201   : > { %3338 = vadd.xlane.f32.xlu1 %v3337_v31 }
0x1202   : > { %v3334_v28 = vadd.f32 %v3798_v5, %v3325_v30 }
0x1204   : > { %v3340_v32 = vsel %vm891_vm1, %v3334_v28, 0.0 }
0x1205   : > { %3341 = vadd.xlane.f32.xlu1 %v3340_v32 }
0x128a   : > { %v3339_v33 = vpop.xlane.xlu1 %3338 }
0x128b   : > { %v3343_v34 = vmul.f32 0.03125, %v3339_v33 }
0x128d   : > { %v3345_v35 = vsub.f32 %v3333_v27, %v3343_v34 }
0x128e   : > { %v3342_v23 = vpop.xlane.xlu1 %3341 }
0x128f   : > { %v3344_v36 = vmul.f32 0.03125, %v3342_v23  ;;  %v3347_v37 = vmul.f32 %v3345_v35, %v3345_v35 }
0x1291   : > { %v3346_v49 = vsub.f32 %v3334_v28, %v3344_v36  ;;  %v3349_v62 = vsel %vm891_vm1, %v3347_v37, 0.0 }
0x1292   : > { %3350 = vadd.xlane.f32.xlu1 %v3349_v62 }
0x1293   : > { %v3348_v38 = vmul.f32 %v3346_v49, %v3346_v49 }
0x1295   : > { %v3352_v50 = vsel %vm891_vm1, %v3348_v38, 0.0 }
0x1296   : > { %3353 = vadd.xlane.f32.xlu1 %v3352_v50 }
0x131b   : > { %v3351_v43 = vpop.xlane.xlu1 %3350 }
0x131c   : > { %v3355_v22 = vmul.f32 0.03125, %v3351_v43 }
0x131e   : > { %v3357_v44 = vadd.f32 1e-05, %v3355_v22 }
0x131f   : > { %v3354_v45 = vpop.xlane.xlu1 %3353 }
0x1320   : > { %4227 = vrsqrt.f32 %v3357_v44  ;;  %v3356_v46 = vmul.f32 0.03125, %v3354_v45  ;;  %v4256_v44 = vmov -1.0  }
0x1322   : > { %v3358_v47 = vadd.f32 1e-05, %v3356_v46 }
0x1324   : > { %4229 = vrsqrt.f32 %v3358_v47 }
0x132d   : > { %v4228_v13 = vpop.eup %4227 }
0x132e   : > { %v3361_v19 = vmul.f32 %v4228_v13, %v3345_v35 }
0x1330   : > { %v3369_v53 = vmul.f32 %v3799_v48, %v3361_v19 }
0x1331   : > { %v4230_v51 = vpop.eup %4229 }
0x1332   : > { %v3362_v52 = vmul.f32 %v4230_v51, %v3346_v49  ;;  %v4864_v56 = vadd.f32 %v3800_v54, %v3369_v53 }
0x1334   : > { %v3370_v55 = vmul.f32 %v3799_v48, %v3362_v52 }
0x1336   : > { %v4866_v57 = vadd.f32 %v3800_v54, %v3370_v55 }
0x1338   : > { %v3379_v58 = vpack.c.bf16 %v4866_v57, %v4864_v56 }
0x133a   : > { %4112 = vmatmul.mubr.msk.bf16.vlgmr.msra.gmra.mxu1 %vm891_vm1, %v3379_v58 }
0x13fa   : > { %v3440_v3 = vpop.f32.mrf.mxu1 }
0x13fb   : > { %v3441_v4 = vadd.f32 %v3801_v0, %v3440_v3 }
0x13fc   : > { %v4113_v7 = vpop.f32.mrf.mxu1 }
0x13fd   : > { %v3449_v9 = vmul.f32 0.70710677, %v3441_v4  ;;  %v3447_v52 = vmul.f32 0.5, %v3441_v4 }
0x13fe   : > { %v3443_v10 = vpop.f32.mrf.mxu1 }
0x13ff   : > { %v3455_v12 = vand.u32 2147483647, %v3449_v9  ;;  %v3444_v15 = vadd.f32 %v3801_v0, %v3443_v10  ;;  %vm3451_vm7 = vcmp.ge.f32.partialorder %v3449_v9, 0.0 }
0x1400   : > { %v4114_v8 = vpop.f32.mrf.mxu1  ;;  %v3453_v45 = vsel %vm3451_vm7, 1.0, %v4256_v44 }
0x1401   : > { %v3457_v11 = vmul.f32 0.3275911, %v3455_v12  ;;  %v3450_v16 = vmul.f32 0.70710677, %v3444_v15  ;;  %v3483_v18 = vsub.f32 0.0, %v3455_v12  ;;  %v3448_v53 = vmul.f32 0.5, %v3444_v15 }
0x1403   : > { %v3459_v1 = vadd.f32 1.0, %v3457_v11  ;;  %v3456_v41 = vand.u32 2147483647, %v3450_v16  ;;  %v3485_v40 = vmul.f32 %v3483_v18, %v3455_v12  ;;  %vm3452_vm8 = vcmp.ge.f32.partialorder %v3450_v16, 0.0 }
0x1404   : > { %v3454_v19 = vsel %vm3452_vm8, 1.0, %v4256_v44 }
0x1405   : > { %4231 = vrcp.f32 %v3459_v1  ;;  %v3458_v14 = vmul.f32 0.3275911, %v3456_v41  ;;  %v3484_v42 = vsub.f32 0.0, %v3456_v41  ;;  %v3487_v29 = vmul.f32 1.442695, %v3485_v40 }
0x1407   : > { %v3460_v17 = vadd.f32 1.0, %v3458_v14  ;;  %v3486_v5 = vmul.f32 %v3484_v42, %v3456_v41 }
0x1409   : > { %4233 = vrcp.f32 %v3460_v17  ;;  %v3489_v6 = vmul.f32 1.442695, %v3486_v5 }
0x140a   : > { %4235 = vpow2.f32 %v3487_v29 }
0x140b   : > { %4237 = vpow2.f32 %v3489_v6 }
0x1412   : > { %v4232_v20 = vpop.eup %4231 }
0x1413   : > { %v3465_v21 = vmul.f32 1.0614054, %v4232_v20 }
0x1415   : > { %v3467_v24 = vadd.f32 -1.4531521, %v3465_v21 }
0x1416   : > { %v4234_v25 = vpop.eup %4233 }
0x1417   : > { %v3469_v26 = vmul.f32 %v4232_v20, %v3467_v24  ;;  %v3466_v27 = vmul.f32 1.0614054, %v4234_v25  ;;  %v4236_v38 = vpop.eup %4235 }
0x1418   : > { %v4238_v22 = vpop.eup %4237 }
0x1419   : > { %v3471_v30 = vadd.f32 1.4214138, %v3469_v26  ;;  %v3468_v31 = vadd.f32 -1.4531521, %v3466_v27  ;;  %v3812_v27 = vld [vmem:[%s4941_s27] ss:$0 sm:$0xff] }
0x141b   : > { %v3473_v28 = vmul.f32 %v4232_v20, %v3471_v30  ;;  %v3470_v32 = vmul.f32 %v4234_v25, %v3468_v31 }
0x141d   : > { %v3475_v33 = vadd.f32 -0.28449672, %v3473_v28  ;;  %v3472_v34 = vadd.f32 1.4214138, %v3470_v32 }
0x141f   : > { %v3477_v35 = vmul.f32 %v4232_v20, %v3475_v33  ;;  %v3474_v23 = vmul.f32 %v4234_v25, %v3472_v34 }
0x1421   : > { %v3479_v36 = vadd.f32 0.2548296, %v3477_v35  ;;  %v3476_v37 = vadd.f32 -0.28449672, %v3474_v23 }
0x1423   : > { %v3481_v49 = vmul.f32 %v4232_v20, %v3479_v36  ;;  %v3478_v62 = vmul.f32 %v4234_v25, %v3476_v37 }
0x1425   : > { %v3491_v50 = vmul.f32 %v4236_v38, %v3481_v49  ;;  %v3480_v2 = vadd.f32 0.2548296, %v3478_v62 }
0x1427   : > { %v3493_v39 = vsub.f32 1.0, %v3491_v50  ;;  %v3482_v43 = vmul.f32 %v4234_v25, %v3480_v2  ;;  %v3811_v25 = vld [vmem:[%s4940_s26] ss:$0 sm:$0xff] }
0x1429   : > { %v3495_v46 = vmul.f32 %v3493_v39, %v3453_v45  ;;  %v3492_v47 = vmul.f32 %v4238_v22, %v3482_v43 }
0x142b   : > { %v3494_v13 = vsub.f32 1.0, %v3492_v47  ;;  %v3497_v48 = vadd.f32 1.0, %v3495_v46 }
0x142d   : > { %v3496_v51 = vmul.f32 %v3494_v13, %v3454_v19  ;;  %v3499_v55 = vmul.f32 %v3497_v48, %v3447_v52 }
0x142f   : > { %v3498_v54 = vadd.f32 1.0, %v3496_v51 }
0x1431   : > { %v3500_v58 = vmul.f32 %v3498_v54, %v3448_v53 }
0x1433   : > { %v3501_v59 = vpack.c.bf16 %v3500_v58, %v3499_v55 }
0x1435   : > { %4124 = vmatmul.mubr.msk.bf16.vlgmr.msra.gmra.mxu0 %vm3534_vm9, %v3501_v59 }
0x14f5   : > { %v3572_v60 = vpop.f32.mrf.mxu0 }
0x14f6   : > { %v3579_v63 = vadd.f32 %v3572_v60, %v4864_v56 }
0x14f7   : > { %v4125_v0 = vpop.f32.mrf.mxu0 }
0x14f8   : > { %v3588_v3 = vadd.f32 %v3810_v61, %v3579_v63 }
0x14f9   : > { %v3575_v7 = vpop.f32.mrf.mxu0 }
0x14fa   : > { %v3580_v9 = vadd.f32 %v3575_v7, %v4866_v57  ;;  %v3592_v4 = vsel %vm891_vm1, %v3588_v3, 0.0 }
0x14fb   : > { %3593 = vadd.xlane.f32.xlu1 %v3592_v4  ;;  %v4126_v10 = vpop.f32.mrf.mxu0 }
0x14fc   : > { %v3589_v12 = vadd.f32 %v3810_v61, %v3580_v9 }
0x14fe   : > { %v3595_v15 = vsel %vm891_vm1, %v3589_v12, 0.0 }
0x14ff   : > { %3596 = vadd.xlane.f32.xlu1 %v3595_v15 }
0x1584   : > { %v3594_v8 = vpop.xlane.xlu1 %3593 }
0x1585   : > { %v3598_v11 = vmul.f32 0.03125, %v3594_v8 }
0x1587   : > { %v3600_v16 = vsub.f32 %v3588_v3, %v3598_v11 }
0x1588   : > { %v3597_v1 = vpop.xlane.xlu1 %3596 }
0x1589   : > { %v3599_v41 = vmul.f32 0.03125, %v3597_v1  ;;  %v3602_v14 = vmul.f32 %v3600_v16, %v3600_v16 }
0x158b   : > { %v3601_v56 = vsub.f32 %v3589_v12, %v3599_v41  ;;  %v3604_v17 = vsel %vm891_vm1, %v3602_v14, 0.0 }
0x158c   : > { %3605 = vadd.xlane.f32.xlu0 %v3604_v17 }
0x158d   : > { %v3603_v18 = vmul.f32 %v3601_v56, %v3601_v56 }
0x158f   : > { %v3607_v57 = vsel %vm891_vm1, %v3603_v18, 0.0 }
0x1590   : > { %3608 = vadd.xlane.f32.xlu1 %v3607_v57 }
0x1615   : > { %v3606_v40 = vpop.xlane.xlu0 %3605 }
0x1616   : > { %v3610_v42 = vmul.f32 0.03125, %v3606_v40 }
0x1618   : > { %v3612_v20 = vadd.f32 1e-05, %v3610_v42 }
0x1619   : > { %v3609_v21 = vpop.xlane.xlu1 %3608 }
0x161a   : > { %4239 = vrsqrt.f32 %v3612_v20  ;;  %v3611_v29 = vmul.f32 0.03125, %v3609_v21 }
0x161c   : > { %v3613_v5 = vadd.f32 1e-05, %v3611_v29 }
0x161e   : > { %4241 = vrsqrt.f32 %v3613_v5 }
0x1627   : > { %v4240_v24 = vpop.eup %4239 }
0x1628   : > { %v3616_v26 = vmul.f32 %v4240_v24, %v3600_v16 }
0x162a   : > { %v3624_v6 = vmul.f32 %v3811_v25, %v3616_v26 }
0x162b   : > { %v4242_v30 = vpop.eup %4241 }
0x162c   : > { %v3632_v31 = vadd.f32 %v3812_v27, %v3624_v6  ;;  %v3617_v28 = vmul.f32 %v4242_v30, %v3601_v56 }
0x162e   : > { %3634 = vst.msk [vmem:[%s862_s0] sm:$0xff] %vm891_vm1, %v3632_v31  ;;  %v3625_v32 = vmul.f32 %v3811_v25, %v3617_v28 }
0x1630   : > { %v3633_v33 = vadd.f32 %v3812_v27, %v3625_v32 }
0x1632   : > { %3635 = vst.msk [vmem:[%s862_s0 + $0x8] sm:$0xff] %vm891_vm1, %v3633_v33 }
0x1633 PF: > { %s38_s8 = sadd.s32 1, %s4249_s8  }
0x1634   : > { %p35_p4 = scmp.ge.s32.totalorder %s38_s8, 4  }
0x1636   :  { %37 = sbr.rel (!%p35_p4) target bundleno = 14 (0xe), region = 178 }

</bundles_post_ra>
